<compile_context>
chip_gen: v5e
topology: v5e:2x2
jax: 0.10.0
libtpu: 0.0.40
codegen_flags: <defaults>
</compile_context>

<pallas_src>
import functools
import math

import jax
import jax.numpy as jnp
from jax.experimental import pallas as pl
from jax.experimental.pallas import tpu as pltpu

BN_EPS = 1e-5
BN_SCALE = 1.0 / math.sqrt(1.0 + BN_EPS)
ACT_DTYPE = jnp.bfloat16          # inter-layer activation storage dtype


# ----------------------------------------------------------------------------
# Pallas kernels
# ----------------------------------------------------------------------------
def _mm_kernel(x_ref, w_ref, b_ref, o_ref, *, relu):
    # bf16 operands straight to the MXU (no in-kernel cast), f32 accumulate,
    # f32 bias/ReLU epilogue, cast on store.
    acc = jnp.dot(x_ref[...], w_ref[...], preferred_element_type=jnp.float32)
    acc = acc + b_ref[...]
    if relu:
        acc = jnp.maximum(acc, 0.0)
    o_ref[...] = acc.astype(o_ref.dtype)


def _pick_tm(M):
    """Largest tile from a fixed ladder that divides M (avoids collapsing to
    pathological tiny tiles for awkward M); full-dim block if M % 8 != 0."""
    if M % 8:
        return M
    for cand in (512, 256, 128, 64, 32, 16, 8):
        if cand <= M and M % cand == 0:
            return cand
    return M


def pallas_matmul(x, w, b, relu=False, out_dtype=ACT_DTYPE):
    """y = relu(x @ w + b).  x:(M,K) bf16, w:(K,N) bf16, b:(N,) f32."""
    M, K = x.shape
    K2, N = w.shape
    assert K == K2, (K, K2)
    x = x.astype(w.dtype)

    tm = _pick_tm(M)
    tn = N
    # Only split N when the M grid would be a single block (coarse_matcher,
    # conv-transpose at tiny spatial sizes) so v7x's 2nd TC gets a block; on
    # v5e/v6e the extra step costs ~0.35us which is negligible here.
    if M // tm == 1 and N >= 256 and N % 256 == 0:
        tn = N // 2

    b2 = b.reshape(1, N).astype(jnp.float32)
    out = pl.pallas_call(
        functools.partial(_mm_kernel, relu=relu),
        out_shape=jax.ShapeDtypeStruct((M, N), out_dtype),
        grid=(M // tm, N // tn),
        in_specs=[
            pl.BlockSpec((tm, K), lambda i, j: (i, 0)),
            pl.BlockSpec((K, tn), lambda i, j: (0, j)),
            pl.BlockSpec((1, tn), lambda i, j: (0, j)),
        ],
        out_specs=pl.BlockSpec((tm, tn), lambda i, j: (i, j)),
        compiler_params=pltpu.CompilerParams(
            dimension_semantics=("parallel", "parallel")),
    )(x, w, b2)
    return out


def _corr_pos_kernel(f1_ref, f0_ref, gx_ref, gy_ref, o_ref, *, scale):
    # s[b, hw1, hw0] = <feat1[b, hw1, :], feat0[b, hw0, :]> / sqrt(C)
    s = jnp.einsum("bkc,bqc->bkq", f1_ref[...], f0_ref[...],
                   preferred_element_type=jnp.float32) * scale
    m = jnp.max(s, axis=1, keepdims=True)
    p = jnp.exp(s - m)                                        # (B, HW1, HW0)
    inv = pl.reciprocal(jnp.sum(p, axis=1, keepdims=True), approx=True)
    px = jnp.sum(p * gx_ref[...], axis=1, keepdims=True) * inv    # E[x]
    py = jnp.sum(p * gy_ref[...], axis=1, keepdims=True) * inv    # E[y]
    o_ref[:, 0:1, :] = px
    o_ref[:, 1:2, :] = py


def corr_pos_embed_pallas(feat0, feat1, grid):
    """Fused corr volume + softmax over H1*W1 + grid expectation, whole batch
    in a single kernel invocation.  The (B, HW1, HW0) volume never hits HBM.

    feat0, feat1: (B, H, W, C) NHWC (bf16); grid: (H1*W1, 2) columns [x, y].
    Returns coarse_warp (B, H0, W0, 2) f32.
    """
    B, H0, W0, C = feat0.shape
    _, H1, W1, _ = feat1.shape
    HW0, HW1 = H0 * W0, H1 * W1
    f0 = feat0.reshape(B, HW0, C)
    f1 = feat1.reshape(B, HW1, C)
    gx = grid[:, 0:1].astype(jnp.float32)                    # (HW1, 1)
    gy = grid[:, 1:2].astype(jnp.float32)
    scale = 1.0 / math.sqrt(C)
    out = pl.pallas_call(
        functools.partial(_corr_pos_kernel, scale=scale),
        out_shape=jax.ShapeDtypeStruct((B, 2, HW0), jnp.float32),
        grid=(1,),
        in_specs=[
            pl.BlockSpec((B, HW1, C), lambda i: (0, 0, 0)),
            pl.BlockSpec((B, HW0, C), lambda i: (0, 0, 0)),
            pl.BlockSpec((HW1, 1), lambda i: (0, 0)),
            pl.BlockSpec((HW1, 1), lambda i: (0, 0)),
        ],
        out_specs=pl.BlockSpec((B, 2, HW0), lambda i: (0, 0, 0)),
        compiler_params=pltpu.CompilerParams(
            dimension_semantics=("arbitrary",)),
    )(f1, f0, gx, gy)
    warp = jnp.transpose(out.reshape(B, 2, H0, W0), (0, 2, 3, 1))  # (B,H0,W0,2)
    return warp


# ----------------------------------------------------------------------------
# Conv / transpose-conv built on the Pallas matmul
# ----------------------------------------------------------------------------
def im2col(x, k, stride, padding, k_pad):
    """NHWC im2col; the K pad column is appended inside the same concat so
    there is no extra HBM round-trip for padding."""
    B, H, W, C = x.shape
    if padding:
        x = jnp.pad(x, ((0, 0), (padding, padding), (padding, padding), (0, 0)))
    Hp, Wp = H + 2 * padding, W + 2 * padding
    Ho = (Hp - k) // stride + 1
    Wo = (Wp - k) // stride + 1
    cols = []
    for i in range(k):
        for j in range(k):
            cols.append(x[:, i:i + stride * (Ho - 1) + 1:stride,
                          j:j + stride * (Wo - 1) + 1:stride, :])
    K = k * k * C
    if k_pad > K:
        cols.append(jnp.zeros((B, Ho, Wo, k_pad - K), x.dtype))
    patches = cols[0] if len(cols) == 1 else jnp.concatenate(cols, axis=-1)
    return patches.reshape(B * Ho * Wo, patches.shape[-1]), (B, Ho, Wo)


def apply_conv(x, lp, out_dtype=ACT_DTYPE):
    patches, (B, Ho, Wo) = im2col(x, lp["k"], lp["s"], lp["p"], lp["w"].shape[0])
    y = pallas_matmul(patches, lp["w"], lp["b"], relu=lp["relu"],
                      out_dtype=out_dtype)
    return y.reshape(B, Ho, Wo, -1)


def apply_seq(x, layers, final_dtype=ACT_DTYPE):
    n = len(layers)
    for idx, lp in enumerate(layers):
        x = apply_conv(x, lp,
                       out_dtype=final_dtype if idx == n - 1 else ACT_DTYPE)
    return x


def conv_transpose2x2(x, w_cat, b_cat, cout, relu=True):
    """ConvTranspose2d(k=2, s=2) as ONE matmul against a (Cin, 4*Cout) weight
    plus a reshape/transpose sub-pixel interleave."""
    B, H, W, Cin = x.shape
    y = pallas_matmul(x.reshape(B * H * W, Cin), w_cat, b_cat, relu=relu)
    y = y.reshape(B, H, W, 2, 2, cout)
    y = jnp.transpose(y, (0, 1, 3, 2, 4, 5)).reshape(B, 2 * H, 2 * W, cout)
    return y


def apply_upconv(x, up):
    y = conv_transpose2x2(x, up["ct_w"], up["ct_b"], up["cout"], relu=True)
    y = apply_conv(y, up["conv"])
    return y


def avgpool4(x):
    B, H, W, C = x.shape
    x32 = x.astype(jnp.float32)
    return x32.reshape(B, H // 4, 4, W // 4, 4, C).mean(axis=(2, 4)).astype(x.dtype)


# ----------------------------------------------------------------------------
# grid_sample (bilinear, align_corners=False, zero padding) — plain JAX glue
# TODO(synk): data-dependent bilinear gather kept outside Pallas (no clean
#             rectangular BlockSpec); negligible at this feature size.
# ----------------------------------------------------------------------------
def grid_sample_bilinear(feat, coords):
    B, H, W, C = feat.shape
    x = coords[..., 0].astype(jnp.float32)
    y = coords[..., 1].astype(jnp.float32)
    ix = ((x + 1.0) * W - 1.0) / 2.0
    iy = ((y + 1.0) * H - 1.0) / 2.0
    ix0 = jnp.floor(ix)
    iy0 = jnp.floor(iy)
    ix1 = ix0 + 1.0
    iy1 = iy0 + 1.0
    wx1 = ix - ix0
    wx0 = 1.0 - wx1
    wy1 = iy - iy0
    wy0 = 1.0 - wy1
    flat = feat.reshape(B, H * W, C)

    def gather(ix_, iy_):
        valid = ((ix_ >= 0) & (ix_ <= W - 1) & (iy_ >= 0) & (iy_ <= H - 1))
        ixc = jnp.clip(ix_, 0, W - 1).astype(jnp.int32)
        iyc = jnp.clip(iy_, 0, H - 1).astype(jnp.int32)
        idx = (iyc * W + ixc).reshape(B, -1, 1)
        g = jnp.take_along_axis(flat, idx, axis=1)
        g = g.reshape(B, ix_.shape[1], ix_.shape[2], C).astype(jnp.float32)
        return g * valid[..., None].astype(jnp.float32)

    out = (gather(ix0, iy0) * (wx0 * wy0)[..., None]
           + gather(ix1, iy0) * (wx1 * wy0)[..., None]
           + gather(ix0, iy1) * (wx0 * wy1)[..., None]
           + gather(ix1, iy1) * (wx1 * wy1)[..., None])
    return out                                                # f32


# ----------------------------------------------------------------------------
# Parameters (deterministic synthetic init; layer config stays Python scalars)
# ----------------------------------------------------------------------------
def init_params(seed=0):
    keys = list(jax.random.split(jax.random.PRNGKey(seed), 256))
    kidx = [0]

    def nk():
        k = keys[kidx[0]]
        kidx[0] += 1
        return k

    def conv_layer(cin, cout, k=3, s=1, p=1, bias=False, relu=True, bn=True,
                   in_scale=1.0):
        K = cin * k * k
        Kp = ((K + 15) // 16) * 16          # bf16 sublane-friendly K pad
        w = jax.random.normal(nk(), (K, cout), jnp.float32) / math.sqrt(K)
        w = w * (in_scale * (BN_SCALE if bn else 1.0))   # fold eval-mode BN
        if Kp != K:
            w = jnp.pad(w, ((0, Kp - K), (0, 0)))        # pad once at init
        w = w.astype(ACT_DTYPE)                          # pre-cast to bf16
        if bias:
            b = jax.random.normal(nk(), (cout,), jnp.float32) * 0.01
        else:
            b = jnp.zeros((cout,), jnp.float32)
        return dict(w=w, b=b, k=k, s=s, p=p, relu=relu)

    def basic(cin, cout, k=3, s=1, p=1, in_scale=1.0):
        return conv_layer(cin, cout, k, s, p, bias=False, relu=True, bn=True,
                          in_scale=in_scale)

    def plain_conv(cin, cout, k=1, s=1, p=0, relu=False, in_scale=1.0):
        return conv_layer(cin, cout, k, s, p, bias=True, relu=relu, bn=False,
                          in_scale=in_scale)

    def upconv(cin, cout):
        w = jax.random.normal(nk(), (2, 2, cin, cout), jnp.float32) / math.sqrt(cin)
        w_cat = jnp.transpose(w, (2, 0, 1, 3)).reshape(cin, 4 * cout)
        w_cat = w_cat.astype(ACT_DTYPE)
        b = jax.random.normal(nk(), (cout,), jnp.float32) * 0.01
        b_cat = jnp.tile(b, 4)
        return dict(ct_w=w_cat, ct_b=b_cat, cout=cout,
                    conv=plain_conv(cin, cout, k=3, s=1, p=1, relu=True))

    # input BatchNorm2d(1) (eval, fresh stats) folded into the two consumers
    P = dict(
        skip1=plain_conv(1, 32, k=1, in_scale=BN_SCALE),
        block1=[basic(1, 8, in_scale=BN_SCALE), basic(8, 16, s=2),
                basic(16, 16), basic(16, 32, s=2)],
        block2=[basic(32, 32), basic(32, 32)],
        block3=[basic(32, 64, s=2), basic(64, 64), basic(64, 64, k=1, p=0)],
        block4=[basic(64, 64, s=2), basic(64, 64), basic(64, 64)],
        block5=[basic(64, 128, s=2), basic(128, 128), basic(128, 128),
                basic(128, 64, k=1, p=0)],
        block_fusion=[basic(64, 64), basic(64, 64), plain_conv(64, 64, k=1)],
        upconv1=upconv(64, 64),
        upconv2_1=upconv(64, 64),
        upconv2_2=upconv(64, 64),
        coarse_matcher=[basic(130, 256), basic(256, 256), basic(256, 256),
                        basic(256, 256), plain_conv(256, 3, k=1)],
    )
    return P


# ----------------------------------------------------------------------------
# Model forward
# ----------------------------------------------------------------------------
def forward_single(x_nchw, P):
    x = jnp.transpose(x_nchw, (0, 2, 3, 1))                    # NCHW -> NHWC
    x = jnp.mean(x, axis=-1, keepdims=True).astype(ACT_DTYPE)  # channel mean
    # input BatchNorm2d(1) scale is folded into block1[0] / skip1 weights
    x1 = apply_seq(x, P["block1"])
    skip = apply_conv(avgpool4(x), P["skip1"])
    x2 = apply_seq(x1 + skip, P["block2"])
    x3 = apply_seq(x2, P["block3"])
    x4 = apply_seq(x3, P["block4"])
    x5 = apply_seq(x4, P["block5"])
    x4u = apply_upconv(x4, P["upconv1"])
    x5u = apply_upconv(x5, P["upconv2_1"])
    x5u = apply_upconv(x5u, P["upconv2_2"])
    feats = apply_seq(x3 + x4u + x5u, P["block_fusion"])
    return x2, feats


def tiny_roma_forward(P, im0, im1, grid, to_normalized, iters=2):
    B = im0.shape[0]
    # Run both images through the backbone as ONE batched pass.
    _, feats = forward_single(jnp.concatenate([im0, im1], axis=0), P)
    f0c, f1c = feats[:B], feats[B:]

    # fused corr volume + full softmax over H1*W1 + grid expectation (f32)
    coarse_warp = corr_pos_embed_pallas(f0c, f1c, grid)            # (B,H,W,2)
    _, H, W, _ = coarse_warp.shape
    coarse_matches = jnp.concatenate(
        [coarse_warp, jnp.zeros((B, H, W, 1), jnp.float32)], axis=-1)
    tn = to_normalized.reshape(1, 1, 1, 3).astype(jnp.float32)

    warped = grid_sample_bilinear(f1c, coarse_matches[..., :2])
    inp = jnp.concatenate([f0c.astype(ACT_DTYPE),
                           warped.astype(ACT_DTYPE),
                           coarse_warp.astype(ACT_DTYPE)], axis=-1)  # 64+64+2
    delta = apply_seq(inp, P["coarse_matcher"], final_dtype=jnp.float32)
    coarse_matches = coarse_matches + delta * tn

    for _ in range(iters - 1):
        warped = grid_sample_bilinear(f1c, coarse_matches[..., :2])
        inp = jnp.concatenate([f0c.astype(ACT_DTYPE),
                               warped.astype(ACT_DTYPE),
                               coarse_matches[..., :2].astype(ACT_DTYPE)],
                              axis=-1)
        delta = apply_seq(inp, P["coarse_matcher"], final_dtype=jnp.float32)
        coarse_matches = coarse_matches + delta * tn

    return jnp.transpose(coarse_matches, (0, 3, 1, 2))  # NCHW (B,3,H/8,W/8)


# ----------------------------------------------------------------------------
if __name__ == "__main__":
    P = init_params(0)

    key = jax.random.PRNGKey(0)
    B, C, H, W = 2, 3, 32, 32
    k1, k2 = jax.random.split(key)
    im0 = jax.random.normal(k1, (B, C, H, W), jnp.float32)
    im1 = jax.random.normal(k2, (B, C, H, W), jnp.float32)

    Hc, Wc = H // 8, W // 8
    gxs = jnp.linspace(-1.0 + 1.0 / Wc, 1.0 - 1.0 / Wc, Wc, dtype=jnp.float32)
    gys = jnp.linspace(-1.0 + 1.0 / Hc, 1.0 - 1.0 / Hc, Hc, dtype=jnp.float32)
    gxx, gyy = jnp.meshgrid(gxs, gys, indexing="xy")
    grid = jnp.stack([gxx, gyy], axis=-1).reshape(Hc * Wc, 2)      # (H*W, 2)
    to_normalized = jnp.array([2.0 / Wc, 2.0 / Hc, 1.0], jnp.float32)

    # Close over P: weights are compile-time constants and the layer config
    # (k / stride / padding / relu) stays static Python.
    fwd = jax.jit(functools.partial(tiny_roma_forward, P))
    out = fwd(im0, im1, grid, to_normalized)
    jax.block_until_ready(out)
    assert out.shape == (B, 3, Hc, Wc), out.shape
    assert bool(jnp.all(jnp.isfinite(out)))
    print("KERNEL_OK")
</pallas_src>

<mosaic_0001>
module attributes {stable_mosaic.version = 11 : i64} {
  func.func @_mm_kernel(%arg0: i32, %arg1: i32, %arg2: memref<512x16xbf16, #tpu.memory_space<vmem>>, %arg3: memref<16x8xbf16, #tpu.memory_space<vmem>>, %arg4: memref<1x8xf32, #tpu.memory_space<vmem>>, %arg5: memref<512x8xbf16, #tpu.memory_space<vmem>>) attributes {dimension_semantics = [#tpu.dimension_semantics<parallel>, #tpu.dimension_semantics<parallel>], iteration_bounds = array<i64: 8, 1>, scalar_prefetch = 0 : i64, scratch_operands = 0 : i64, tpu.core_type = #tpu.core_type<tc>, window_params = [{transform_indices = @transform_0, window_bounds = array<i64: 512, 16>}, {transform_indices = @transform_1, window_bounds = array<i64: 16, 8>}, {transform_indices = @transform_2, window_bounds = array<i64: 1, 8>}, {transform_indices = @transform_3, window_bounds = array<i64: 512, 8>}]} {
    %c0 = arith.constant 0 : index
    %c0_0 = arith.constant 0 : index
    %0 = vector.load %arg2[%c0, %c0_0] : memref<512x16xbf16, #tpu.memory_space<vmem>>, vector<512x16xbf16>
    %c0_1 = arith.constant 0 : index
    %c0_2 = arith.constant 0 : index
    %1 = vector.load %arg3[%c0_1, %c0_2] : memref<16x8xbf16, #tpu.memory_space<vmem>>, vector<16x8xbf16>
    %cst = arith.constant dense<0.000000e+00> : vector<512x8xf32>
    %2 = tpu.matmul %0, %1, %cst {dimension_numbers = #tpu.dot_dimension_numbers<[1], [0], [0], [1], [0, 0, 1, 1], [], []>} : vector<512x16xbf16>, vector<16x8xbf16>, vector<512x8xf32> -> vector<512x8xf32>
    %c0_3 = arith.constant 0 : index
    %c0_4 = arith.constant 0 : index
    %3 = vector.load %arg4[%c0_3, %c0_4] : memref<1x8xf32, #tpu.memory_space<vmem>>, vector<1x8xf32>
    %4 = vector.broadcast %3 : vector<1x8xf32> to vector<512x8xf32>
    %5 = arith.addf %2, %4 : vector<512x8xf32>
    %cst_5 = arith.constant 0.000000e+00 : f32
    %6 = vector.broadcast %cst_5 : f32 to vector<512x8xf32>
    %7 = arith.maximumf %5, %6 : vector<512x8xf32>
    %8 = arith.truncf %7 : vector<512x8xf32> to vector<512x8xbf16>
    %c0_6 = arith.constant 0 : index
    %c0_7 = arith.constant 0 : index
    %9 = vector.load %arg5[%c0_6, %c0_7] : memref<512x8xbf16, #tpu.memory_space<vmem>>, vector<512x8xbf16>
    tpu.vector_store %arg5[%c0_6, %c0_7], %8 {strides = array<i32>} : memref<512x8xbf16, #tpu.memory_space<vmem>>, vector<512x8xbf16>,
    return
  }
  func.func @transform_0(%arg0: i32, %arg1: i32) -> (i32, i32) {
    %c0_i32 = arith.constant 0 : i32
    %c0_i32_0 = arith.constant 0 : i32
    return %arg0, %c0_i32 : i32, i32
  }
  func.func @transform_1(%arg0: i32, %arg1: i32) -> (i32, i32) {
    %c0_i32 = arith.constant 0 : i32
    %c0_i32_0 = arith.constant 0 : i32
    return %c0_i32, %arg1 : i32, i32
  }
  func.func @transform_2(%arg0: i32, %arg1: i32) -> (i32, i32) {
    %c0_i32 = arith.constant 0 : i32
    %c0_i32_0 = arith.constant 0 : i32
    return %c0_i32, %arg1 : i32, i32
  }
  func.func @transform_3(%arg0: i32, %arg1: i32) -> (i32, i32) {
    %c0_i32 = arith.constant 0 : i32
    return %arg0, %arg1 : i32, i32
  }
}

module attributes {stable_mosaic.version = 11 : i64} {
  func.func @_mm_kernel(%arg0: i32, %arg1: i32, %arg2: memref<512x80xbf16, #tpu.memory_space<vmem>>, %arg3: memref<80x16xbf16, #tpu.memory_space<vmem>>, %arg4: memref<1x16xf32, #tpu.memory_space<vmem>>, %arg5: memref<512x16xbf16, #tpu.memory_space<vmem>>) attributes {dimension_semantics = [#tpu.dimension_semantics<parallel>, #tpu.dimension_semantics<parallel>], iteration_bounds = array<i64: 2, 1>, scalar_prefetch = 0 : i64, scratch_operands = 0 : i64, tpu.core_type = #tpu.core_type<tc>, window_params = [{transform_indices = @transform_0, window_bounds = array<i64: 512, 80>}, {transform_indices = @transform_1, window_bounds = array<i64: 80, 16>}, {transform_indices = @transform_2, window_bounds = array<i64: 1, 16>}, {transform_indices = @transform_3, window_bounds = array<i64: 512, 16>}]} {
    %c0 = arith.constant 0 : index
    %c0_0 = arith.constant 0 : index
    %0 = vector.load %arg2[%c0, %c0_0] : memref<512x80xbf16, #tpu.memory_space<vmem>>, vector<512x80xbf16>
    %c0_1 = arith.constant 0 : index
    %c0_2 = arith.constant 0 : index
    %1 = vector.load %arg3[%c0_1, %c0_2] : memref<80x16xbf16, #tpu.memory_space<vmem>>, vector<80x16xbf16>
    %cst = arith.constant dense<0.000000e+00> : vector<512x16xf32>
    %2 = tpu.matmul %0, %1, %cst {dimension_numbers = #tpu.dot_dimension_numbers<[1], [0], [0], [1], [0, 0, 1, 1], [], []>} : vector<512x80xbf16>, vector<80x16xbf16>, vector<512x16xf32> -> vector<512x16xf32>
    %c0_3 = arith.constant 0 : index
    %c0_4 = arith.constant 0 : index
    %3 = vector.load %arg4[%c0_3, %c0_4] : memref<1x16xf32, #tpu.memory_space<vmem>>, vector<1x16xf32>
    %4 = vector.broadcast %3 : vector<1x16xf32> to vector<512x16xf32>
    %5 = arith.addf %2, %4 : vector<512x16xf32>
    %cst_5 = arith.constant 0.000000e+00 : f32
    %6 = vector.broadcast %cst_5 : f32 to vector<512x16xf32>
    %7 = arith.maximumf %5, %6 : vector<512x16xf32>
    %8 = arith.truncf %7 : vector<512x16xf32> to vector<512x16xbf16>
    %c0_6 = arith.constant 0 : index
    %c0_7 = arith.constant 0 : index
    %9 = vector.load %arg5[%c0_6, %c0_7] : memref<512x16xbf16, #tpu.memory_space<vmem>>, vector<512x16xbf16>
    tpu.vector_store %arg5[%c0_6, %c0_7], %8 {strides = array<i32>} : memref<512x16xbf16, #tpu.memory_space<vmem>>, vector<512x16xbf16>,
    return
  }
  func.func @transform_0(%arg0: i32, %arg1: i32) -> (i32, i32) {
    %c0_i32 = arith.constant 0 : i32
    %c0_i32_0 = arith.constant 0 : i32
    return %arg0, %c0_i32 : i32, i32
  }
  func.func @transform_1(%arg0: i32, %arg1: i32) -> (i32, i32) {
    %c0_i32 = arith.constant 0 : i32
    %c0_i32_0 = arith.constant 0 : i32
    return %c0_i32, %arg1 : i32, i32
  }
  func.func @transform_2(%arg0: i32, %arg1: i32) -> (i32, i32) {
    %c0_i32 = arith.constant 0 : i32
    %c0_i32_0 = arith.constant 0 : i32
    return %c0_i32, %arg1 : i32, i32
  }
  func.func @transform_3(%arg0: i32, %arg1: i32) -> (i32, i32) {
    %c0_i32 = arith.constant 0 : i32
    return %arg0, %arg1 : i32, i32
  }
}

module attributes {stable_mosaic.version = 11 : i64} {
  func.func @_mm_kernel(%arg0: i32, %arg1: i32, %arg2: memref<512x144xbf16, #tpu.memory_space<vmem>>, %arg3: memref<144x16xbf16, #tpu.memory_space<vmem>>, %arg4: memref<1x16xf32, #tpu.memory_space<vmem>>, %arg5: memref<512x16xbf16, #tpu.memory_space<vmem>>) attributes {dimension_semantics = [#tpu.dimension_semantics<parallel>, #tpu.dimension_semantics<parallel>], iteration_bounds = array<i64: 2, 1>, scalar_prefetch = 0 : i64, scratch_operands = 0 : i64, tpu.core_type = #tpu.core_type<tc>, window_params = [{transform_indices = @transform_0, window_bounds = array<i64: 512, 144>}, {transform_indices = @transform_1, window_bounds = array<i64: 144, 16>}, {transform_indices = @transform_2, window_bounds = array<i64: 1, 16>}, {transform_indices = @transform_3, window_bounds = array<i64: 512, 16>}]} {
    %c0 = arith.constant 0 : index
    %c0_0 = arith.constant 0 : index
    %0 = vector.load %arg2[%c0, %c0_0] : memref<512x144xbf16, #tpu.memory_space<vmem>>, vector<512x144xbf16>
    %c0_1 = arith.constant 0 : index
    %c0_2 = arith.constant 0 : index
    %1 = vector.load %arg3[%c0_1, %c0_2] : memref<144x16xbf16, #tpu.memory_space<vmem>>, vector<144x16xbf16>
    %cst = arith.constant dense<0.000000e+00> : vector<512x16xf32>
    %2 = tpu.matmul %0, %1, %cst {dimension_numbers = #tpu.dot_dimension_numbers<[1], [0], [0], [1], [0, 0, 1, 1], [], []>} : vector<512x144xbf16>, vector<144x16xbf16>, vector<512x16xf32> -> vector<512x16xf32>
    %c0_3 = arith.constant 0 : index
    %c0_4 = arith.constant 0 : index
    %3 = vector.load %arg4[%c0_3, %c0_4] : memref<1x16xf32, #tpu.memory_space<vmem>>, vector<1x16xf32>
    %4 = vector.broadcast %3 : vector<1x16xf32> to vector<512x16xf32>
    %5 = arith.addf %2, %4 : vector<512x16xf32>
    %cst_5 = arith.constant 0.000000e+00 : f32
    %6 = vector.broadcast %cst_5 : f32 to vector<512x16xf32>
    %7 = arith.maximumf %5, %6 : vector<512x16xf32>
    %8 = arith.truncf %7 : vector<512x16xf32> to vector<512x16xbf16>
    %c0_6 = arith.constant 0 : index
    %c0_7 = arith.constant 0 : index
    %9 = vector.load %arg5[%c0_6, %c0_7] : memref<512x16xbf16, #tpu.memory_space<vmem>>, vector<512x16xbf16>
    tpu.vector_store %arg5[%c0_6, %c0_7], %8 {strides = array<i32>} : memref<512x16xbf16, #tpu.memory_space<vmem>>, vector<512x16xbf16>,
    return
  }
  func.func @transform_0(%arg0: i32, %arg1: i32) -> (i32, i32) {
    %c0_i32 = arith.constant 0 : i32
    %c0_i32_0 = arith.constant 0 : i32
    return %arg0, %c0_i32 : i32, i32
  }
  func.func @transform_1(%arg0: i32, %arg1: i32) -> (i32, i32) {
    %c0_i32 = arith.constant 0 : i32
    %c0_i32_0 = arith.constant 0 : i32
    return %c0_i32, %arg1 : i32, i32
  }
  func.func @transform_2(%arg0: i32, %arg1: i32) -> (i32, i32) {
    %c0_i32 = arith.constant 0 : i32
    %c0_i32_0 = arith.constant 0 : i32
    return %c0_i32, %arg1 : i32, i32
  }
  func.func @transform_3(%arg0: i32, %arg1: i32) -> (i32, i32) {
    %c0_i32 = arith.constant 0 : i32
    return %arg0, %arg1 : i32, i32
  }
}

module attributes {stable_mosaic.version = 11 : i64} {
  func.func @_mm_kernel(%arg0: i32, %arg1: i32, %arg2: memref<256x144xbf16, #tpu.memory_space<vmem>>, %arg3: memref<144x32xbf16, #tpu.memory_space<vmem>>, %arg4: memref<1x32xf32, #tpu.memory_space<vmem>>, %arg5: memref<256x32xbf16, #tpu.memory_space<vmem>>) attributes {dimension_semantics = [#tpu.dimension_semantics<parallel>, #tpu.dimension_semantics<parallel>], iteration_bounds = array<i64: 1, 1>, scalar_prefetch = 0 : i64, scratch_operands = 0 : i64, tpu.core_type = #tpu.core_type<tc>, window_params = [{transform_indices = @transform_0, window_bounds = array<i64: 256, 144>}, {transform_indices = @transform_1, window_bounds = array<i64: 144, 32>}, {transform_indices = @transform_2, window_bounds = array<i64: 1, 32>}, {transform_indices = @transform_3, window_bounds = array<i64: 256, 32>}]} {
    %c0 = arith.constant 0 : index
    %c0_0 = arith.constant 0 : index
    %0 = vector.load %arg2[%c0, %c0_0] : memref<256x144xbf16, #tpu.memory_space<vmem>>, vector<256x144xbf16>
    %c0_1 = arith.constant 0 : index
    %c0_2 = arith.constant 0 : index
    %1 = vector.load %arg3[%c0_1, %c0_2] : memref<144x32xbf16, #tpu.memory_space<vmem>>, vector<144x32xbf16>
    %cst = arith.constant dense<0.000000e+00> : vector<256x32xf32>
    %2 = tpu.matmul %0, %1, %cst {dimension_numbers = #tpu.dot_dimension_numbers<[1], [0], [0], [1], [0, 0, 1, 1], [], []>} : vector<256x144xbf16>, vector<144x32xbf16>, vector<256x32xf32> -> vector<256x32xf32>
    %c0_3 = arith.constant 0 : index
    %c0_4 = arith.constant 0 : index
    %3 = vector.load %arg4[%c0_3, %c0_4] : memref<1x32xf32, #tpu.memory_space<vmem>>, vector<1x32xf32>
    %4 = vector.broadcast %3 : vector<1x32xf32> to vector<256x32xf32>
    %5 = arith.addf %2, %4 : vector<256x32xf32>
    %cst_5 = arith.constant 0.000000e+00 : f32
    %6 = vector.broadcast %cst_5 : f32 to vector<256x32xf32>
    %7 = arith.maximumf %5, %6 : vector<256x32xf32>
    %8 = arith.truncf %7 : vector<256x32xf32> to vector<256x32xbf16>
    %c0_6 = arith.constant 0 : index
    %c0_7 = arith.constant 0 : index
    %9 = vector.load %arg5[%c0_6, %c0_7] : memref<256x32xbf16, #tpu.memory_space<vmem>>, vector<256x32xbf16>
    tpu.vector_store %arg5[%c0_6, %c0_7], %8 {strides = array<i32>} : memref<256x32xbf16, #tpu.memory_space<vmem>>, vector<256x32xbf16>,
    return
  }
  func.func @transform_0(%arg0: i32, %arg1: i32) -> (i32, i32) {
    %c0_i32 = arith.constant 0 : i32
    %c0_i32_0 = arith.constant 0 : i32
    return %arg0, %c0_i32 : i32, i32
  }
  func.func @transform_1(%arg0: i32, %arg1: i32) -> (i32, i32) {
    %c0_i32 = arith.constant 0 : i32
    %c0_i32_0 = arith.constant 0 : i32
    return %c0_i32, %arg1 : i32, i32
  }
  func.func @transform_2(%arg0: i32, %arg1: i32) -> (i32, i32) {
    %c0_i32 = arith.constant 0 : i32
    %c0_i32_0 = arith.constant 0 : i32
    return %c0_i32, %arg1 : i32, i32
  }
  func.func @transform_3(%arg0: i32, %arg1: i32) -> (i32, i32) {
    %c0_i32 = arith.constant 0 : i32
    return %arg0, %arg1 : i32, i32
  }
}

module attributes {stable_mosaic.version = 11 : i64} {
  func.func @_mm_kernel(%arg0: i32, %arg1: i32, %arg2: memref<256x16xbf16, #tpu.memory_space<vmem>>, %arg3: memref<16x32xbf16, #tpu.memory_space<vmem>>, %arg4: memref<1x32xf32, #tpu.memory_space<vmem>>, %arg5: memref<256x32xbf16, #tpu.memory_space<vmem>>) attributes {dimension_semantics = [#tpu.dimension_semantics<parallel>, #tpu.dimension_semantics<parallel>], iteration_bounds = array<i64: 1, 1>, scalar_prefetch = 0 : i64, scratch_operands = 0 : i64, tpu.core_type = #tpu.core_type<tc>, window_params = [{transform_indices = @transform_0, window_bounds = array<i64: 256, 16>}, {transform_indices = @transform_1, window_bounds = array<i64: 16, 32>}, {transform_indices = @transform_2, window_bounds = array<i64: 1, 32>}, {transform_indices = @transform_3, window_bounds = array<i64: 256, 32>}]} {
    %c0 = arith.constant 0 : index
    %c0_0 = arith.constant 0 : index
    %0 = vector.load %arg2[%c0, %c0_0] : memref<256x16xbf16, #tpu.memory_space<vmem>>, vector<256x16xbf16>
    %c0_1 = arith.constant 0 : index
    %c0_2 = arith.constant 0 : index
    %1 = vector.load %arg3[%c0_1, %c0_2] : memref<16x32xbf16, #tpu.memory_space<vmem>>, vector<16x32xbf16>
    %cst = arith.constant dense<0.000000e+00> : vector<256x32xf32>
    %2 = tpu.matmul %0, %1, %cst {dimension_numbers = #tpu.dot_dimension_numbers<[1], [0], [0], [1], [0, 0, 1, 1], [], []>} : vector<256x16xbf16>, vector<16x32xbf16>, vector<256x32xf32> -> vector<256x32xf32>
    %c0_3 = arith.constant 0 : index
    %c0_4 = arith.constant 0 : index
    %3 = vector.load %arg4[%c0_3, %c0_4] : memref<1x32xf32, #tpu.memory_space<vmem>>, vector<1x32xf32>
    %4 = vector.broadcast %3 : vector<1x32xf32> to vector<256x32xf32>
    %5 = arith.addf %2, %4 : vector<256x32xf32>
    %6 = arith.truncf %5 : vector<256x32xf32> to vector<256x32xbf16>
    %c0_5 = arith.constant 0 : index
    %c0_6 = arith.constant 0 : index
    %7 = vector.load %arg5[%c0_5, %c0_6] : memref<256x32xbf16, #tpu.memory_space<vmem>>, vector<256x32xbf16>
    tpu.vector_store %arg5[%c0_5, %c0_6], %6 {strides = array<i32>} : memref<256x32xbf16, #tpu.memory_space<vmem>>, vector<256x32xbf16>,
    return
  }
  func.func @transform_0(%arg0: i32, %arg1: i32) -> (i32, i32) {
    %c0_i32 = arith.constant 0 : i32
    %c0_i32_0 = arith.constant 0 : i32
    return %arg0, %c0_i32 : i32, i32
  }
  func.func @transform_1(%arg0: i32, %arg1: i32) -> (i32, i32) {
    %c0_i32 = arith.constant 0 : i32
    %c0_i32_0 = arith.constant 0 : i32
    return %c0_i32, %arg1 : i32, i32
  }
  func.func @transform_2(%arg0: i32, %arg1: i32) -> (i32, i32) {
    %c0_i32 = arith.constant 0 : i32
    %c0_i32_0 = arith.constant 0 : i32
    return %c0_i32, %arg1 : i32, i32
  }
  func.func @transform_3(%arg0: i32, %arg1: i32) -> (i32, i32) {
    %c0_i32 = arith.constant 0 : i32
    return %arg0, %arg1 : i32, i32
  }
}

module attributes {stable_mosaic.version = 11 : i64} {
  func.func @_mm_kernel(%arg0: i32, %arg1: i32, %arg2: memref<256x288xbf16, #tpu.memory_space<vmem>>, %arg3: memref<288x32xbf16, #tpu.memory_space<vmem>>, %arg4: memref<1x32xf32, #tpu.memory_space<vmem>>, %arg5: memref<256x32xbf16, #tpu.memory_space<vmem>>) attributes {dimension_semantics = [#tpu.dimension_semantics<parallel>, #tpu.dimension_semantics<parallel>], iteration_bounds = array<i64: 1, 1>, scalar_prefetch = 0 : i64, scratch_operands = 0 : i64, tpu.core_type = #tpu.core_type<tc>, window_params = [{transform_indices = @transform_0, window_bounds = array<i64: 256, 288>}, {transform_indices = @transform_1, window_bounds = array<i64: 288, 32>}, {transform_indices = @transform_2, window_bounds = array<i64: 1, 32>}, {transform_indices = @transform_3, window_bounds = array<i64: 256, 32>}]} {
    %c0 = arith.constant 0 : index
    %c0_0 = arith.constant 0 : index
    %0 = vector.load %arg2[%c0, %c0_0] : memref<256x288xbf16, #tpu.memory_space<vmem>>, vector<256x288xbf16>
    %c0_1 = arith.constant 0 : index
    %c0_2 = arith.constant 0 : index
    %1 = vector.load %arg3[%c0_1, %c0_2] : memref<288x32xbf16, #tpu.memory_space<vmem>>, vector<288x32xbf16>
    %cst = arith.constant dense<0.000000e+00> : vector<256x32xf32>
    %2 = tpu.matmul %0, %1, %cst {dimension_numbers = #tpu.dot_dimension_numbers<[1], [0], [0], [1], [0, 0, 1, 1], [], []>} : vector<256x288xbf16>, vector<288x32xbf16>, vector<256x32xf32> -> vector<256x32xf32>
    %c0_3 = arith.constant 0 : index
    %c0_4 = arith.constant 0 : index
    %3 = vector.load %arg4[%c0_3, %c0_4] : memref<1x32xf32, #tpu.memory_space<vmem>>, vector<1x32xf32>
    %4 = vector.broadcast %3 : vector<1x32xf32> to vector<256x32xf32>
    %5 = arith.addf %2, %4 : vector<256x32xf32>
    %cst_5 = arith.constant 0.000000e+00 : f32
    %6 = vector.broadcast %cst_5 : f32 to vector<256x32xf32>
    %7 = arith.maximumf %5, %6 : vector<256x32xf32>
    %8 = arith.truncf %7 : vector<256x32xf32> to vector<256x32xbf16>
    %c0_6 = arith.constant 0 : index
    %c0_7 = arith.constant 0 : index
    %9 = vector.load %arg5[%c0_6, %c0_7] : memref<256x32xbf16, #tpu.memory_space<vmem>>, vector<256x32xbf16>
    tpu.vector_store %arg5[%c0_6, %c0_7], %8 {strides = array<i32>} : memref<256x32xbf16, #tpu.memory_space<vmem>>, vector<256x32xbf16>,
    return
  }
  func.func @transform_0(%arg0: i32, %arg1: i32) -> (i32, i32) {
    %c0_i32 = arith.constant 0 : i32
    %c0_i32_0 = arith.constant 0 : i32
    return %arg0, %c0_i32 : i32, i32
  }
  func.func @transform_1(%arg0: i32, %arg1: i32) -> (i32, i32) {
    %c0_i32 = arith.constant 0 : i32
    %c0_i32_0 = arith.constant 0 : i32
    return %c0_i32, %arg1 : i32, i32
  }
  func.func @transform_2(%arg0: i32, %arg1: i32) -> (i32, i32) {
    %c0_i32 = arith.constant 0 : i32
    %c0_i32_0 = arith.constant 0 : i32
    return %c0_i32, %arg1 : i32, i32
  }
  func.func @transform_3(%arg0: i32, %arg1: i32) -> (i32, i32) {
    %c0_i32 = arith.constant 0 : i32
    return %arg0, %arg1 : i32, i32
  }
}

module attributes {stable_mosaic.version = 11 : i64} {
  func.func @_mm_kernel(%arg0: i32, %arg1: i32, %arg2: memref<64x288xbf16, #tpu.memory_space<vmem>>, %arg3: memref<288x64xbf16, #tpu.memory_space<vmem>>, %arg4: memref<1x64xf32, #tpu.memory_space<vmem>>, %arg5: memref<64x64xbf16, #tpu.memory_space<vmem>>) attributes {dimension_semantics = [#tpu.dimension_semantics<parallel>, #tpu.dimension_semantics<parallel>], iteration_bounds = array<i64: 1, 1>, scalar_prefetch = 0 : i64, scratch_operands = 0 : i64, tpu.core_type = #tpu.core_type<tc>, window_params = [{transform_indices = @transform_0, window_bounds = array<i64: 64, 288>}, {transform_indices = @transform_1, window_bounds = array<i64: 288, 64>}, {transform_indices = @transform_2, window_bounds = array<i64: 1, 64>}, {transform_indices = @transform_3, window_bounds = array<i64: 64, 64>}]} {
    %c0 = arith.constant 0 : index
    %c0_0 = arith.constant 0 : index
    %0 = vector.load %arg2[%c0, %c0_0] : memref<64x288xbf16, #tpu.memory_space<vmem>>, vector<64x288xbf16>
    %c0_1 = arith.constant 0 : index
    %c0_2 = arith.constant 0 : index
    %1 = vector.load %arg3[%c0_1, %c0_2] : memref<288x64xbf16, #tpu.memory_space<vmem>>, vector<288x64xbf16>
    %cst = arith.constant dense<0.000000e+00> : vector<64x64xf32>
    %2 = tpu.matmul %0, %1, %cst {dimension_numbers = #tpu.dot_dimension_numbers<[1], [0], [0], [1], [0, 0, 1, 1], [], []>} : vector<64x288xbf16>, vector<288x64xbf16>, vector<64x64xf32> -> vector<64x64xf32>
    %c0_3 = arith.constant 0 : index
    %c0_4 = arith.constant 0 : index
    %3 = vector.load %arg4[%c0_3, %c0_4] : memref<1x64xf32, #tpu.memory_space<vmem>>, vector<1x64xf32>
    %4 = vector.broadcast %3 : vector<1x64xf32> to vector<64x64xf32>
    %5 = arith.addf %2, %4 : vector<64x64xf32>
    %cst_5 = arith.constant 0.000000e+00 : f32
    %6 = vector.broadcast %cst_5 : f32 to vector<64x64xf32>
    %7 = arith.maximumf %5, %6 : vector<64x64xf32>
    %8 = arith.truncf %7 : vector<64x64xf32> to vector<64x64xbf16>
    %c0_6 = arith.constant 0 : index
    %c0_7 = arith.constant 0 : index
    %9 = vector.load %arg5[%c0_6, %c0_7] : memref<64x64xbf16, #tpu.memory_space<vmem>>, vector<64x64xbf16>
    tpu.vector_store %arg5[%c0_6, %c0_7], %8 {strides = array<i32>} : memref<64x64xbf16, #tpu.memory_space<vmem>>, vector<64x64xbf16>,
    return
  }
  func.func @transform_0(%arg0: i32, %arg1: i32) -> (i32, i32) {
    %c0_i32 = arith.constant 0 : i32
    %c0_i32_0 = arith.constant 0 : i32
    return %arg0, %c0_i32 : i32, i32
  }
  func.func @transform_1(%arg0: i32, %arg1: i32) -> (i32, i32) {
    %c0_i32 = arith.constant 0 : i32
    %c0_i32_0 = arith.constant 0 : i32
    return %c0_i32, %arg1 : i32, i32
  }
  func.func @transform_2(%arg0: i32, %arg1: i32) -> (i32, i32) {
    %c0_i32 = arith.constant 0 : i32
    %c0_i32_0 = arith.constant 0 : i32
    return %c0_i32, %arg1 : i32, i32
  }
  func.func @transform_3(%arg0: i32, %arg1: i32) -> (i32, i32) {
    %c0_i32 = arith.constant 0 : i32
    return %arg0, %arg1 : i32, i32
  }
}

module attributes {stable_mosaic.version = 11 : i64} {
  func.func @_mm_kernel(%arg0: i32, %arg1: i32, %arg2: memref<64x576xbf16, #tpu.memory_space<vmem>>, %arg3: memref<576x64xbf16, #tpu.memory_space<vmem>>, %arg4: memref<1x64xf32, #tpu.memory_space<vmem>>, %arg5: memref<64x64xbf16, #tpu.memory_space<vmem>>) attributes {dimension_semantics = [#tpu.dimension_semantics<parallel>, #tpu.dimension_semantics<parallel>], iteration_bounds = array<i64: 1, 1>, scalar_prefetch = 0 : i64, scratch_operands = 0 : i64, tpu.core_type = #tpu.core_type<tc>, window_params = [{transform_indices = @transform_0, window_bounds = array<i64: 64, 576>}, {transform_indices = @transform_1, window_bounds = array<i64: 576, 64>}, {transform_indices = @transform_2, window_bounds = array<i64: 1, 64>}, {transform_indices = @transform_3, window_bounds = array<i64: 64, 64>}]} {
    %c0 = arith.constant 0 : index
    %c0_0 = arith.constant 0 : index
    %0 = vector.load %arg2[%c0, %c0_0] : memref<64x576xbf16, #tpu.memory_space<vmem>>, vector<64x576xbf16>
    %c0_1 = arith.constant 0 : index
    %c0_2 = arith.constant 0 : index
    %1 = vector.load %arg3[%c0_1, %c0_2] : memref<576x64xbf16, #tpu.memory_space<vmem>>, vector<576x64xbf16>
    %cst = arith.constant dense<0.000000e+00> : vector<64x64xf32>
    %2 = tpu.matmul %0, %1, %cst {dimension_numbers = #tpu.dot_dimension_numbers<[1], [0], [0], [1], [0, 0, 1, 1], [], []>} : vector<64x576xbf16>, vector<576x64xbf16>, vector<64x64xf32> -> vector<64x64xf32>
    %c0_3 = arith.constant 0 : index
    %c0_4 = arith.constant 0 : index
    %3 = vector.load %arg4[%c0_3, %c0_4] : memref<1x64xf32, #tpu.memory_space<vmem>>, vector<1x64xf32>
    %4 = vector.broadcast %3 : vector<1x64xf32> to vector<64x64xf32>
    %5 = arith.addf %2, %4 : vector<64x64xf32>
    %cst_5 = arith.constant 0.000000e+00 : f32
    %6 = vector.broadcast %cst_5 : f32 to vector<64x64xf32>
    %7 = arith.maximumf %5, %6 : vector<64x64xf32>
    %8 = arith.truncf %7 : vector<64x64xf32> to vector<64x64xbf16>
    %c0_6 = arith.constant 0 : index
    %c0_7 = arith.constant 0 : index
    %9 = vector.load %arg5[%c0_6, %c0_7] : memref<64x64xbf16, #tpu.memory_space<vmem>>, vector<64x64xbf16>
    tpu.vector_store %arg5[%c0_6, %c0_7], %8 {strides = array<i32>} : memref<64x64xbf16, #tpu.memory_space<vmem>>, vector<64x64xbf16>,
    return
  }
  func.func @transform_0(%arg0: i32, %arg1: i32) -> (i32, i32) {
    %c0_i32 = arith.constant 0 : i32
    %c0_i32_0 = arith.constant 0 : i32
    return %arg0, %c0_i32 : i32, i32
  }
  func.func @transform_1(%arg0: i32, %arg1: i32) -> (i32, i32) {
    %c0_i32 = arith.constant 0 : i32
    %c0_i32_0 = arith.constant 0 : i32
    return %c0_i32, %arg1 : i32, i32
  }
  func.func @transform_2(%arg0: i32, %arg1: i32) -> (i32, i32) {
    %c0_i32 = arith.constant 0 : i32
    %c0_i32_0 = arith.constant 0 : i32
    return %c0_i32, %arg1 : i32, i32
  }
  func.func @transform_3(%arg0: i32, %arg1: i32) -> (i32, i32) {
    %c0_i32 = arith.constant 0 : i32
    return %arg0, %arg1 : i32, i32
  }
}

module attributes {stable_mosaic.version = 11 : i64} {
  func.func @_mm_kernel(%arg0: i32, %arg1: i32, %arg2: memref<64x64xbf16, #tpu.memory_space<vmem>>, %arg3: memref<64x64xbf16, #tpu.memory_space<vmem>>, %arg4: memref<1x64xf32, #tpu.memory_space<vmem>>, %arg5: memref<64x64xbf16, #tpu.memory_space<vmem>>) attributes {dimension_semantics = [#tpu.dimension_semantics<parallel>, #tpu.dimension_semantics<parallel>], iteration_bounds = array<i64: 1, 1>, scalar_prefetch = 0 : i64, scratch_operands = 0 : i64, tpu.core_type = #tpu.core_type<tc>, window_params = [{transform_indices = @transform_0, window_bounds = array<i64: 64, 64>}, {transform_indices = @transform_1, window_bounds = array<i64: 64, 64>}, {transform_indices = @transform_2, window_bounds = array<i64: 1, 64>}, {transform_indices = @transform_3, window_bounds = array<i64: 64, 64>}]} {
    %c0 = arith.constant 0 : index
    %c0_0 = arith.constant 0 : index
    %0 = vector.load %arg2[%c0, %c0_0] : memref<64x64xbf16, #tpu.memory_space<vmem>>, vector<64x64xbf16>
    %c0_1 = arith.constant 0 : index
    %c0_2 = arith.constant 0 : index
    %1 = vector.load %arg3[%c0_1, %c0_2] : memref<64x64xbf16, #tpu.memory_space<vmem>>, vector<64x64xbf16>
    %cst = arith.constant dense<0.000000e+00> : vector<64x64xf32>
    %2 = tpu.matmul %0, %1, %cst {dimension_numbers = #tpu.dot_dimension_numbers<[1], [0], [0], [1], [0, 0, 1, 1], [], []>} : vector<64x64xbf16>, vector<64x64xbf16>, vector<64x64xf32> -> vector<64x64xf32>
    %c0_3 = arith.constant 0 : index
    %c0_4 = arith.constant 0 : index
    %3 = vector.load %arg4[%c0_3, %c0_4] : memref<1x64xf32, #tpu.memory_space<vmem>>, vector<1x64xf32>
    %4 = vector.broadcast %3 : vector<1x64xf32> to vector<64x64xf32>
    %5 = arith.addf %2, %4 : vector<64x64xf32>
    %cst_5 = arith.constant 0.000000e+00 : f32
    %6 = vector.broadcast %cst_5 : f32 to vector<64x64xf32>
    %7 = arith.maximumf %5, %6 : vector<64x64xf32>
    %8 = arith.truncf %7 : vector<64x64xf32> to vector<64x64xbf16>
    %c0_6 = arith.constant 0 : index
    %c0_7 = arith.constant 0 : index
    %9 = vector.load %arg5[%c0_6, %c0_7] : memref<64x64xbf16, #tpu.memory_space<vmem>>, vector<64x64xbf16>
    tpu.vector_store %arg5[%c0_6, %c0_7], %8 {strides = array<i32>} : memref<64x64xbf16, #tpu.memory_space<vmem>>, vector<64x64xbf16>,
    return
  }
  func.func @transform_0(%arg0: i32, %arg1: i32) -> (i32, i32) {
    %c0_i32 = arith.constant 0 : i32
    %c0_i32_0 = arith.constant 0 : i32
    return %arg0, %c0_i32 : i32, i32
  }
  func.func @transform_1(%arg0: i32, %arg1: i32) -> (i32, i32) {
    %c0_i32 = arith.constant 0 : i32
    %c0_i32_0 = arith.constant 0 : i32
    return %c0_i32, %arg1 : i32, i32
  }
  func.func @transform_2(%arg0: i32, %arg1: i32) -> (i32, i32) {
    %c0_i32 = arith.constant 0 : i32
    %c0_i32_0 = arith.constant 0 : i32
    return %c0_i32, %arg1 : i32, i32
  }
  func.func @transform_3(%arg0: i32, %arg1: i32) -> (i32, i32) {
    %c0_i32 = arith.constant 0 : i32
    return %arg0, %arg1 : i32, i32
  }
}

module attributes {stable_mosaic.version = 11 : i64} {
  func.func @_mm_kernel(%arg0: i32, %arg1: i32, %arg2: memref<16x576xbf16, #tpu.memory_space<vmem>>, %arg3: memref<576x64xbf16, #tpu.memory_space<vmem>>, %arg4: memref<1x64xf32, #tpu.memory_space<vmem>>, %arg5: memref<16x64xbf16, #tpu.memory_space<vmem>>) attributes {dimension_semantics = [#tpu.dimension_semantics<parallel>, #tpu.dimension_semantics<parallel>], iteration_bounds = array<i64: 1, 1>, scalar_prefetch = 0 : i64, scratch_operands = 0 : i64, tpu.core_type = #tpu.core_type<tc>, window_params = [{transform_indices = @transform_0, window_bounds = array<i64: 16, 576>}, {transform_indices = @transform_1, window_bounds = array<i64: 576, 64>}, {transform_indices = @transform_2, window_bounds = array<i64: 1, 64>}, {transform_indices = @transform_3, window_bounds = array<i64: 16, 64>}]} {
    %c0 = arith.constant 0 : index
    %c0_0 = arith.constant 0 : index
    %0 = vector.load %arg2[%c0, %c0_0] : memref<16x576xbf16, #tpu.memory_space<vmem>>, vector<16x576xbf16>
    %c0_1 = arith.constant 0 : index
    %c0_2 = arith.constant 0 : index
    %1 = vector.load %arg3[%c0_1, %c0_2] : memref<576x64xbf16, #tpu.memory_space<vmem>>, vector<576x64xbf16>
    %cst = arith.constant dense<0.000000e+00> : vector<16x64xf32>
    %2 = tpu.matmul %0, %1, %cst {dimension_numbers = #tpu.dot_dimension_numbers<[1], [0], [0], [1], [0, 0, 1, 1], [], []>} : vector<16x576xbf16>, vector<576x64xbf16>, vector<16x64xf32> -> vector<16x64xf32>
    %c0_3 = arith.constant 0 : index
    %c0_4 = arith.constant 0 : index
    %3 = vector.load %arg4[%c0_3, %c0_4] : memref<1x64xf32, #tpu.memory_space<vmem>>, vector<1x64xf32>
    %4 = vector.broadcast %3 : vector<1x64xf32> to vector<16x64xf32>
    %5 = arith.addf %2, %4 : vector<16x64xf32>
    %cst_5 = arith.constant 0.000000e+00 : f32
    %6 = vector.broadcast %cst_5 : f32 to vector<16x64xf32>
    %7 = arith.maximumf %5, %6 : vector<16x64xf32>
    %8 = arith.truncf %7 : vector<16x64xf32> to vector<16x64xbf16>
    %c0_6 = arith.constant 0 : index
    %c0_7 = arith.constant 0 : index
    %9 = vector.load %arg5[%c0_6, %c0_7] : memref<16x64xbf16, #tpu.memory_space<vmem>>, vector<16x64xbf16>
    tpu.vector_store %arg5[%c0_6, %c0_7], %8 {strides = array<i32>} : memref<16x64xbf16, #tpu.memory_space<vmem>>, vector<16x64xbf16>,
    return
  }
  func.func @transform_0(%arg0: i32, %arg1: i32) -> (i32, i32) {
    %c0_i32 = arith.constant 0 : i32
    %c0_i32_0 = arith.constant 0 : i32
    return %arg0, %c0_i32 : i32, i32
  }
  func.func @transform_1(%arg0: i32, %arg1: i32) -> (i32, i32) {
    %c0_i32 = arith.constant 0 : i32
    %c0_i32_0 = arith.constant 0 : i32
    return %c0_i32, %arg1 : i32, i32
  }
  func.func @transform_2(%arg0: i32, %arg1: i32) -> (i32, i32) {
    %c0_i32 = arith.constant 0 : i32
    %c0_i32_0 = arith.constant 0 : i32
    return %c0_i32, %arg1 : i32, i32
  }
  func.func @transform_3(%arg0: i32, %arg1: i32) -> (i32, i32) {
    %c0_i32 = arith.constant 0 : i32
    return %arg0, %arg1 : i32, i32
  }
}

module attributes {stable_mosaic.version = 11 : i64} {
  func.func @_mm_kernel(%arg0: i32, %arg1: i32, %arg2: memref<16x64xbf16, #tpu.memory_space<vmem>>, %arg3: memref<64x128xbf16, #tpu.memory_space<vmem>>, %arg4: memref<1x128xf32, #tpu.memory_space<vmem>>, %arg5: memref<16x128xbf16, #tpu.memory_space<vmem>>) attributes {dimension_semantics = [#tpu.dimension_semantics<parallel>, #tpu.dimension_semantics<parallel>], iteration_bounds = array<i64: 1, 2>, scalar_prefetch = 0 : i64, scratch_operands = 0 : i64, tpu.core_type = #tpu.core_type<tc>, window_params = [{transform_indices = @transform_0, window_bounds = array<i64: 16, 64>}, {transform_indices = @transform_1, window_bounds = array<i64: 64, 128>}, {transform_indices = @transform_2, window_bounds = array<i64: 1, 128>}, {transform_indices = @transform_3, window_bounds = array<i64: 16, 128>}]} {
    %c0 = arith.constant 0 : index
    %c0_0 = arith.constant 0 : index
    %0 = vector.load %arg2[%c0, %c0_0] : memref<16x64xbf16, #tpu.memory_space<vmem>>, vector<16x64xbf16>
    %c0_1 = arith.constant 0 : index
    %c0_2 = arith.constant 0 : index
    %1 = vector.load %arg3[%c0_1, %c0_2] : memref<64x128xbf16, #tpu.memory_space<vmem>>, vector<64x128xbf16>
    %cst = arith.constant dense<0.000000e+00> : vector<16x128xf32>
    %2 = tpu.matmul %0, %1, %cst {dimension_numbers = #tpu.dot_dimension_numbers<[1], [0], [0], [1], [0, 0, 1, 1], [], []>} : vector<16x64xbf16>, vector<64x128xbf16>, vector<16x128xf32> -> vector<16x128xf32>
    %c0_3 = arith.constant 0 : index
    %c0_4 = arith.constant 0 : index
    %3 = vector.load %arg4[%c0_3, %c0_4] : memref<1x128xf32, #tpu.memory_space<vmem>>, vector<1x128xf32>
    %4 = vector.broadcast %3 : vector<1x128xf32> to vector<16x128xf32>
    %5 = arith.addf %2, %4 : vector<16x128xf32>
    %cst_5 = arith.constant 0.000000e+00 : f32
    %6 = vector.broadcast %cst_5 : f32 to vector<16x128xf32>
    %7 = arith.maximumf %5, %6 : vector<16x128xf32>
    %8 = arith.truncf %7 : vector<16x128xf32> to vector<16x128xbf16>
    %c0_6 = arith.constant 0 : index
    %c0_7 = arith.constant 0 : index
    %9 = vector.load %arg5[%c0_6, %c0_7] : memref<16x128xbf16, #tpu.memory_space<vmem>>, vector<16x128xbf16>
    tpu.vector_store %arg5[%c0_6, %c0_7], %8 {strides = array<i32>} : memref<16x128xbf16, #tpu.memory_space<vmem>>, vector<16x128xbf16>,
    return
  }
  func.func @transform_0(%arg0: i32, %arg1: i32) -> (i32, i32) {
    %c0_i32 = arith.constant 0 : i32
    %c0_i32_0 = arith.constant 0 : i32
    return %arg0, %c0_i32 : i32, i32
  }
  func.func @transform_1(%arg0: i32, %arg1: i32) -> (i32, i32) {
    %c0_i32 = arith.constant 0 : i32
    %c0_i32_0 = arith.constant 0 : i32
    return %c0_i32, %arg1 : i32, i32
  }
  func.func @transform_2(%arg0: i32, %arg1: i32) -> (i32, i32) {
    %c0_i32 = arith.constant 0 : i32
    %c0_i32_0 = arith.constant 0 : i32
    return %c0_i32, %arg1 : i32, i32
  }
  func.func @transform_3(%arg0: i32, %arg1: i32) -> (i32, i32) {
    %c0_i32 = arith.constant 0 : i32
    return %arg0, %arg1 : i32, i32
  }
}

module attributes {stable_mosaic.version = 11 : i64} {
  func.func @_mm_kernel(%arg0: i32, %arg1: i32, %arg2: memref<4x576xbf16, #tpu.memory_space<vmem>>, %arg3: memref<576x128xbf16, #tpu.memory_space<vmem>>, %arg4: memref<1x128xf32, #tpu.memory_space<vmem>>, %arg5: memref<4x128xbf16, #tpu.memory_space<vmem>>) attributes {dimension_semantics = [#tpu.dimension_semantics<parallel>, #tpu.dimension_semantics<parallel>], iteration_bounds = array<i64: 1, 1>, scalar_prefetch = 0 : i64, scratch_operands = 0 : i64, tpu.core_type = #tpu.core_type<tc>, window_params = [{transform_indices = @transform_0, window_bounds = array<i64: 4, 576>}, {transform_indices = @transform_1, window_bounds = array<i64: 576, 128>}, {transform_indices = @transform_2, window_bounds = array<i64: 1, 128>}, {transform_indices = @transform_3, window_bounds = array<i64: 4, 128>}]} {
    %c0 = arith.constant 0 : index
    %c0_0 = arith.constant 0 : index
    %0 = vector.load %arg2[%c0, %c0_0] : memref<4x576xbf16, #tpu.memory_space<vmem>>, vector<4x576xbf16>
    %c0_1 = arith.constant 0 : index
    %c0_2 = arith.constant 0 : index
    %1 = vector.load %arg3[%c0_1, %c0_2] : memref<576x128xbf16, #tpu.memory_space<vmem>>, vector<576x128xbf16>
    %cst = arith.constant dense<0.000000e+00> : vector<4x128xf32>
    %2 = tpu.matmul %0, %1, %cst {dimension_numbers = #tpu.dot_dimension_numbers<[1], [0], [0], [1], [0, 0, 1, 1], [], []>} : vector<4x576xbf16>, vector<576x128xbf16>, vector<4x128xf32> -> vector<4x128xf32>
    %c0_3 = arith.constant 0 : index
    %c0_4 = arith.constant 0 : index
    %3 = vector.load %arg4[%c0_3, %c0_4] : memref<1x128xf32, #tpu.memory_space<vmem>>, vector<1x128xf32>
    %4 = vector.broadcast %3 : vector<1x128xf32> to vector<4x128xf32>
    %5 = arith.addf %2, %4 : vector<4x128xf32>
    %cst_5 = arith.constant 0.000000e+00 : f32
    %6 = vector.broadcast %cst_5 : f32 to vector<4x128xf32>
    %7 = arith.maximumf %5, %6 : vector<4x128xf32>
    %8 = arith.truncf %7 : vector<4x128xf32> to vector<4x128xbf16>
    %c0_6 = arith.constant 0 : index
    %c0_7 = arith.constant 0 : index
    %9 = vector.load %arg5[%c0_6, %c0_7] : memref<4x128xbf16, #tpu.memory_space<vmem>>, vector<4x128xbf16>
    tpu.vector_store %arg5[%c0_6, %c0_7], %8 {strides = array<i32>} : memref<4x128xbf16, #tpu.memory_space<vmem>>, vector<4x128xbf16>,
    return
  }
  func.func @transform_0(%arg0: i32, %arg1: i32) -> (i32, i32) {
    %c0_i32 = arith.constant 0 : i32
    %c0_i32_0 = arith.constant 0 : i32
    return %arg0, %c0_i32 : i32, i32
  }
  func.func @transform_1(%arg0: i32, %arg1: i32) -> (i32, i32) {
    %c0_i32 = arith.constant 0 : i32
    %c0_i32_0 = arith.constant 0 : i32
    return %c0_i32, %arg1 : i32, i32
  }
  func.func @transform_2(%arg0: i32, %arg1: i32) -> (i32, i32) {
    %c0_i32 = arith.constant 0 : i32
    %c0_i32_0 = arith.constant 0 : i32
    return %c0_i32, %arg1 : i32, i32
  }
  func.func @transform_3(%arg0: i32, %arg1: i32) -> (i32, i32) {
    %c0_i32 = arith.constant 0 : i32
    return %arg0, %arg1 : i32, i32
  }
}

module attributes {stable_mosaic.version = 11 : i64} {
  func.func @_mm_kernel(%arg0: i32, %arg1: i32, %arg2: memref<4x64xbf16, #tpu.memory_space<vmem>>, %arg3: memref<64x128xbf16, #tpu.memory_space<vmem>>, %arg4: memref<1x128xf32, #tpu.memory_space<vmem>>, %arg5: memref<4x128xbf16, #tpu.memory_space<vmem>>) attributes {dimension_semantics = [#tpu.dimension_semantics<parallel>, #tpu.dimension_semantics<parallel>], iteration_bounds = array<i64: 1, 2>, scalar_prefetch = 0 : i64, scratch_operands = 0 : i64, tpu.core_type = #tpu.core_type<tc>, window_params = [{transform_indices = @transform_0, window_bounds = array<i64: 4, 64>}, {transform_indices = @transform_1, window_bounds = array<i64: 64, 128>}, {transform_indices = @transform_2, window_bounds = array<i64: 1, 128>}, {transform_indices = @transform_3, window_bounds = array<i64: 4, 128>}]} {
    %c0 = arith.constant 0 : index
    %c0_0 = arith.constant 0 : index
    %0 = vector.load %arg2[%c0, %c0_0] : memref<4x64xbf16, #tpu.memory_space<vmem>>, vector<4x64xbf16>
    %c0_1 = arith.constant 0 : index
    %c0_2 = arith.constant 0 : index
    %1 = vector.load %arg3[%c0_1, %c0_2] : memref<64x128xbf16, #tpu.memory_space<vmem>>, vector<64x128xbf16>
    %cst = arith.constant dense<0.000000e+00> : vector<4x128xf32>
    %2 = tpu.matmul %0, %1, %cst {dimension_numbers = #tpu.dot_dimension_numbers<[1], [0], [0], [1], [0, 0, 1, 1], [], []>} : vector<4x64xbf16>, vector<64x128xbf16>, vector<4x128xf32> -> vector<4x128xf32>
    %c0_3 = arith.constant 0 : index
    %c0_4 = arith.constant 0 : index
    %3 = vector.load %arg4[%c0_3, %c0_4] : memref<1x128xf32, #tpu.memory_space<vmem>>, vector<1x128xf32>
    %4 = vector.broadcast %3 : vector<1x128xf32> to vector<4x128xf32>
    %5 = arith.addf %2, %4 : vector<4x128xf32>
    %cst_5 = arith.constant 0.000000e+00 : f32
    %6 = vector.broadcast %cst_5 : f32 to vector<4x128xf32>
    %7 = arith.maximumf %5, %6 : vector<4x128xf32>
    %8 = arith.truncf %7 : vector<4x128xf32> to vector<4x128xbf16>
    %c0_6 = arith.constant 0 : index
    %c0_7 = arith.constant 0 : index
    %9 = vector.load %arg5[%c0_6, %c0_7] : memref<4x128xbf16, #tpu.memory_space<vmem>>, vector<4x128xbf16>
    tpu.vector_store %arg5[%c0_6, %c0_7], %8 {strides = array<i32>} : memref<4x128xbf16, #tpu.memory_space<vmem>>, vector<4x128xbf16>,
    return
  }
  func.func @transform_0(%arg0: i32, %arg1: i32) -> (i32, i32) {
    %c0_i32 = arith.constant 0 : i32
    %c0_i32_0 = arith.constant 0 : i32
    return %arg0, %c0_i32 : i32, i32
  }
  func.func @transform_1(%arg0: i32, %arg1: i32) -> (i32, i32) {
    %c0_i32 = arith.constant 0 : i32
    %c0_i32_0 = arith.constant 0 : i32
    return %c0_i32, %arg1 : i32, i32
  }
  func.func @transform_2(%arg0: i32, %arg1: i32) -> (i32, i32) {
    %c0_i32 = arith.constant 0 : i32
    %c0_i32_0 = arith.constant 0 : i32
    return %c0_i32, %arg1 : i32, i32
  }
  func.func @transform_3(%arg0: i32, %arg1: i32) -> (i32, i32) {
    %c0_i32 = arith.constant 0 : i32
    return %arg0, %arg1 : i32, i32
  }
}

module attributes {stable_mosaic.version = 11 : i64} {
  func.func @_mm_kernel(%arg0: i32, %arg1: i32, %arg2: memref<4x128xbf16, #tpu.memory_space<vmem>>, %arg3: memref<128x64xbf16, #tpu.memory_space<vmem>>, %arg4: memref<1x64xf32, #tpu.memory_space<vmem>>, %arg5: memref<4x64xbf16, #tpu.memory_space<vmem>>) attributes {dimension_semantics = [#tpu.dimension_semantics<parallel>, #tpu.dimension_semantics<parallel>], iteration_bounds = array<i64: 1, 1>, scalar_prefetch = 0 : i64, scratch_operands = 0 : i64, tpu.core_type = #tpu.core_type<tc>, window_params = [{transform_indices = @transform_0, window_bounds = array<i64: 4, 128>}, {transform_indices = @transform_1, window_bounds = array<i64: 128, 64>}, {transform_indices = @transform_2, window_bounds = array<i64: 1, 64>}, {transform_indices = @transform_3, window_bounds = array<i64: 4, 64>}]} {
    %c0 = arith.constant 0 : index
    %c0_0 = arith.constant 0 : index
    %0 = vector.load %arg2[%c0, %c0_0] : memref<4x128xbf16, #tpu.memory_space<vmem>>, vector<4x128xbf16>
    %c0_1 = arith.constant 0 : index
    %c0_2 = arith.constant 0 : index
    %1 = vector.load %arg3[%c0_1, %c0_2] : memref<128x64xbf16, #tpu.memory_space<vmem>>, vector<128x64xbf16>
    %cst = arith.constant dense<0.000000e+00> : vector<4x64xf32>
    %2 = tpu.matmul %0, %1, %cst {dimension_numbers = #tpu.dot_dimension_numbers<[1], [0], [0], [1], [0, 0, 1, 1], [], []>} : vector<4x128xbf16>, vector<128x64xbf16>, vector<4x64xf32> -> vector<4x64xf32>
    %c0_3 = arith.constant 0 : index
    %c0_4 = arith.constant 0 : index
    %3 = vector.load %arg4[%c0_3, %c0_4] : memref<1x64xf32, #tpu.memory_space<vmem>>, vector<1x64xf32>
    %4 = vector.broadcast %3 : vector<1x64xf32> to vector<4x64xf32>
    %5 = arith.addf %2, %4 : vector<4x64xf32>
    %cst_5 = arith.constant 0.000000e+00 : f32
    %6 = vector.broadcast %cst_5 : f32 to vector<4x64xf32>
    %7 = arith.maximumf %5, %6 : vector<4x64xf32>
    %8 = arith.truncf %7 : vector<4x64xf32> to vector<4x64xbf16>
    %c0_6 = arith.constant 0 : index
    %c0_7 = arith.constant 0 : index
    %9 = vector.load %arg5[%c0_6, %c0_7] : memref<4x64xbf16, #tpu.memory_space<vmem>>, vector<4x64xbf16>
    tpu.vector_store %arg5[%c0_6, %c0_7], %8 {strides = array<i32>} : memref<4x64xbf16, #tpu.memory_space<vmem>>, vector<4x64xbf16>,
    return
  }
  func.func @transform_0(%arg0: i32, %arg1: i32) -> (i32, i32) {
    %c0_i32 = arith.constant 0 : i32
    %c0_i32_0 = arith.constant 0 : i32
    return %arg0, %c0_i32 : i32, i32
  }
  func.func @transform_1(%arg0: i32, %arg1: i32) -> (i32, i32) {
    %c0_i32 = arith.constant 0 : i32
    %c0_i32_0 = arith.constant 0 : i32
    return %c0_i32, %arg1 : i32, i32
  }
  func.func @transform_2(%arg0: i32, %arg1: i32) -> (i32, i32) {
    %c0_i32 = arith.constant 0 : i32
    %c0_i32_0 = arith.constant 0 : i32
    return %c0_i32, %arg1 : i32, i32
  }
  func.func @transform_3(%arg0: i32, %arg1: i32) -> (i32, i32) {
    %c0_i32 = arith.constant 0 : i32
    return %arg0, %arg1 : i32, i32
  }
}

module attributes {stable_mosaic.version = 11 : i64} {
  func.func @_mm_kernel(%arg0: i32, %arg1: i32, %arg2: memref<4x1152xbf16, #tpu.memory_space<vmem>>, %arg3: memref<1152x128xbf16, #tpu.memory_space<vmem>>, %arg4: memref<1x128xf32, #tpu.memory_space<vmem>>, %arg5: memref<4x128xbf16, #tpu.memory_space<vmem>>) attributes {dimension_semantics = [#tpu.dimension_semantics<parallel>, #tpu.dimension_semantics<parallel>], iteration_bounds = array<i64: 1, 1>, scalar_prefetch = 0 : i64, scratch_operands = 0 : i64, tpu.core_type = #tpu.core_type<tc>, window_params = [{transform_indices = @transform_0, window_bounds = array<i64: 4, 1152>}, {transform_indices = @transform_1, window_bounds = array<i64: 1152, 128>}, {transform_indices = @transform_2, window_bounds = array<i64: 1, 128>}, {transform_indices = @transform_3, window_bounds = array<i64: 4, 128>}]} {
    %c0 = arith.constant 0 : index
    %c0_0 = arith.constant 0 : index
    %0 = vector.load %arg2[%c0, %c0_0] : memref<4x1152xbf16, #tpu.memory_space<vmem>>, vector<4x1152xbf16>
    %c0_1 = arith.constant 0 : index
    %c0_2 = arith.constant 0 : index
    %1 = vector.load %arg3[%c0_1, %c0_2] : memref<1152x128xbf16, #tpu.memory_space<vmem>>, vector<1152x128xbf16>
    %cst = arith.constant dense<0.000000e+00> : vector<4x128xf32>
    %2 = tpu.matmul %0, %1, %cst {dimension_numbers = #tpu.dot_dimension_numbers<[1], [0], [0], [1], [0, 0, 1, 1], [], []>} : vector<4x1152xbf16>, vector<1152x128xbf16>, vector<4x128xf32> -> vector<4x128xf32>
    %c0_3 = arith.constant 0 : index
    %c0_4 = arith.constant 0 : index
    %3 = vector.load %arg4[%c0_3, %c0_4] : memref<1x128xf32, #tpu.memory_space<vmem>>, vector<1x128xf32>
    %4 = vector.broadcast %3 : vector<1x128xf32> to vector<4x128xf32>
    %5 = arith.addf %2, %4 : vector<4x128xf32>
    %cst_5 = arith.constant 0.000000e+00 : f32
    %6 = vector.broadcast %cst_5 : f32 to vector<4x128xf32>
    %7 = arith.maximumf %5, %6 : vector<4x128xf32>
    %8 = arith.truncf %7 : vector<4x128xf32> to vector<4x128xbf16>
    %c0_6 = arith.constant 0 : index
    %c0_7 = arith.constant 0 : index
    %9 = vector.load %arg5[%c0_6, %c0_7] : memref<4x128xbf16, #tpu.memory_space<vmem>>, vector<4x128xbf16>
    tpu.vector_store %arg5[%c0_6, %c0_7], %8 {strides = array<i32>} : memref<4x128xbf16, #tpu.memory_space<vmem>>, vector<4x128xbf16>,
    return
  }
  func.func @transform_0(%arg0: i32, %arg1: i32) -> (i32, i32) {
    %c0_i32 = arith.constant 0 : i32
    %c0_i32_0 = arith.constant 0 : i32
    return %arg0, %c0_i32 : i32, i32
  }
  func.func @transform_1(%arg0: i32, %arg1: i32) -> (i32, i32) {
    %c0_i32 = arith.constant 0 : i32
    %c0_i32_0 = arith.constant 0 : i32
    return %c0_i32, %arg1 : i32, i32
  }
  func.func @transform_2(%arg0: i32, %arg1: i32) -> (i32, i32) {
    %c0_i32 = arith.constant 0 : i32
    %c0_i32_0 = arith.constant 0 : i32
    return %c0_i32, %arg1 : i32, i32
  }
  func.func @transform_3(%arg0: i32, %arg1: i32) -> (i32, i32) {
    %c0_i32 = arith.constant 0 : i32
    return %arg0, %arg1 : i32, i32
  }
}

module attributes {stable_mosaic.version = 11 : i64} {
  func.func @_mm_kernel(%arg0: i32, %arg1: i32, %arg2: memref<64x64xbf16, #tpu.memory_space<vmem>>, %arg3: memref<64x64xbf16, #tpu.memory_space<vmem>>, %arg4: memref<1x64xf32, #tpu.memory_space<vmem>>, %arg5: memref<64x64xbf16, #tpu.memory_space<vmem>>) attributes {dimension_semantics = [#tpu.dimension_semantics<parallel>, #tpu.dimension_semantics<parallel>], iteration_bounds = array<i64: 1, 1>, scalar_prefetch = 0 : i64, scratch_operands = 0 : i64, tpu.core_type = #tpu.core_type<tc>, window_params = [{transform_indices = @transform_0, window_bounds = array<i64: 64, 64>}, {transform_indices = @transform_1, window_bounds = array<i64: 64, 64>}, {transform_indices = @transform_2, window_bounds = array<i64: 1, 64>}, {transform_indices = @transform_3, window_bounds = array<i64: 64, 64>}]} {
    %c0 = arith.constant 0 : index
    %c0_0 = arith.constant 0 : index
    %0 = vector.load %arg2[%c0, %c0_0] : memref<64x64xbf16, #tpu.memory_space<vmem>>, vector<64x64xbf16>
    %c0_1 = arith.constant 0 : index
    %c0_2 = arith.constant 0 : index
    %1 = vector.load %arg3[%c0_1, %c0_2] : memref<64x64xbf16, #tpu.memory_space<vmem>>, vector<64x64xbf16>
    %cst = arith.constant dense<0.000000e+00> : vector<64x64xf32>
    %2 = tpu.matmul %0, %1, %cst {dimension_numbers = #tpu.dot_dimension_numbers<[1], [0], [0], [1], [0, 0, 1, 1], [], []>} : vector<64x64xbf16>, vector<64x64xbf16>, vector<64x64xf32> -> vector<64x64xf32>
    %c0_3 = arith.constant 0 : index
    %c0_4 = arith.constant 0 : index
    %3 = vector.load %arg4[%c0_3, %c0_4] : memref<1x64xf32, #tpu.memory_space<vmem>>, vector<1x64xf32>
    %4 = vector.broadcast %3 : vector<1x64xf32> to vector<64x64xf32>
    %5 = arith.addf %2, %4 : vector<64x64xf32>
    %6 = arith.truncf %5 : vector<64x64xf32> to vector<64x64xbf16>
    %c0_5 = arith.constant 0 : index
    %c0_6 = arith.constant 0 : index
    %7 = vector.load %arg5[%c0_5, %c0_6] : memref<64x64xbf16, #tpu.memory_space<vmem>>, vector<64x64xbf16>
    tpu.vector_store %arg5[%c0_5, %c0_6], %6 {strides = array<i32>} : memref<64x64xbf16, #tpu.memory_space<vmem>>, vector<64x64xbf16>,
    return
  }
  func.func @transform_0(%arg0: i32, %arg1: i32) -> (i32, i32) {
    %c0_i32 = arith.constant 0 : i32
    %c0_i32_0 = arith.constant 0 : i32
    return %arg0, %c0_i32 : i32, i32
  }
  func.func @transform_1(%arg0: i32, %arg1: i32) -> (i32, i32) {
    %c0_i32 = arith.constant 0 : i32
    %c0_i32_0 = arith.constant 0 : i32
    return %c0_i32, %arg1 : i32, i32
  }
  func.func @transform_2(%arg0: i32, %arg1: i32) -> (i32, i32) {
    %c0_i32 = arith.constant 0 : i32
    %c0_i32_0 = arith.constant 0 : i32
    return %c0_i32, %arg1 : i32, i32
  }
  func.func @transform_3(%arg0: i32, %arg1: i32) -> (i32, i32) {
    %c0_i32 = arith.constant 0 : i32
    return %arg0, %arg1 : i32, i32
  }
}

module attributes {stable_mosaic.version = 11 : i64} {
  func.func @_corr_pos_kernel(%arg0: i32, %arg1: memref<2x16x64xbf16, #tpu.memory_space<vmem>>, %arg2: memref<2x16x64xbf16, #tpu.memory_space<vmem>>, %arg3: memref<16x1xf32, #tpu.memory_space<vmem>>, %arg4: memref<16x1xf32, #tpu.memory_space<vmem>>, %arg5: memref<2x2x16xf32, #tpu.memory_space<vmem>>) attributes {dimension_semantics = [#tpu.dimension_semantics<arbitrary>], iteration_bounds = array<i64: 1>, scalar_prefetch = 0 : i64, scratch_operands = 0 : i64, tpu.core_type = #tpu.core_type<tc>, window_params = [{pipeline_mode = #tpu.pipeline_mode<synchronous>, transform_indices = @transform_0, window_bounds = array<i64: 2, 16, 64>}, {pipeline_mode = #tpu.pipeline_mode<synchronous>, transform_indices = @transform_1, window_bounds = array<i64: 2, 16, 64>}, {pipeline_mode = #tpu.pipeline_mode<synchronous>, transform_indices = @transform_2, window_bounds = array<i64: 16, 1>}, {pipeline_mode = #tpu.pipeline_mode<synchronous>, transform_indices = @transform_3, window_bounds = array<i64: 16, 1>}, {pipeline_mode = #tpu.pipeline_mode<synchronous>, transform_indices = @transform_4, window_bounds = array<i64: 2, 2, 16>}]} {
    %c0 = arith.constant 0 : index
    %c0_0 = arith.constant 0 : index
    %c0_1 = arith.constant 0 : index
    %0 = vector.load %arg1[%c0, %c0_0, %c0_1] : memref<2x16x64xbf16, #tpu.memory_space<vmem>>, vector<2x16x64xbf16>
    %c0_2 = arith.constant 0 : index
    %c0_3 = arith.constant 0 : index
    %c0_4 = arith.constant 0 : index
    %1 = vector.load %arg2[%c0_2, %c0_3, %c0_4] : memref<2x16x64xbf16, #tpu.memory_space<vmem>>, vector<2x16x64xbf16>
    "tpu.trace_start"() <{level = 10 : i32, message = "bkc,bqc->bkq"}> : () -> ()
    %cst = arith.constant dense<0.000000e+00> : vector<2x16x16xf32>
    %2 = tpu.matmul %0, %1, %cst {dimension_numbers = #tpu.dot_dimension_numbers<[2], [2], [1], [1], [0, 0, 0, 1, 1, 1], [0], [0]>} : vector<2x16x64xbf16>, vector<2x16x64xbf16>, vector<2x16x16xf32> -> vector<2x16x16xf32>
    "tpu.trace_stop"() : () -> ()
    %cst_5 = arith.constant 1.250000e-01 : f32
    %3 = vector.broadcast %cst_5 : f32 to vector<2x16x16xf32>
    %4 = arith.mulf %2, %3 : vector<2x16x16xf32>
    %cst_6 = arith.constant dense<0xFF800000> : vector<2x16xf32>
    %5 = vector.multi_reduction <maximumf>, %4, %cst_6 [1] : vector<2x16x16xf32> to vector<2x16xf32>
    %6 = vector.shape_cast %5 : vector<2x16xf32> to vector<2x1x16xf32>
    %7 = vector.broadcast %6 : vector<2x1x16xf32> to vector<2x16x16xf32>
    %8 = arith.subf %4, %7 : vector<2x16x16xf32>
    %9 = math.exp %8 : vector<2x16x16xf32>
    %cst_7 = arith.constant dense<0.000000e+00> : vector<2x16xf32>
    %10 = vector.multi_reduction <add>, %9, %cst_7 [1] : vector<2x16x16xf32> to vector<2x16xf32>
    %11 = vector.shape_cast %10 : vector<2x16xf32> to vector<2x1x16xf32>
    %12 = tpu.reciprocal %11 {approx = true} : vector<2x1x16xf32> -> vector<2x1x16xf32>
    %c0_8 = arith.constant 0 : index
    %c0_9 = arith.constant 0 : index
    %13 = vector.load %arg3[%c0_8, %c0_9] : memref<16x1xf32, #tpu.memory_space<vmem>>, vector<16x1xf32>
    %14 = vector.shape_cast %13 : vector<16x1xf32> to vector<1x16x1xf32>
    %15 = vector.broadcast %14 : vector<1x16x1xf32> to vector<2x16x16xf32>
    %16 = arith.mulf %9, %15 : vector<2x16x16xf32>
    %cst_10 = arith.constant dense<0.000000e+00> : vector<2x16xf32>
    %17 = vector.multi_reduction <add>, %16, %cst_10 [1] : vector<2x16x16xf32> to vector<2x16xf32>
    %18 = vector.shape_cast %17 : vector<2x16xf32> to vector<2x1x16xf32>
    %19 = arith.mulf %18, %12 : vector<2x1x16xf32>
    %c0_11 = arith.constant 0 : index
    %c0_12 = arith.constant 0 : index
    %20 = vector.load %arg4[%c0_11, %c0_12] : memref<16x1xf32, #tpu.memory_space<vmem>>, vector<16x1xf32>
    %21 = vector.shape_cast %20 : vector<16x1xf32> to vector<1x16x1xf32>
    %22 = vector.broadcast %21 : vector<1x16x1xf32> to vector<2x16x16xf32>
    %23 = arith.mulf %9, %22 : vector<2x16x16xf32>
    %cst_13 = arith.constant dense<0.000000e+00> : vector<2x16xf32>
    %24 = vector.multi_reduction <add>, %23, %cst_13 [1] : vector<2x16x16xf32> to vector<2x16xf32>
    %25 = vector.shape_cast %24 : vector<2x16xf32> to vector<2x1x16xf32>
    %26 = arith.mulf %25, %12 : vector<2x1x16xf32>
    %c0_14 = arith.constant 0 : index
    %c0_15 = arith.constant 0 : index
    %c0_16 = arith.constant 0 : index
    %27 = vector.load %arg5[%c0_14, %c0_15, %c0_16] : memref<2x2x16xf32, #tpu.memory_space<vmem>>, vector<2x1x16xf32>
    tpu.vector_store %arg5[%c0_14, %c0_15, %c0_16], %19 {strides = array<i32>} : memref<2x2x16xf32, #tpu.memory_space<vmem>>, vector<2x1x16xf32>,
    %c0_17 = arith.constant 0 : index
    %c1 = arith.constant 1 : index
    %c0_18 = arith.constant 0 : index
    %28 = vector.load %arg5[%c0_17, %c1, %c0_18] : memref<2x2x16xf32, #tpu.memory_space<vmem>>, vector<2x1x16xf32>
    tpu.vector_store %arg5[%c0_17, %c1, %c0_18], %26 {strides = array<i32>} : memref<2x2x16xf32, #tpu.memory_space<vmem>>, vector<2x1x16xf32>,
    return
  }
  func.func @transform_0(%arg0: i32) -> (i32, i32, i32) {
    %c0_i32 = arith.constant 0 : i32
    %c0_i32_0 = arith.constant 0 : i32
    %c0_i32_1 = arith.constant 0 : i32
    %c0_i32_2 = arith.constant 0 : i32
    return %c0_i32, %c0_i32_0, %c0_i32_1 : i32, i32, i32
  }
  func.func @transform_1(%arg0: i32) -> (i32, i32, i32) {
    %c0_i32 = arith.constant 0 : i32
    %c0_i32_0 = arith.constant 0 : i32
    %c0_i32_1 = arith.constant 0 : i32
    %c0_i32_2 = arith.constant 0 : i32
    return %c0_i32, %c0_i32_0, %c0_i32_1 : i32, i32, i32
  }
  func.func @transform_2(%arg0: i32) -> (i32, i32) {
    %c0_i32 = arith.constant 0 : i32
    %c0_i32_0 = arith.constant 0 : i32
    %c0_i32_1 = arith.constant 0 : i32
    return %c0_i32, %c0_i32_0 : i32, i32
  }
  func.func @transform_3(%arg0: i32) -> (i32, i32) {
    %c0_i32 = arith.constant 0 : i32
    %c0_i32_0 = arith.constant 0 : i32
    %c0_i32_1 = arith.constant 0 : i32
    return %c0_i32, %c0_i32_0 : i32, i32
  }
  func.func @transform_4(%arg0: i32) -> (i32, i32, i32) {
    %c0_i32 = arith.constant 0 : i32
    %c0_i32_0 = arith.constant 0 : i32
    %c0_i32_1 = arith.constant 0 : i32
    %c0_i32_2 = arith.constant 0 : i32
    return %c0_i32, %c0_i32_0, %c0_i32_1 : i32, i32, i32
  }
}

module attributes {stable_mosaic.version = 11 : i64} {
  func.func @_mm_kernel(%arg0: i32, %arg1: i32, %arg2: memref<32x1184xbf16, #tpu.memory_space<vmem>>, %arg3: memref<1184x128xbf16, #tpu.memory_space<vmem>>, %arg4: memref<1x128xf32, #tpu.memory_space<vmem>>, %arg5: memref<32x128xbf16, #tpu.memory_space<vmem>>) attributes {dimension_semantics = [#tpu.dimension_semantics<parallel>, #tpu.dimension_semantics<parallel>], iteration_bounds = array<i64: 1, 2>, scalar_prefetch = 0 : i64, scratch_operands = 0 : i64, tpu.core_type = #tpu.core_type<tc>, window_params = [{transform_indices = @transform_0, window_bounds = array<i64: 32, 1184>}, {transform_indices = @transform_1, window_bounds = array<i64: 1184, 128>}, {transform_indices = @transform_2, window_bounds = array<i64: 1, 128>}, {transform_indices = @transform_3, window_bounds = array<i64: 32, 128>}]} {
    %c0 = arith.constant 0 : index
    %c0_0 = arith.constant 0 : index
    %0 = vector.load %arg2[%c0, %c0_0] : memref<32x1184xbf16, #tpu.memory_space<vmem>>, vector<32x1184xbf16>
    %c0_1 = arith.constant 0 : index
    %c0_2 = arith.constant 0 : index
    %1 = vector.load %arg3[%c0_1, %c0_2] : memref<1184x128xbf16, #tpu.memory_space<vmem>>, vector<1184x128xbf16>
    %cst = arith.constant dense<0.000000e+00> : vector<32x128xf32>
    %2 = tpu.matmul %0, %1, %cst {dimension_numbers = #tpu.dot_dimension_numbers<[1], [0], [0], [1], [0, 0, 1, 1], [], []>} : vector<32x1184xbf16>, vector<1184x128xbf16>, vector<32x128xf32> -> vector<32x128xf32>
    %c0_3 = arith.constant 0 : index
    %c0_4 = arith.constant 0 : index
    %3 = vector.load %arg4[%c0_3, %c0_4] : memref<1x128xf32, #tpu.memory_space<vmem>>, vector<1x128xf32>
    %4 = vector.broadcast %3 : vector<1x128xf32> to vector<32x128xf32>
    %5 = arith.addf %2, %4 : vector<32x128xf32>
    %cst_5 = arith.constant 0.000000e+00 : f32
    %6 = vector.broadcast %cst_5 : f32 to vector<32x128xf32>
    %7 = arith.maximumf %5, %6 : vector<32x128xf32>
    %8 = arith.truncf %7 : vector<32x128xf32> to vector<32x128xbf16>
    %c0_6 = arith.constant 0 : index
    %c0_7 = arith.constant 0 : index
    %9 = vector.load %arg5[%c0_6, %c0_7] : memref<32x128xbf16, #tpu.memory_space<vmem>>, vector<32x128xbf16>
    tpu.vector_store %arg5[%c0_6, %c0_7], %8 {strides = array<i32>} : memref<32x128xbf16, #tpu.memory_space<vmem>>, vector<32x128xbf16>,
    return
  }
  func.func @transform_0(%arg0: i32, %arg1: i32) -> (i32, i32) {
    %c0_i32 = arith.constant 0 : i32
    %c0_i32_0 = arith.constant 0 : i32
    return %arg0, %c0_i32 : i32, i32
  }
  func.func @transform_1(%arg0: i32, %arg1: i32) -> (i32, i32) {
    %c0_i32 = arith.constant 0 : i32
    %c0_i32_0 = arith.constant 0 : i32
    return %c0_i32, %arg1 : i32, i32
  }
  func.func @transform_2(%arg0: i32, %arg1: i32) -> (i32, i32) {
    %c0_i32 = arith.constant 0 : i32
    %c0_i32_0 = arith.constant 0 : i32
    return %c0_i32, %arg1 : i32, i32
  }
  func.func @transform_3(%arg0: i32, %arg1: i32) -> (i32, i32) {
    %c0_i32 = arith.constant 0 : i32
    return %arg0, %arg1 : i32, i32
  }
}

module attributes {stable_mosaic.version = 11 : i64} {
  func.func @_mm_kernel(%arg0: i32, %arg1: i32, %arg2: memref<32x2304xbf16, #tpu.memory_space<vmem>>, %arg3: memref<2304x128xbf16, #tpu.memory_space<vmem>>, %arg4: memref<1x128xf32, #tpu.memory_space<vmem>>, %arg5: memref<32x128xbf16, #tpu.memory_space<vmem>>) attributes {dimension_semantics = [#tpu.dimension_semantics<parallel>, #tpu.dimension_semantics<parallel>], iteration_bounds = array<i64: 1, 2>, scalar_prefetch = 0 : i64, scratch_operands = 0 : i64, tpu.core_type = #tpu.core_type<tc>, window_params = [{transform_indices = @transform_0, window_bounds = array<i64: 32, 2304>}, {transform_indices = @transform_1, window_bounds = array<i64: 2304, 128>}, {transform_indices = @transform_2, window_bounds = array<i64: 1, 128>}, {transform_indices = @transform_3, window_bounds = array<i64: 32, 128>}]} {
    %c0 = arith.constant 0 : index
    %c0_0 = arith.constant 0 : index
    %0 = vector.load %arg2[%c0, %c0_0] : memref<32x2304xbf16, #tpu.memory_space<vmem>>, vector<32x2304xbf16>
    %c0_1 = arith.constant 0 : index
    %c0_2 = arith.constant 0 : index
    %1 = vector.load %arg3[%c0_1, %c0_2] : memref<2304x128xbf16, #tpu.memory_space<vmem>>, vector<2304x128xbf16>
    %cst = arith.constant dense<0.000000e+00> : vector<32x128xf32>
    %2 = tpu.matmul %0, %1, %cst {dimension_numbers = #tpu.dot_dimension_numbers<[1], [0], [0], [1], [0, 0, 1, 1], [], []>} : vector<32x2304xbf16>, vector<2304x128xbf16>, vector<32x128xf32> -> vector<32x128xf32>
    %c0_3 = arith.constant 0 : index
    %c0_4 = arith.constant 0 : index
    %3 = vector.load %arg4[%c0_3, %c0_4] : memref<1x128xf32, #tpu.memory_space<vmem>>, vector<1x128xf32>
    %4 = vector.broadcast %3 : vector<1x128xf32> to vector<32x128xf32>
    %5 = arith.addf %2, %4 : vector<32x128xf32>
    %cst_5 = arith.constant 0.000000e+00 : f32
    %6 = vector.broadcast %cst_5 : f32 to vector<32x128xf32>
    %7 = arith.maximumf %5, %6 : vector<32x128xf32>
    %8 = arith.truncf %7 : vector<32x128xf32> to vector<32x128xbf16>
    %c0_6 = arith.constant 0 : index
    %c0_7 = arith.constant 0 : index
    %9 = vector.load %arg5[%c0_6, %c0_7] : memref<32x128xbf16, #tpu.memory_space<vmem>>, vector<32x128xbf16>
    tpu.vector_store %arg5[%c0_6, %c0_7], %8 {strides = array<i32>} : memref<32x128xbf16, #tpu.memory_space<vmem>>, vector<32x128xbf16>,
    return
  }
  func.func @transform_0(%arg0: i32, %arg1: i32) -> (i32, i32) {
    %c0_i32 = arith.constant 0 : i32
    %c0_i32_0 = arith.constant 0 : i32
    return %arg0, %c0_i32 : i32, i32
  }
  func.func @transform_1(%arg0: i32, %arg1: i32) -> (i32, i32) {
    %c0_i32 = arith.constant 0 : i32
    %c0_i32_0 = arith.constant 0 : i32
    return %c0_i32, %arg1 : i32, i32
  }
  func.func @transform_2(%arg0: i32, %arg1: i32) -> (i32, i32) {
    %c0_i32 = arith.constant 0 : i32
    %c0_i32_0 = arith.constant 0 : i32
    return %c0_i32, %arg1 : i32, i32
  }
  func.func @transform_3(%arg0: i32, %arg1: i32) -> (i32, i32) {
    %c0_i32 = arith.constant 0 : i32
    return %arg0, %arg1 : i32, i32
  }
}

module attributes {stable_mosaic.version = 11 : i64} {
  func.func @_mm_kernel(%arg0: i32, %arg1: i32, %arg2: memref<32x256xbf16, #tpu.memory_space<vmem>>, %arg3: memref<256x3xbf16, #tpu.memory_space<vmem>>, %arg4: memref<1x3xf32, #tpu.memory_space<vmem>>, %arg5: memref<32x3xf32, #tpu.memory_space<vmem>>) attributes {dimension_semantics = [#tpu.dimension_semantics<parallel>, #tpu.dimension_semantics<parallel>], iteration_bounds = array<i64: 1, 1>, scalar_prefetch = 0 : i64, scratch_operands = 0 : i64, tpu.core_type = #tpu.core_type<tc>, window_params = [{transform_indices = @transform_0, window_bounds = array<i64: 32, 256>}, {transform_indices = @transform_1, window_bounds = array<i64: 256, 3>}, {transform_indices = @transform_2, window_bounds = array<i64: 1, 3>}, {transform_indices = @transform_3, window_bounds = array<i64: 32, 3>}]} {
    %c0 = arith.constant 0 : index
    %c0_0 = arith.constant 0 : index
    %0 = vector.load %arg2[%c0, %c0_0] : memref<32x256xbf16, #tpu.memory_space<vmem>>, vector<32x256xbf16>
    %c0_1 = arith.constant 0 : index
    %c0_2 = arith.constant 0 : index
    %1 = vector.load %arg3[%c0_1, %c0_2] : memref<256x3xbf16, #tpu.memory_space<vmem>>, vector<256x3xbf16>
    %cst = arith.constant dense<0.000000e+00> : vector<32x3xf32>
    %2 = tpu.matmul %0, %1, %cst {dimension_numbers = #tpu.dot_dimension_numbers<[1], [0], [0], [1], [0, 0, 1, 1], [], []>} : vector<32x256xbf16>, vector<256x3xbf16>, vector<32x3xf32> -> vector<32x3xf32>
    %c0_3 = arith.constant 0 : index
    %c0_4 = arith.constant 0 : index
    %3 = vector.load %arg4[%c0_3, %c0_4] : memref<1x3xf32, #tpu.memory_space<vmem>>, vector<1x3xf32>
    %4 = vector.broadcast %3 : vector<1x3xf32> to vector<32x3xf32>
    %5 = arith.addf %2, %4 : vector<32x3xf32>
    %c0_5 = arith.constant 0 : index
    %c0_6 = arith.constant 0 : index
    %6 = vector.load %arg5[%c0_5, %c0_6] : memref<32x3xf32, #tpu.memory_space<vmem>>, vector<32x3xf32>
    tpu.vector_store %arg5[%c0_5, %c0_6], %5 {strides = array<i32>} : memref<32x3xf32, #tpu.memory_space<vmem>>, vector<32x3xf32>,
    return
  }
  func.func @transform_0(%arg0: i32, %arg1: i32) -> (i32, i32) {
    %c0_i32 = arith.constant 0 : i32
    %c0_i32_0 = arith.constant 0 : i32
    return %arg0, %c0_i32 : i32, i32
  }
  func.func @transform_1(%arg0: i32, %arg1: i32) -> (i32, i32) {
    %c0_i32 = arith.constant 0 : i32
    %c0_i32_0 = arith.constant 0 : i32
    return %c0_i32, %arg1 : i32, i32
  }
  func.func @transform_2(%arg0: i32, %arg1: i32) -> (i32, i32) {
    %c0_i32 = arith.constant 0 : i32
    %c0_i32_0 = arith.constant 0 : i32
    return %c0_i32, %arg1 : i32, i32
  }
  func.func @transform_3(%arg0: i32, %arg1: i32) -> (i32, i32) {
    %c0_i32 = arith.constant 0 : i32
    return %arg0, %arg1 : i32, i32
  }
}

</mosaic_0001>

<bundles_post_ra>
// kernel: tiny_roma_forward.37
= control target key start
LH: loop header
LB: loop body
LE: loop exit
PB: predicated region body
PF: predicated region fallthrough
CT: control target
= control target key end

     0   :  { %s1305_s12 = smov 0   ;;  %s1307_s13 = smov 0   ;;  %s1613_s0 = inlined_call_operand.vmem [shape: bf16[4096,16], index: 0, kind: input, shape index: {}]   ;;  %s1614_s1 = inlined_call_operand.vmem [shape: bf16[16,8], index: 1, kind: input, shape index: {}]   ;;  %s1615_s2 = inlined_call_operand.vmem [shape: f32[1,8], index: 2, kind: input, shape index: {}]   ;;  %s1616_s3 = inlined_call_operand.vmem [shape: bf16[4096,8], index: 3, kind: output, shape index: {}]  }
   0x1   :  { %s1309_s14 = smov 0  }
   0x2 LB: > { %s25_s15 = sadd.s32 1, %s1279_s13  ;;  %p1029_p0 = scmp.ge.s32.totalorder %s1283_s14, 1  ;;  %s1283_s14 = sphi %s1309_s14, %s13_s14   ;;  %s1279_s13 = sphi %s1307_s13, %s1618_s13   ;;  %s1275_s12 = sphi %s1305_s12, %s1617_s12  }
   0x3   : > { %p27_p1 = scmp.ge.s32.totalorder %s25_s15, 8  ;;  %p169_p2 = scmp.lt.s32.totalorder %s1283_s14, 9 }
   0x5   : > { %s1620_s15 = smov (%p27_p1, %s25_s15), 0  ;;  %p170_p3 = pnand %p1029_p0, %p169_p2 }
   0x6   : > { %s1030_s18 = sshll.u32 (!%p170_p3), %s1275_s12, 6 }
   0x7   : > { %173 = sbr.rel (%p170_p3) target bundleno = 278 (0x116), region = 32  ;;  %p204_p4 = scmp.lt.s32.totalorder (!%p170_p3), %s1030_s18, 511 }
   0xc   : > { %v1232_v0 = vld [vmem:[%s1614_s1] sm:$0xff]  ;;  %s1622_s18 = smov (!%p204_p4, %s1030_s18), 511  ;;  %vm462_vm0 = vcmask 130048   ;;  %vm856_vm1 = vcmask 60416  }
   0xd   : > { %566 = vmatpush.bf16.msra.mxu0 %v1232_v0  ;;  %1233 = vmatpush.bf16.msra.mxu1 %v1232_v0  ;;  %s1031_s19 = sshll.u32 %s1622_s18, 2  ;;  %v1403_v33 = vld [vmem:[%s1615_s2] ss:$0 sm:$0xff] }
   0xe   : > { %1234 = vmatpush.bf16.msra.mxu2 %v1232_v0  ;;  %1235 = vmatpush.bf16.msra.mxu3 %v1232_v0  ;;  %s1334_s22 = scalar_lea.vmem %s1613_s0, %s1031_s19  ;;  %s1412_s27 = scalar_lea.vmem %s1616_s3, %s1031_s19 }
   0xf   : > { %v1200_v1 = vld [vmem:[%s1334_s22] sm:$0xff]  ;;  %v1201_v5 = vld [vmem:[%s1334_s22 + $0x8] sm:$0xff]  ;;  %v1202_v9 = vld [vmem:[%s1334_s22 + $0x10] sm:$0xff] }
  0x10   : > { %v1208_v2 = vld [vmem:[%s1334_s22 + $0x40] sm:$0xff]  ;;  %1166 = vmatmul.msk.bf16.vlgmr.msra.gmra.mxu0 %vm462_vm0, %v1200_v1  ;;  %v1209_v6 = vld [vmem:[%s1334_s22 + $0x48] sm:$0xff]  ;;  %v1210_v10 = vld [vmem:[%s1334_s22 + $0x50] sm:$0xff] }
  0x11   : > { %v1216_v3 = vld [vmem:[%s1334_s22 + $0x80] sm:$0xff]  ;;  %1174 = vmatmul.msk.bf16.vlgmr.msra.gmra.mxu1 %vm462_vm0, %v1208_v2  ;;  %v1217_v7 = vld [vmem:[%s1334_s22 + $0x88] sm:$0xff]  ;;  %v1218_v11 = vld [vmem:[%s1334_s22 + $0x90] sm:$0xff] }
  0x12   : > { %v1224_v4 = vld [vmem:[%s1334_s22 + $0xc0] sm:$0xff]  ;;  %1182 = vmatmul.msk.bf16.vlgmr.msra.gmra.mxu2 %vm462_vm0, %v1216_v3  ;;  %v1225_v8 = vld [vmem:[%s1334_s22 + $0xc8] sm:$0xff]  ;;  %v1226_v12 = vld [vmem:[%s1334_s22 + $0xd0] sm:$0xff] }
  0x13   : > { %1190 = vmatmul.msk.bf16.vlgmr.msra.gmra.mxu3 %vm462_vm0, %v1224_v4  ;;  %v1203_v13 = vld [vmem:[%s1334_s22 + $0x18] sm:$0xff]  ;;  %v1204_v17 = vld [vmem:[%s1334_s22 + $0x20] sm:$0xff]  ;;  %v1205_v21 = vld [vmem:[%s1334_s22 + $0x28] sm:$0xff] }
  0x14   : > { %v1211_v14 = vld [vmem:[%s1334_s22 + $0x58] sm:$0xff]  ;;  %v1212_v18 = vld [vmem:[%s1334_s22 + $0x60] sm:$0xff]  ;;  %v1213_v22 = vld [vmem:[%s1334_s22 + $0x68] sm:$0xff] }
  0x15   : > { %v1219_v15 = vld [vmem:[%s1334_s22 + $0x98] sm:$0xff]  ;;  %v1220_v19 = vld [vmem:[%s1334_s22 + $0xa0] sm:$0xff]  ;;  %v1221_v23 = vld [vmem:[%s1334_s22 + $0xa8] sm:$0xff] }
  0x16   : > { %v1227_v16 = vld [vmem:[%s1334_s22 + $0xd8] sm:$0xff]  ;;  %v1228_v20 = vld [vmem:[%s1334_s22 + $0xe0] sm:$0xff]  ;;  %v1229_v24 = vld [vmem:[%s1334_s22 + $0xe8] sm:$0xff] }
  0x17   : > { %v1206_v25 = vld [vmem:[%s1334_s22 + $0x30] sm:$0xff]  ;;  %v1207_v29 = vld [vmem:[%s1334_s22 + $0x38] sm:$0xff] }
  0x18   : > { %v1214_v26 = vld [vmem:[%s1334_s22 + $0x70] sm:$0xff]  ;;  %v1215_v30 = vld [vmem:[%s1334_s22 + $0x78] sm:$0xff] }
  0x19   : > { %v1222_v27 = vld [vmem:[%s1334_s22 + $0xb0] sm:$0xff]  ;;  %v1223_v31 = vld [vmem:[%s1334_s22 + $0xb8] sm:$0xff] }
  0x1a   : > { %v1230_v28 = vld [vmem:[%s1334_s22 + $0xf0] sm:$0xff]  ;;  %v1231_v32 = vld [vmem:[%s1334_s22 + $0xf8] sm:$0xff] }
  0x20   : > { %1167 = vmatmul.msk.bf16.gmra.mxu0 %vm462_vm0, %v1201_v5 }
  0x21   : > { %1175 = vmatmul.msk.bf16.gmra.mxu1 %vm462_vm0, %v1209_v6 }
  0x22   : > { %1183 = vmatmul.msk.bf16.gmra.mxu2 %vm462_vm0, %v1217_v7 }
  0x23   : > { %1191 = vmatmul.msk.bf16.gmra.mxu3 %vm462_vm0, %v1225_v8 }
  0x30   : > { %1168 = vmatmul.msk.bf16.gmra.mxu0 %vm462_vm0, %v1202_v9 }
  0x31   : > { %1176 = vmatmul.msk.bf16.gmra.mxu1 %vm462_vm0, %v1210_v10 }
  0x32   : > { %1184 = vmatmul.msk.bf16.gmra.mxu2 %vm462_vm0, %v1218_v11 }
  0x33   : > { %1192 = vmatmul.msk.bf16.gmra.mxu3 %vm462_vm0, %v1226_v12 }
  0x40   : > { %1169 = vmatmul.msk.bf16.gmra.mxu0 %vm462_vm0, %v1203_v13 }
  0x41   : > { %1177 = vmatmul.msk.bf16.gmra.mxu1 %vm462_vm0, %v1211_v14 }
  0x42   : > { %1185 = vmatmul.msk.bf16.gmra.mxu2 %vm462_vm0, %v1219_v15 }
  0x43   : > { %1193 = vmatmul.msk.bf16.gmra.mxu3 %vm462_vm0, %v1227_v16 }
  0x50   : > { %1170 = vmatmul.msk.bf16.gmra.mxu0 %vm462_vm0, %v1204_v17 }
  0x51   : > { %1178 = vmatmul.msk.bf16.gmra.mxu1 %vm462_vm0, %v1212_v18 }
  0x52   : > { %1186 = vmatmul.msk.bf16.gmra.mxu2 %vm462_vm0, %v1220_v19 }
  0x53   : > { %1194 = vmatmul.msk.bf16.gmra.mxu3 %vm462_vm0, %v1228_v20 }
  0x60   : > { %1171 = vmatmul.msk.bf16.gmra.mxu0 %vm462_vm0, %v1205_v21 }
  0x61   : > { %1179 = vmatmul.msk.bf16.gmra.mxu1 %vm462_vm0, %v1213_v22 }
  0x62   : > { %1187 = vmatmul.msk.bf16.gmra.mxu2 %vm462_vm0, %v1221_v23 }
  0x63   : > { %1195 = vmatmul.msk.bf16.gmra.mxu3 %vm462_vm0, %v1229_v24 }
  0x70   : > { %1172 = vmatmul.msk.bf16.gmra.mxu0 %vm462_vm0, %v1206_v25 }
  0x71   : > { %1180 = vmatmul.msk.bf16.gmra.mxu1 %vm462_vm0, %v1214_v26 }
  0x72   : > { %1188 = vmatmul.msk.bf16.gmra.mxu2 %vm462_vm0, %v1222_v27 }
  0x73   : > { %1196 = vmatmul.msk.bf16.gmra.mxu3 %vm462_vm0, %v1230_v28 }
  0x80   : > { %1173 = vmatmul.msk.bf16.gmra.mxu0 %vm462_vm0, %v1207_v29 }
  0x81   : > { %1181 = vmatmul.msk.bf16.gmra.mxu1 %vm462_vm0, %v1215_v30 }
  0x82   : > { %1189 = vmatmul.msk.bf16.gmra.mxu2 %vm462_vm0, %v1223_v31 }
  0x83   : > { %1197 = vmatmul.msk.bf16.gmra.mxu3 %vm462_vm0, %v1231_v32 }
  0x8d   : > { %v568_v34 = vpop.f32.mrf.mxu0 }
  0x8e   : > { %v608_v35 = vpop.f32.mrf.mxu1  ;;  %v569_v36 = vadd.f32 %v1403_v33, %v568_v34 }
  0x8f   : > { %v609_v37 = vadd.f32 %v1403_v33, %v608_v35 }
  0x90   : > { %v728_v38 = vmax.f32 %v569_v36, 0.0 }
  0x91   : > { %v744_v39 = vmax.f32 %v609_v37, 0.0 }
  0x92   : > { %v792_v40 = vpack.c.bf16 %v728_v38, %v728_v38 }
  0x93   : > { %v808_v41 = vpack.c.bf16 %v744_v39, %v744_v39 }
  0x94   : > { %857 = vst.msk [vmem:[%s1412_s27] sm:$0xf] %vm856_vm1, %v792_v40 }
  0x95   : > { %v648_v42 = vpop.f32.mrf.mxu2  ;;  %873 = vst.msk [vmem:[%s1412_s27 + $0x40] sm:$0xf] %vm856_vm1, %v808_v41  ;;  %v570_v46 = vpop.f32.mrf.mxu0 }
  0x96   : > { %v688_v43 = vpop.f32.mrf.mxu3  ;;  %v649_v44 = vadd.f32 %v1403_v33, %v648_v42  ;;  %v610_v47 = vpop.f32.mrf.mxu1  ;;  %v571_v48 = vadd.f32 %v1403_v33, %v570_v46 }
  0x97   : > { %v689_v45 = vadd.f32 %v1403_v33, %v688_v43  ;;  %v611_v49 = vadd.f32 %v1403_v33, %v610_v47 }
  0x98   : > { %v760_v50 = vmax.f32 %v649_v44, 0.0  ;;  %v729_v52 = vmax.f32 %v571_v48, 0.0 }
  0x99   : > { %v776_v51 = vmax.f32 %v689_v45, 0.0  ;;  %v745_v53 = vmax.f32 %v611_v49, 0.0 }
  0x9a   : > { %v824_v54 = vpack.c.bf16 %v760_v50, %v760_v50  ;;  %v793_v56 = vpack.c.bf16 %v729_v52, %v729_v52 }
  0x9b   : > { %v840_v55 = vpack.c.bf16 %v776_v51, %v776_v51  ;;  %v809_v57 = vpack.c.bf16 %v745_v53, %v745_v53 }
  0x9c   : > { %889 = vst.msk [vmem:[%s1412_s27 + $0x80] sm:$0xf] %vm856_vm1, %v824_v54 }
  0x9d   : > { %905 = vst.msk [vmem:[%s1412_s27 + $0xc0] sm:$0xf] %vm856_vm1, %v840_v55  ;;  %v650_v58 = vpop.f32.mrf.mxu2  ;;  %v573_v62 = vpop.f32.mrf.mxu0 }
  0x9e   : > { %v690_v59 = vpop.f32.mrf.mxu3  ;;  %858 = vst.msk [vmem:[%s1412_s27 + $0x4] sm:$0xf] %vm856_vm1, %v793_v56  ;;  %v651_v60 = vadd.f32 %v1403_v33, %v650_v58  ;;  %v613_v63 = vpop.f32.mrf.mxu1  ;;  %v574_v0 = vadd.f32 %v1403_v33, %v573_v62 }
  0x9f   : > { %v691_v61 = vadd.f32 %v1403_v33, %v690_v59  ;;  %874 = vst.msk [vmem:[%s1412_s27 + $0x44] sm:$0xf] %vm856_vm1, %v809_v57  ;;  %v614_v1 = vadd.f32 %v1403_v33, %v613_v63 }
  0xa0   : > { %v761_v2 = vmax.f32 %v651_v60, 0.0  ;;  %v730_v4 = vmax.f32 %v574_v0, 0.0 }
  0xa1   : > { %v777_v3 = vmax.f32 %v691_v61, 0.0  ;;  %v746_v5 = vmax.f32 %v614_v1, 0.0 }
  0xa2   : > { %v825_v6 = vpack.c.bf16 %v761_v2, %v761_v2  ;;  %v794_v8 = vpack.c.bf16 %v730_v4, %v730_v4 }
  0xa3   : > { %v841_v7 = vpack.c.bf16 %v777_v3, %v777_v3  ;;  %v810_v9 = vpack.c.bf16 %v746_v5, %v746_v5 }
  0xa4   : > { %890 = vst.msk [vmem:[%s1412_s27 + $0x84] sm:$0xf] %vm856_vm1, %v825_v6 }
  0xa5   : > { %906 = vst.msk [vmem:[%s1412_s27 + $0xc4] sm:$0xf] %vm856_vm1, %v841_v7  ;;  %v653_v10 = vpop.f32.mrf.mxu2  ;;  %v575_v14 = vpop.f32.mrf.mxu0 }
  0xa6   : > { %v693_v11 = vpop.f32.mrf.mxu3  ;;  %859 = vst.msk [vmem:[%s1412_s27 + $0x8] sm:$0xf] %vm856_vm1, %v794_v8  ;;  %v654_v12 = vadd.f32 %v1403_v33, %v653_v10  ;;  %v615_v15 = vpop.f32.mrf.mxu1  ;;  %v576_v16 = vadd.f32 %v1403_v33, %v575_v14 }
  0xa7   : > { %v694_v13 = vadd.f32 %v1403_v33, %v693_v11  ;;  %875 = vst.msk [vmem:[%s1412_s27 + $0x48] sm:$0xf] %vm856_vm1, %v810_v9  ;;  %v616_v17 = vadd.f32 %v1403_v33, %v615_v15 }
  0xa8   : > { %v762_v18 = vmax.f32 %v654_v12, 0.0  ;;  %v731_v20 = vmax.f32 %v576_v16, 0.0 }
  0xa9   : > { %v778_v19 = vmax.f32 %v694_v13, 0.0  ;;  %v747_v21 = vmax.f32 %v616_v17, 0.0 }
  0xaa   : > { %v826_v22 = vpack.c.bf16 %v762_v18, %v762_v18  ;;  %v795_v24 = vpack.c.bf16 %v731_v20, %v731_v20 }
  0xab   : > { %v842_v23 = vpack.c.bf16 %v778_v19, %v778_v19  ;;  %v811_v25 = vpack.c.bf16 %v747_v21, %v747_v21 }
  0xac   : > { %891 = vst.msk [vmem:[%s1412_s27 + $0x88] sm:$0xf] %vm856_vm1, %v826_v22 }
  0xad   : > { %907 = vst.msk [vmem:[%s1412_s27 + $0xc8] sm:$0xf] %vm856_vm1, %v842_v23  ;;  %v655_v26 = vpop.f32.mrf.mxu2  ;;  %v578_v30 = vpop.f32.mrf.mxu0 }
  0xae   : > { %v695_v27 = vpop.f32.mrf.mxu3  ;;  %860 = vst.msk [vmem:[%s1412_s27 + $0xc] sm:$0xf] %vm856_vm1, %v795_v24  ;;  %v656_v28 = vadd.f32 %v1403_v33, %v655_v26  ;;  %v618_v31 = vpop.f32.mrf.mxu1  ;;  %v579_v32 = vadd.f32 %v1403_v33, %v578_v30 }
  0xaf   : > { %v696_v29 = vadd.f32 %v1403_v33, %v695_v27  ;;  %876 = vst.msk [vmem:[%s1412_s27 + $0x4c] sm:$0xf] %vm856_vm1, %v811_v25  ;;  %v619_v34 = vadd.f32 %v1403_v33, %v618_v31 }
  0xb0   : > { %v763_v35 = vmax.f32 %v656_v28, 0.0  ;;  %v732_v37 = vmax.f32 %v579_v32, 0.0 }
  0xb1   : > { %v779_v36 = vmax.f32 %v696_v29, 0.0  ;;  %v748_v38 = vmax.f32 %v619_v34, 0.0 }
  0xb2   : > { %v827_v39 = vpack.c.bf16 %v763_v35, %v763_v35  ;;  %v796_v41 = vpack.c.bf16 %v732_v37, %v732_v37 }
  0xb3   : > { %v843_v40 = vpack.c.bf16 %v779_v36, %v779_v36  ;;  %v812_v42 = vpack.c.bf16 %v748_v38, %v748_v38 }
  0xb4   : > { %892 = vst.msk [vmem:[%s1412_s27 + $0x8c] sm:$0xf] %vm856_vm1, %v827_v39 }
  0xb5   : > { %908 = vst.msk [vmem:[%s1412_s27 + $0xcc] sm:$0xf] %vm856_vm1, %v843_v40  ;;  %v658_v43 = vpop.f32.mrf.mxu2  ;;  %v580_v47 = vpop.f32.mrf.mxu0 }
  0xb6   : > { %v698_v44 = vpop.f32.mrf.mxu3  ;;  %861 = vst.msk [vmem:[%s1412_s27 + $0x10] sm:$0xf] %vm856_vm1, %v796_v41  ;;  %v659_v45 = vadd.f32 %v1403_v33, %v658_v43  ;;  %v620_v48 = vpop.f32.mrf.mxu1  ;;  %v581_v49 = vadd.f32 %v1403_v33, %v580_v47 }
  0xb7   : > { %v699_v46 = vadd.f32 %v1403_v33, %v698_v44  ;;  %877 = vst.msk [vmem:[%s1412_s27 + $0x50] sm:$0xf] %vm856_vm1, %v812_v42  ;;  %v621_v50 = vadd.f32 %v1403_v33, %v620_v48 }
  0xb8   : > { %v764_v51 = vmax.f32 %v659_v45, 0.0  ;;  %v733_v53 = vmax.f32 %v581_v49, 0.0 }
  0xb9   : > { %v780_v52 = vmax.f32 %v699_v46, 0.0  ;;  %v749_v54 = vmax.f32 %v621_v50, 0.0 }
  0xba   : > { %v828_v55 = vpack.c.bf16 %v764_v51, %v764_v51  ;;  %v797_v57 = vpack.c.bf16 %v733_v53, %v733_v53 }
  0xbb   : > { %v844_v56 = vpack.c.bf16 %v780_v52, %v780_v52  ;;  %v813_v58 = vpack.c.bf16 %v749_v54, %v749_v54 }
  0xbc   : > { %893 = vst.msk [vmem:[%s1412_s27 + $0x90] sm:$0xf] %vm856_vm1, %v828_v55 }
  0xbd   : > { %909 = vst.msk [vmem:[%s1412_s27 + $0xd0] sm:$0xf] %vm856_vm1, %v844_v56  ;;  %v660_v59 = vpop.f32.mrf.mxu2  ;;  %v583_v63 = vpop.f32.mrf.mxu0 }
  0xbe   : > { %v700_v60 = vpop.f32.mrf.mxu3  ;;  %862 = vst.msk [vmem:[%s1412_s27 + $0x14] sm:$0xf] %vm856_vm1, %v797_v57  ;;  %v661_v61 = vadd.f32 %v1403_v33, %v660_v59  ;;  %v623_v0 = vpop.f32.mrf.mxu1  ;;  %v584_v1 = vadd.f32 %v1403_v33, %v583_v63 }
  0xbf   : > { %v701_v62 = vadd.f32 %v1403_v33, %v700_v60  ;;  %878 = vst.msk [vmem:[%s1412_s27 + $0x54] sm:$0xf] %vm856_vm1, %v813_v58  ;;  %v624_v2 = vadd.f32 %v1403_v33, %v623_v0 }
  0xc0   : > { %v765_v3 = vmax.f32 %v661_v61, 0.0  ;;  %v734_v5 = vmax.f32 %v584_v1, 0.0 }
  0xc1   : > { %v781_v4 = vmax.f32 %v701_v62, 0.0  ;;  %v750_v6 = vmax.f32 %v624_v2, 0.0 }
  0xc2   : > { %v829_v7 = vpack.c.bf16 %v765_v3, %v765_v3  ;;  %v798_v9 = vpack.c.bf16 %v734_v5, %v734_v5 }
  0xc3   : > { %v845_v8 = vpack.c.bf16 %v781_v4, %v781_v4  ;;  %v814_v10 = vpack.c.bf16 %v750_v6, %v750_v6 }
  0xc4   : > { %894 = vst.msk [vmem:[%s1412_s27 + $0x94] sm:$0xf] %vm856_vm1, %v829_v7 }
  0xc5   : > { %910 = vst.msk [vmem:[%s1412_s27 + $0xd4] sm:$0xf] %vm856_vm1, %v845_v8  ;;  %v663_v11 = vpop.f32.mrf.mxu2  ;;  %v585_v15 = vpop.f32.mrf.mxu0 }
  0xc6   : > { %v703_v12 = vpop.f32.mrf.mxu3  ;;  %863 = vst.msk [vmem:[%s1412_s27 + $0x18] sm:$0xf] %vm856_vm1, %v798_v9  ;;  %v664_v13 = vadd.f32 %v1403_v33, %v663_v11  ;;  %v625_v16 = vpop.f32.mrf.mxu1  ;;  %v586_v17 = vadd.f32 %v1403_v33, %v585_v15 }
  0xc7   : > { %v704_v14 = vadd.f32 %v1403_v33, %v703_v12  ;;  %879 = vst.msk [vmem:[%s1412_s27 + $0x58] sm:$0xf] %vm856_vm1, %v814_v10  ;;  %v626_v18 = vadd.f32 %v1403_v33, %v625_v16 }
  0xc8   : > { %v766_v19 = vmax.f32 %v664_v13, 0.0  ;;  %v735_v21 = vmax.f32 %v586_v17, 0.0 }
  0xc9   : > { %v782_v20 = vmax.f32 %v704_v14, 0.0  ;;  %v751_v22 = vmax.f32 %v626_v18, 0.0 }
  0xca   : > { %v830_v23 = vpack.c.bf16 %v766_v19, %v766_v19  ;;  %v799_v25 = vpack.c.bf16 %v735_v21, %v735_v21 }
  0xcb   : > { %v846_v24 = vpack.c.bf16 %v782_v20, %v782_v20  ;;  %v815_v26 = vpack.c.bf16 %v751_v22, %v751_v22 }
  0xcc   : > { %895 = vst.msk [vmem:[%s1412_s27 + $0x98] sm:$0xf] %vm856_vm1, %v830_v23 }
  0xcd   : > { %911 = vst.msk [vmem:[%s1412_s27 + $0xd8] sm:$0xf] %vm856_vm1, %v846_v24  ;;  %v665_v27 = vpop.f32.mrf.mxu2  ;;  %v588_v31 = vpop.f32.mrf.mxu0 }
  0xce   : > { %v705_v28 = vpop.f32.mrf.mxu3  ;;  %864 = vst.msk [vmem:[%s1412_s27 + $0x1c] sm:$0xf] %vm856_vm1, %v799_v25  ;;  %v666_v29 = vadd.f32 %v1403_v33, %v665_v27  ;;  %v628_v32 = vpop.f32.mrf.mxu1  ;;  %v589_v34 = vadd.f32 %v1403_v33, %v588_v31 }
  0xcf   : > { %v706_v30 = vadd.f32 %v1403_v33, %v705_v28  ;;  %880 = vst.msk [vmem:[%s1412_s27 + $0x5c] sm:$0xf] %vm856_vm1, %v815_v26  ;;  %v629_v35 = vadd.f32 %v1403_v33, %v628_v32 }
  0xd0   : > { %v767_v36 = vmax.f32 %v666_v29, 0.0  ;;  %v736_v38 = vmax.f32 %v589_v34, 0.0 }
  0xd1   : > { %v783_v37 = vmax.f32 %v706_v30, 0.0  ;;  %v752_v39 = vmax.f32 %v629_v35, 0.0 }
  0xd2   : > { %v831_v40 = vpack.c.bf16 %v767_v36, %v767_v36  ;;  %v800_v42 = vpack.c.bf16 %v736_v38, %v736_v38 }
  0xd3   : > { %v847_v41 = vpack.c.bf16 %v783_v37, %v783_v37  ;;  %v816_v43 = vpack.c.bf16 %v752_v39, %v752_v39 }
  0xd4   : > { %896 = vst.msk [vmem:[%s1412_s27 + $0x9c] sm:$0xf] %vm856_vm1, %v831_v40 }
  0xd5   : > { %912 = vst.msk [vmem:[%s1412_s27 + $0xdc] sm:$0xf] %vm856_vm1, %v847_v41  ;;  %v668_v44 = vpop.f32.mrf.mxu2  ;;  %v590_v48 = vpop.f32.mrf.mxu0 }
  0xd6   : > { %v708_v45 = vpop.f32.mrf.mxu3  ;;  %865 = vst.msk [vmem:[%s1412_s27 + $0x20] sm:$0xf] %vm856_vm1, %v800_v42  ;;  %v669_v46 = vadd.f32 %v1403_v33, %v668_v44  ;;  %v630_v49 = vpop.f32.mrf.mxu1  ;;  %v591_v50 = vadd.f32 %v1403_v33, %v590_v48 }
  0xd7   : > { %v709_v47 = vadd.f32 %v1403_v33, %v708_v45  ;;  %881 = vst.msk [vmem:[%s1412_s27 + $0x60] sm:$0xf] %vm856_vm1, %v816_v43  ;;  %v631_v51 = vadd.f32 %v1403_v33, %v630_v49 }
  0xd8   : > { %v768_v52 = vmax.f32 %v669_v46, 0.0  ;;  %v737_v54 = vmax.f32 %v591_v50, 0.0 }
  0xd9   : > { %v784_v53 = vmax.f32 %v709_v47, 0.0  ;;  %v753_v55 = vmax.f32 %v631_v51, 0.0 }
  0xda   : > { %v832_v56 = vpack.c.bf16 %v768_v52, %v768_v52  ;;  %v801_v58 = vpack.c.bf16 %v737_v54, %v737_v54 }
  0xdb   : > { %v848_v57 = vpack.c.bf16 %v784_v53, %v784_v53  ;;  %v817_v59 = vpack.c.bf16 %v753_v55, %v753_v55 }
  0xdc   : > { %897 = vst.msk [vmem:[%s1412_s27 + $0xa0] sm:$0xf] %vm856_vm1, %v832_v56 }
  0xdd   : > { %913 = vst.msk [vmem:[%s1412_s27 + $0xe0] sm:$0xf] %vm856_vm1, %v848_v57  ;;  %v670_v60 = vpop.f32.mrf.mxu2  ;;  %v593_v0 = vpop.f32.mrf.mxu0 }
  0xde   : > { %v710_v61 = vpop.f32.mrf.mxu3  ;;  %866 = vst.msk [vmem:[%s1412_s27 + $0x24] sm:$0xf] %vm856_vm1, %v801_v58  ;;  %v671_v62 = vadd.f32 %v1403_v33, %v670_v60  ;;  %v633_v1 = vpop.f32.mrf.mxu1  ;;  %v594_v2 = vadd.f32 %v1403_v33, %v593_v0 }
  0xdf   : > { %v711_v63 = vadd.f32 %v1403_v33, %v710_v61  ;;  %882 = vst.msk [vmem:[%s1412_s27 + $0x64] sm:$0xf] %vm856_vm1, %v817_v59  ;;  %v634_v3 = vadd.f32 %v1403_v33, %v633_v1 }
  0xe0   : > { %v769_v4 = vmax.f32 %v671_v62, 0.0  ;;  %v738_v6 = vmax.f32 %v594_v2, 0.0 }
  0xe1   : > { %v785_v5 = vmax.f32 %v711_v63, 0.0  ;;  %v754_v7 = vmax.f32 %v634_v3, 0.0 }
  0xe2   : > { %v833_v8 = vpack.c.bf16 %v769_v4, %v769_v4  ;;  %v802_v10 = vpack.c.bf16 %v738_v6, %v738_v6 }
  0xe3   : > { %v849_v9 = vpack.c.bf16 %v785_v5, %v785_v5  ;;  %v818_v11 = vpack.c.bf16 %v754_v7, %v754_v7 }
  0xe4   : > { %898 = vst.msk [vmem:[%s1412_s27 + $0xa4] sm:$0xf] %vm856_vm1, %v833_v8 }
  0xe5   : > { %914 = vst.msk [vmem:[%s1412_s27 + $0xe4] sm:$0xf] %vm856_vm1, %v849_v9  ;;  %v673_v12 = vpop.f32.mrf.mxu2  ;;  %v595_v16 = vpop.f32.mrf.mxu0 }
  0xe6   : > { %v713_v13 = vpop.f32.mrf.mxu3  ;;  %867 = vst.msk [vmem:[%s1412_s27 + $0x28] sm:$0xf] %vm856_vm1, %v802_v10  ;;  %v674_v14 = vadd.f32 %v1403_v33, %v673_v12  ;;  %v635_v17 = vpop.f32.mrf.mxu1  ;;  %v596_v18 = vadd.f32 %v1403_v33, %v595_v16 }
  0xe7   : > { %v714_v15 = vadd.f32 %v1403_v33, %v713_v13  ;;  %883 = vst.msk [vmem:[%s1412_s27 + $0x68] sm:$0xf] %vm856_vm1, %v818_v11  ;;  %v636_v19 = vadd.f32 %v1403_v33, %v635_v17 }
  0xe8   : > { %v770_v20 = vmax.f32 %v674_v14, 0.0  ;;  %v739_v22 = vmax.f32 %v596_v18, 0.0 }
  0xe9   : > { %v786_v21 = vmax.f32 %v714_v15, 0.0  ;;  %v755_v23 = vmax.f32 %v636_v19, 0.0 }
  0xea   : > { %v834_v24 = vpack.c.bf16 %v770_v20, %v770_v20  ;;  %v803_v26 = vpack.c.bf16 %v739_v22, %v739_v22 }
  0xeb   : > { %v850_v25 = vpack.c.bf16 %v786_v21, %v786_v21  ;;  %v819_v27 = vpack.c.bf16 %v755_v23, %v755_v23 }
  0xec   : > { %899 = vst.msk [vmem:[%s1412_s27 + $0xa8] sm:$0xf] %vm856_vm1, %v834_v24 }
  0xed   : > { %915 = vst.msk [vmem:[%s1412_s27 + $0xe8] sm:$0xf] %vm856_vm1, %v850_v25  ;;  %v675_v28 = vpop.f32.mrf.mxu2  ;;  %v598_v32 = vpop.f32.mrf.mxu0 }
  0xee   : > { %v715_v29 = vpop.f32.mrf.mxu3  ;;  %868 = vst.msk [vmem:[%s1412_s27 + $0x2c] sm:$0xf] %vm856_vm1, %v803_v26  ;;  %v676_v30 = vadd.f32 %v1403_v33, %v675_v28  ;;  %v638_v34 = vpop.f32.mrf.mxu1  ;;  %v599_v35 = vadd.f32 %v1403_v33, %v598_v32 }
  0xef   : > { %v716_v31 = vadd.f32 %v1403_v33, %v715_v29  ;;  %884 = vst.msk [vmem:[%s1412_s27 + $0x6c] sm:$0xf] %vm856_vm1, %v819_v27  ;;  %v639_v36 = vadd.f32 %v1403_v33, %v638_v34 }
  0xf0   : > { %v771_v37 = vmax.f32 %v676_v30, 0.0  ;;  %v740_v39 = vmax.f32 %v599_v35, 0.0 }
  0xf1   : > { %v787_v38 = vmax.f32 %v716_v31, 0.0  ;;  %v756_v40 = vmax.f32 %v639_v36, 0.0 }
  0xf2   : > { %v835_v41 = vpack.c.bf16 %v771_v37, %v771_v37  ;;  %v804_v43 = vpack.c.bf16 %v740_v39, %v740_v39 }
  0xf3   : > { %v851_v42 = vpack.c.bf16 %v787_v38, %v787_v38  ;;  %v820_v44 = vpack.c.bf16 %v756_v40, %v756_v40 }
  0xf4   : > { %900 = vst.msk [vmem:[%s1412_s27 + $0xac] sm:$0xf] %vm856_vm1, %v835_v41 }
  0xf5   : > { %916 = vst.msk [vmem:[%s1412_s27 + $0xec] sm:$0xf] %vm856_vm1, %v851_v42  ;;  %v678_v45 = vpop.f32.mrf.mxu2  ;;  %v600_v49 = vpop.f32.mrf.mxu0 }
  0xf6   : > { %v718_v46 = vpop.f32.mrf.mxu3  ;;  %869 = vst.msk [vmem:[%s1412_s27 + $0x30] sm:$0xf] %vm856_vm1, %v804_v43  ;;  %v679_v47 = vadd.f32 %v1403_v33, %v678_v45  ;;  %v640_v50 = vpop.f32.mrf.mxu1  ;;  %v601_v51 = vadd.f32 %v1403_v33, %v600_v49 }
  0xf7   : > { %v719_v48 = vadd.f32 %v1403_v33, %v718_v46  ;;  %885 = vst.msk [vmem:[%s1412_s27 + $0x70] sm:$0xf] %vm856_vm1, %v820_v44  ;;  %v641_v52 = vadd.f32 %v1403_v33, %v640_v50 }
  0xf8   : > { %v772_v53 = vmax.f32 %v679_v47, 0.0  ;;  %v741_v55 = vmax.f32 %v601_v51, 0.0 }
  0xf9   : > { %v788_v54 = vmax.f32 %v719_v48, 0.0  ;;  %v757_v56 = vmax.f32 %v641_v52, 0.0 }
  0xfa   : > { %v836_v57 = vpack.c.bf16 %v772_v53, %v772_v53  ;;  %v805_v59 = vpack.c.bf16 %v741_v55, %v741_v55 }
  0xfb   : > { %v852_v58 = vpack.c.bf16 %v788_v54, %v788_v54  ;;  %v821_v60 = vpack.c.bf16 %v757_v56, %v757_v56 }
  0xfc   : > { %901 = vst.msk [vmem:[%s1412_s27 + $0xb0] sm:$0xf] %vm856_vm1, %v836_v57 }
  0xfd   : > { %917 = vst.msk [vmem:[%s1412_s27 + $0xf0] sm:$0xf] %vm856_vm1, %v852_v58  ;;  %v680_v61 = vpop.f32.mrf.mxu2  ;;  %v603_v1 = vpop.f32.mrf.mxu0 }
  0xfe   : > { %v720_v62 = vpop.f32.mrf.mxu3  ;;  %870 = vst.msk [vmem:[%s1412_s27 + $0x34] sm:$0xf] %vm856_vm1, %v805_v59  ;;  %v681_v63 = vadd.f32 %v1403_v33, %v680_v61  ;;  %v643_v2 = vpop.f32.mrf.mxu1  ;;  %v604_v3 = vadd.f32 %v1403_v33, %v603_v1 }
  0xff   : > { %v721_v0 = vadd.f32 %v1403_v33, %v720_v62  ;;  %886 = vst.msk [vmem:[%s1412_s27 + $0x74] sm:$0xf] %vm856_vm1, %v821_v60  ;;  %v644_v4 = vadd.f32 %v1403_v33, %v643_v2 }
 0x100   : > { %v773_v5 = vmax.f32 %v681_v63, 0.0  ;;  %v742_v7 = vmax.f32 %v604_v3, 0.0 }
 0x101   : > { %v789_v6 = vmax.f32 %v721_v0, 0.0  ;;  %v758_v8 = vmax.f32 %v644_v4, 0.0 }
 0x102   : > { %v837_v9 = vpack.c.bf16 %v773_v5, %v773_v5  ;;  %v806_v11 = vpack.c.bf16 %v742_v7, %v742_v7 }
 0x103   : > { %v853_v10 = vpack.c.bf16 %v789_v6, %v789_v6  ;;  %v822_v12 = vpack.c.bf16 %v758_v8, %v758_v8 }
 0x104   : > { %902 = vst.msk [vmem:[%s1412_s27 + $0xb4] sm:$0xf] %vm856_vm1, %v837_v9 }
 0x105   : > { %918 = vst.msk [vmem:[%s1412_s27 + $0xf4] sm:$0xf] %vm856_vm1, %v853_v10  ;;  %v683_v13 = vpop.f32.mrf.mxu2  ;;  %v605_v17 = vpop.f32.mrf.mxu0 }
 0x106   : > { %v723_v14 = vpop.f32.mrf.mxu3  ;;  %871 = vst.msk [vmem:[%s1412_s27 + $0x38] sm:$0xf] %vm856_vm1, %v806_v11  ;;  %v684_v15 = vadd.f32 %v1403_v33, %v683_v13  ;;  %v645_v18 = vpop.f32.mrf.mxu1  ;;  %v606_v19 = vadd.f32 %v1403_v33, %v605_v17 }
 0x107   : > { %v724_v16 = vadd.f32 %v1403_v33, %v723_v14  ;;  %887 = vst.msk [vmem:[%s1412_s27 + $0x78] sm:$0xf] %vm856_vm1, %v822_v12  ;;  %v646_v20 = vadd.f32 %v1403_v33, %v645_v18 }
 0x108   : > { %v774_v21 = vmax.f32 %v684_v15, 0.0  ;;  %v743_v23 = vmax.f32 %v606_v19, 0.0 }
 0x109   : > { %v790_v22 = vmax.f32 %v724_v16, 0.0  ;;  %v759_v24 = vmax.f32 %v646_v20, 0.0 }
 0x10a   : > { %v838_v25 = vpack.c.bf16 %v774_v21, %v774_v21  ;;  %v807_v27 = vpack.c.bf16 %v743_v23, %v743_v23 }
 0x10b   : > { %v854_v26 = vpack.c.bf16 %v790_v22, %v790_v22  ;;  %v823_v28 = vpack.c.bf16 %v759_v24, %v759_v24 }
 0x10c   : > { %903 = vst.msk [vmem:[%s1412_s27 + $0xb8] sm:$0xf] %vm856_vm1, %v838_v25 }
 0x10d   : > { %919 = vst.msk [vmem:[%s1412_s27 + $0xf8] sm:$0xf] %vm856_vm1, %v854_v26  ;;  %v685_v29 = vpop.f32.mrf.mxu2 }
 0x10e   : > { %v725_v30 = vpop.f32.mrf.mxu3  ;;  %872 = vst.msk [vmem:[%s1412_s27 + $0x3c] sm:$0xf] %vm856_vm1, %v807_v27  ;;  %v686_v31 = vadd.f32 %v1403_v33, %v685_v29 }
 0x10f   : > { %v726_v32 = vadd.f32 %v1403_v33, %v725_v30  ;;  %888 = vst.msk [vmem:[%s1412_s27 + $0x7c] sm:$0xf] %vm856_vm1, %v823_v28 }
 0x110   : > { %v775_v34 = vmax.f32 %v686_v31, 0.0 }
 0x111   : > { %v791_v35 = vmax.f32 %v726_v32, 0.0 }
 0x112   : > { %v839_v36 = vpack.c.bf16 %v775_v34, %v775_v34 }
 0x113   : > { %v855_v37 = vpack.c.bf16 %v791_v35, %v791_v35 }
 0x114   : > { %904 = vst.msk [vmem:[%s1412_s27 + $0xbc] sm:$0xf] %vm856_vm1, %v839_v36 }
 0x115   : > { %920 = vst.msk [vmem:[%s1412_s27 + $0xfc] sm:$0xf] %vm856_vm1, %v855_v37 }
 0x116 PF: > { %s13_s14 = sadd.s32 1, %s1283_s14   ;;  %s1617_s12 = smov %s1279_s13 }
 0x117   : > { %p10_p5 = scmp.ge.s32.totalorder %s13_s14, 10   ;;  %s1618_s13 = smov %s1620_s15 }
 0x119   :  { %12 = sbr.rel (!%p10_p5) target bundleno = 2 (0x2), region = 68 }

// kernel: tiny_roma_forward.38
= control target key start
LH: loop header
LB: loop body
LE: loop exit
PB: predicated region body
PF: predicated region fallthrough
CT: control target
= control target key end

     0   :  { %s1369_s12 = smov 0   ;;  %s1371_s13 = smov 0   ;;  %s1689_s0 = inlined_call_operand.vmem [shape: bf16[1024,80], index: 0, kind: input, shape index: {}]   ;;  %s1690_s1 = inlined_call_operand.vmem [shape: bf16[80,16], index: 1, kind: input, shape index: {}]   ;;  %s1691_s2 = inlined_call_operand.vmem [shape: f32[1,16], index: 2, kind: input, shape index: {}]   ;;  %s1692_s3 = inlined_call_operand.vmem [shape: bf16[1024,16], index: 3, kind: output, shape index: {}]  }
   0x1   :  { %s1373_s14 = smov 0  }
   0x2 LB: > { %s25_s15 = sadd.s32 1, %s1343_s13  ;;  %p1061_p0 = scmp.ge.s32.totalorder %s1347_s14, 1  ;;  %s1347_s14 = sphi %s1373_s14, %s13_s14   ;;  %s1343_s13 = sphi %s1371_s13, %s1694_s13   ;;  %s1339_s12 = sphi %s1369_s12, %s1693_s12  }
   0x3   : > { %p27_p1 = scmp.ge.s32.totalorder %s25_s15, 2  ;;  %p169_p2 = scmp.lt.s32.totalorder %s1347_s14, 3 }
   0x5   : > { %s1696_s15 = smov (%p27_p1, %s25_s15), 0  ;;  %p170_p3 = pnand %p1061_p0, %p169_p2 }
   0x6   : > { %s1062_s18 = sshll.u32 (!%p170_p3), %s1339_s12, 6 }
   0x7   : > { %173 = sbr.rel (%p170_p3) target bundleno = 293 (0x125), region = 32  ;;  %p204_p4 = scmp.lt.s32.totalorder (!%p170_p3), %s1062_s18, 127 }
   0xc   : > { %v1284_v0 = vld [vmem:[%s1690_s1 + $0x20] sm:$0xff]  ;;  %v1283_v1 = vld [vmem:[%s1690_s1 + $0x18] sm:$0xff]  ;;  %v1282_v2 = vld [vmem:[%s1690_s1 + $0x10] sm:$0xff]  ;;  %s1698_s18 = smov (!%p204_p4, %s1062_s18), 127  ;;  %vm494_vm0 = vcmask 654336   ;;  %vm888_vm1 = vcmask 125952  }
   0xd   : > { %594 = vmatpush.bf16.msra.mxu0 %v1284_v0  ;;  %1285 = vmatpush.bf16.msra.mxu1 %v1284_v0  ;;  %v1281_v3 = vld [vmem:[%s1690_s1 + $0x8] sm:$0xff]  ;;  %s1063_s25 = sshll.u32 %s1698_s18, 2  ;;  %v1280_v4 = vld [vmem:[%s1690_s1] sm:$0xff] }
   0xe   : > { %1286 = vmatpush.bf16.msra.mxu2 %v1284_v0  ;;  %1287 = vmatpush.bf16.msra.mxu3 %v1284_v0  ;;  %s1410_s30 = scalar_lea.vmem %s1689_s0, %s1063_s25  ;;  %v1479_v37 = vld [vmem:[%s1691_s2] ss:$0 sm:$0xff]  ;;  %s1488_s8 = scalar_lea.vmem %s1692_s3, %s1063_s25 }
   0xf   : > { %v1248_v5 = vld [vmem:[%s1410_s30] sm:$0xff]  ;;  %v1249_v9 = vld [vmem:[%s1410_s30 + $0x8] sm:$0xff]  ;;  %v1250_v13 = vld [vmem:[%s1410_s30 + $0x10] sm:$0xff] }
  0x10   : > { %v1256_v6 = vld [vmem:[%s1410_s30 + $0x40] sm:$0xff]  ;;  %v1257_v10 = vld [vmem:[%s1410_s30 + $0x48] sm:$0xff]  ;;  %v1258_v14 = vld [vmem:[%s1410_s30 + $0x50] sm:$0xff] }
  0x11   : > { %595 = vmatpush.bf16.msra.mxu0 %v1283_v1  ;;  %1288 = vmatpush.bf16.msra.mxu1 %v1283_v1  ;;  %v1264_v7 = vld [vmem:[%s1410_s30 + $0x80] sm:$0xff]  ;;  %v1265_v11 = vld [vmem:[%s1410_s30 + $0x88] sm:$0xff]  ;;  %v1266_v15 = vld [vmem:[%s1410_s30 + $0x90] sm:$0xff] }
  0x12   : > { %1289 = vmatpush.bf16.msra.mxu2 %v1283_v1  ;;  %1290 = vmatpush.bf16.msra.mxu3 %v1283_v1  ;;  %v1272_v8 = vld [vmem:[%s1410_s30 + $0xc0] sm:$0xff]  ;;  %v1273_v12 = vld [vmem:[%s1410_s30 + $0xc8] sm:$0xff]  ;;  %v1274_v16 = vld [vmem:[%s1410_s30 + $0xd0] sm:$0xff] }
  0x13   : > { %v1251_v17 = vld [vmem:[%s1410_s30 + $0x18] sm:$0xff]  ;;  %v1252_v21 = vld [vmem:[%s1410_s30 + $0x20] sm:$0xff]  ;;  %v1253_v25 = vld [vmem:[%s1410_s30 + $0x28] sm:$0xff] }
  0x14   : > { %v1259_v18 = vld [vmem:[%s1410_s30 + $0x58] sm:$0xff]  ;;  %v1260_v22 = vld [vmem:[%s1410_s30 + $0x60] sm:$0xff]  ;;  %v1261_v26 = vld [vmem:[%s1410_s30 + $0x68] sm:$0xff] }
  0x15   : > { %596 = vmatpush.bf16.msra.mxu0 %v1282_v2  ;;  %1291 = vmatpush.bf16.msra.mxu1 %v1282_v2  ;;  %v1267_v19 = vld [vmem:[%s1410_s30 + $0x98] sm:$0xff]  ;;  %v1268_v23 = vld [vmem:[%s1410_s30 + $0xa0] sm:$0xff]  ;;  %v1269_v27 = vld [vmem:[%s1410_s30 + $0xa8] sm:$0xff] }
  0x16   : > { %1292 = vmatpush.bf16.msra.mxu2 %v1282_v2  ;;  %1293 = vmatpush.bf16.msra.mxu3 %v1282_v2  ;;  %v1275_v20 = vld [vmem:[%s1410_s30 + $0xd8] sm:$0xff]  ;;  %v1276_v24 = vld [vmem:[%s1410_s30 + $0xe0] sm:$0xff]  ;;  %v1277_v28 = vld [vmem:[%s1410_s30 + $0xe8] sm:$0xff] }
  0x17   : > { %v1254_v29 = vld [vmem:[%s1410_s30 + $0x30] sm:$0xff]  ;;  %v1255_v33 = vld [vmem:[%s1410_s30 + $0x38] sm:$0xff] }
  0x18   : > { %v1262_v30 = vld [vmem:[%s1410_s30 + $0x70] sm:$0xff]  ;;  %v1263_v34 = vld [vmem:[%s1410_s30 + $0x78] sm:$0xff] }
  0x19   : > { %597 = vmatpush.bf16.msra.mxu0 %v1281_v3  ;;  %1294 = vmatpush.bf16.msra.mxu1 %v1281_v3  ;;  %v1270_v31 = vld [vmem:[%s1410_s30 + $0xb0] sm:$0xff]  ;;  %v1271_v35 = vld [vmem:[%s1410_s30 + $0xb8] sm:$0xff] }
  0x1a   : > { %1295 = vmatpush.bf16.msra.mxu2 %v1281_v3  ;;  %1296 = vmatpush.bf16.msra.mxu3 %v1281_v3  ;;  %v1278_v32 = vld [vmem:[%s1410_s30 + $0xf0] sm:$0xff]  ;;  %v1279_v36 = vld [vmem:[%s1410_s30 + $0xf8] sm:$0xff] }
  0x1d   : > { %598 = vmatpush.bf16.msra.mxu0 %v1280_v4  ;;  %1297 = vmatpush.bf16.msra.mxu1 %v1280_v4 }
  0x1e   : > { %1298 = vmatpush.bf16.msra.mxu2 %v1280_v4  ;;  %1299 = vmatpush.bf16.msra.mxu3 %v1280_v4 }
  0x20   : > { %1214 = vmatmul.msk.bf16.vlgmr.msra.gmra.mxu0 %vm494_vm0, %v1248_v5  ;;  %1222 = vmatmul.msk.bf16.vlgmr.msra.gmra.mxu1 %vm494_vm0, %v1256_v6 }
  0x21   : > { %1230 = vmatmul.msk.bf16.vlgmr.msra.gmra.mxu2 %vm494_vm0, %v1264_v7  ;;  %1238 = vmatmul.msk.bf16.vlgmr.msra.gmra.mxu3 %vm494_vm0, %v1272_v8 }
  0x30   : > { %1215 = vmatmul.msk.bf16.gmra.mxu0 %vm494_vm0, %v1249_v9  ;;  %1223 = vmatmul.msk.bf16.gmra.mxu1 %vm494_vm0, %v1257_v10 }
  0x31   : > { %1231 = vmatmul.msk.bf16.gmra.mxu2 %vm494_vm0, %v1265_v11  ;;  %1239 = vmatmul.msk.bf16.gmra.mxu3 %vm494_vm0, %v1273_v12 }
  0x40   : > { %1216 = vmatmul.msk.bf16.gmra.mxu0 %vm494_vm0, %v1250_v13  ;;  %1224 = vmatmul.msk.bf16.gmra.mxu1 %vm494_vm0, %v1258_v14 }
  0x41   : > { %1232 = vmatmul.msk.bf16.gmra.mxu2 %vm494_vm0, %v1266_v15  ;;  %1240 = vmatmul.msk.bf16.gmra.mxu3 %vm494_vm0, %v1274_v16 }
  0x50   : > { %1217 = vmatmul.msk.bf16.gmra.mxu0 %vm494_vm0, %v1251_v17  ;;  %1225 = vmatmul.msk.bf16.gmra.mxu1 %vm494_vm0, %v1259_v18 }
  0x51   : > { %1233 = vmatmul.msk.bf16.gmra.mxu2 %vm494_vm0, %v1267_v19  ;;  %1241 = vmatmul.msk.bf16.gmra.mxu3 %vm494_vm0, %v1275_v20 }
  0x60   : > { %1218 = vmatmul.msk.bf16.gmra.mxu0 %vm494_vm0, %v1252_v21  ;;  %1226 = vmatmul.msk.bf16.gmra.mxu1 %vm494_vm0, %v1260_v22 }
  0x61   : > { %1234 = vmatmul.msk.bf16.gmra.mxu2 %vm494_vm0, %v1268_v23  ;;  %1242 = vmatmul.msk.bf16.gmra.mxu3 %vm494_vm0, %v1276_v24 }
  0x70   : > { %1219 = vmatmul.msk.bf16.gmra.mxu0 %vm494_vm0, %v1253_v25  ;;  %1227 = vmatmul.msk.bf16.gmra.mxu1 %vm494_vm0, %v1261_v26 }
  0x71   : > { %1235 = vmatmul.msk.bf16.gmra.mxu2 %vm494_vm0, %v1269_v27  ;;  %1243 = vmatmul.msk.bf16.gmra.mxu3 %vm494_vm0, %v1277_v28 }
  0x80   : > { %1220 = vmatmul.msk.bf16.gmra.mxu0 %vm494_vm0, %v1254_v29  ;;  %1228 = vmatmul.msk.bf16.gmra.mxu1 %vm494_vm0, %v1262_v30 }
  0x81   : > { %1236 = vmatmul.msk.bf16.gmra.mxu2 %vm494_vm0, %v1270_v31  ;;  %1244 = vmatmul.msk.bf16.gmra.mxu3 %vm494_vm0, %v1278_v32 }
  0x90   : > { %1221 = vmatmul.msk.bf16.gmra.mxu0 %vm494_vm0, %v1255_v33  ;;  %1229 = vmatmul.msk.bf16.gmra.mxu1 %vm494_vm0, %v1263_v34 }
  0x91   : > { %1237 = vmatmul.msk.bf16.gmra.mxu2 %vm494_vm0, %v1271_v35  ;;  %1245 = vmatmul.msk.bf16.gmra.mxu3 %vm494_vm0, %v1279_v36 }
  0x9d   : > { %v600_v38 = vpop.f32.mrf.mxu0  ;;  %v640_v39 = vpop.f32.mrf.mxu1 }
  0x9e   : > { %v601_v40 = vadd.f32 %v1479_v37, %v600_v38  ;;  %v641_v41 = vadd.f32 %v1479_v37, %v640_v39 }
  0xa0   : > { %v760_v42 = vmax.f32 %v601_v40, 0.0  ;;  %v776_v43 = vmax.f32 %v641_v41, 0.0 }
  0xa2   : > { %v824_v44 = vpack.c.bf16 %v760_v42, %v760_v42  ;;  %v840_v45 = vpack.c.bf16 %v776_v43, %v776_v43 }
  0xa4   : > { %889 = vst.msk [vmem:[%s1488_s8] sm:$0xf] %vm888_vm1, %v824_v44  ;;  %v680_v46 = vpop.f32.mrf.mxu2  ;;  %v720_v47 = vpop.f32.mrf.mxu3 }
  0xa5   : > { %905 = vst.msk [vmem:[%s1488_s8 + $0x40] sm:$0xf] %vm888_vm1, %v840_v45  ;;  %v681_v48 = vadd.f32 %v1479_v37, %v680_v46  ;;  %v721_v49 = vadd.f32 %v1479_v37, %v720_v47  ;;  %v602_v50 = vpop.f32.mrf.mxu0  ;;  %v642_v51 = vpop.f32.mrf.mxu1 }
  0xa6   : > { %v603_v52 = vadd.f32 %v1479_v37, %v602_v50  ;;  %v643_v53 = vadd.f32 %v1479_v37, %v642_v51 }
  0xa7   : > { %v792_v54 = vmax.f32 %v681_v48, 0.0  ;;  %v808_v55 = vmax.f32 %v721_v49, 0.0 }
  0xa8   : > { %v761_v56 = vmax.f32 %v603_v52, 0.0  ;;  %v777_v57 = vmax.f32 %v643_v53, 0.0 }
  0xa9   : > { %v856_v58 = vpack.c.bf16 %v792_v54, %v792_v54  ;;  %v872_v59 = vpack.c.bf16 %v808_v55, %v808_v55 }
  0xaa   : > { %v825_v60 = vpack.c.bf16 %v761_v56, %v761_v56  ;;  %v841_v61 = vpack.c.bf16 %v777_v57, %v777_v57 }
  0xab   : > { %921 = vst.msk [vmem:[%s1488_s8 + $0x80] sm:$0xf] %vm888_vm1, %v856_v58 }
  0xac   : > { %937 = vst.msk [vmem:[%s1488_s8 + $0xc0] sm:$0xf] %vm888_vm1, %v872_v59  ;;  %v682_v62 = vpop.f32.mrf.mxu2  ;;  %v722_v63 = vpop.f32.mrf.mxu3 }
  0xad   : > { %890 = vst.msk [vmem:[%s1488_s8 + $0x4] sm:$0xf] %vm888_vm1, %v825_v60  ;;  %v683_v0 = vadd.f32 %v1479_v37, %v682_v62  ;;  %v723_v1 = vadd.f32 %v1479_v37, %v722_v63  ;;  %v605_v2 = vpop.f32.mrf.mxu0  ;;  %v645_v3 = vpop.f32.mrf.mxu1 }
  0xae   : > { %906 = vst.msk [vmem:[%s1488_s8 + $0x44] sm:$0xf] %vm888_vm1, %v841_v61  ;;  %v606_v4 = vadd.f32 %v1479_v37, %v605_v2  ;;  %v646_v5 = vadd.f32 %v1479_v37, %v645_v3 }
  0xaf   : > { %v793_v6 = vmax.f32 %v683_v0, 0.0  ;;  %v809_v7 = vmax.f32 %v723_v1, 0.0 }
  0xb0   : > { %v762_v8 = vmax.f32 %v606_v4, 0.0  ;;  %v778_v9 = vmax.f32 %v646_v5, 0.0 }
  0xb1   : > { %v857_v10 = vpack.c.bf16 %v793_v6, %v793_v6  ;;  %v873_v11 = vpack.c.bf16 %v809_v7, %v809_v7 }
  0xb2   : > { %v826_v12 = vpack.c.bf16 %v762_v8, %v762_v8  ;;  %v842_v13 = vpack.c.bf16 %v778_v9, %v778_v9 }
  0xb3   : > { %922 = vst.msk [vmem:[%s1488_s8 + $0x84] sm:$0xf] %vm888_vm1, %v857_v10 }
  0xb4   : > { %938 = vst.msk [vmem:[%s1488_s8 + $0xc4] sm:$0xf] %vm888_vm1, %v873_v11  ;;  %v685_v14 = vpop.f32.mrf.mxu2  ;;  %v725_v15 = vpop.f32.mrf.mxu3 }
  0xb5   : > { %891 = vst.msk [vmem:[%s1488_s8 + $0x8] sm:$0xf] %vm888_vm1, %v826_v12  ;;  %v686_v16 = vadd.f32 %v1479_v37, %v685_v14  ;;  %v726_v17 = vadd.f32 %v1479_v37, %v725_v15  ;;  %v607_v18 = vpop.f32.mrf.mxu0  ;;  %v647_v19 = vpop.f32.mrf.mxu1 }
  0xb6   : > { %907 = vst.msk [vmem:[%s1488_s8 + $0x48] sm:$0xf] %vm888_vm1, %v842_v13  ;;  %v608_v20 = vadd.f32 %v1479_v37, %v607_v18  ;;  %v648_v21 = vadd.f32 %v1479_v37, %v647_v19 }
  0xb7   : > { %v794_v22 = vmax.f32 %v686_v16, 0.0  ;;  %v810_v23 = vmax.f32 %v726_v17, 0.0 }
  0xb8   : > { %v763_v24 = vmax.f32 %v608_v20, 0.0  ;;  %v779_v25 = vmax.f32 %v648_v21, 0.0 }
  0xb9   : > { %v858_v26 = vpack.c.bf16 %v794_v22, %v794_v22  ;;  %v874_v27 = vpack.c.bf16 %v810_v23, %v810_v23 }
  0xba   : > { %v827_v28 = vpack.c.bf16 %v763_v24, %v763_v24  ;;  %v843_v29 = vpack.c.bf16 %v779_v25, %v779_v25 }
  0xbb   : > { %923 = vst.msk [vmem:[%s1488_s8 + $0x88] sm:$0xf] %vm888_vm1, %v858_v26 }
  0xbc   : > { %939 = vst.msk [vmem:[%s1488_s8 + $0xc8] sm:$0xf] %vm888_vm1, %v874_v27  ;;  %v687_v30 = vpop.f32.mrf.mxu2  ;;  %v727_v31 = vpop.f32.mrf.mxu3 }
  0xbd   : > { %892 = vst.msk [vmem:[%s1488_s8 + $0xc] sm:$0xf] %vm888_vm1, %v827_v28  ;;  %v688_v32 = vadd.f32 %v1479_v37, %v687_v30  ;;  %v728_v33 = vadd.f32 %v1479_v37, %v727_v31  ;;  %v610_v34 = vpop.f32.mrf.mxu0  ;;  %v650_v35 = vpop.f32.mrf.mxu1 }
  0xbe   : > { %908 = vst.msk [vmem:[%s1488_s8 + $0x4c] sm:$0xf] %vm888_vm1, %v843_v29  ;;  %v611_v36 = vadd.f32 %v1479_v37, %v610_v34  ;;  %v651_v38 = vadd.f32 %v1479_v37, %v650_v35 }
  0xbf   : > { %v795_v39 = vmax.f32 %v688_v32, 0.0  ;;  %v811_v40 = vmax.f32 %v728_v33, 0.0 }
  0xc0   : > { %v764_v41 = vmax.f32 %v611_v36, 0.0  ;;  %v780_v42 = vmax.f32 %v651_v38, 0.0 }
  0xc1   : > { %v859_v43 = vpack.c.bf16 %v795_v39, %v795_v39  ;;  %v875_v44 = vpack.c.bf16 %v811_v40, %v811_v40 }
  0xc2   : > { %v828_v45 = vpack.c.bf16 %v764_v41, %v764_v41  ;;  %v844_v46 = vpack.c.bf16 %v780_v42, %v780_v42 }
  0xc3   : > { %924 = vst.msk [vmem:[%s1488_s8 + $0x8c] sm:$0xf] %vm888_vm1, %v859_v43 }
  0xc4   : > { %940 = vst.msk [vmem:[%s1488_s8 + $0xcc] sm:$0xf] %vm888_vm1, %v875_v44  ;;  %v690_v47 = vpop.f32.mrf.mxu2  ;;  %v730_v48 = vpop.f32.mrf.mxu3 }
  0xc5   : > { %893 = vst.msk [vmem:[%s1488_s8 + $0x10] sm:$0xf] %vm888_vm1, %v828_v45  ;;  %v691_v49 = vadd.f32 %v1479_v37, %v690_v47  ;;  %v731_v50 = vadd.f32 %v1479_v37, %v730_v48  ;;  %v612_v51 = vpop.f32.mrf.mxu0  ;;  %v652_v52 = vpop.f32.mrf.mxu1 }
  0xc6   : > { %909 = vst.msk [vmem:[%s1488_s8 + $0x50] sm:$0xf] %vm888_vm1, %v844_v46  ;;  %v613_v53 = vadd.f32 %v1479_v37, %v612_v51  ;;  %v653_v54 = vadd.f32 %v1479_v37, %v652_v52 }
  0xc7   : > { %v796_v55 = vmax.f32 %v691_v49, 0.0  ;;  %v812_v56 = vmax.f32 %v731_v50, 0.0 }
  0xc8   : > { %v765_v57 = vmax.f32 %v613_v53, 0.0  ;;  %v781_v58 = vmax.f32 %v653_v54, 0.0 }
  0xc9   : > { %v860_v59 = vpack.c.bf16 %v796_v55, %v796_v55  ;;  %v876_v60 = vpack.c.bf16 %v812_v56, %v812_v56 }
  0xca   : > { %v829_v61 = vpack.c.bf16 %v765_v57, %v765_v57  ;;  %v845_v62 = vpack.c.bf16 %v781_v58, %v781_v58 }
  0xcb   : > { %925 = vst.msk [vmem:[%s1488_s8 + $0x90] sm:$0xf] %vm888_vm1, %v860_v59 }
  0xcc   : > { %941 = vst.msk [vmem:[%s1488_s8 + $0xd0] sm:$0xf] %vm888_vm1, %v876_v60  ;;  %v692_v63 = vpop.f32.mrf.mxu2  ;;  %v732_v0 = vpop.f32.mrf.mxu3 }
  0xcd   : > { %894 = vst.msk [vmem:[%s1488_s8 + $0x14] sm:$0xf] %vm888_vm1, %v829_v61  ;;  %v693_v1 = vadd.f32 %v1479_v37, %v692_v63  ;;  %v733_v2 = vadd.f32 %v1479_v37, %v732_v0  ;;  %v615_v3 = vpop.f32.mrf.mxu0  ;;  %v655_v4 = vpop.f32.mrf.mxu1 }
  0xce   : > { %910 = vst.msk [vmem:[%s1488_s8 + $0x54] sm:$0xf] %vm888_vm1, %v845_v62  ;;  %v616_v5 = vadd.f32 %v1479_v37, %v615_v3  ;;  %v656_v6 = vadd.f32 %v1479_v37, %v655_v4 }
  0xcf   : > { %v797_v7 = vmax.f32 %v693_v1, 0.0  ;;  %v813_v8 = vmax.f32 %v733_v2, 0.0 }
  0xd0   : > { %v766_v9 = vmax.f32 %v616_v5, 0.0  ;;  %v782_v10 = vmax.f32 %v656_v6, 0.0 }
  0xd1   : > { %v861_v11 = vpack.c.bf16 %v797_v7, %v797_v7  ;;  %v877_v12 = vpack.c.bf16 %v813_v8, %v813_v8 }
  0xd2   : > { %v830_v13 = vpack.c.bf16 %v766_v9, %v766_v9  ;;  %v846_v14 = vpack.c.bf16 %v782_v10, %v782_v10 }
  0xd3   : > { %926 = vst.msk [vmem:[%s1488_s8 + $0x94] sm:$0xf] %vm888_vm1, %v861_v11 }
  0xd4   : > { %942 = vst.msk [vmem:[%s1488_s8 + $0xd4] sm:$0xf] %vm888_vm1, %v877_v12  ;;  %v695_v15 = vpop.f32.mrf.mxu2  ;;  %v735_v16 = vpop.f32.mrf.mxu3 }
  0xd5   : > { %895 = vst.msk [vmem:[%s1488_s8 + $0x18] sm:$0xf] %vm888_vm1, %v830_v13  ;;  %v696_v17 = vadd.f32 %v1479_v37, %v695_v15  ;;  %v736_v18 = vadd.f32 %v1479_v37, %v735_v16  ;;  %v617_v19 = vpop.f32.mrf.mxu0  ;;  %v657_v20 = vpop.f32.mrf.mxu1 }
  0xd6   : > { %911 = vst.msk [vmem:[%s1488_s8 + $0x58] sm:$0xf] %vm888_vm1, %v846_v14  ;;  %v618_v21 = vadd.f32 %v1479_v37, %v617_v19  ;;  %v658_v22 = vadd.f32 %v1479_v37, %v657_v20 }
  0xd7   : > { %v798_v23 = vmax.f32 %v696_v17, 0.0  ;;  %v814_v24 = vmax.f32 %v736_v18, 0.0 }
  0xd8   : > { %v767_v25 = vmax.f32 %v618_v21, 0.0  ;;  %v783_v26 = vmax.f32 %v658_v22, 0.0 }
  0xd9   : > { %v862_v27 = vpack.c.bf16 %v798_v23, %v798_v23  ;;  %v878_v28 = vpack.c.bf16 %v814_v24, %v814_v24 }
  0xda   : > { %v831_v29 = vpack.c.bf16 %v767_v25, %v767_v25  ;;  %v847_v30 = vpack.c.bf16 %v783_v26, %v783_v26 }
  0xdb   : > { %927 = vst.msk [vmem:[%s1488_s8 + $0x98] sm:$0xf] %vm888_vm1, %v862_v27 }
  0xdc   : > { %943 = vst.msk [vmem:[%s1488_s8 + $0xd8] sm:$0xf] %vm888_vm1, %v878_v28  ;;  %v697_v31 = vpop.f32.mrf.mxu2  ;;  %v737_v32 = vpop.f32.mrf.mxu3 }
  0xdd   : > { %896 = vst.msk [vmem:[%s1488_s8 + $0x1c] sm:$0xf] %vm888_vm1, %v831_v29  ;;  %v698_v33 = vadd.f32 %v1479_v37, %v697_v31  ;;  %v738_v34 = vadd.f32 %v1479_v37, %v737_v32  ;;  %v620_v35 = vpop.f32.mrf.mxu0  ;;  %v660_v36 = vpop.f32.mrf.mxu1 }
  0xde   : > { %912 = vst.msk [vmem:[%s1488_s8 + $0x5c] sm:$0xf] %vm888_vm1, %v847_v30  ;;  %v621_v38 = vadd.f32 %v1479_v37, %v620_v35  ;;  %v661_v39 = vadd.f32 %v1479_v37, %v660_v36 }
  0xdf   : > { %v799_v40 = vmax.f32 %v698_v33, 0.0  ;;  %v815_v41 = vmax.f32 %v738_v34, 0.0 }
  0xe0   : > { %v768_v42 = vmax.f32 %v621_v38, 0.0  ;;  %v784_v43 = vmax.f32 %v661_v39, 0.0 }
  0xe1   : > { %v863_v44 = vpack.c.bf16 %v799_v40, %v799_v40  ;;  %v879_v45 = vpack.c.bf16 %v815_v41, %v815_v41 }
  0xe2   : > { %v832_v46 = vpack.c.bf16 %v768_v42, %v768_v42  ;;  %v848_v47 = vpack.c.bf16 %v784_v43, %v784_v43 }
  0xe3   : > { %928 = vst.msk [vmem:[%s1488_s8 + $0x9c] sm:$0xf] %vm888_vm1, %v863_v44 }
  0xe4   : > { %944 = vst.msk [vmem:[%s1488_s8 + $0xdc] sm:$0xf] %vm888_vm1, %v879_v45  ;;  %v700_v48 = vpop.f32.mrf.mxu2  ;;  %v740_v49 = vpop.f32.mrf.mxu3 }
  0xe5   : > { %897 = vst.msk [vmem:[%s1488_s8 + $0x20] sm:$0xf] %vm888_vm1, %v832_v46  ;;  %v701_v50 = vadd.f32 %v1479_v37, %v700_v48  ;;  %v741_v51 = vadd.f32 %v1479_v37, %v740_v49  ;;  %v622_v52 = vpop.f32.mrf.mxu0  ;;  %v662_v53 = vpop.f32.mrf.mxu1 }
  0xe6   : > { %913 = vst.msk [vmem:[%s1488_s8 + $0x60] sm:$0xf] %vm888_vm1, %v848_v47  ;;  %v623_v54 = vadd.f32 %v1479_v37, %v622_v52  ;;  %v663_v55 = vadd.f32 %v1479_v37, %v662_v53 }
  0xe7   : > { %v800_v56 = vmax.f32 %v701_v50, 0.0  ;;  %v816_v57 = vmax.f32 %v741_v51, 0.0 }
  0xe8   : > { %v769_v58 = vmax.f32 %v623_v54, 0.0  ;;  %v785_v59 = vmax.f32 %v663_v55, 0.0 }
  0xe9   : > { %v864_v60 = vpack.c.bf16 %v800_v56, %v800_v56  ;;  %v880_v61 = vpack.c.bf16 %v816_v57, %v816_v57 }
  0xea   : > { %v833_v62 = vpack.c.bf16 %v769_v58, %v769_v58  ;;  %v849_v63 = vpack.c.bf16 %v785_v59, %v785_v59 }
  0xeb   : > { %929 = vst.msk [vmem:[%s1488_s8 + $0xa0] sm:$0xf] %vm888_vm1, %v864_v60 }
  0xec   : > { %945 = vst.msk [vmem:[%s1488_s8 + $0xe0] sm:$0xf] %vm888_vm1, %v880_v61  ;;  %v702_v0 = vpop.f32.mrf.mxu2  ;;  %v742_v1 = vpop.f32.mrf.mxu3 }
  0xed   : > { %898 = vst.msk [vmem:[%s1488_s8 + $0x24] sm:$0xf] %vm888_vm1, %v833_v62  ;;  %v703_v2 = vadd.f32 %v1479_v37, %v702_v0  ;;  %v743_v3 = vadd.f32 %v1479_v37, %v742_v1  ;;  %v625_v4 = vpop.f32.mrf.mxu0  ;;  %v665_v5 = vpop.f32.mrf.mxu1 }
  0xee   : > { %914 = vst.msk [vmem:[%s1488_s8 + $0x64] sm:$0xf] %vm888_vm1, %v849_v63  ;;  %v626_v6 = vadd.f32 %v1479_v37, %v625_v4  ;;  %v666_v7 = vadd.f32 %v1479_v37, %v665_v5 }
  0xef   : > { %v801_v8 = vmax.f32 %v703_v2, 0.0  ;;  %v817_v9 = vmax.f32 %v743_v3, 0.0 }
  0xf0   : > { %v770_v10 = vmax.f32 %v626_v6, 0.0  ;;  %v786_v11 = vmax.f32 %v666_v7, 0.0 }
  0xf1   : > { %v865_v12 = vpack.c.bf16 %v801_v8, %v801_v8  ;;  %v881_v13 = vpack.c.bf16 %v817_v9, %v817_v9 }
  0xf2   : > { %v834_v14 = vpack.c.bf16 %v770_v10, %v770_v10  ;;  %v850_v15 = vpack.c.bf16 %v786_v11, %v786_v11 }
  0xf3   : > { %930 = vst.msk [vmem:[%s1488_s8 + $0xa4] sm:$0xf] %vm888_vm1, %v865_v12 }
  0xf4   : > { %946 = vst.msk [vmem:[%s1488_s8 + $0xe4] sm:$0xf] %vm888_vm1, %v881_v13  ;;  %v705_v16 = vpop.f32.mrf.mxu2  ;;  %v745_v17 = vpop.f32.mrf.mxu3 }
  0xf5   : > { %899 = vst.msk [vmem:[%s1488_s8 + $0x28] sm:$0xf] %vm888_vm1, %v834_v14  ;;  %v706_v18 = vadd.f32 %v1479_v37, %v705_v16  ;;  %v746_v19 = vadd.f32 %v1479_v37, %v745_v17  ;;  %v627_v20 = vpop.f32.mrf.mxu0  ;;  %v667_v21 = vpop.f32.mrf.mxu1 }
  0xf6   : > { %915 = vst.msk [vmem:[%s1488_s8 + $0x68] sm:$0xf] %vm888_vm1, %v850_v15  ;;  %v628_v22 = vadd.f32 %v1479_v37, %v627_v20  ;;  %v668_v23 = vadd.f32 %v1479_v37, %v667_v21 }
  0xf7   : > { %v802_v24 = vmax.f32 %v706_v18, 0.0  ;;  %v818_v25 = vmax.f32 %v746_v19, 0.0 }
  0xf8   : > { %v771_v26 = vmax.f32 %v628_v22, 0.0  ;;  %v787_v27 = vmax.f32 %v668_v23, 0.0 }
  0xf9   : > { %v866_v28 = vpack.c.bf16 %v802_v24, %v802_v24  ;;  %v882_v29 = vpack.c.bf16 %v818_v25, %v818_v25 }
  0xfa   : > { %v835_v30 = vpack.c.bf16 %v771_v26, %v771_v26  ;;  %v851_v31 = vpack.c.bf16 %v787_v27, %v787_v27 }
  0xfb   : > { %931 = vst.msk [vmem:[%s1488_s8 + $0xa8] sm:$0xf] %vm888_vm1, %v866_v28 }
  0xfc   : > { %947 = vst.msk [vmem:[%s1488_s8 + $0xe8] sm:$0xf] %vm888_vm1, %v882_v29  ;;  %v707_v32 = vpop.f32.mrf.mxu2  ;;  %v747_v33 = vpop.f32.mrf.mxu3 }
  0xfd   : > { %900 = vst.msk [vmem:[%s1488_s8 + $0x2c] sm:$0xf] %vm888_vm1, %v835_v30  ;;  %v708_v34 = vadd.f32 %v1479_v37, %v707_v32  ;;  %v748_v35 = vadd.f32 %v1479_v37, %v747_v33  ;;  %v630_v36 = vpop.f32.mrf.mxu0  ;;  %v670_v38 = vpop.f32.mrf.mxu1 }
  0xfe   : > { %916 = vst.msk [vmem:[%s1488_s8 + $0x6c] sm:$0xf] %vm888_vm1, %v851_v31  ;;  %v631_v39 = vadd.f32 %v1479_v37, %v630_v36  ;;  %v671_v40 = vadd.f32 %v1479_v37, %v670_v38 }
  0xff   : > { %v803_v41 = vmax.f32 %v708_v34, 0.0  ;;  %v819_v42 = vmax.f32 %v748_v35, 0.0 }
 0x100   : > { %v772_v43 = vmax.f32 %v631_v39, 0.0  ;;  %v788_v44 = vmax.f32 %v671_v40, 0.0 }
 0x101   : > { %v867_v45 = vpack.c.bf16 %v803_v41, %v803_v41  ;;  %v883_v46 = vpack.c.bf16 %v819_v42, %v819_v42 }
 0x102   : > { %v836_v47 = vpack.c.bf16 %v772_v43, %v772_v43  ;;  %v852_v48 = vpack.c.bf16 %v788_v44, %v788_v44 }
 0x103   : > { %932 = vst.msk [vmem:[%s1488_s8 + $0xac] sm:$0xf] %vm888_vm1, %v867_v45 }
 0x104   : > { %948 = vst.msk [vmem:[%s1488_s8 + $0xec] sm:$0xf] %vm888_vm1, %v883_v46  ;;  %v710_v49 = vpop.f32.mrf.mxu2  ;;  %v750_v50 = vpop.f32.mrf.mxu3 }
 0x105   : > { %901 = vst.msk [vmem:[%s1488_s8 + $0x30] sm:$0xf] %vm888_vm1, %v836_v47  ;;  %v711_v51 = vadd.f32 %v1479_v37, %v710_v49  ;;  %v751_v52 = vadd.f32 %v1479_v37, %v750_v50  ;;  %v632_v53 = vpop.f32.mrf.mxu0  ;;  %v672_v54 = vpop.f32.mrf.mxu1 }
 0x106   : > { %917 = vst.msk [vmem:[%s1488_s8 + $0x70] sm:$0xf] %vm888_vm1, %v852_v48  ;;  %v633_v55 = vadd.f32 %v1479_v37, %v632_v53  ;;  %v673_v56 = vadd.f32 %v1479_v37, %v672_v54 }
 0x107   : > { %v804_v57 = vmax.f32 %v711_v51, 0.0  ;;  %v820_v58 = vmax.f32 %v751_v52, 0.0 }
 0x108   : > { %v773_v59 = vmax.f32 %v633_v55, 0.0  ;;  %v789_v60 = vmax.f32 %v673_v56, 0.0 }
 0x109   : > { %v868_v61 = vpack.c.bf16 %v804_v57, %v804_v57  ;;  %v884_v62 = vpack.c.bf16 %v820_v58, %v820_v58 }
 0x10a   : > { %v837_v63 = vpack.c.bf16 %v773_v59, %v773_v59  ;;  %v853_v0 = vpack.c.bf16 %v789_v60, %v789_v60 }
 0x10b   : > { %933 = vst.msk [vmem:[%s1488_s8 + $0xb0] sm:$0xf] %vm888_vm1, %v868_v61 }
 0x10c   : > { %949 = vst.msk [vmem:[%s1488_s8 + $0xf0] sm:$0xf] %vm888_vm1, %v884_v62  ;;  %v712_v1 = vpop.f32.mrf.mxu2  ;;  %v752_v2 = vpop.f32.mrf.mxu3 }
 0x10d   : > { %902 = vst.msk [vmem:[%s1488_s8 + $0x34] sm:$0xf] %vm888_vm1, %v837_v63  ;;  %v713_v3 = vadd.f32 %v1479_v37, %v712_v1  ;;  %v753_v4 = vadd.f32 %v1479_v37, %v752_v2  ;;  %v635_v5 = vpop.f32.mrf.mxu0  ;;  %v675_v6 = vpop.f32.mrf.mxu1 }
 0x10e   : > { %918 = vst.msk [vmem:[%s1488_s8 + $0x74] sm:$0xf] %vm888_vm1, %v853_v0  ;;  %v636_v7 = vadd.f32 %v1479_v37, %v635_v5  ;;  %v676_v8 = vadd.f32 %v1479_v37, %v675_v6 }
 0x10f   : > { %v805_v9 = vmax.f32 %v713_v3, 0.0  ;;  %v821_v10 = vmax.f32 %v753_v4, 0.0 }
 0x110   : > { %v774_v11 = vmax.f32 %v636_v7, 0.0  ;;  %v790_v12 = vmax.f32 %v676_v8, 0.0 }
 0x111   : > { %v869_v13 = vpack.c.bf16 %v805_v9, %v805_v9  ;;  %v885_v14 = vpack.c.bf16 %v821_v10, %v821_v10 }
 0x112   : > { %v838_v15 = vpack.c.bf16 %v774_v11, %v774_v11  ;;  %v854_v16 = vpack.c.bf16 %v790_v12, %v790_v12 }
 0x113   : > { %934 = vst.msk [vmem:[%s1488_s8 + $0xb4] sm:$0xf] %vm888_vm1, %v869_v13 }
 0x114   : > { %950 = vst.msk [vmem:[%s1488_s8 + $0xf4] sm:$0xf] %vm888_vm1, %v885_v14  ;;  %v715_v17 = vpop.f32.mrf.mxu2  ;;  %v755_v18 = vpop.f32.mrf.mxu3 }
 0x115   : > { %903 = vst.msk [vmem:[%s1488_s8 + $0x38] sm:$0xf] %vm888_vm1, %v838_v15  ;;  %v716_v19 = vadd.f32 %v1479_v37, %v715_v17  ;;  %v756_v20 = vadd.f32 %v1479_v37, %v755_v18  ;;  %v637_v21 = vpop.f32.mrf.mxu0  ;;  %v677_v22 = vpop.f32.mrf.mxu1 }
 0x116   : > { %919 = vst.msk [vmem:[%s1488_s8 + $0x78] sm:$0xf] %vm888_vm1, %v854_v16  ;;  %v638_v23 = vadd.f32 %v1479_v37, %v637_v21  ;;  %v678_v24 = vadd.f32 %v1479_v37, %v677_v22 }
 0x117   : > { %v806_v25 = vmax.f32 %v716_v19, 0.0  ;;  %v822_v26 = vmax.f32 %v756_v20, 0.0 }
 0x118   : > { %v775_v27 = vmax.f32 %v638_v23, 0.0  ;;  %v791_v28 = vmax.f32 %v678_v24, 0.0 }
 0x119   : > { %v870_v29 = vpack.c.bf16 %v806_v25, %v806_v25  ;;  %v886_v30 = vpack.c.bf16 %v822_v26, %v822_v26 }
 0x11a   : > { %v839_v31 = vpack.c.bf16 %v775_v27, %v775_v27  ;;  %v855_v32 = vpack.c.bf16 %v791_v28, %v791_v28 }
 0x11b   : > { %935 = vst.msk [vmem:[%s1488_s8 + $0xb8] sm:$0xf] %vm888_vm1, %v870_v29 }
 0x11c   : > { %951 = vst.msk [vmem:[%s1488_s8 + $0xf8] sm:$0xf] %vm888_vm1, %v886_v30  ;;  %v717_v33 = vpop.f32.mrf.mxu2  ;;  %v757_v34 = vpop.f32.mrf.mxu3 }
 0x11d   : > { %904 = vst.msk [vmem:[%s1488_s8 + $0x3c] sm:$0xf] %vm888_vm1, %v839_v31  ;;  %v718_v35 = vadd.f32 %v1479_v37, %v717_v33  ;;  %v758_v36 = vadd.f32 %v1479_v37, %v757_v34 }
 0x11e   : > { %920 = vst.msk [vmem:[%s1488_s8 + $0x7c] sm:$0xf] %vm888_vm1, %v855_v32 }
 0x11f   : > { %v807_v38 = vmax.f32 %v718_v35, 0.0  ;;  %v823_v39 = vmax.f32 %v758_v36, 0.0 }
 0x121   : > { %v871_v40 = vpack.c.bf16 %v807_v38, %v807_v38  ;;  %v887_v41 = vpack.c.bf16 %v823_v39, %v823_v39 }
 0x123   : > { %936 = vst.msk [vmem:[%s1488_s8 + $0xbc] sm:$0xf] %vm888_vm1, %v871_v40 }
 0x124   : > { %952 = vst.msk [vmem:[%s1488_s8 + $0xfc] sm:$0xf] %vm888_vm1, %v887_v41 }
 0x125 PF: > { %s13_s14 = sadd.s32 1, %s1347_s14   ;;  %s1693_s12 = smov %s1343_s13 }
 0x126   : > { %p10_p5 = scmp.ge.s32.totalorder %s13_s14, 4   ;;  %s1694_s13 = smov %s1696_s15 }
 0x128   :  { %12 = sbr.rel (!%p10_p5) target bundleno = 2 (0x2), region = 68 }

// kernel: tiny_roma_forward.39
= control target key start
LH: loop header
LB: loop body
LE: loop exit
PB: predicated region body
PF: predicated region fallthrough
CT: control target
= control target key end

     0   :  { %s1878_s12 = smov 0   ;;  %s1880_s13 = smov 0   ;;  %s2375_s0 = inlined_call_operand.vmem [shape: bf16[1024,144], index: 0, kind: input, shape index: {}]   ;;  %s2376_s1 = inlined_call_operand.vmem [shape: bf16[144,16], index: 1, kind: input, shape index: {}]   ;;  %s2377_s2 = inlined_call_operand.vmem [shape: f32[1,16], index: 2, kind: input, shape index: {}]   ;;  %s2378_s3 = inlined_call_operand.vmem [shape: bf16[1024,16], index: 3, kind: output, shape index: {}]  }
   0x1   :  { %s1882_s14 = smov 0  }
   0x2 LB: > { %s25_s15 = sadd.s32 1, %s1852_s13  ;;  %p1393_p0 = scmp.ge.s32.totalorder %s1856_s14, 1  ;;  %s1856_s14 = sphi %s1882_s14, %s13_s14   ;;  %s1852_s13 = sphi %s1880_s13, %s2380_s13   ;;  %s1848_s12 = sphi %s1878_s12, %s2379_s12  }
   0x3   : > { %p27_p1 = scmp.ge.s32.totalorder %s25_s15, 2  ;;  %p170_p2 = scmp.lt.s32.totalorder %s1856_s14, 3 }
   0x5   : > { %s2382_s15 = smov (%p27_p1, %s25_s15), 0  ;;  %p171_p3 = pnand %p1393_p0, %p170_p2 }
   0x6   : > { %s1394_s20 = sshll.u32 (!%p171_p3), %s1848_s12, 6 }
   0x7   : > { %174 = sbr.rel (%p171_p3) target bundleno = 433 (0x1b1), region = 32  ;;  %p206_p4 = scmp.lt.s32.totalorder (!%p171_p3), %s1394_s20, 127 }
   0xc   : > { %v1797_v0 = vld [vmem:[%s2376_s1 + $0x38] sm:$0xff]  ;;  %v1798_v1 = vld [vmem:[%s2376_s1 + $0x40] sm:$0xff]  ;;  %v1796_v2 = vld [vmem:[%s2376_s1 + $0x30] sm:$0xff]  ;;  %s2384_s20 = smov (!%p206_p4, %s1394_s20), 127  ;;  %vm657_vm0 = vcmask 130048   ;;  %vm1220_vm1 = vcmask 125952  }
   0xd   : > { %754 = vmatpush.bf16.msra.mxu0 %v1797_v0  ;;  %1799 = vmatpush.bf16.msra.mxu2 %v1797_v0  ;;  %s1725_s23 = sshll.u32 %s2384_s20, 3  ;;  %v1795_v3 = vld [vmem:[%s2376_s1 + $0x28] sm:$0xff]  ;;  %v1794_v7 = vld [vmem:[%s2376_s1 + $0x20] sm:$0xff]  ;;  %v1793_v11 = vld [vmem:[%s2376_s1 + $0x18] sm:$0xff]  ;;  %s1398_s17 = sshll.u32 %s2384_s20, 2 }
   0xe   : > { %930 = vmatpush.bf16.msra.mxu1 %v1798_v1  ;;  %1807 = vmatpush.bf16.msra.mxu3 %v1798_v1  ;;  %s1911_s26 = scalar_lea.vmem %s2375_s0, %s1725_s23  ;;  %v1792_v12 = vld [vmem:[%s2376_s1 + $0x10] sm:$0xff]  ;;  %v1791_v16 = vld [vmem:[%s2376_s1 + $0x8] sm:$0xff]  ;;  %v1790_v19 = vld [vmem:[%s2376_s1] sm:$0xff]  ;;  %s2045_s21 = scalar_lea.vmem %s2378_s3, %s1398_s17 }
   0xf   : > { %v1726_v4 = vld [vmem:[%s1911_s26 + $0x4] sm:$0xf]  ;;  %v1403_v5 = vld [vmem:[%s1911_s26 + $0x8] sm:$0xf0]  ;;  %v1760_v8 = vld [vmem:[%s1911_s26 + $0x114] sm:$0xf] }
  0x10   : > { %v1406_v6 = vor.u32 %v1726_v4, %v1403_v5  ;;  %v1539_v9 = vld [vmem:[%s1911_s26 + $0x118] sm:$0xf0]  ;;  %v1728_v13 = vld [vmem:[%s1911_s26 + $0x14] sm:$0xf]  ;;  %v1762_v17 = vld [vmem:[%s1911_s26 + $0x124] sm:$0xf] }
  0x11   : > { %755 = vmatpush.bf16.msra.mxu0 %v1796_v2  ;;  %1800 = vmatpush.bf16.msra.mxu2 %v1796_v2  ;;  %v1542_v10 = vor.u32 %v1760_v8, %v1539_v9  ;;  %v1411_v14 = vld [vmem:[%s1911_s26 + $0x18] sm:$0xf0]  ;;  %v1547_v18 = vld [vmem:[%s1911_s26 + $0x128] sm:$0xf0]  ;;  %v1401_v20 = vld [vmem:[%s1911_s26] sm:$0xf] }
  0x12   : > { %1691 = vmatmul.msk.bf16.vlgmr.msra.gmra.mxu1 %vm657_vm0, %v1406_v6  ;;  %v1414_v15 = vor.u32 %v1728_v13, %v1411_v14  ;;  %v1727_v21 = vld [vmem:[%s1911_s26 + $0x4] sm:$0xf0]  ;;  %v1550_v22 = vor.u32 %v1762_v17, %v1547_v18  ;;  %v1529_v23 = vld [vmem:[%s1911_s26 + $0x100] sm:$0xf]  ;;  %v1730_v27 = vld [vmem:[%s1911_s26 + $0x24] sm:$0xf] }
  0x13   : > { %1708 = vmatmul.msk.bf16.vlgmr.msra.gmra.mxu3 %vm657_vm0, %v1542_v10  ;;  %v1759_v24 = vld [vmem:[%s1911_s26 + $0x104] sm:$0xf0]  ;;  %v1402_v25 = vor.u32 %v1727_v21, %v1401_v20  ;;  %v1419_v28 = vld [vmem:[%s1911_s26 + $0x28] sm:$0xf0]  ;;  %v1764_v30 = vld [vmem:[%s1911_s26 + $0x134] sm:$0xf] }
  0x14   : > { %v1530_v26 = vor.u32 %v1759_v24, %v1529_v23  ;;  %v1422_v29 = vor.u32 %v1730_v27, %v1419_v28  ;;  %v1555_v31 = vld [vmem:[%s1911_s26 + $0x138] sm:$0xf0]  ;;  %v1409_v32 = vld [vmem:[%s1911_s26 + $0x10] sm:$0xf]  ;;  %v1729_v33 = vld [vmem:[%s1911_s26 + $0x14] sm:$0xf0] }
  0x15   : > { %756 = vmatpush.bf16.msra.mxu0 %v1795_v3  ;;  %1801 = vmatpush.bf16.msra.mxu2 %v1795_v3  ;;  %v1558_v34 = vor.u32 %v1764_v30, %v1555_v31  ;;  %v1537_v35 = vld [vmem:[%s1911_s26 + $0x110] sm:$0xf]  ;;  %v1761_v36 = vld [vmem:[%s1911_s26 + $0x114] sm:$0xf0]  ;;  %v1410_v37 = vor.u32 %v1729_v33, %v1409_v32  ;;  %v1732_v39 = vld [vmem:[%s1911_s26 + $0x34] sm:$0xf] }
  0x16   : > { %v1538_v38 = vor.u32 %v1761_v36, %v1537_v35  ;;  %v1427_v40 = vld [vmem:[%s1911_s26 + $0x38] sm:$0xf0]  ;;  %v1766_v42 = vld [vmem:[%s1911_s26 + $0x144] sm:$0xf]  ;;  %v1563_v43 = vld [vmem:[%s1911_s26 + $0x148] sm:$0xf0] }
  0x17   : > { %v1430_v41 = vor.u32 %v1732_v39, %v1427_v40  ;;  %v1417_v44 = vld [vmem:[%s1911_s26 + $0x20] sm:$0xf]  ;;  %v1731_v45 = vld [vmem:[%s1911_s26 + $0x24] sm:$0xf0]  ;;  %v1566_v46 = vor.u32 %v1766_v42, %v1563_v43  ;;  %v1734_v51 = vld [vmem:[%s1911_s26 + $0x44] sm:$0xf] }
  0x18   : > { %v1545_v47 = vld [vmem:[%s1911_s26 + $0x120] sm:$0xf]  ;;  %v1763_v48 = vld [vmem:[%s1911_s26 + $0x124] sm:$0xf0]  ;;  %v1418_v49 = vor.u32 %v1731_v45, %v1417_v44  ;;  %v1435_v52 = vld [vmem:[%s1911_s26 + $0x48] sm:$0xf0] }
  0x19   : > { %757 = vmatpush.bf16.msra.mxu0 %v1794_v7  ;;  %1802 = vmatpush.bf16.msra.mxu2 %v1794_v7  ;;  %v1546_v50 = vor.u32 %v1763_v48, %v1545_v47  ;;  %v1438_v53 = vor.u32 %v1734_v51, %v1435_v52  ;;  %v1768_v54 = vld [vmem:[%s1911_s26 + $0x154] sm:$0xf]  ;;  %v1571_v55 = vld [vmem:[%s1911_s26 + $0x158] sm:$0xf0]  ;;  %v1425_v56 = vld [vmem:[%s1911_s26 + $0x30] sm:$0xf] }
  0x1a   : > { %v1733_v57 = vld [vmem:[%s1911_s26 + $0x34] sm:$0xf0]  ;;  %v1574_v58 = vor.u32 %v1768_v54, %v1571_v55  ;;  %v1553_v59 = vld [vmem:[%s1911_s26 + $0x130] sm:$0xf]  ;;  %v1736_v63 = vld [vmem:[%s1911_s26 + $0x54] sm:$0xf] }
  0x1b   : > { %v1765_v60 = vld [vmem:[%s1911_s26 + $0x134] sm:$0xf0]  ;;  %v1426_v61 = vor.u32 %v1733_v57, %v1425_v56  ;;  %v1443_v0 = vld [vmem:[%s1911_s26 + $0x58] sm:$0xf0]  ;;  %v1770_v2 = vld [vmem:[%s1911_s26 + $0x164] sm:$0xf] }
  0x1c   : > { %v1554_v62 = vor.u32 %v1765_v60, %v1553_v59  ;;  %v1446_v1 = vor.u32 %v1736_v63, %v1443_v0  ;;  %v1579_v3 = vld [vmem:[%s1911_s26 + $0x168] sm:$0xf0]  ;;  %v1433_v4 = vld [vmem:[%s1911_s26 + $0x40] sm:$0xf]  ;;  %v1735_v5 = vld [vmem:[%s1911_s26 + $0x44] sm:$0xf0] }
  0x1d   : > { %758 = vmatpush.bf16.msra.mxu0 %v1793_v11  ;;  %1803 = vmatpush.bf16.msra.mxu2 %v1793_v11  ;;  %v1582_v6 = vor.u32 %v1770_v2, %v1579_v3  ;;  %v1561_v7 = vld [vmem:[%s1911_s26 + $0x140] sm:$0xf]  ;;  %v1767_v8 = vld [vmem:[%s1911_s26 + $0x144] sm:$0xf0]  ;;  %v1434_v9 = vor.u32 %v1735_v5, %v1433_v4  ;;  %v1738_v11 = vld [vmem:[%s1911_s26 + $0x64] sm:$0xf] }
  0x1e   : > { %v1562_v10 = vor.u32 %v1767_v8, %v1561_v7  ;;  %v1772_v14 = vld [vmem:[%s1911_s26 + $0x174] sm:$0xf]  ;;  %v1737_v17 = vld [vmem:[%s1911_s26 + $0x54] sm:$0xf0]  ;;  %v1459_v24 = vld [vmem:[%s1911_s26 + $0x78] sm:$0xf0] }
  0x1f   : > { %v1769_v20 = vld [vmem:[%s1911_s26 + $0x154] sm:$0xf0]  ;;  %v1740_v23 = vld [vmem:[%s1911_s26 + $0x74] sm:$0xf]  ;;  %v1595_v27 = vld [vmem:[%s1911_s26 + $0x188] sm:$0xf0] }
  0x20   : > { %v1449_v28 = vld [vmem:[%s1911_s26 + $0x60] sm:$0xf]  ;;  %v1771_v32 = vld [vmem:[%s1911_s26 + $0x164] sm:$0xf0]  ;;  %v1742_v35 = vld [vmem:[%s1911_s26 + $0x84] sm:$0xf] }
  0x21   : > { %759 = vmatpush.bf16.msra.mxu0 %v1792_v12  ;;  %1804 = vmatpush.bf16.msra.mxu2 %v1792_v12  ;;  %v1451_v12 = vld [vmem:[%s1911_s26 + $0x68] sm:$0xf0]  ;;  %v1577_v31 = vld [vmem:[%s1911_s26 + $0x160] sm:$0xf]  ;;  %v1776_v39 = vld [vmem:[%s1911_s26 + $0x194] sm:$0xf] }
  0x22   : > { %1692 = vmatmul.msk.bf16.gmra.mxu1 %vm657_vm0, %v1414_v15  ;;  %v1454_v13 = vor.u32 %v1738_v11, %v1451_v12  ;;  %v1587_v15 = vld [vmem:[%s1911_s26 + $0x178] sm:$0xf0]  ;;  %v1467_v36 = vld [vmem:[%s1911_s26 + $0x88] sm:$0xf0]  ;;  %v1741_v42 = vld [vmem:[%s1911_s26 + $0x74] sm:$0xf0] }
  0x23   : > { %1709 = vmatmul.msk.bf16.gmra.mxu3 %vm657_vm0, %v1550_v22  ;;  %v1590_v18 = vor.u32 %v1772_v14, %v1587_v15  ;;  %v1603_v40 = vld [vmem:[%s1911_s26 + $0x198] sm:$0xf0]  ;;  %v1585_v44 = vld [vmem:[%s1911_s26 + $0x170] sm:$0xf]  ;;  %v1773_v45 = vld [vmem:[%s1911_s26 + $0x174] sm:$0xf0] }
  0x24   : > { %v1606_v43 = vor.u32 %v1776_v39, %v1603_v40  ;;  %v1586_v47 = vor.u32 %v1773_v45, %v1585_v44  ;;  %v1475_v51 = vld [vmem:[%s1911_s26 + $0x98] sm:$0xf0]  ;;  %v1778_v55 = vld [vmem:[%s1911_s26 + $0x1a4] sm:$0xf]  ;;  %v1611_v56 = vld [vmem:[%s1911_s26 + $0x1a8] sm:$0xf0] }
  0x25   : > { %760 = vmatpush.bf16.msra.mxu0 %v1791_v16  ;;  %1805 = vmatpush.bf16.msra.mxu2 %v1791_v16  ;;  %v1441_v16 = vld [vmem:[%s1911_s26 + $0x50] sm:$0xf]  ;;  %v1465_v57 = vld [vmem:[%s1911_s26 + $0x80] sm:$0xf]  ;;  %v1614_v59 = vor.u32 %v1778_v55, %v1611_v56  ;;  %v1746_v7 = vld [vmem:[%s1911_s26 + $0xa4] sm:$0xf] }
  0x26   : > { %v1442_v21 = vor.u32 %v1737_v17, %v1441_v16  ;;  %v2031_v60 = vld [vmem:[%s2377_s2] ss:$0 sm:$0xff]  ;;  %v1483_v8 = vld [vmem:[%s1911_s26 + $0xa8] sm:$0xf0]  ;;  %v1780_v17 = vld [vmem:[%s1911_s26 + $0x1b4] sm:$0xf] }
  0x27   : > { %v1486_v12 = vor.u32 %v1746_v7, %v1483_v8  ;;  %v1609_v56 = vld [vmem:[%s1911_s26 + $0x1a0] sm:$0xf] }
  0x29   : > { %761 = vmatpush.bf16.msra.mxu0 %v1790_v19  ;;  %1806 = vmatpush.bf16.msra.mxu2 %v1790_v19  ;;  %v1569_v19 = vld [vmem:[%s1911_s26 + $0x150] sm:$0xf] }
  0x2a   : > { %v1570_v22 = vor.u32 %v1769_v20, %v1569_v19  ;;  %v1473_v19 = vld [vmem:[%s1911_s26 + $0x90] sm:$0xf]  ;;  %v1745_v20 = vld [vmem:[%s1911_s26 + $0x94] sm:$0xf0] }
  0x2c   : > { %762 = vmatmul.bf16.vlgmr.msra.gmra.mxu0 %v1402_v25  ;;  %842 = vmatmul.bf16.vlgmr.msra.gmra.mxu2 %v1530_v26  ;;  %v1462_v25 = vor.u32 %v1740_v23, %v1459_v24  ;;  %v1774_v26 = vld [vmem:[%s1911_s26 + $0x184] sm:$0xf]  ;;  %v1601_v23 = vld [vmem:[%s1911_s26 + $0x190] sm:$0xf]  ;;  %v1777_v24 = vld [vmem:[%s1911_s26 + $0x194] sm:$0xf0] }
  0x2d   : > { %v1598_v30 = vor.u32 %v1774_v26, %v1595_v27  ;;  %v1474_v27 = vor.u32 %v1745_v20, %v1473_v19 }
  0x32   : > { %1693 = vmatmul.msk.bf16.gmra.mxu1 %vm657_vm0, %v1422_v29  ;;  %v1739_v29 = vld [vmem:[%s1911_s26 + $0x64] sm:$0xf0] }
  0x33   : > { %1710 = vmatmul.msk.bf16.gmra.mxu3 %vm657_vm0, %v1558_v34  ;;  %v1450_v33 = vor.u32 %v1739_v29, %v1449_v28  ;;  %v1578_v34 = vor.u32 %v1771_v32, %v1577_v31  ;;  %v1602_v29 = vor.u32 %v1777_v24, %v1601_v23  ;;  %v1784_v23 = vld [vmem:[%s1911_s26 + $0x1d4] sm:$0xf]  ;;  %v1635_v24 = vld [vmem:[%s1911_s26 + $0x1d8] sm:$0xf0] }
  0x3c   : > { %767 = vmatmul.bf16.gmra.mxu0 %v1410_v37  ;;  %847 = vmatmul.bf16.gmra.mxu2 %v1538_v38  ;;  %v1470_v37 = vor.u32 %v1742_v35, %v1467_v36  ;;  %v1748_v35 = vld [vmem:[%s1911_s26 + $0xb4] sm:$0xf]  ;;  %v1491_v36 = vld [vmem:[%s1911_s26 + $0xb8] sm:$0xf0] }
  0x42   : > { %1694 = vmatmul.msk.bf16.gmra.mxu1 %vm657_vm0, %v1430_v41  ;;  %v1457_v41 = vld [vmem:[%s1911_s26 + $0x70] sm:$0xf] }
  0x43   : > { %1711 = vmatmul.msk.bf16.gmra.mxu3 %vm657_vm0, %v1566_v46  ;;  %v1458_v46 = vor.u32 %v1741_v42, %v1457_v41  ;;  %v1494_v41 = vor.u32 %v1748_v35, %v1491_v36 }
  0x4c   : > { %772 = vmatmul.bf16.gmra.mxu0 %v1418_v49  ;;  %852 = vmatmul.bf16.gmra.mxu2 %v1546_v50  ;;  %v1744_v50 = vld [vmem:[%s1911_s26 + $0x94] sm:$0xf] }
  0x4d   : > { %v1478_v52 = vor.u32 %v1744_v50, %v1475_v51  ;;  %v1481_v51 = vld [vmem:[%s1911_s26 + $0xa0] sm:$0xf] }
  0x52   : > { %1695 = vmatmul.msk.bf16.gmra.mxu1 %vm657_vm0, %v1438_v53 }
  0x53   : > { %1712 = vmatmul.msk.bf16.gmra.mxu3 %vm657_vm0, %v1574_v58  ;;  %v1743_v58 = vld [vmem:[%s1911_s26 + $0x84] sm:$0xf0] }
  0x54   : > { %v1466_v63 = vor.u32 %v1743_v58, %v1465_v57  ;;  %v1779_v57 = vld [vmem:[%s1911_s26 + $0x1a4] sm:$0xf0] }
  0x5c   : > { %777 = vmatmul.bf16.gmra.mxu0 %v1426_v61  ;;  %857 = vmatmul.bf16.gmra.mxu2 %v1554_v62  ;;  %v1593_v61 = vld [vmem:[%s1911_s26 + $0x180] sm:$0xf]  ;;  %v1775_v62 = vld [vmem:[%s1911_s26 + $0x184] sm:$0xf0] }
  0x62   : > { %1696 = vmatmul.msk.bf16.gmra.mxu1 %vm657_vm0, %v1446_v1  ;;  %v1594_v1 = vor.u32 %v1775_v62, %v1593_v61 }
  0x63   : > { %1713 = vmatmul.msk.bf16.gmra.mxu3 %vm657_vm0, %v1582_v6 }
  0x6c   : > { %782 = vmatmul.bf16.gmra.mxu0 %v1434_v9  ;;  %862 = vmatmul.bf16.gmra.mxu2 %v1562_v10 }
  0x72   : > { %1697 = vmatmul.msk.bf16.gmra.mxu1 %vm657_vm0, %v1454_v13 }
  0x73   : > { %1714 = vmatmul.msk.bf16.gmra.mxu3 %vm657_vm0, %v1590_v18  ;;  %v1619_v18 = vld [vmem:[%s1911_s26 + $0x1b8] sm:$0xf0] }
  0x7c   : > { %787 = vmatmul.bf16.gmra.mxu0 %v1442_v21  ;;  %867 = vmatmul.bf16.gmra.mxu2 %v1570_v22  ;;  %v1622_v21 = vor.u32 %v1780_v17, %v1619_v18 }
  0x82   : > { %1698 = vmatmul.msk.bf16.gmra.mxu1 %vm657_vm0, %v1462_v25 }
  0x83   : > { %1715 = vmatmul.msk.bf16.gmra.mxu3 %vm657_vm0, %v1598_v30 }
  0x8c   : > { %792 = vmatmul.bf16.gmra.mxu0 %v1450_v33  ;;  %872 = vmatmul.bf16.gmra.mxu2 %v1578_v34 }
  0x8f   : > { %v932_v38 = vpop.f32.mrf.mxu1 }
  0x92   : > { %1699 = vmatmul.msk.bf16.gmra.mxu1 %vm657_vm0, %v1470_v37 }
  0x93   : > { %1716 = vmatmul.msk.bf16.gmra.mxu3 %vm657_vm0, %v1606_v43 }
  0x96   : > { %v2017_v49 = vpop.f32.mrf.mxu3 }
  0x97   : > { %v934_v48 = vpop.f32.mrf.mxu1 }
  0x9c   : > { %797 = vmatmul.bf16.gmra.mxu0 %v1458_v46  ;;  %877 = vmatmul.bf16.gmra.mxu2 %v1586_v47  ;;  %v1782_v47 = vld [vmem:[%s1911_s26 + $0x1c4] sm:$0xf] }
  0x9e   : > { %v2021_v54 = vpop.f32.mrf.mxu3 }
  0x9f   : > { %v937_v53 = vpop.f32.mrf.mxu1 }
  0xa2   : > { %1700 = vmatmul.msk.bf16.gmra.mxu1 %vm657_vm0, %v1478_v52  ;;  %v1747_v52 = vld [vmem:[%s1911_s26 + $0xa4] sm:$0xf0] }
  0xa3   : > { %1717 = vmatmul.msk.bf16.gmra.mxu3 %vm657_vm0, %v1614_v59 }
  0xa6   : > { %v2037_v4 = vpop.f32.mrf.mxu3 }
  0xa7   : > { %v939_v3 = vpop.f32.mrf.mxu1 }
  0xa9   : > { %v763_v0 = vpop.f32.mrf.mxu0 }
  0xaa   : > { %v764_v2 = vadd.f32 %v2031_v60, %v763_v0  ;;  %v1610_v0 = vor.u32 %v1779_v57, %v1609_v56 }
  0xac   : > { %v933_v5 = vadd.f32 %v932_v38, %v764_v2  ;;  %802 = vmatmul.bf16.gmra.mxu0 %v1466_v63  ;;  %882 = vmatmul.bf16.gmra.mxu2 %v1594_v1 }
  0xae   : > { %v1092_v6 = vmax.f32 %v933_v5, 0.0  ;;  %v2054_v15 = vpop.f32.mrf.mxu3 }
  0xaf   : > { %v2047_v10 = vpop.f32.mrf.mxu2  ;;  %v2052_v14 = vpop.f32.mrf.mxu1 }
  0xb0   : > { %v1156_v9 = vpack.c.bf16 %v1092_v6, %v1092_v6 }
  0xb1   : > { %v765_v11 = vpop.f32.mrf.mxu0 }
  0xb2   : > { %1221 = vst.msk [vmem:[%s2045_s21] sm:$0xf] %vm1220_vm1, %v1156_v9  ;;  %v766_v13 = vadd.f32 %v2031_v60, %v765_v11  ;;  %1701 = vmatmul.msk.bf16.gmra.mxu1 %vm657_vm0, %v1486_v12  ;;  %v1750_v9 = vld [vmem:[%s1911_s26 + $0xc4] sm:$0xf]  ;;  %v1499_v11 = vld [vmem:[%s1911_s26 + $0xc8] sm:$0xf0] }
  0xb3   : > { %1718 = vmatmul.msk.bf16.gmra.mxu3 %vm657_vm0, %v1622_v21 }
  0xb4   : > { %v935_v16 = vadd.f32 %v934_v48, %v766_v13  ;;  %v1627_v48 = vld [vmem:[%s1911_s26 + $0x1c8] sm:$0xf0] }
  0xb6   : > { %v1093_v22 = vmax.f32 %v935_v16, 0.0  ;;  %v2069_v32 = vpop.f32.mrf.mxu3 }
  0xb7   : > { %v2063_v26 = vpop.f32.mrf.mxu2  ;;  %v944_v31 = vpop.f32.mrf.mxu1 }
  0xb8   : > { %v1157_v25 = vpack.c.bf16 %v1093_v22, %v1093_v22 }
  0xb9   : > { %v768_v28 = vpop.f32.mrf.mxu0 }
  0xba   : > { %1222 = vst.msk [vmem:[%s2045_s21 + $0x4] sm:$0xf] %vm1220_vm1, %v1157_v25  ;;  %v769_v30 = vadd.f32 %v2031_v60, %v768_v28  ;;  %v1749_v28 = vld [vmem:[%s1911_s26 + $0xb4] sm:$0xf0] }
  0xbc   : > { %v938_v33 = vadd.f32 %v937_v53, %v769_v30  ;;  %807 = vmatmul.bf16.gmra.mxu0 %v1474_v27  ;;  %887 = vmatmul.bf16.gmra.mxu2 %v1602_v29  ;;  %v1630_v53 = vor.u32 %v1782_v47, %v1627_v48  ;;  %v1489_v27 = vld [vmem:[%s1911_s26 + $0xb0] sm:$0xf]  ;;  %v1638_v29 = vor.u32 %v1784_v23, %v1635_v24 }
  0xbe   : > { %v1094_v34 = vmax.f32 %v938_v33, 0.0  ;;  %v2080_v45 = vpop.f32.mrf.mxu3  ;;  %v1617_v33 = vld [vmem:[%s1911_s26 + $0x1b0] sm:$0xf] }
  0xbf   : > { %v848_v38 = vpop.f32.mrf.mxu2  ;;  %v2077_v43 = vpop.f32.mrf.mxu1 }
  0xc0   : > { %v1158_v37 = vpack.c.bf16 %v1094_v34, %v1094_v34  ;;  %v849_v39 = vadd.f32 %v2031_v60, %v848_v38  ;;  %v1781_v34 = vld [vmem:[%s1911_s26 + $0x1b4] sm:$0xf0] }
  0xc1   : > { %v770_v40 = vpop.f32.mrf.mxu0 }
  0xc2   : > { %1223 = vst.msk [vmem:[%s2045_s21 + $0x8] sm:$0xf] %vm1220_vm1, %v1158_v37  ;;  %v771_v42 = vadd.f32 %v2031_v60, %v770_v40  ;;  %v1018_v44 = vadd.f32 %v2017_v49, %v849_v39  ;;  %1702 = vmatmul.msk.bf16.gmra.mxu1 %vm657_vm0, %v1494_v41  ;;  %v1482_v49 = vor.u32 %v1747_v52, %v1481_v51  ;;  %v1507_v51 = vld [vmem:[%s1911_s26 + $0xd8] sm:$0xf0] }
  0xc3   : > { %1719 = vmatmul.msk.bf16.gmra.mxu3 %vm657_vm0, %v1630_v53  ;;  %v1618_v39 = vor.u32 %v1781_v34, %v1617_v33 }
  0xc4   : > { %v940_v46 = vadd.f32 %v939_v3, %v771_v42  ;;  %v1126_v50 = vmax.f32 %v1018_v44, 0.0 }
  0xc6   : > { %v1095_v55 = vmax.f32 %v940_v46, 0.0  ;;  %v1190_v58 = vpack.c.bf16 %v1126_v50, %v1126_v50  ;;  %v2099_v5 = vpop.f32.mrf.mxu3  ;;  %v1752_v50 = vld [vmem:[%s1911_s26 + $0xd4] sm:$0xf] }
  0xc7   : > { %v850_v61 = vpop.f32.mrf.mxu2  ;;  %v2096_v2 = vpop.f32.mrf.mxu1 }
  0xc8   : > { %v1159_v59 = vpack.c.bf16 %v1095_v55, %v1095_v55  ;;  %1255 = vst.msk [vmem:[%s2045_s21 + $0x88] sm:$0xf] %vm1220_vm1, %v1190_v58  ;;  %v851_v62 = vadd.f32 %v2031_v60, %v850_v61 }
  0xc9   : > { %v773_v63 = vpop.f32.mrf.mxu0 }
  0xca   : > { %1224 = vst.msk [vmem:[%s2045_s21 + $0xc] sm:$0xf] %vm1220_vm1, %v1159_v59  ;;  %v774_v1 = vadd.f32 %v2031_v60, %v773_v63  ;;  %v1020_v3 = vadd.f32 %v2021_v54, %v851_v62  ;;  %v1786_v62 = vld [vmem:[%s1911_s26 + $0x1e4] sm:$0xf]  ;;  %v1643_v63 = vld [vmem:[%s1911_s26 + $0x1e8] sm:$0xf0] }
  0xcc   : > { %v943_v6 = vadd.f32 %v2052_v14, %v774_v1  ;;  %812 = vmatmul.bf16.gmra.mxu0 %v1482_v49  ;;  %v1127_v7 = vmax.f32 %v1020_v3, 0.0  ;;  %892 = vmatmul.bf16.gmra.mxu2 %v1610_v0  ;;  %v1502_v14 = vor.u32 %v1750_v9, %v1499_v11  ;;  %v1497_v1 = vld [vmem:[%s1911_s26 + $0xc0] sm:$0xf]  ;;  %v1751_v3 = vld [vmem:[%s1911_s26 + $0xc4] sm:$0xf0] }
  0xcd   : > { %v1783_v9 = vld [vmem:[%s1911_s26 + $0x1c4] sm:$0xf0] }
  0xce   : > { %v1096_v8 = vmax.f32 %v943_v6, 0.0  ;;  %v1191_v12 = vpack.c.bf16 %v1127_v7, %v1127_v7  ;;  %v2113_v21 = vpop.f32.mrf.mxu3  ;;  %v1646_v6 = vor.u32 %v1786_v62, %v1643_v63  ;;  %v1756_v63 = vld [vmem:[%s1911_s26 + $0xf4] sm:$0xf] }
  0xcf   : > { %v853_v16 = vpop.f32.mrf.mxu2  ;;  %v2110_v19 = vpop.f32.mrf.mxu1 }
  0xd0   : > { %v1160_v13 = vpack.c.bf16 %v1096_v8, %v1096_v8  ;;  %1256 = vst.msk [vmem:[%s2045_s21 + $0x8c] sm:$0xf] %vm1220_vm1, %v1191_v12  ;;  %v854_v54 = vadd.f32 %v2031_v60, %v853_v16  ;;  %v1625_v8 = vld [vmem:[%s1911_s26 + $0x1c0] sm:$0xf] }
  0xd1   : > { %v775_v17 = vpop.f32.mrf.mxu0 }
  0xd2   : > { %1225 = vst.msk [vmem:[%s2045_s21 + $0x10] sm:$0xf] %vm1220_vm1, %v1160_v13  ;;  %v776_v18 = vadd.f32 %v2031_v60, %v775_v17  ;;  %v1023_v20 = vadd.f32 %v2037_v4, %v854_v54  ;;  %1703 = vmatmul.msk.bf16.gmra.mxu1 %vm657_vm0, %v1502_v14  ;;  %v1490_v4 = vor.u32 %v1749_v28, %v1489_v27  ;;  %v1515_v27 = vld [vmem:[%s1911_s26 + $0xe8] sm:$0xf0] }
  0xd3   : > { %1720 = vmatmul.msk.bf16.gmra.mxu3 %vm657_vm0, %v1638_v29  ;;  %v1498_v13 = vor.u32 %v1751_v3, %v1497_v1  ;;  %v1626_v54 = vor.u32 %v1783_v9, %v1625_v8 }
  0xd4   : > { %v945_v22 = vadd.f32 %v944_v31, %v776_v18  ;;  %v1128_v25 = vmax.f32 %v1023_v20, 0.0 }
  0xd6   : > { %v1097_v30 = vmax.f32 %v945_v22, 0.0  ;;  %v1192_v35 = vpack.c.bf16 %v1128_v25, %v1128_v25  ;;  %v2132_v44 = vpop.f32.mrf.mxu3  ;;  %v1754_v25 = vld [vmem:[%s1911_s26 + $0xe4] sm:$0xf] }
  0xd7   : > { %v855_v37 = vpop.f32.mrf.mxu2  ;;  %v2129_v41 = vpop.f32.mrf.mxu1  ;;  %v1518_v33 = vor.u32 %v1754_v25, %v1515_v27 }
  0xd8   : > { %v1161_v36 = vpack.c.bf16 %v1097_v30, %v1097_v30  ;;  %1257 = vst.msk [vmem:[%s2045_s21 + $0x90] sm:$0xf] %vm1220_vm1, %v1192_v35  ;;  %v856_v31 = vadd.f32 %v2031_v60, %v855_v37 }
  0xd9   : > { %v778_v38 = vpop.f32.mrf.mxu0 }
  0xda   : > { %1226 = vst.msk [vmem:[%s2045_s21 + $0x14] sm:$0xf] %vm1220_vm1, %v1161_v36  ;;  %v779_v40 = vadd.f32 %v2031_v60, %v778_v38  ;;  %v1025_v42 = vadd.f32 %v2054_v15, %v856_v31  ;;  %v1651_v31 = vld [vmem:[%s1911_s26 + $0x1f8] sm:$0xf0] }
  0xdc   : > { %v948_v46 = vadd.f32 %v2077_v43, %v779_v40  ;;  %817 = vmatmul.bf16.gmra.mxu0 %v1490_v4  ;;  %v1129_v47 = vmax.f32 %v1025_v42, 0.0  ;;  %897 = vmatmul.bf16.gmra.mxu2 %v1618_v39  ;;  %v1510_v43 = vor.u32 %v1752_v50, %v1507_v51  ;;  %v1788_v4 = vld [vmem:[%s1911_s26 + $0x1f4] sm:$0xf]  ;;  %v1505_v39 = vld [vmem:[%s1911_s26 + $0xd0] sm:$0xf] }
  0xdd   : > { %v1753_v40 = vld [vmem:[%s1911_s26 + $0xd4] sm:$0xf0]  ;;  %v1654_v42 = vor.u32 %v1788_v4, %v1651_v31 }
  0xde   : > { %v1098_v48 = vmax.f32 %v948_v46, 0.0  ;;  %v1193_v52 = vpack.c.bf16 %v1129_v47, %v1129_v47  ;;  %v2146_v61 = vpop.f32.mrf.mxu3  ;;  %v1633_v47 = vld [vmem:[%s1911_s26 + $0x1d0] sm:$0xf] }
  0xdf   : > { %v858_v55 = vpop.f32.mrf.mxu2  ;;  %v2143_v58 = vpop.f32.mrf.mxu1 }
  0xe0   : > { %v1162_v53 = vpack.c.bf16 %v1098_v48, %v1098_v48  ;;  %1258 = vst.msk [vmem:[%s2045_s21 + $0x94] sm:$0xf] %vm1220_vm1, %v1193_v52  ;;  %v859_v15 = vadd.f32 %v2031_v60, %v858_v55  ;;  %v1785_v48 = vld [vmem:[%s1911_s26 + $0x1d4] sm:$0xf0] }
  0xe1   : > { %v780_v56 = vpop.f32.mrf.mxu0 }
  0xe2   : > { %1227 = vst.msk [vmem:[%s2045_s21 + $0x18] sm:$0xf] %vm1220_vm1, %v1162_v53  ;;  %v781_v57 = vadd.f32 %v2031_v60, %v780_v56  ;;  %v1028_v59 = vadd.f32 %v2069_v32, %v859_v15  ;;  %1704 = vmatmul.msk.bf16.gmra.mxu1 %vm657_vm0, %v1510_v43  ;;  %v1634_v15 = vor.u32 %v1785_v48, %v1633_v47 }
  0xe3   : > { %1721 = vmatmul.msk.bf16.gmra.mxu3 %vm657_vm0, %v1646_v6 }
  0xe4   : > { %v950_v49 = vadd.f32 %v2096_v2, %v781_v57  ;;  %v1130_v0 = vmax.f32 %v1028_v59, 0.0 }
  0xe6   : > { %v1099_v7 = vmax.f32 %v950_v49, 0.0  ;;  %v1194_v11 = vpack.c.bf16 %v1130_v0, %v1130_v0  ;;  %v2167_v22 = vpop.f32.mrf.mxu3  ;;  %v1523_v0 = vld [vmem:[%s1911_s26 + $0xf8] sm:$0xf0] }
  0xe7   : > { %v860_v32 = vpop.f32.mrf.mxu2  ;;  %v2163_v14 = vpop.f32.mrf.mxu1  ;;  %v1526_v8 = vor.u32 %v1756_v63, %v1523_v0 }
  0xe8   : > { %v1163_v12 = vpack.c.bf16 %v1099_v7, %v1099_v7  ;;  %1259 = vst.msk [vmem:[%s2045_s21 + $0x98] sm:$0xf] %vm1220_vm1, %v1194_v11  ;;  %v861_v2 = vadd.f32 %v2031_v60, %v860_v32 }
  0xe9   : > { %v783_v16 = vpop.f32.mrf.mxu0 }
  0xea   : > { %1228 = vst.msk [vmem:[%s2045_s21 + $0x1c] sm:$0xf] %vm1220_vm1, %v1163_v12  ;;  %v784_v17 = vadd.f32 %v2031_v60, %v783_v16  ;;  %v1030_v18 = vadd.f32 %v2080_v45, %v861_v2  ;;  %v1513_v2 = vld [vmem:[%s1911_s26 + $0xe0] sm:$0xf]  ;;  %v1755_v16 = vld [vmem:[%s1911_s26 + $0xe4] sm:$0xf0] }
  0xeb   : > { %v1514_v25 = vor.u32 %v1755_v16, %v1513_v2 }
  0xec   : > { %v953_v20 = vadd.f32 %v2110_v19, %v784_v17  ;;  %822 = vmatmul.bf16.gmra.mxu0 %v1498_v13  ;;  %v1131_v23 = vmax.f32 %v1030_v18, 0.0  ;;  %902 = vmatmul.bf16.gmra.mxu2 %v1626_v54  ;;  %v1641_v17 = vld [vmem:[%s1911_s26 + $0x1e0] sm:$0xf]  ;;  %v1787_v18 = vld [vmem:[%s1911_s26 + $0x1e4] sm:$0xf0] }
  0xed   : > { %v1642_v27 = vor.u32 %v1787_v18, %v1641_v17 }
  0xee   : > { %v1100_v24 = vmax.f32 %v953_v20, 0.0  ;;  %v1195_v28 = vpack.c.bf16 %v1131_v23, %v1131_v23  ;;  %v2188_v50 = vpop.f32.mrf.mxu3 }
  0xef   : > { %v863_v30 = vpop.f32.mrf.mxu2  ;;  %v2177_v35 = vpop.f32.mrf.mxu1 }
  0xf0   : > { %v1164_v29 = vpack.c.bf16 %v1100_v24, %v1100_v24  ;;  %1260 = vst.msk [vmem:[%s2045_s21 + $0x9c] sm:$0xf] %vm1220_vm1, %v1195_v28  ;;  %v864_v45 = vadd.f32 %v2031_v60, %v863_v30 }
  0xf1   : > { %v785_v19 = vpop.f32.mrf.mxu0 }
  0xf2   : > { %1229 = vst.msk [vmem:[%s2045_s21 + $0x20] sm:$0xf] %vm1220_vm1, %v1164_v29  ;;  %v786_v34 = vadd.f32 %v2031_v60, %v785_v19  ;;  %v1033_v36 = vadd.f32 %v2099_v5, %v864_v45  ;;  %1705 = vmatmul.msk.bf16.gmra.mxu1 %vm657_vm0, %v1518_v33 }
  0xf3   : > { %1722 = vmatmul.msk.bf16.gmra.mxu3 %vm657_vm0, %v1654_v42 }
  0xf4   : > { %v955_v37 = vadd.f32 %v2129_v41, %v786_v34  ;;  %v1132_v38 = vmax.f32 %v1033_v36, 0.0  ;;  %v1506_v41 = vor.u32 %v1753_v40, %v1505_v39  ;;  %v1758_v36 = vld [vmem:[%s1911_s26 + $0x104] sm:$0xf] }
  0xf6   : > { %v1101_v46 = vmax.f32 %v955_v37, 0.0  ;;  %v1196_v51 = vpack.c.bf16 %v1132_v38, %v1132_v38  ;;  %v2201_v7 = vpop.f32.mrf.mxu3  ;;  %v1531_v37 = vld [vmem:[%s1911_s26 + $0x108] sm:$0xf0] }
  0xf7   : > { %v865_v5 = vpop.f32.mrf.mxu2  ;;  %v964_v43 = vpop.f32.mrf.mxu1  ;;  %v1534_v40 = vor.u32 %v1758_v36, %v1531_v37 }
  0xf8   : > { %v1165_v52 = vpack.c.bf16 %v1101_v46, %v1101_v46  ;;  %1261 = vst.msk [vmem:[%s2045_s21 + $0xa0] sm:$0xf] %vm1220_vm1, %v1196_v51  ;;  %v866_v53 = vadd.f32 %v2031_v60, %v865_v5  ;;  %v1757_v5 = vld [vmem:[%s1911_s26 + $0xf4] sm:$0xf0] }
  0xf9   : > { %v788_v55 = vpop.f32.mrf.mxu0 }
  0xfa   : > { %1230 = vst.msk [vmem:[%s2045_s21 + $0x24] sm:$0xf] %vm1220_vm1, %v1165_v52  ;;  %v789_v56 = vadd.f32 %v2031_v60, %v788_v55  ;;  %v1035_v57 = vadd.f32 %v2113_v21, %v866_v53  ;;  %v1521_v52 = vld [vmem:[%s1911_s26 + $0xf0] sm:$0xf]  ;;  %v1789_v55 = vld [vmem:[%s1911_s26 + $0x1f4] sm:$0xf0] }
  0xfb   : > { %v1649_v53 = vld [vmem:[%s1911_s26 + $0x1f0] sm:$0xf] }
  0xfc   : > { %v958_v59 = vadd.f32 %v2143_v58, %v789_v56  ;;  %827 = vmatmul.bf16.gmra.mxu0 %v1506_v41  ;;  %v1133_v49 = vmax.f32 %v1035_v57, 0.0  ;;  %907 = vmatmul.bf16.gmra.mxu2 %v1634_v15 }
  0xfe   : > { %v1102_v62 = vmax.f32 %v958_v59, 0.0  ;;  %v1197_v1 = vpack.c.bf16 %v1133_v49, %v1133_v49  ;;  %v2222_v30 = vpop.f32.mrf.mxu3  ;;  %v1522_v59 = vor.u32 %v1757_v5, %v1521_v52  ;;  %v1650_v49 = vor.u32 %v1789_v55, %v1649_v53 }
  0xff   : > { %v868_v6 = vpop.f32.mrf.mxu2  ;;  %v967_v11 = vpop.f32.mrf.mxu1 }
 0x100   : > { %v1166_v3 = vpack.c.bf16 %v1102_v62, %v1102_v62  ;;  %1262 = vst.msk [vmem:[%s2045_s21 + $0xa4] sm:$0xf] %vm1220_vm1, %v1197_v1  ;;  %v869_v21 = vadd.f32 %v2031_v60, %v868_v6 }
 0x101   : > { %v790_v58 = vpop.f32.mrf.mxu0 }
 0x102   : > { %1231 = vst.msk [vmem:[%s2045_s21 + $0x28] sm:$0xf] %vm1220_vm1, %v1166_v3  ;;  %v791_v9 = vadd.f32 %v2031_v60, %v790_v58  ;;  %v1038_v12 = vadd.f32 %v2132_v44, %v869_v21  ;;  %1706 = vmatmul.msk.bf16.gmra.mxu1 %vm657_vm0, %v1526_v8 }
 0x104   : > { %v960_v32 = vadd.f32 %v2163_v14, %v791_v9  ;;  %v1134_v13 = vmax.f32 %v1038_v12, 0.0 }
 0x106   : > { %v1103_v54 = vmax.f32 %v960_v32, 0.0  ;;  %v1198_v20 = vpack.c.bf16 %v1134_v13, %v1134_v13  ;;  %v2235_v48 = vpop.f32.mrf.mxu3 }
 0x107   : > { %v870_v24 = vpop.f32.mrf.mxu2  ;;  %v969_v29 = vpop.f32.mrf.mxu1 }
 0x108   : > { %v1167_v23 = vpack.c.bf16 %v1103_v54, %v1103_v54  ;;  %1263 = vst.msk [vmem:[%s2045_s21 + $0xa8] sm:$0xf] %vm1220_vm1, %v1198_v20  ;;  %v871_v44 = vadd.f32 %v2031_v60, %v870_v24 }
 0x109   : > { %v793_v14 = vpop.f32.mrf.mxu0 }
 0x10a   : > { %1232 = vst.msk [vmem:[%s2045_s21 + $0x2c] sm:$0xf] %vm1220_vm1, %v1167_v23  ;;  %v794_v28 = vadd.f32 %v2031_v60, %v793_v14  ;;  %v1040_v45 = vadd.f32 %v2146_v61, %v871_v44 }
 0x10c   : > { %v963_v19 = vadd.f32 %v2177_v35, %v794_v28  ;;  %832 = vmatmul.bf16.gmra.mxu0 %v1514_v25  ;;  %v1135_v33 = vmax.f32 %v1040_v45, 0.0  ;;  %912 = vmatmul.bf16.gmra.mxu2 %v1642_v27 }
 0x10e   : > { %v1104_v34 = vmax.f32 %v963_v19, 0.0  ;;  %v1199_v4 = vpack.c.bf16 %v1135_v33, %v1135_v33  ;;  %v1054_v21 = vpop.f32.mrf.mxu3 }
 0x10f   : > { %v873_v38 = vpop.f32.mrf.mxu2  ;;  %v972_v42 = vpop.f32.mrf.mxu1 }
 0x110   : > { %v1168_v31 = vpack.c.bf16 %v1104_v34, %v1104_v34  ;;  %1264 = vst.msk [vmem:[%s2045_s21 + $0xac] sm:$0xf] %vm1220_vm1, %v1199_v4  ;;  %v874_v39 = vadd.f32 %v2031_v60, %v873_v38 }
 0x111   : > { %v795_v61 = vpop.f32.mrf.mxu0 }
 0x112   : > { %1233 = vst.msk [vmem:[%s2045_s21 + $0x30] sm:$0xf] %vm1220_vm1, %v1168_v31  ;;  %v796_v35 = vadd.f32 %v2031_v60, %v795_v61  ;;  %v1043_v46 = vadd.f32 %v2167_v22, %v874_v39  ;;  %1707 = vmatmul.msk.bf16.gmra.mxu1 %vm657_vm0, %v1534_v40 }
 0x114   : > { %v965_v47 = vadd.f32 %v964_v43, %v796_v35  ;;  %v1136_v51 = vmax.f32 %v1043_v46, 0.0 }
 0x116   : > { %v1105_v41 = vmax.f32 %v965_v47, 0.0  ;;  %v1200_v15 = vpack.c.bf16 %v1136_v51, %v1136_v51  ;;  %v1057_v23 = vpop.f32.mrf.mxu3 }
 0x117   : > { %v875_v57 = vpop.f32.mrf.mxu2  ;;  %v974_v63 = vpop.f32.mrf.mxu1 }
 0x118   : > { %v1169_v56 = vpack.c.bf16 %v1105_v41, %v1105_v41  ;;  %1265 = vst.msk [vmem:[%s2045_s21 + $0xb0] sm:$0xf] %vm1220_vm1, %v1200_v15  ;;  %v876_v22 = vadd.f32 %v2031_v60, %v875_v57 }
 0x119   : > { %v798_v43 = vpop.f32.mrf.mxu0 }
 0x11a   : > { %1234 = vst.msk [vmem:[%s2045_s21 + $0x34] sm:$0xf] %vm1220_vm1, %v1169_v56  ;;  %v799_v62 = vadd.f32 %v2031_v60, %v798_v43  ;;  %v1045_v0 = vadd.f32 %v2188_v50, %v876_v22 }
 0x11c   : > { %v968_v1 = vadd.f32 %v967_v11, %v799_v62  ;;  %837 = vmatmul.bf16.gmra.mxu0 %v1522_v59  ;;  %v1137_v3 = vmax.f32 %v1045_v0, 0.0  ;;  %917 = vmatmul.bf16.gmra.mxu2 %v1650_v49 }
 0x11e   : > { %v1106_v6 = vmax.f32 %v968_v1, 0.0  ;;  %v1201_v58 = vpack.c.bf16 %v1137_v3, %v1137_v3  ;;  %v1059_v31 = vpop.f32.mrf.mxu3 }
 0x11f   : > { %v878_v9 = vpop.f32.mrf.mxu2  ;;  %v977_v11 = vpop.f32.mrf.mxu1 }
 0x120   : > { %v1170_v8 = vpack.c.bf16 %v1106_v6, %v1106_v6  ;;  %1266 = vst.msk [vmem:[%s2045_s21 + $0xb4] sm:$0xf] %vm1220_vm1, %v1201_v58  ;;  %v879_v12 = vadd.f32 %v2031_v60, %v878_v9 }
 0x121   : > { %v800_v32 = vpop.f32.mrf.mxu0 }
 0x122   : > { %1235 = vst.msk [vmem:[%s2045_s21 + $0x38] sm:$0xf] %vm1220_vm1, %v1170_v8  ;;  %v801_v50 = vadd.f32 %v2031_v60, %v800_v32  ;;  %v1048_v13 = vadd.f32 %v2201_v7, %v879_v12 }
 0x124   : > { %v970_v2 = vadd.f32 %v969_v29, %v801_v50  ;;  %v1138_v16 = vmax.f32 %v1048_v13, 0.0 }
 0x126   : > { %v1107_v54 = vmax.f32 %v970_v2, 0.0  ;;  %v1202_v17 = vpack.c.bf16 %v1138_v16, %v1138_v16  ;;  %v1062_v41 = vpop.f32.mrf.mxu3 }
 0x127   : > { %v880_v20 = vpop.f32.mrf.mxu2  ;;  %v979_v14 = vpop.f32.mrf.mxu1 }
 0x128   : > { %v1171_v18 = vpack.c.bf16 %v1107_v54, %v1107_v54  ;;  %1267 = vst.msk [vmem:[%s2045_s21 + $0xb8] sm:$0xf] %vm1220_vm1, %v1202_v17  ;;  %v881_v24 = vadd.f32 %v2031_v60, %v880_v20 }
 0x129   : > { %v803_v25 = vpop.f32.mrf.mxu0 }
 0x12a   : > { %1236 = vst.msk [vmem:[%s2045_s21 + $0x3c] sm:$0xf] %vm1220_vm1, %v1171_v18  ;;  %v804_v44 = vadd.f32 %v2031_v60, %v803_v25  ;;  %v1050_v7 = vadd.f32 %v2222_v30, %v881_v24 }
 0x12c   : > { %v973_v27 = vadd.f32 %v972_v42, %v804_v44  ;;  %v1139_v28 = vmax.f32 %v1050_v7, 0.0 }
 0x12e   : > { %v1108_v29 = vmax.f32 %v973_v27, 0.0  ;;  %v1203_v45 = vpack.c.bf16 %v1139_v28, %v1139_v28  ;;  %v1064_v3 = vpop.f32.mrf.mxu3 }
 0x12f   : > { %v883_v33 = vpop.f32.mrf.mxu2  ;;  %v982_v4 = vpop.f32.mrf.mxu1 }
 0x130   : > { %v1172_v19 = vpack.c.bf16 %v1108_v29, %v1108_v29  ;;  %1268 = vst.msk [vmem:[%s2045_s21 + $0xbc] sm:$0xf] %vm1220_vm1, %v1203_v45  ;;  %v884_v34 = vadd.f32 %v2031_v60, %v883_v33 }
 0x131   : > { %v805_v36 = vpop.f32.mrf.mxu0 }
 0x132   : > { %1237 = vst.msk [vmem:[%s2045_s21 + $0x40] sm:$0xf] %vm1220_vm1, %v1172_v19  ;;  %v806_v37 = vadd.f32 %v2031_v60, %v805_v36  ;;  %v1053_v30 = vadd.f32 %v2235_v48, %v884_v34 }
 0x134   : > { %v975_v38 = vadd.f32 %v974_v63, %v806_v37  ;;  %v1140_v39 = vmax.f32 %v1053_v30, 0.0 }
 0x136   : > { %v1109_v61 = vmax.f32 %v975_v38, 0.0  ;;  %v1204_v40 = vpack.c.bf16 %v1140_v39, %v1140_v39  ;;  %v1067_v18 = vpop.f32.mrf.mxu3 }
 0x137   : > { %v885_v42 = vpop.f32.mrf.mxu2  ;;  %v984_v52 = vpop.f32.mrf.mxu1 }
 0x138   : > { %v1173_v35 = vpack.c.bf16 %v1109_v61, %v1109_v61  ;;  %1269 = vst.msk [vmem:[%s2045_s21 + $0xc0] sm:$0xf] %vm1220_vm1, %v1204_v40  ;;  %v886_v46 = vadd.f32 %v2031_v60, %v885_v42 }
 0x139   : > { %v808_v47 = vpop.f32.mrf.mxu0 }
 0x13a   : > { %1238 = vst.msk [vmem:[%s2045_s21 + $0x44] sm:$0xf] %vm1220_vm1, %v1173_v35  ;;  %v809_v51 = vadd.f32 %v2031_v60, %v808_v47  ;;  %v1055_v5 = vadd.f32 %v1054_v21, %v886_v46 }
 0x13c   : > { %v978_v48 = vadd.f32 %v977_v11, %v809_v51  ;;  %v1141_v53 = vmax.f32 %v1055_v5, 0.0 }
 0x13e   : > { %v1110_v55 = vmax.f32 %v978_v48, 0.0  ;;  %v1205_v15 = vpack.c.bf16 %v1141_v53, %v1141_v53  ;;  %v1069_v37 = vpop.f32.mrf.mxu3 }
 0x13f   : > { %v888_v57 = vpop.f32.mrf.mxu2  ;;  %v987_v49 = vpop.f32.mrf.mxu1 }
 0x140   : > { %v1174_v56 = vpack.c.bf16 %v1110_v55, %v1110_v55  ;;  %1270 = vst.msk [vmem:[%s2045_s21 + $0xc4] sm:$0xf] %vm1220_vm1, %v1205_v15  ;;  %v889_v59 = vadd.f32 %v2031_v60, %v888_v57 }
 0x141   : > { %v810_v22 = vpop.f32.mrf.mxu0 }
 0x142   : > { %1239 = vst.msk [vmem:[%s2045_s21 + $0x48] sm:$0xf] %vm1220_vm1, %v1174_v56  ;;  %v811_v43 = vadd.f32 %v2031_v60, %v810_v22  ;;  %v1058_v62 = vadd.f32 %v1057_v23, %v889_v59 }
 0x144   : > { %v980_v63 = vadd.f32 %v979_v14, %v811_v43  ;;  %v1142_v0 = vmax.f32 %v1058_v62, 0.0 }
 0x146   : > { %v1111_v1 = vmax.f32 %v980_v63, 0.0  ;;  %v1206_v6 = vpack.c.bf16 %v1142_v0, %v1142_v0  ;;  %v1072_v5 = vpop.f32.mrf.mxu3 }
 0x147   : > { %v890_v58 = vpop.f32.mrf.mxu2  ;;  %v989_v32 = vpop.f32.mrf.mxu1 }
 0x148   : > { %v1175_v21 = vpack.c.bf16 %v1111_v1, %v1111_v1  ;;  %1271 = vst.msk [vmem:[%s2045_s21 + $0xc8] sm:$0xf] %vm1220_vm1, %v1206_v6  ;;  %v891_v8 = vadd.f32 %v2031_v60, %v890_v58 }
 0x149   : > { %v813_v9 = vpop.f32.mrf.mxu0 }
 0x14a   : > { %1240 = vst.msk [vmem:[%s2045_s21 + $0x4c] sm:$0xf] %vm1220_vm1, %v1175_v21  ;;  %v814_v12 = vadd.f32 %v2031_v60, %v813_v9  ;;  %v1060_v50 = vadd.f32 %v1059_v31, %v891_v8 }
 0x14c   : > { %v983_v11 = vadd.f32 %v982_v4, %v814_v12  ;;  %v1143_v13 = vmax.f32 %v1060_v50, 0.0 }
 0x14e   : > { %v1112_v2 = vmax.f32 %v983_v11, 0.0  ;;  %v1207_v16 = vpack.c.bf16 %v1143_v13, %v1143_v13  ;;  %v1074_v0 = vpop.f32.mrf.mxu3 }
 0x14f   : > { %v893_v17 = vpop.f32.mrf.mxu2  ;;  %v992_v25 = vpop.f32.mrf.mxu1 }
 0x150   : > { %v1176_v54 = vpack.c.bf16 %v1112_v2, %v1112_v2  ;;  %1272 = vst.msk [vmem:[%s2045_s21 + $0xcc] sm:$0xf] %vm1220_vm1, %v1207_v16  ;;  %v894_v20 = vadd.f32 %v2031_v60, %v893_v17 }
 0x151   : > { %v815_v23 = vpop.f32.mrf.mxu0 }
 0x152   : > { %1241 = vst.msk [vmem:[%s2045_s21 + $0x50] sm:$0xf] %vm1220_vm1, %v1176_v54  ;;  %v816_v24 = vadd.f32 %v2031_v60, %v815_v23  ;;  %v1063_v44 = vadd.f32 %v1062_v41, %v894_v20 }
 0x154   : > { %v985_v14 = vadd.f32 %v984_v52, %v816_v24  ;;  %v1144_v7 = vmax.f32 %v1063_v44, 0.0 }
 0x156   : > { %v1113_v27 = vmax.f32 %v985_v14, 0.0  ;;  %v1208_v28 = vpack.c.bf16 %v1144_v7, %v1144_v7  ;;  %v1077_v54 = vpop.f32.mrf.mxu3 }
 0x157   : > { %v895_v45 = vpop.f32.mrf.mxu2  ;;  %v994_v36 = vpop.f32.mrf.mxu1 }
 0x158   : > { %v1177_v29 = vpack.c.bf16 %v1113_v27, %v1113_v27  ;;  %1273 = vst.msk [vmem:[%s2045_s21 + $0xd0] sm:$0xf] %vm1220_vm1, %v1208_v28  ;;  %v896_v19 = vadd.f32 %v2031_v60, %v895_v45 }
 0x159   : > { %v818_v33 = vpop.f32.mrf.mxu0 }
 0x15a   : > { %1242 = vst.msk [vmem:[%s2045_s21 + $0x54] sm:$0xf] %vm1220_vm1, %v1177_v29  ;;  %v819_v34 = vadd.f32 %v2031_v60, %v818_v33  ;;  %v1065_v4 = vadd.f32 %v1064_v3, %v896_v19 }
 0x15c   : > { %v988_v31 = vadd.f32 %v987_v49, %v819_v34  ;;  %v1145_v30 = vmax.f32 %v1065_v4, 0.0 }
 0x15e   : > { %v1114_v38 = vmax.f32 %v988_v31, 0.0  ;;  %v1209_v39 = vpack.c.bf16 %v1145_v30, %v1145_v30  ;;  %v1079_v34 = vpop.f32.mrf.mxu3 }
 0x15f   : > { %v898_v40 = vpop.f32.mrf.mxu2  ;;  %v997_v47 = vpop.f32.mrf.mxu1 }
 0x160   : > { %v1178_v61 = vpack.c.bf16 %v1114_v38, %v1114_v38  ;;  %1274 = vst.msk [vmem:[%s2045_s21 + $0xd4] sm:$0xf] %vm1220_vm1, %v1209_v39  ;;  %v899_v35 = vadd.f32 %v2031_v60, %v898_v40 }
 0x161   : > { %v820_v42 = vpop.f32.mrf.mxu0 }
 0x162   : > { %1243 = vst.msk [vmem:[%s2045_s21 + $0x58] sm:$0xf] %vm1220_vm1, %v1178_v61  ;;  %v821_v46 = vadd.f32 %v2031_v60, %v820_v42  ;;  %v1068_v51 = vadd.f32 %v1067_v18, %v899_v35 }
 0x164   : > { %v990_v52 = vadd.f32 %v989_v32, %v821_v46  ;;  %v1146_v48 = vmax.f32 %v1068_v51, 0.0 }
 0x166   : > { %v1115_v41 = vmax.f32 %v990_v52, 0.0  ;;  %v1210_v53 = vpack.c.bf16 %v1146_v48, %v1146_v48  ;;  %v1082_v51 = vpop.f32.mrf.mxu3 }
 0x167   : > { %v900_v15 = vpop.f32.mrf.mxu2  ;;  %v999_v22 = vpop.f32.mrf.mxu1 }
 0x168   : > { %v1179_v55 = vpack.c.bf16 %v1115_v41, %v1115_v41  ;;  %1275 = vst.msk [vmem:[%s2045_s21 + $0xd8] sm:$0xf] %vm1220_vm1, %v1210_v53  ;;  %v901_v56 = vadd.f32 %v2031_v60, %v900_v15 }
 0x169   : > { %v823_v57 = vpop.f32.mrf.mxu0 }
 0x16a   : > { %1244 = vst.msk [vmem:[%s2045_s21 + $0x5c] sm:$0xf] %vm1220_vm1, %v1179_v55  ;;  %v824_v59 = vadd.f32 %v2031_v60, %v823_v57  ;;  %v1070_v43 = vadd.f32 %v1069_v37, %v901_v56  ;;  %v844_v55 = vadd.f32 %v2031_v60, %v2047_v10 }
 0x16c   : > { %v993_v49 = vadd.f32 %v992_v25, %v824_v59  ;;  %v1147_v62 = vmax.f32 %v1070_v43, 0.0 }
 0x16e   : > { %v1116_v63 = vmax.f32 %v993_v49, 0.0  ;;  %v1211_v1 = vpack.c.bf16 %v1147_v62, %v1147_v62  ;;  %v1084_v10 = vpop.f32.mrf.mxu3 }
 0x16f   : > { %v903_v6 = vpop.f32.mrf.mxu2  ;;  %v1002_v9 = vpop.f32.mrf.mxu1 }
 0x170   : > { %v1180_v3 = vpack.c.bf16 %v1116_v63, %v1116_v63  ;;  %1276 = vst.msk [vmem:[%s2045_s21 + $0xdc] sm:$0xf] %vm1220_vm1, %v1211_v1  ;;  %v904_v21 = vadd.f32 %v2031_v60, %v903_v6 }
 0x171   : > { %v825_v58 = vpop.f32.mrf.mxu0 }
 0x172   : > { %1245 = vst.msk [vmem:[%s2045_s21 + $0x60] sm:$0xf] %vm1220_vm1, %v1180_v3  ;;  %v826_v8 = vadd.f32 %v2031_v60, %v825_v58  ;;  %v1073_v12 = vadd.f32 %v1072_v5, %v904_v21  ;;  %v1833_v58 = vld [vmem:[%s2377_s2] ss:$0 sm:$0xff] }
 0x174   : > { %v995_v32 = vadd.f32 %v994_v36, %v826_v8  ;;  %v1148_v50 = vmax.f32 %v1073_v12, 0.0 }
 0x176   : > { %v1117_v11 = vmax.f32 %v995_v32, 0.0  ;;  %v1212_v13 = vpack.c.bf16 %v1148_v50, %v1148_v50 }
 0x177   : > { %v905_v16 = vpop.f32.mrf.mxu2  ;;  %v1004_v23 = vpop.f32.mrf.mxu1 }
 0x178   : > { %v1181_v2 = vpack.c.bf16 %v1117_v11, %v1117_v11  ;;  %1277 = vst.msk [vmem:[%s2045_s21 + $0xe0] sm:$0xf] %vm1220_vm1, %v1212_v13  ;;  %v906_v17 = vadd.f32 %v2031_v60, %v905_v16 }
 0x179   : > { %v828_v18 = vpop.f32.mrf.mxu0 }
 0x17a   : > { %1246 = vst.msk [vmem:[%s2045_s21 + $0x64] sm:$0xf] %vm1220_vm1, %v1181_v2  ;;  %v829_v20 = vadd.f32 %v2031_v60, %v828_v18  ;;  %v1075_v24 = vadd.f32 %v1074_v0, %v906_v17 }
 0x17c   : > { %v998_v25 = vadd.f32 %v997_v47, %v829_v20  ;;  %v1149_v44 = vmax.f32 %v1075_v24, 0.0  ;;  %v1087_v20 = vpop.f32.mrf.mxu3 }
 0x17e   : > { %v1118_v14 = vmax.f32 %v998_v25, 0.0  ;;  %v1213_v7 = vpack.c.bf16 %v1149_v44, %v1149_v44 }
 0x17f   : > { %v908_v28 = vpop.f32.mrf.mxu2  ;;  %v1007_v33 = vpop.f32.mrf.mxu1 }
 0x180   : > { %v1182_v27 = vpack.c.bf16 %v1118_v14, %v1118_v14  ;;  %1278 = vst.msk [vmem:[%s2045_s21 + $0xe4] sm:$0xf] %vm1220_vm1, %v1213_v7  ;;  %v909_v29 = vadd.f32 %v2031_v60, %v908_v28 }
 0x181   : > { %v830_v45 = vpop.f32.mrf.mxu0 }
 0x182   : > { %1247 = vst.msk [vmem:[%s2045_s21 + $0x68] sm:$0xf] %vm1220_vm1, %v1182_v27  ;;  %v831_v19 = vadd.f32 %v2031_v60, %v830_v45  ;;  %v1078_v36 = vadd.f32 %v1077_v54, %v909_v29 }
 0x184   : > { %v1000_v37 = vadd.f32 %v999_v22, %v831_v19  ;;  %v1150_v4 = vmax.f32 %v1078_v36, 0.0 }
 0x186   : > { %v1119_v31 = vmax.f32 %v1000_v37, 0.0  ;;  %v1214_v30 = vpack.c.bf16 %v1150_v4, %v1150_v4 }
 0x187   : > { %v910_v39 = vpop.f32.mrf.mxu2  ;;  %v1009_v42 = vpop.f32.mrf.mxu1 }
 0x188   : > { %v1183_v38 = vpack.c.bf16 %v1119_v31, %v1119_v31  ;;  %1279 = vst.msk [vmem:[%s2045_s21 + $0xe8] sm:$0xf] %vm1220_vm1, %v1214_v30  ;;  %v911_v61 = vadd.f32 %v2031_v60, %v910_v39 }
 0x189   : > { %v833_v40 = vpop.f32.mrf.mxu0 }
 0x18a   : > { %1248 = vst.msk [vmem:[%s2045_s21 + $0x6c] sm:$0xf] %vm1220_vm1, %v1183_v38  ;;  %v834_v35 = vadd.f32 %v2031_v60, %v833_v40  ;;  %v1080_v46 = vadd.f32 %v1079_v34, %v911_v61  ;;  %v1089_v34 = vpop.f32.mrf.mxu3 }
 0x18c   : > { %v1003_v47 = vadd.f32 %v1002_v9, %v834_v35  ;;  %v1151_v52 = vmax.f32 %v1080_v46, 0.0 }
 0x18e   : > { %v1120_v5 = vmax.f32 %v1003_v47, 0.0  ;;  %v1215_v48 = vpack.c.bf16 %v1151_v52, %v1151_v52 }
 0x18f   : > { %v913_v53 = vpop.f32.mrf.mxu2  ;;  %v1012_v59 = vpop.f32.mrf.mxu1 }
 0x190   : > { %v1184_v41 = vpack.c.bf16 %v1120_v5, %v1120_v5  ;;  %1280 = vst.msk [vmem:[%s2045_s21 + $0xec] sm:$0xf] %vm1220_vm1, %v1215_v48  ;;  %v914_v15 = vadd.f32 %v2031_v60, %v913_v53  ;;  %v1013_v43 = vadd.f32 %v1012_v59, %v844_v55 }
 0x191   : > { %v835_v56 = vpop.f32.mrf.mxu0 }
 0x192   : > { %1249 = vst.msk [vmem:[%s2045_s21 + $0x70] sm:$0xf] %vm1220_vm1, %v1184_v41  ;;  %v836_v57 = vadd.f32 %v2031_v60, %v835_v56  ;;  %v1083_v22 = vadd.f32 %v1082_v51, %v914_v15  ;;  %v1124_v63 = vmax.f32 %v1013_v43, 0.0  ;;  %v846_v60 = vadd.f32 %v1833_v58, %v2063_v26 }
 0x194   : > { %v1005_v49 = vadd.f32 %v1004_v23, %v836_v57  ;;  %v1152_v62 = vmax.f32 %v1083_v22, 0.0  ;;  %v1188_v3 = vpack.c.bf16 %v1124_v63, %v1124_v63 }
 0x196   : > { %v1121_v0 = vmax.f32 %v1005_v49, 0.0  ;;  %v1216_v1 = vpack.c.bf16 %v1152_v62, %v1152_v62  ;;  %1253 = vst.msk [vmem:[%s2045_s21 + $0x80] sm:$0xf] %vm1220_vm1, %v1188_v3 }
 0x197   : > { %v915_v21 = vpop.f32.mrf.mxu2  ;;  %v1014_v32 = vpop.f32.mrf.mxu1 }
 0x198   : > { %v1185_v6 = vpack.c.bf16 %v1121_v0, %v1121_v0  ;;  %1281 = vst.msk [vmem:[%s2045_s21 + $0xf0] sm:$0xf] %vm1220_vm1, %v1216_v1  ;;  %v916_v8 = vadd.f32 %v1833_v58, %v915_v21  ;;  %v1015_v11 = vadd.f32 %v1014_v32, %v846_v60 }
 0x199   : > { %v838_v9 = vpop.f32.mrf.mxu0 }
 0x19a   : > { %1250 = vst.msk [vmem:[%s2045_s21 + $0x74] sm:$0xf] %vm1220_vm1, %v1185_v6  ;;  %v839_v12 = vadd.f32 %v1833_v58, %v838_v9  ;;  %v1085_v50 = vadd.f32 %v1084_v10, %v916_v8  ;;  %v1125_v16 = vmax.f32 %v1015_v11, 0.0 }
 0x19c   : > { %v1008_v13 = vadd.f32 %v1007_v33, %v839_v12  ;;  %v1153_v2 = vmax.f32 %v1085_v50, 0.0  ;;  %v1189_v17 = vpack.c.bf16 %v1125_v16, %v1125_v16 }
 0x19e   : > { %v1122_v54 = vmax.f32 %v1008_v13, 0.0  ;;  %v1217_v26 = vpack.c.bf16 %v1153_v2, %v1153_v2  ;;  %1254 = vst.msk [vmem:[%s2045_s21 + $0x84] sm:$0xf] %vm1220_vm1, %v1189_v17 }
 0x19f   : > { %v918_v23 = vpop.f32.mrf.mxu2 }
 0x1a0   : > { %v1186_v18 = vpack.c.bf16 %v1122_v54, %v1122_v54  ;;  %1282 = vst.msk [vmem:[%s2045_s21 + $0xf4] sm:$0xf] %vm1220_vm1, %v1217_v26  ;;  %v919_v24 = vadd.f32 %v1833_v58, %v918_v23 }
 0x1a1   : > { %v840_v25 = vpop.f32.mrf.mxu0 }
 0x1a2   : > { %1251 = vst.msk [vmem:[%s2045_s21 + $0x78] sm:$0xf] %vm1220_vm1, %v1186_v18  ;;  %v841_v44 = vadd.f32 %v1833_v58, %v840_v25  ;;  %v1088_v14 = vadd.f32 %v1087_v20, %v919_v24 }
 0x1a4   : > { %v1010_v7 = vadd.f32 %v1009_v42, %v841_v44  ;;  %v1154_v27 = vmax.f32 %v1088_v14, 0.0 }
 0x1a6   : > { %v1123_v28 = vmax.f32 %v1010_v7, 0.0  ;;  %v1218_v29 = vpack.c.bf16 %v1154_v27, %v1154_v27 }
 0x1a7   : > { %v920_v19 = vpop.f32.mrf.mxu2 }
 0x1a8   : > { %v1187_v45 = vpack.c.bf16 %v1123_v28, %v1123_v28  ;;  %1283 = vst.msk [vmem:[%s2045_s21 + $0xf8] sm:$0xf] %vm1220_vm1, %v1218_v29  ;;  %v921_v33 = vadd.f32 %v1833_v58, %v920_v19 }
 0x1aa   : > { %1252 = vst.msk [vmem:[%s2045_s21 + $0x7c] sm:$0xf] %vm1220_vm1, %v1187_v45  ;;  %v1090_v36 = vadd.f32 %v1089_v34, %v921_v33 }
 0x1ac   : > { %v1155_v37 = vmax.f32 %v1090_v36, 0.0 }
 0x1ae   : > { %v1219_v4 = vpack.c.bf16 %v1155_v37, %v1155_v37 }
 0x1b0   : > { %1284 = vst.msk [vmem:[%s2045_s21 + $0xfc] sm:$0xf] %vm1220_vm1, %v1219_v4 }
 0x1b1 PF: > { %s13_s14 = sadd.s32 1, %s1856_s14   ;;  %s2379_s12 = smov %s1852_s13 }
 0x1b2   : > { %p10_p5 = scmp.ge.s32.totalorder %s13_s14, 4   ;;  %s2380_s13 = smov %s2382_s15 }
 0x1b4   :  { %12 = sbr.rel (!%p10_p5) target bundleno = 2 (0x2), region = 68 }

// kernel: tiny_roma_forward.40
= control target key start
LH: loop header
LB: loop body
LE: loop exit
PB: predicated region body
PF: predicated region fallthrough
CT: control target
= control target key end

     0   :  { %vm267_vm0 = vcmask 130048   ;;  %vm558_vm1 = vcmask 257024   ;;  %s1252_s1 = inlined_call_operand.vmem [shape: bf16[144,32], index: 1, kind: input, shape index: {}]   ;;  %s1253_s0 = inlined_call_operand.vmem [shape: bf16[256,144], index: 0, kind: input, shape index: {}]   ;;  %s1254_s2 = inlined_call_operand.vmem [shape: f32[1,32], index: 2, kind: input, shape index: {}]   ;;  %s1255_s3 = inlined_call_operand.vmem [shape: bf16[256,32], index: 3, kind: output, shape index: {}]  }
   0x1   :  { %v814_v0 = vld [vmem:[%s1252_s1 + $0x38] sm:$0xff]  ;;  %v815_v1 = vld [vmem:[%s1252_s1 + $0x40] sm:$0xff]  ;;  %v599_v3 = vld [vmem:[%s1253_s0 + $0x8] sm:$0xf0] }
   0x2   :  { %v775_v2 = vld [vmem:[%s1253_s0 + $0x4] sm:$0xf]  ;;  %316 = vmatpush.bf16.msra.mxu0 %v814_v0  ;;  %816 = vmatpush.bf16.msra.mxu2 %v814_v0  ;;  %v813_v5 = vld [vmem:[%s1252_s1 + $0x30] sm:$0xff]  ;;  %v812_v6 = vld [vmem:[%s1252_s1 + $0x28] sm:$0xff] }
   0x3   :  { %v602_v4 = vor.u32 %v775_v2, %v599_v3  ;;  %412 = vmatpush.bf16.msra.mxu1 %v815_v1  ;;  %824 = vmatpush.bf16.msra.mxu3 %v815_v1  ;;  %v793_v7 = vld [vmem:[%s1253_s0 + $0x94] sm:$0xf]  ;;  %v671_v8 = vld [vmem:[%s1253_s0 + $0x98] sm:$0xf0]  ;;  %v811_v10 = vld [vmem:[%s1252_s1 + $0x20] sm:$0xff] }
   0x4   :  { %v674_v9 = vor.u32 %v793_v7, %v671_v8  ;;  %v810_v11 = vld [vmem:[%s1252_s1 + $0x18] sm:$0xff]  ;;  %v777_v12 = vld [vmem:[%s1253_s0 + $0x14] sm:$0xf]  ;;  %v808_v16 = vld [vmem:[%s1252_s1 + $0x8] sm:$0xff] }
   0x5   :  { %v607_v13 = vld [vmem:[%s1253_s0 + $0x18] sm:$0xf0]  ;;  %v809_v15 = vld [vmem:[%s1252_s1 + $0x10] sm:$0xff]  ;;  %v795_v17 = vld [vmem:[%s1253_s0 + $0xa4] sm:$0xf] }
   0x6   :  { %759 = vmatmul.msk.bf16.vlgmr.msra.gmra.mxu1 %vm267_vm0, %v602_v4  ;;  %317 = vmatpush.bf16.msra.mxu0 %v813_v5  ;;  %v610_v14 = vor.u32 %v777_v12, %v607_v13  ;;  %v679_v18 = vld [vmem:[%s1253_s0 + $0xa8] sm:$0xf0]  ;;  %v807_v20 = vld [vmem:[%s1252_s1] sm:$0xff]  ;;  %v776_v22 = vld [vmem:[%s1253_s0 + $0x4] sm:$0xf0] }
   0x7   :  { %817 = vmatpush.bf16.msra.mxu2 %v813_v5  ;;  %768 = vmatmul.msk.bf16.vlgmr.msra.gmra.mxu3 %vm267_vm0, %v674_v9  ;;  %v682_v19 = vor.u32 %v795_v17, %v679_v18  ;;  %v597_v21 = vld [vmem:[%s1253_s0] sm:$0xf]  ;;  %v792_v24 = vld [vmem:[%s1253_s0 + $0x84] sm:$0xf0]  ;;  %v779_v27 = vld [vmem:[%s1253_s0 + $0x24] sm:$0xf] }
   0x8   :  { %v661_v23 = vld [vmem:[%s1253_s0 + $0x80] sm:$0xf]  ;;  %v598_v25 = vor.u32 %v776_v22, %v597_v21  ;;  %v615_v28 = vld [vmem:[%s1253_s0 + $0x28] sm:$0xf0]  ;;  %v797_v30 = vld [vmem:[%s1253_s0 + $0xb4] sm:$0xf] }
   0x9   :  { %v662_v26 = vor.u32 %v792_v24, %v661_v23  ;;  %v618_v29 = vor.u32 %v779_v27, %v615_v28  ;;  %v687_v31 = vld [vmem:[%s1253_s0 + $0xb8] sm:$0xf0]  ;;  %v605_v33 = vld [vmem:[%s1253_s0 + $0x10] sm:$0xf]  ;;  %v778_v34 = vld [vmem:[%s1253_s0 + $0x14] sm:$0xf0] }
   0xa   :  { %318 = vmatpush.bf16.msra.mxu0 %v812_v6  ;;  %v690_v32 = vor.u32 %v797_v30, %v687_v31  ;;  %v669_v35 = vld [vmem:[%s1253_s0 + $0x90] sm:$0xf]  ;;  %v794_v36 = vld [vmem:[%s1253_s0 + $0x94] sm:$0xf0]  ;;  %v606_v37 = vor.u32 %v778_v34, %v605_v33  ;;  %v781_v39 = vld [vmem:[%s1253_s0 + $0x34] sm:$0xf] }
   0xb   :  { %818 = vmatpush.bf16.msra.mxu2 %v812_v6  ;;  %v670_v38 = vor.u32 %v794_v36, %v669_v35  ;;  %v623_v40 = vld [vmem:[%s1253_s0 + $0x38] sm:$0xf0]  ;;  %v799_v42 = vld [vmem:[%s1253_s0 + $0xc4] sm:$0xf]  ;;  %v695_v43 = vld [vmem:[%s1253_s0 + $0xc8] sm:$0xf0] }
   0xc   :  { %v626_v41 = vor.u32 %v781_v39, %v623_v40  ;;  %v698_v44 = vor.u32 %v799_v42, %v695_v43  ;;  %v613_v45 = vld [vmem:[%s1253_s0 + $0x20] sm:$0xf]  ;;  %v780_v46 = vld [vmem:[%s1253_s0 + $0x24] sm:$0xf0]  ;;  %v783_v51 = vld [vmem:[%s1253_s0 + $0x44] sm:$0xf] }
   0xd   :  { %v677_v47 = vld [vmem:[%s1253_s0 + $0xa0] sm:$0xf]  ;;  %v796_v48 = vld [vmem:[%s1253_s0 + $0xa4] sm:$0xf0]  ;;  %v614_v49 = vor.u32 %v780_v46, %v613_v45  ;;  %v631_v52 = vld [vmem:[%s1253_s0 + $0x48] sm:$0xf0] }
   0xe   :  { %319 = vmatpush.bf16.msra.mxu0 %v811_v10  ;;  %v678_v50 = vor.u32 %v796_v48, %v677_v47  ;;  %v634_v53 = vor.u32 %v783_v51, %v631_v52  ;;  %v801_v54 = vld [vmem:[%s1253_s0 + $0xd4] sm:$0xf]  ;;  %v703_v55 = vld [vmem:[%s1253_s0 + $0xd8] sm:$0xf0]  ;;  %v621_v57 = vld [vmem:[%s1253_s0 + $0x30] sm:$0xf] }
   0xf   :  { %819 = vmatpush.bf16.msra.mxu2 %v811_v10  ;;  %v706_v56 = vor.u32 %v801_v54, %v703_v55  ;;  %v782_v58 = vld [vmem:[%s1253_s0 + $0x34] sm:$0xf0]  ;;  %v685_v59 = vld [vmem:[%s1253_s0 + $0xb0] sm:$0xf]  ;;  %v785_v63 = vld [vmem:[%s1253_s0 + $0x54] sm:$0xf] }
  0x10   :  { %v798_v60 = vld [vmem:[%s1253_s0 + $0xb4] sm:$0xf0]  ;;  %v622_v61 = vor.u32 %v782_v58, %v621_v57  ;;  %v639_v0 = vld [vmem:[%s1253_s0 + $0x58] sm:$0xf0]  ;;  %v803_v2 = vld [vmem:[%s1253_s0 + $0xe4] sm:$0xf] }
  0x11   :  { %v686_v62 = vor.u32 %v798_v60, %v685_v59  ;;  %v642_v1 = vor.u32 %v785_v63, %v639_v0  ;;  %v711_v3 = vld [vmem:[%s1253_s0 + $0xe8] sm:$0xf0]  ;;  %v629_v5 = vld [vmem:[%s1253_s0 + $0x40] sm:$0xf]  ;;  %v784_v6 = vld [vmem:[%s1253_s0 + $0x44] sm:$0xf0] }
  0x12   :  { %320 = vmatpush.bf16.msra.mxu0 %v810_v11  ;;  %v714_v4 = vor.u32 %v803_v2, %v711_v3  ;;  %v693_v7 = vld [vmem:[%s1253_s0 + $0xc0] sm:$0xf]  ;;  %v800_v8 = vld [vmem:[%s1253_s0 + $0xc4] sm:$0xf0]  ;;  %v630_v9 = vor.u32 %v784_v6, %v629_v5  ;;  %v647_v12 = vld [vmem:[%s1253_s0 + $0x68] sm:$0xf0] }
  0x13   :  { %820 = vmatpush.bf16.msra.mxu2 %v810_v11  ;;  %v694_v10 = vor.u32 %v800_v8, %v693_v7  ;;  %v787_v11 = vld [vmem:[%s1253_s0 + $0x64] sm:$0xf]  ;;  %v786_v17 = vld [vmem:[%s1253_s0 + $0x54] sm:$0xf0]  ;;  %v789_v23 = vld [vmem:[%s1253_s0 + $0x74] sm:$0xf] }
  0x14   :  { %v650_v13 = vor.u32 %v787_v11, %v647_v12  ;;  %v655_v24 = vld [vmem:[%s1253_s0 + $0x78] sm:$0xf0]  ;;  %v788_v27 = vld [vmem:[%s1253_s0 + $0x64] sm:$0xf0]  ;;  %v709_v28 = vld [vmem:[%s1253_s0 + $0xe0] sm:$0xf] }
  0x15   :  { %v663_v33 = vld [vmem:[%s1253_s0 + $0x88] sm:$0xf0]  ;;  %v653_v36 = vld [vmem:[%s1253_s0 + $0x70] sm:$0xf]  ;;  %v806_v40 = vld [vmem:[%s1253_s0 + $0xf4] sm:$0xf0] }
  0x16   :  { %760 = vmatmul.msk.bf16.gmra.mxu1 %vm267_vm0, %v610_v14  ;;  %321 = vmatpush.bf16.msra.mxu0 %v809_v15  ;;  %v805_v14 = vld [vmem:[%s1253_s0 + $0xf4] sm:$0xf]  ;;  %v717_v39 = vld [vmem:[%s1253_s0 + $0xf0] sm:$0xf]  ;;  %v1084_v45 = vld [vmem:[%s1254_s2] ss:$0 sm:$0xff] }
  0x17   :  { %821 = vmatpush.bf16.msra.mxu2 %v809_v15  ;;  %769 = vmatmul.msk.bf16.gmra.mxu3 %vm267_vm0, %v682_v19  ;;  %v719_v15 = vld [vmem:[%s1253_s0 + $0xf8] sm:$0xf0]  ;;  %v701_v19 = vld [vmem:[%s1253_s0 + $0xd0] sm:$0xf]  ;;  %v718_v42 = vor.u32 %v806_v40, %v717_v39 }
  0x18   :  { %v722_v18 = vor.u32 %v805_v14, %v719_v15 }
  0x1a   :  { %322 = vmatpush.bf16.msra.mxu0 %v808_v16 }
  0x1b   :  { %822 = vmatpush.bf16.msra.mxu2 %v808_v16  ;;  %v637_v16 = vld [vmem:[%s1253_s0 + $0x50] sm:$0xf] }
  0x1c   :  { %v638_v21 = vor.u32 %v786_v17, %v637_v16 }
  0x1e   :  { %323 = vmatpush.bf16.msra.mxu0 %v807_v20 }
  0x1f   :  { %823 = vmatpush.bf16.msra.mxu2 %v807_v20  ;;  %v802_v20 = vld [vmem:[%s1253_s0 + $0xd4] sm:$0xf0] }
  0x20   :  { %v702_v22 = vor.u32 %v802_v20, %v701_v19 }
  0x21   :  { %324 = vmatmul.bf16.vlgmr.msra.gmra.mxu0 %v598_v25  ;;  %v658_v25 = vor.u32 %v789_v23, %v655_v24 }
  0x22   :  { %364 = vmatmul.bf16.vlgmr.msra.gmra.mxu2 %v662_v26  ;;  %v645_v26 = vld [vmem:[%s1253_s0 + $0x60] sm:$0xf] }
  0x23   :  { %v646_v30 = vor.u32 %v788_v27, %v645_v26 }
  0x26   :  { %761 = vmatmul.msk.bf16.gmra.mxu1 %vm267_vm0, %v618_v29  ;;  %v804_v29 = vld [vmem:[%s1253_s0 + $0xe4] sm:$0xf0] }
  0x27   :  { %770 = vmatmul.msk.bf16.gmra.mxu3 %vm267_vm0, %v690_v32  ;;  %v710_v31 = vor.u32 %v804_v29, %v709_v28  ;;  %v791_v32 = vld [vmem:[%s1253_s0 + $0x84] sm:$0xf] }
  0x28   :  { %v666_v34 = vor.u32 %v791_v32, %v663_v33 }
  0x31   :  { %329 = vmatmul.bf16.gmra.mxu0 %v606_v37  ;;  %v790_v37 = vld [vmem:[%s1253_s0 + $0x74] sm:$0xf0] }
  0x32   :  { %369 = vmatmul.bf16.gmra.mxu2 %v670_v38 }
  0x36   :  { %762 = vmatmul.msk.bf16.gmra.mxu1 %vm267_vm0, %v626_v41  ;;  %v654_v41 = vor.u32 %v790_v37, %v653_v36 }
  0x37   :  { %771 = vmatmul.msk.bf16.gmra.mxu3 %vm267_vm0, %v698_v44 }
  0x41   :  { %334 = vmatmul.bf16.gmra.mxu0 %v614_v49 }
  0x42   :  { %374 = vmatmul.bf16.gmra.mxu2 %v678_v50 }
  0x46   :  { %763 = vmatmul.msk.bf16.gmra.mxu1 %vm267_vm0, %v634_v53 }
  0x47   :  { %772 = vmatmul.msk.bf16.gmra.mxu3 %vm267_vm0, %v706_v56 }
  0x51   :  { %339 = vmatmul.bf16.gmra.mxu0 %v622_v61 }
  0x52   :  { %379 = vmatmul.bf16.gmra.mxu2 %v686_v62 }
  0x56   :  { %764 = vmatmul.msk.bf16.gmra.mxu1 %vm267_vm0, %v642_v1 }
  0x57   :  { %773 = vmatmul.msk.bf16.gmra.mxu3 %vm267_vm0, %v714_v4 }
  0x61   :  { %344 = vmatmul.bf16.gmra.mxu0 %v630_v9 }
  0x62   :  { %384 = vmatmul.bf16.gmra.mxu2 %v694_v10 }
  0x66   :  { %765 = vmatmul.msk.bf16.gmra.mxu1 %vm267_vm0, %v650_v13 }
  0x67   :  { %774 = vmatmul.msk.bf16.gmra.mxu3 %vm267_vm0, %v722_v18 }
  0x71   :  { %349 = vmatmul.bf16.gmra.mxu0 %v638_v21 }
  0x72   :  { %389 = vmatmul.bf16.gmra.mxu2 %v702_v22 }
  0x76   :  { %766 = vmatmul.msk.bf16.gmra.mxu1 %vm267_vm0, %v658_v25 }
  0x81   :  { %354 = vmatmul.bf16.gmra.mxu0 %v646_v30 }
  0x82   :  { %394 = vmatmul.bf16.gmra.mxu2 %v710_v31 }
  0x83   :  { %v414_v35 = vpop.f32.mrf.mxu1 }
  0x86   :  { %767 = vmatmul.msk.bf16.gmra.mxu1 %vm267_vm0, %v666_v34 }
  0x8a   :  { %v459_v46 = vpop.f32.mrf.mxu3 }
  0x8b   :  { %v416_v38 = vpop.f32.mrf.mxu1 }
  0x91   :  { %359 = vmatmul.bf16.gmra.mxu0 %v654_v41 }
  0x92   :  { %399 = vmatmul.bf16.gmra.mxu2 %v718_v42  ;;  %v461_v56 = vpop.f32.mrf.mxu3 }
  0x93   :  { %v419_v43 = vpop.f32.mrf.mxu1 }
  0x9a   :  { %v464_v1 = vpop.f32.mrf.mxu3 }
  0x9b   :  { %v421_v44 = vpop.f32.mrf.mxu1 }
  0x9e   :  { %v325_v47 = vpop.f32.mrf.mxu0 }
  0x9f   :  { %v326_v48 = vadd.f32 %v1084_v45, %v325_v47 }
  0xa1   :  { %v415_v49 = vadd.f32 %v414_v35, %v326_v48 }
  0xa2   :  { %v466_v14 = vpop.f32.mrf.mxu3 }
  0xa3   :  { %v494_v50 = vmax.f32 %v415_v49, 0.0  ;;  %v424_v51 = vpop.f32.mrf.mxu1 }
  0xa5   :  { %v526_v52 = vpack.c.bf16 %v494_v50, %v494_v50  ;;  %v1087_v53 = vpop.f32.mrf.mxu2 }
  0xa6   :  { %v327_v54 = vpop.f32.mrf.mxu0 }
  0xa7   :  { %559 = vst.msk [vmem:[%s1255_s3] sm:$0xf] %vm558_vm1, %v526_v52  ;;  %v328_v55 = vadd.f32 %v1084_v45, %v327_v54 }
  0xa9   :  { %v417_v57 = vadd.f32 %v416_v38, %v328_v55 }
  0xaa   :  { %v469_v29 = vpop.f32.mrf.mxu3 }
  0xab   :  { %v495_v58 = vmax.f32 %v417_v57, 0.0  ;;  %v426_v59 = vpop.f32.mrf.mxu1 }
  0xad   :  { %v527_v60 = vpack.c.bf16 %v495_v58, %v495_v58  ;;  %v1094_v61 = vpop.f32.mrf.mxu2 }
  0xae   :  { %v330_v62 = vpop.f32.mrf.mxu0 }
  0xaf   :  { %560 = vst.msk [vmem:[%s1255_s3 + $0x4] sm:$0xf] %vm558_vm1, %v527_v60  ;;  %v331_v63 = vadd.f32 %v1084_v45, %v330_v62 }
  0xb1   :  { %v420_v0 = vadd.f32 %v419_v43, %v331_v63 }
  0xb3   :  { %v496_v2 = vmax.f32 %v420_v0, 0.0  ;;  %v429_v3 = vpop.f32.mrf.mxu1 }
  0xb5   :  { %v528_v4 = vpack.c.bf16 %v496_v2, %v496_v2  ;;  %v370_v5 = vpop.f32.mrf.mxu2 }
  0xb6   :  { %v371_v6 = vadd.f32 %v1084_v45, %v370_v5  ;;  %v332_v7 = vpop.f32.mrf.mxu0 }
  0xb7   :  { %561 = vst.msk [vmem:[%s1255_s3 + $0x8] sm:$0xf] %vm558_vm1, %v528_v4  ;;  %v333_v8 = vadd.f32 %v1084_v45, %v332_v7 }
  0xb8   :  { %v460_v9 = vadd.f32 %v459_v46, %v371_v6 }
  0xb9   :  { %v422_v10 = vadd.f32 %v421_v44, %v333_v8  ;;  %v471_v44 = vpop.f32.mrf.mxu3 }
  0xba   :  { %v512_v11 = vmax.f32 %v460_v9, 0.0 }
  0xbb   :  { %v497_v12 = vmax.f32 %v422_v10, 0.0  ;;  %v431_v13 = vpop.f32.mrf.mxu1 }
  0xbc   :  { %v544_v15 = vpack.c.bf16 %v512_v11, %v512_v11 }
  0xbd   :  { %v529_v16 = vpack.c.bf16 %v497_v12, %v497_v12  ;;  %v372_v17 = vpop.f32.mrf.mxu2 }
  0xbe   :  { %577 = vst.msk [vmem:[%s1255_s3 + $0x48] sm:$0xf] %vm558_vm1, %v544_v15  ;;  %v373_v18 = vadd.f32 %v1084_v45, %v372_v17  ;;  %v335_v19 = vpop.f32.mrf.mxu0 }
  0xbf   :  { %562 = vst.msk [vmem:[%s1255_s3 + $0xc] sm:$0xf] %vm558_vm1, %v529_v16  ;;  %v336_v20 = vadd.f32 %v1084_v45, %v335_v19 }
  0xc0   :  { %v462_v21 = vadd.f32 %v461_v56, %v373_v18 }
  0xc1   :  { %v425_v22 = vadd.f32 %v424_v51, %v336_v20  ;;  %v474_v60 = vpop.f32.mrf.mxu3 }
  0xc2   :  { %v513_v23 = vmax.f32 %v462_v21, 0.0 }
  0xc3   :  { %v498_v24 = vmax.f32 %v425_v22, 0.0  ;;  %v434_v25 = vpop.f32.mrf.mxu1 }
  0xc4   :  { %v545_v26 = vpack.c.bf16 %v513_v23, %v513_v23 }
  0xc5   :  { %v530_v27 = vpack.c.bf16 %v498_v24, %v498_v24  ;;  %v375_v28 = vpop.f32.mrf.mxu2 }
  0xc6   :  { %578 = vst.msk [vmem:[%s1255_s3 + $0x4c] sm:$0xf] %vm558_vm1, %v545_v26  ;;  %v376_v30 = vadd.f32 %v1084_v45, %v375_v28  ;;  %v337_v31 = vpop.f32.mrf.mxu0 }
  0xc7   :  { %563 = vst.msk [vmem:[%s1255_s3 + $0x10] sm:$0xf] %vm558_vm1, %v530_v27  ;;  %v338_v32 = vadd.f32 %v1084_v45, %v337_v31 }
  0xc8   :  { %v465_v33 = vadd.f32 %v464_v1, %v376_v30 }
  0xc9   :  { %v427_v34 = vadd.f32 %v426_v59, %v338_v32  ;;  %v476_v12 = vpop.f32.mrf.mxu3 }
  0xca   :  { %v514_v35 = vmax.f32 %v465_v33, 0.0 }
  0xcb   :  { %v499_v36 = vmax.f32 %v427_v34, 0.0  ;;  %v436_v37 = vpop.f32.mrf.mxu1 }
  0xcc   :  { %v546_v38 = vpack.c.bf16 %v514_v35, %v514_v35 }
  0xcd   :  { %v531_v39 = vpack.c.bf16 %v499_v36, %v499_v36  ;;  %v377_v40 = vpop.f32.mrf.mxu2 }
  0xce   :  { %579 = vst.msk [vmem:[%s1255_s3 + $0x50] sm:$0xf] %vm558_vm1, %v546_v38  ;;  %v378_v41 = vadd.f32 %v1084_v45, %v377_v40  ;;  %v340_v42 = vpop.f32.mrf.mxu0 }
  0xcf   :  { %564 = vst.msk [vmem:[%s1255_s3 + $0x14] sm:$0xf] %vm558_vm1, %v531_v39  ;;  %v341_v43 = vadd.f32 %v1084_v45, %v340_v42 }
  0xd0   :  { %v467_v46 = vadd.f32 %v466_v14, %v378_v41 }
  0xd1   :  { %v430_v47 = vadd.f32 %v429_v3, %v341_v43  ;;  %v479_v27 = vpop.f32.mrf.mxu3 }
  0xd2   :  { %v515_v48 = vmax.f32 %v467_v46, 0.0 }
  0xd3   :  { %v500_v49 = vmax.f32 %v430_v47, 0.0  ;;  %v439_v50 = vpop.f32.mrf.mxu1 }
  0xd4   :  { %v547_v51 = vpack.c.bf16 %v515_v48, %v515_v48 }
  0xd5   :  { %v532_v52 = vpack.c.bf16 %v500_v49, %v500_v49  ;;  %v380_v54 = vpop.f32.mrf.mxu2 }
  0xd6   :  { %580 = vst.msk [vmem:[%s1255_s3 + $0x54] sm:$0xf] %vm558_vm1, %v547_v51  ;;  %v381_v55 = vadd.f32 %v1084_v45, %v380_v54  ;;  %v342_v56 = vpop.f32.mrf.mxu0 }
  0xd7   :  { %565 = vst.msk [vmem:[%s1255_s3 + $0x18] sm:$0xf] %vm558_vm1, %v532_v52  ;;  %v343_v57 = vadd.f32 %v1084_v45, %v342_v56 }
  0xd8   :  { %v470_v58 = vadd.f32 %v469_v29, %v381_v55 }
  0xd9   :  { %v432_v59 = vadd.f32 %v431_v13, %v343_v57  ;;  %v481_v42 = vpop.f32.mrf.mxu3 }
  0xda   :  { %v516_v62 = vmax.f32 %v470_v58, 0.0 }
  0xdb   :  { %v501_v63 = vmax.f32 %v432_v59, 0.0  ;;  %v441_v0 = vpop.f32.mrf.mxu1  ;;  %v366_v59 = vadd.f32 %v1084_v45, %v1087_v53 }
  0xdc   :  { %v548_v1 = vpack.c.bf16 %v516_v62, %v516_v62 }
  0xdd   :  { %v533_v2 = vpack.c.bf16 %v501_v63, %v501_v63  ;;  %v382_v3 = vpop.f32.mrf.mxu2 }
  0xde   :  { %581 = vst.msk [vmem:[%s1255_s3 + $0x58] sm:$0xf] %vm558_vm1, %v548_v1  ;;  %v383_v4 = vadd.f32 %v1084_v45, %v382_v3  ;;  %v345_v5 = vpop.f32.mrf.mxu0 }
  0xdf   :  { %566 = vst.msk [vmem:[%s1255_s3 + $0x1c] sm:$0xf] %vm558_vm1, %v533_v2  ;;  %v346_v6 = vadd.f32 %v1084_v45, %v345_v5 }
  0xe0   :  { %v472_v7 = vadd.f32 %v471_v44, %v383_v4 }
  0xe1   :  { %v435_v8 = vadd.f32 %v434_v25, %v346_v6  ;;  %v484_v58 = vpop.f32.mrf.mxu3 }
  0xe2   :  { %v517_v9 = vmax.f32 %v472_v7, 0.0 }
  0xe3   :  { %v502_v10 = vmax.f32 %v435_v8, 0.0  ;;  %v444_v11 = vpop.f32.mrf.mxu1 }
  0xe4   :  { %v549_v13 = vpack.c.bf16 %v517_v9, %v517_v9 }
  0xe5   :  { %v534_v14 = vpack.c.bf16 %v502_v10, %v502_v10  ;;  %v385_v15 = vpop.f32.mrf.mxu2  ;;  %v368_v10 = vadd.f32 %v1084_v45, %v1094_v61 }
  0xe6   :  { %582 = vst.msk [vmem:[%s1255_s3 + $0x5c] sm:$0xf] %vm558_vm1, %v549_v13  ;;  %v386_v16 = vadd.f32 %v1084_v45, %v385_v15  ;;  %v347_v17 = vpop.f32.mrf.mxu0 }
  0xe7   :  { %567 = vst.msk [vmem:[%s1255_s3 + $0x20] sm:$0xf] %vm558_vm1, %v534_v14  ;;  %v348_v18 = vadd.f32 %v1084_v45, %v347_v17 }
  0xe8   :  { %v475_v19 = vadd.f32 %v474_v60, %v386_v16 }
  0xe9   :  { %v437_v20 = vadd.f32 %v436_v37, %v348_v18  ;;  %v486_v13 = vpop.f32.mrf.mxu3 }
  0xea   :  { %v518_v21 = vmax.f32 %v475_v19, 0.0 }
  0xeb   :  { %v503_v22 = vmax.f32 %v437_v20, 0.0  ;;  %v446_v23 = vpop.f32.mrf.mxu1 }
  0xec   :  { %v550_v24 = vpack.c.bf16 %v518_v21, %v518_v21 }
  0xed   :  { %v535_v25 = vpack.c.bf16 %v503_v22, %v503_v22  ;;  %v387_v26 = vpop.f32.mrf.mxu2 }
  0xee   :  { %583 = vst.msk [vmem:[%s1255_s3 + $0x60] sm:$0xf] %vm558_vm1, %v550_v24  ;;  %v388_v28 = vadd.f32 %v1084_v45, %v387_v26  ;;  %v350_v29 = vpop.f32.mrf.mxu0 }
  0xef   :  { %568 = vst.msk [vmem:[%s1255_s3 + $0x24] sm:$0xf] %vm558_vm1, %v535_v25  ;;  %v351_v30 = vadd.f32 %v1084_v45, %v350_v29 }
  0xf0   :  { %v477_v31 = vadd.f32 %v476_v12, %v388_v28 }
  0xf1   :  { %v440_v32 = vadd.f32 %v439_v50, %v351_v30  ;;  %v489_v29 = vpop.f32.mrf.mxu3 }
  0xf2   :  { %v519_v33 = vmax.f32 %v477_v31, 0.0 }
  0xf3   :  { %v504_v34 = vmax.f32 %v440_v32, 0.0  ;;  %v449_v35 = vpop.f32.mrf.mxu1 }
  0xf4   :  { %v551_v36 = vpack.c.bf16 %v519_v33, %v519_v33 }
  0xf5   :  { %v536_v37 = vpack.c.bf16 %v504_v34, %v504_v34  ;;  %v390_v38 = vpop.f32.mrf.mxu2 }
  0xf6   :  { %584 = vst.msk [vmem:[%s1255_s3 + $0x64] sm:$0xf] %vm558_vm1, %v551_v36  ;;  %v391_v39 = vadd.f32 %v1084_v45, %v390_v38  ;;  %v352_v40 = vpop.f32.mrf.mxu0 }
  0xf7   :  { %569 = vst.msk [vmem:[%s1255_s3 + $0x28] sm:$0xf] %vm558_vm1, %v536_v37  ;;  %v353_v41 = vadd.f32 %v1084_v45, %v352_v40 }
  0xf8   :  { %v480_v43 = vadd.f32 %v479_v27, %v391_v39 }
  0xf9   :  { %v442_v44 = vadd.f32 %v441_v0, %v353_v41 }
  0xfa   :  { %v520_v46 = vmax.f32 %v480_v43, 0.0 }
  0xfb   :  { %v505_v47 = vmax.f32 %v442_v44, 0.0  ;;  %v451_v48 = vpop.f32.mrf.mxu1 }
  0xfc   :  { %v552_v49 = vpack.c.bf16 %v520_v46, %v520_v46 }
  0xfd   :  { %v537_v50 = vpack.c.bf16 %v505_v47, %v505_v47  ;;  %v392_v51 = vpop.f32.mrf.mxu2 }
  0xfe   :  { %585 = vst.msk [vmem:[%s1255_s3 + $0x68] sm:$0xf] %vm558_vm1, %v552_v49  ;;  %v393_v52 = vadd.f32 %v1084_v45, %v392_v51  ;;  %v355_v54 = vpop.f32.mrf.mxu0 }
  0xff   :  { %570 = vst.msk [vmem:[%s1255_s3 + $0x2c] sm:$0xf] %vm558_vm1, %v537_v50  ;;  %v356_v55 = vadd.f32 %v1084_v45, %v355_v54 }
 0x100   :  { %v482_v56 = vadd.f32 %v481_v42, %v393_v52  ;;  %v491_v42 = vpop.f32.mrf.mxu3 }
 0x101   :  { %v445_v57 = vadd.f32 %v444_v11, %v356_v55 }
 0x102   :  { %v521_v60 = vmax.f32 %v482_v56, 0.0 }
 0x103   :  { %v506_v62 = vmax.f32 %v445_v57, 0.0  ;;  %v454_v63 = vpop.f32.mrf.mxu1 }
 0x104   :  { %v553_v0 = vpack.c.bf16 %v521_v60, %v521_v60  ;;  %v455_v1 = vadd.f32 %v454_v63, %v366_v59 }
 0x105   :  { %v538_v2 = vpack.c.bf16 %v506_v62, %v506_v62  ;;  %v395_v3 = vpop.f32.mrf.mxu2 }
 0x106   :  { %586 = vst.msk [vmem:[%s1255_s3 + $0x6c] sm:$0xf] %vm558_vm1, %v553_v0  ;;  %v510_v4 = vmax.f32 %v455_v1, 0.0  ;;  %v396_v5 = vadd.f32 %v1084_v45, %v395_v3  ;;  %v357_v6 = vpop.f32.mrf.mxu0 }
 0x107   :  { %571 = vst.msk [vmem:[%s1255_s3 + $0x30] sm:$0xf] %vm558_vm1, %v538_v2  ;;  %v358_v53 = vadd.f32 %v1084_v45, %v357_v6 }
 0x108   :  { %v542_v7 = vpack.c.bf16 %v510_v4, %v510_v4  ;;  %v485_v8 = vadd.f32 %v484_v58, %v396_v5 }
 0x109   :  { %v447_v9 = vadd.f32 %v446_v23, %v358_v53 }
 0x10a   :  { %575 = vst.msk [vmem:[%s1255_s3 + $0x40] sm:$0xf] %vm558_vm1, %v542_v7  ;;  %v522_v11 = vmax.f32 %v485_v8, 0.0 }
 0x10b   :  { %v507_v12 = vmax.f32 %v447_v9, 0.0  ;;  %v456_v14 = vpop.f32.mrf.mxu1 }
 0x10c   :  { %v554_v15 = vpack.c.bf16 %v522_v11, %v522_v11  ;;  %v457_v16 = vadd.f32 %v456_v14, %v368_v10 }
 0x10d   :  { %v539_v17 = vpack.c.bf16 %v507_v12, %v507_v12  ;;  %v397_v18 = vpop.f32.mrf.mxu2 }
 0x10e   :  { %587 = vst.msk [vmem:[%s1255_s3 + $0x70] sm:$0xf] %vm558_vm1, %v554_v15  ;;  %v511_v19 = vmax.f32 %v457_v16, 0.0  ;;  %v398_v61 = vadd.f32 %v1084_v45, %v397_v18  ;;  %v360_v20 = vpop.f32.mrf.mxu0 }
 0x10f   :  { %572 = vst.msk [vmem:[%s1255_s3 + $0x34] sm:$0xf] %vm558_vm1, %v539_v17  ;;  %v361_v21 = vadd.f32 %v1084_v45, %v360_v20 }
 0x110   :  { %v543_v22 = vpack.c.bf16 %v511_v19, %v511_v19  ;;  %v487_v23 = vadd.f32 %v486_v13, %v398_v61 }
 0x111   :  { %v450_v24 = vadd.f32 %v449_v35, %v361_v21 }
 0x112   :  { %576 = vst.msk [vmem:[%s1255_s3 + $0x44] sm:$0xf] %vm558_vm1, %v543_v22  ;;  %v523_v25 = vmax.f32 %v487_v23, 0.0 }
 0x113   :  { %v508_v26 = vmax.f32 %v450_v24, 0.0 }
 0x114   :  { %v555_v27 = vpack.c.bf16 %v523_v25, %v523_v25 }
 0x115   :  { %v540_v28 = vpack.c.bf16 %v508_v26, %v508_v26  ;;  %v400_v30 = vpop.f32.mrf.mxu2 }
 0x116   :  { %588 = vst.msk [vmem:[%s1255_s3 + $0x74] sm:$0xf] %vm558_vm1, %v555_v27  ;;  %v401_v31 = vadd.f32 %v1084_v45, %v400_v30  ;;  %v362_v32 = vpop.f32.mrf.mxu0 }
 0x117   :  { %573 = vst.msk [vmem:[%s1255_s3 + $0x38] sm:$0xf] %vm558_vm1, %v540_v28  ;;  %v363_v33 = vadd.f32 %v1084_v45, %v362_v32 }
 0x118   :  { %v490_v34 = vadd.f32 %v489_v29, %v401_v31 }
 0x119   :  { %v452_v35 = vadd.f32 %v451_v48, %v363_v33 }
 0x11a   :  { %v524_v36 = vmax.f32 %v490_v34, 0.0 }
 0x11b   :  { %v509_v37 = vmax.f32 %v452_v35, 0.0 }
 0x11c   :  { %v556_v38 = vpack.c.bf16 %v524_v36, %v524_v36 }
 0x11d   :  { %v541_v39 = vpack.c.bf16 %v509_v37, %v509_v37  ;;  %v402_v40 = vpop.f32.mrf.mxu2 }
 0x11e   :  { %589 = vst.msk [vmem:[%s1255_s3 + $0x78] sm:$0xf] %vm558_vm1, %v556_v38  ;;  %v403_v41 = vadd.f32 %v1084_v45, %v402_v40 }
 0x11f   :  { %574 = vst.msk [vmem:[%s1255_s3 + $0x3c] sm:$0xf] %vm558_vm1, %v541_v39 }
 0x120   :  { %v492_v43 = vadd.f32 %v491_v42, %v403_v41 }
 0x122   :  { %v525_v44 = vmax.f32 %v492_v43, 0.0 }
 0x124   :  { %v557_v46 = vpack.c.bf16 %v525_v44, %v525_v44 }
 0x126   :  { %590 = vst.msk [vmem:[%s1255_s3 + $0x7c] sm:$0xf] %vm558_vm1, %v557_v46 }

// kernel: tiny_roma_forward.41
= control target key start
LH: loop header
LB: loop body
LE: loop exit
PB: predicated region body
PF: predicated region fallthrough
CT: control target
= control target key end

     0   :  { %vm139_vm0 = vcmask 130048   ;;  %vm309_vm1 = vcmask 257024   ;;  %s703_s1 = inlined_call_operand.vmem [shape: bf16[16,32], index: 1, kind: input, shape index: {}]   ;;  %s704_s0 = inlined_call_operand.vmem [shape: bf16[256,16], index: 0, kind: input, shape index: {}]   ;;  %s705_s2 = inlined_call_operand.vmem [shape: f32[1,32], index: 2, kind: input, shape index: {}]   ;;  %s706_s3 = inlined_call_operand.vmem [shape: bf16[256,32], index: 3, kind: output, shape index: {}]  }
   0x1   :  { %v446_v0 = vld [vmem:[%s703_s1] sm:$0xff]  ;;  %v431_v5 = vld [vmem:[%s704_s0 + $0x8] sm:$0xff]  ;;  %v432_v9 = vld [vmem:[%s704_s0 + $0x10] sm:$0xff] }
   0x2   :  { %v430_v1 = vld [vmem:[%s704_s0] sm:$0xff]  ;;  %195 = vmatpush.bf16.msra.mxu0 %v446_v0  ;;  %447 = vmatpush.bf16.msra.mxu1 %v446_v0  ;;  %v435_v6 = vld [vmem:[%s704_s0 + $0x28] sm:$0xff]  ;;  %v436_v10 = vld [vmem:[%s704_s0 + $0x30] sm:$0xff] }
   0x3   :  { %v434_v2 = vld [vmem:[%s704_s0 + $0x20] sm:$0xff]  ;;  %448 = vmatpush.bf16.msra.mxu2 %v446_v0  ;;  %449 = vmatpush.bf16.msra.mxu3 %v446_v0  ;;  %v439_v7 = vld [vmem:[%s704_s0 + $0x48] sm:$0xff]  ;;  %v440_v11 = vld [vmem:[%s704_s0 + $0x50] sm:$0xff] }
   0x4   :  { %v438_v3 = vld [vmem:[%s704_s0 + $0x40] sm:$0xff]  ;;  %v443_v8 = vld [vmem:[%s704_s0 + $0x68] sm:$0xff]  ;;  %v444_v12 = vld [vmem:[%s704_s0 + $0x70] sm:$0xff] }
   0x5   :  { %v442_v4 = vld [vmem:[%s704_s0 + $0x60] sm:$0xff]  ;;  %414 = vmatmul.msk.bf16.vlgmr.msra.gmra.mxu0 %vm139_vm0, %v430_v1  ;;  %418 = vmatmul.msk.bf16.vlgmr.msra.gmra.mxu1 %vm139_vm0, %v434_v2  ;;  %v433_v13 = vld [vmem:[%s704_s0 + $0x18] sm:$0xff] }
   0x6   :  { %422 = vmatmul.msk.bf16.vlgmr.msra.gmra.mxu2 %vm139_vm0, %v438_v3  ;;  %426 = vmatmul.msk.bf16.vlgmr.msra.gmra.mxu3 %vm139_vm0, %v442_v4  ;;  %v437_v14 = vld [vmem:[%s704_s0 + $0x38] sm:$0xff]  ;;  %v541_v17 = vld [vmem:[%s705_s2] ss:$0 sm:$0xff] }
   0x7   :  { %v441_v15 = vld [vmem:[%s704_s0 + $0x58] sm:$0xff] }
   0x8   :  { %v445_v16 = vld [vmem:[%s704_s0 + $0x78] sm:$0xff] }
  0x15   :  { %415 = vmatmul.msk.bf16.gmra.mxu0 %vm139_vm0, %v431_v5  ;;  %419 = vmatmul.msk.bf16.gmra.mxu1 %vm139_vm0, %v435_v6 }
  0x16   :  { %423 = vmatmul.msk.bf16.gmra.mxu2 %vm139_vm0, %v439_v7  ;;  %427 = vmatmul.msk.bf16.gmra.mxu3 %vm139_vm0, %v443_v8 }
  0x25   :  { %416 = vmatmul.msk.bf16.gmra.mxu0 %vm139_vm0, %v432_v9  ;;  %420 = vmatmul.msk.bf16.gmra.mxu1 %vm139_vm0, %v436_v10 }
  0x26   :  { %424 = vmatmul.msk.bf16.gmra.mxu2 %vm139_vm0, %v440_v11  ;;  %428 = vmatmul.msk.bf16.gmra.mxu3 %vm139_vm0, %v444_v12 }
  0x35   :  { %417 = vmatmul.msk.bf16.gmra.mxu0 %vm139_vm0, %v433_v13  ;;  %421 = vmatmul.msk.bf16.gmra.mxu1 %vm139_vm0, %v437_v14 }
  0x36   :  { %425 = vmatmul.msk.bf16.gmra.mxu2 %vm139_vm0, %v441_v15  ;;  %429 = vmatmul.msk.bf16.gmra.mxu3 %vm139_vm0, %v445_v16 }
  0x82   :  { %v197_v18 = vpop.f32.mrf.mxu0  ;;  %v217_v19 = vpop.f32.mrf.mxu1 }
  0x83   :  { %v198_v20 = vadd.f32 %v541_v17, %v197_v18  ;;  %v218_v21 = vadd.f32 %v541_v17, %v217_v19 }
  0x85   :  { %v277_v22 = vpack.c.bf16 %v198_v20, %v198_v20  ;;  %v285_v23 = vpack.c.bf16 %v218_v21, %v218_v21 }
  0x87   :  { %310 = vst.msk [vmem:[%s706_s3] sm:$0xf] %vm309_vm1, %v277_v22 }
  0x88   :  { %318 = vst.msk [vmem:[%s706_s3 + $0x20] sm:$0xf] %vm309_vm1, %v285_v23 }
  0x89   :  { %v237_v24 = vpop.f32.mrf.mxu2  ;;  %v257_v25 = vpop.f32.mrf.mxu3 }
  0x8a   :  { %v238_v26 = vadd.f32 %v541_v17, %v237_v24  ;;  %v258_v27 = vadd.f32 %v541_v17, %v257_v25  ;;  %v199_v28 = vpop.f32.mrf.mxu0  ;;  %v219_v29 = vpop.f32.mrf.mxu1 }
  0x8b   :  { %v200_v30 = vadd.f32 %v541_v17, %v199_v28  ;;  %v220_v31 = vadd.f32 %v541_v17, %v219_v29 }
  0x8c   :  { %v293_v32 = vpack.c.bf16 %v238_v26, %v238_v26  ;;  %v301_v33 = vpack.c.bf16 %v258_v27, %v258_v27 }
  0x8d   :  { %v278_v34 = vpack.c.bf16 %v200_v30, %v200_v30  ;;  %v286_v35 = vpack.c.bf16 %v220_v31, %v220_v31 }
  0x8e   :  { %326 = vst.msk [vmem:[%s706_s3 + $0x40] sm:$0xf] %vm309_vm1, %v293_v32 }
  0x8f   :  { %334 = vst.msk [vmem:[%s706_s3 + $0x60] sm:$0xf] %vm309_vm1, %v301_v33 }
  0x90   :  { %311 = vst.msk [vmem:[%s706_s3 + $0x4] sm:$0xf] %vm309_vm1, %v278_v34 }
  0x91   :  { %319 = vst.msk [vmem:[%s706_s3 + $0x24] sm:$0xf] %vm309_vm1, %v286_v35  ;;  %v239_v36 = vpop.f32.mrf.mxu2  ;;  %v259_v37 = vpop.f32.mrf.mxu3 }
  0x92   :  { %v240_v38 = vadd.f32 %v541_v17, %v239_v36  ;;  %v260_v39 = vadd.f32 %v541_v17, %v259_v37  ;;  %v202_v40 = vpop.f32.mrf.mxu0  ;;  %v222_v41 = vpop.f32.mrf.mxu1 }
  0x93   :  { %v203_v42 = vadd.f32 %v541_v17, %v202_v40  ;;  %v223_v43 = vadd.f32 %v541_v17, %v222_v41 }
  0x94   :  { %v294_v44 = vpack.c.bf16 %v240_v38, %v240_v38  ;;  %v302_v45 = vpack.c.bf16 %v260_v39, %v260_v39 }
  0x95   :  { %v279_v46 = vpack.c.bf16 %v203_v42, %v203_v42  ;;  %v287_v47 = vpack.c.bf16 %v223_v43, %v223_v43 }
  0x96   :  { %327 = vst.msk [vmem:[%s706_s3 + $0x44] sm:$0xf] %vm309_vm1, %v294_v44 }
  0x97   :  { %335 = vst.msk [vmem:[%s706_s3 + $0x64] sm:$0xf] %vm309_vm1, %v302_v45 }
  0x98   :  { %312 = vst.msk [vmem:[%s706_s3 + $0x8] sm:$0xf] %vm309_vm1, %v279_v46 }
  0x99   :  { %320 = vst.msk [vmem:[%s706_s3 + $0x28] sm:$0xf] %vm309_vm1, %v287_v47  ;;  %v242_v48 = vpop.f32.mrf.mxu2  ;;  %v262_v49 = vpop.f32.mrf.mxu3 }
  0x9a   :  { %v243_v50 = vadd.f32 %v541_v17, %v242_v48  ;;  %v263_v51 = vadd.f32 %v541_v17, %v262_v49  ;;  %v204_v52 = vpop.f32.mrf.mxu0  ;;  %v224_v53 = vpop.f32.mrf.mxu1 }
  0x9b   :  { %v205_v54 = vadd.f32 %v541_v17, %v204_v52  ;;  %v225_v55 = vadd.f32 %v541_v17, %v224_v53 }
  0x9c   :  { %v295_v56 = vpack.c.bf16 %v243_v50, %v243_v50  ;;  %v303_v57 = vpack.c.bf16 %v263_v51, %v263_v51 }
  0x9d   :  { %v280_v58 = vpack.c.bf16 %v205_v54, %v205_v54  ;;  %v288_v59 = vpack.c.bf16 %v225_v55, %v225_v55 }
  0x9e   :  { %328 = vst.msk [vmem:[%s706_s3 + $0x48] sm:$0xf] %vm309_vm1, %v295_v56 }
  0x9f   :  { %336 = vst.msk [vmem:[%s706_s3 + $0x68] sm:$0xf] %vm309_vm1, %v303_v57 }
  0xa0   :  { %313 = vst.msk [vmem:[%s706_s3 + $0xc] sm:$0xf] %vm309_vm1, %v280_v58 }
  0xa1   :  { %321 = vst.msk [vmem:[%s706_s3 + $0x2c] sm:$0xf] %vm309_vm1, %v288_v59  ;;  %v244_v60 = vpop.f32.mrf.mxu2  ;;  %v264_v61 = vpop.f32.mrf.mxu3 }
  0xa2   :  { %v245_v62 = vadd.f32 %v541_v17, %v244_v60  ;;  %v265_v63 = vadd.f32 %v541_v17, %v264_v61  ;;  %v207_v0 = vpop.f32.mrf.mxu0  ;;  %v227_v1 = vpop.f32.mrf.mxu1 }
  0xa3   :  { %v208_v2 = vadd.f32 %v541_v17, %v207_v0  ;;  %v228_v3 = vadd.f32 %v541_v17, %v227_v1 }
  0xa4   :  { %v296_v4 = vpack.c.bf16 %v245_v62, %v245_v62  ;;  %v304_v5 = vpack.c.bf16 %v265_v63, %v265_v63 }
  0xa5   :  { %v281_v6 = vpack.c.bf16 %v208_v2, %v208_v2  ;;  %v289_v7 = vpack.c.bf16 %v228_v3, %v228_v3 }
  0xa6   :  { %329 = vst.msk [vmem:[%s706_s3 + $0x4c] sm:$0xf] %vm309_vm1, %v296_v4 }
  0xa7   :  { %337 = vst.msk [vmem:[%s706_s3 + $0x6c] sm:$0xf] %vm309_vm1, %v304_v5 }
  0xa8   :  { %314 = vst.msk [vmem:[%s706_s3 + $0x10] sm:$0xf] %vm309_vm1, %v281_v6 }
  0xa9   :  { %322 = vst.msk [vmem:[%s706_s3 + $0x30] sm:$0xf] %vm309_vm1, %v289_v7  ;;  %v247_v8 = vpop.f32.mrf.mxu2  ;;  %v267_v9 = vpop.f32.mrf.mxu3 }
  0xaa   :  { %v248_v10 = vadd.f32 %v541_v17, %v247_v8  ;;  %v268_v11 = vadd.f32 %v541_v17, %v267_v9  ;;  %v209_v12 = vpop.f32.mrf.mxu0  ;;  %v229_v13 = vpop.f32.mrf.mxu1 }
  0xab   :  { %v210_v14 = vadd.f32 %v541_v17, %v209_v12  ;;  %v230_v15 = vadd.f32 %v541_v17, %v229_v13 }
  0xac   :  { %v297_v16 = vpack.c.bf16 %v248_v10, %v248_v10  ;;  %v305_v18 = vpack.c.bf16 %v268_v11, %v268_v11 }
  0xad   :  { %v282_v19 = vpack.c.bf16 %v210_v14, %v210_v14  ;;  %v290_v20 = vpack.c.bf16 %v230_v15, %v230_v15 }
  0xae   :  { %330 = vst.msk [vmem:[%s706_s3 + $0x50] sm:$0xf] %vm309_vm1, %v297_v16 }
  0xaf   :  { %338 = vst.msk [vmem:[%s706_s3 + $0x70] sm:$0xf] %vm309_vm1, %v305_v18 }
  0xb0   :  { %315 = vst.msk [vmem:[%s706_s3 + $0x14] sm:$0xf] %vm309_vm1, %v282_v19 }
  0xb1   :  { %323 = vst.msk [vmem:[%s706_s3 + $0x34] sm:$0xf] %vm309_vm1, %v290_v20  ;;  %v249_v21 = vpop.f32.mrf.mxu2  ;;  %v269_v22 = vpop.f32.mrf.mxu3 }
  0xb2   :  { %v250_v23 = vadd.f32 %v541_v17, %v249_v21  ;;  %v270_v24 = vadd.f32 %v541_v17, %v269_v22  ;;  %v212_v25 = vpop.f32.mrf.mxu0  ;;  %v232_v26 = vpop.f32.mrf.mxu1 }
  0xb3   :  { %v213_v27 = vadd.f32 %v541_v17, %v212_v25  ;;  %v233_v28 = vadd.f32 %v541_v17, %v232_v26 }
  0xb4   :  { %v298_v29 = vpack.c.bf16 %v250_v23, %v250_v23  ;;  %v306_v30 = vpack.c.bf16 %v270_v24, %v270_v24 }
  0xb5   :  { %v283_v31 = vpack.c.bf16 %v213_v27, %v213_v27  ;;  %v291_v32 = vpack.c.bf16 %v233_v28, %v233_v28 }
  0xb6   :  { %331 = vst.msk [vmem:[%s706_s3 + $0x54] sm:$0xf] %vm309_vm1, %v298_v29 }
  0xb7   :  { %339 = vst.msk [vmem:[%s706_s3 + $0x74] sm:$0xf] %vm309_vm1, %v306_v30 }
  0xb8   :  { %316 = vst.msk [vmem:[%s706_s3 + $0x18] sm:$0xf] %vm309_vm1, %v283_v31 }
  0xb9   :  { %324 = vst.msk [vmem:[%s706_s3 + $0x38] sm:$0xf] %vm309_vm1, %v291_v32  ;;  %v252_v33 = vpop.f32.mrf.mxu2  ;;  %v272_v34 = vpop.f32.mrf.mxu3 }
  0xba   :  { %v253_v35 = vadd.f32 %v541_v17, %v252_v33  ;;  %v273_v36 = vadd.f32 %v541_v17, %v272_v34  ;;  %v214_v37 = vpop.f32.mrf.mxu0  ;;  %v234_v38 = vpop.f32.mrf.mxu1 }
  0xbb   :  { %v215_v39 = vadd.f32 %v541_v17, %v214_v37  ;;  %v235_v40 = vadd.f32 %v541_v17, %v234_v38 }
  0xbc   :  { %v299_v41 = vpack.c.bf16 %v253_v35, %v253_v35  ;;  %v307_v42 = vpack.c.bf16 %v273_v36, %v273_v36 }
  0xbd   :  { %v284_v43 = vpack.c.bf16 %v215_v39, %v215_v39  ;;  %v292_v44 = vpack.c.bf16 %v235_v40, %v235_v40 }
  0xbe   :  { %332 = vst.msk [vmem:[%s706_s3 + $0x58] sm:$0xf] %vm309_vm1, %v299_v41 }
  0xbf   :  { %340 = vst.msk [vmem:[%s706_s3 + $0x78] sm:$0xf] %vm309_vm1, %v307_v42 }
  0xc0   :  { %317 = vst.msk [vmem:[%s706_s3 + $0x1c] sm:$0xf] %vm309_vm1, %v284_v43 }
  0xc1   :  { %325 = vst.msk [vmem:[%s706_s3 + $0x3c] sm:$0xf] %vm309_vm1, %v292_v44  ;;  %v254_v45 = vpop.f32.mrf.mxu2  ;;  %v274_v46 = vpop.f32.mrf.mxu3 }
  0xc2   :  { %v255_v47 = vadd.f32 %v541_v17, %v254_v45  ;;  %v275_v48 = vadd.f32 %v541_v17, %v274_v46 }
  0xc4   :  { %v300_v49 = vpack.c.bf16 %v255_v47, %v255_v47  ;;  %v308_v50 = vpack.c.bf16 %v275_v48, %v275_v48 }
  0xc6   :  { %333 = vst.msk [vmem:[%s706_s3 + $0x5c] sm:$0xf] %vm309_vm1, %v300_v49 }
  0xc7   :  { %341 = vst.msk [vmem:[%s706_s3 + $0x7c] sm:$0xf] %vm309_vm1, %v308_v50 }

// kernel: tiny_roma_forward.42
= control target key start
LH: loop header
LB: loop body
LE: loop exit
PB: predicated region body
PF: predicated region fallthrough
CT: control target
= control target key end

     0   :  { %vm467_vm0 = vcmask 261120   ;;  %vm847_vm1 = vcmask 257024   ;;  %s1836_s1 = inlined_call_operand.vmem [shape: bf16[288,32], index: 1, kind: input, shape index: {}]   ;;  %s1837_s0 = inlined_call_operand.vmem [shape: bf16[256,288], index: 0, kind: input, shape index: {}]   ;;  %s1838_s2 = inlined_call_operand.vmem [shape: f32[1,32], index: 2, kind: input, shape index: {}]   ;;  %s1839_s3 = inlined_call_operand.vmem [shape: bf16[256,32], index: 3, kind: output, shape index: {}]  }
   0x1   :  { %v1219_v0 = vld [vmem:[%s1836_s1 + $0x38] sm:$0xff]  ;;  %v1275_v1 = vld [vmem:[%s1836_s1 + $0x88] sm:$0xff]  ;;  %v1218_v3 = vld [vmem:[%s1836_s1 + $0x30] sm:$0xff] }
   0x2   :  { %v1227_v2 = vld [vmem:[%s1836_s1 + $0x78] sm:$0xff]  ;;  %516 = vmatpush.bf16.msra.mxu0 %v1219_v0  ;;  %1230 = vmatpush.bf16.msra.mxu3 %v1219_v0  ;;  %v1286_v4 = vld [vmem:[%s1836_s1 + $0x80] sm:$0xff]  ;;  %v1226_v5 = vld [vmem:[%s1836_s1 + $0x70] sm:$0xff] }
   0x3   :  { %700 = vmatpush.bf16.msra.mxu2 %v1275_v1  ;;  %605 = vmatpush.bf16.msra.mxu1 %v1227_v2  ;;  %v894_v6 = vld [vmem:[%s1837_s0 + $0x8] sm:$0xf]  ;;  %v1166_v7 = vld [vmem:[%s1837_s0 + $0x10] sm:$0xf0]  ;;  %v1216_v11 = vld [vmem:[%s1836_s1 + $0x20] sm:$0xff] }
   0x4   :  { %v895_v8 = vor.u32 %v1166_v7, %v894_v6  ;;  %v1217_v9 = vld [vmem:[%s1836_s1 + $0x28] sm:$0xff]  ;;  %v1224_v12 = vld [vmem:[%s1836_s1 + $0x60] sm:$0xff]  ;;  %v1215_v13 = vld [vmem:[%s1836_s1 + $0x18] sm:$0xff] }
   0x5   :  { %v1225_v10 = vld [vmem:[%s1836_s1 + $0x68] sm:$0xff]  ;;  %v1223_v14 = vld [vmem:[%s1836_s1 + $0x58] sm:$0xff]  ;;  %v1214_v15 = vld [vmem:[%s1836_s1 + $0x10] sm:$0xff] }
   0x6   :  { %517 = vmatpush.bf16.msra.mxu0 %v1218_v3  ;;  %1231 = vmatpush.bf16.msra.mxu3 %v1218_v3  ;;  %v1222_v16 = vld [vmem:[%s1836_s1 + $0x50] sm:$0xff]  ;;  %v906_v17 = vld [vmem:[%s1837_s0 + $0x20] sm:$0xf]  ;;  %v1169_v18 = vld [vmem:[%s1837_s0 + $0x28] sm:$0xf0] }
   0x7   :  { %701 = vmatpush.bf16.msra.mxu2 %v1286_v4  ;;  %606 = vmatpush.bf16.msra.mxu1 %v1226_v5  ;;  %v907_v19 = vor.u32 %v1169_v18, %v906_v17  ;;  %v1213_v20 = vld [vmem:[%s1836_s1 + $0x8] sm:$0xff]  ;;  %v1212_v22 = vld [vmem:[%s1836_s1] sm:$0xff]  ;;  %v888_v29 = vld [vmem:[%s1837_s0 + $0xc] sm:$0xf0] }
   0x8   :  { %v1221_v21 = vld [vmem:[%s1836_s1 + $0x48] sm:$0xff]  ;;  %v1220_v23 = vld [vmem:[%s1836_s1 + $0x40] sm:$0xff]  ;;  %v918_v33 = vld [vmem:[%s1837_s0 + $0x38] sm:$0xf] }
   0x9   :  { %v886_v24 = vld [vmem:[%s1837_s0] sm:$0xf]  ;;  %v1165_v25 = vld [vmem:[%s1837_s0 + $0x8] sm:$0xf0]  ;;  %v1164_v28 = vld [vmem:[%s1837_s0 + $0x4] sm:$0xf] }
   0xa   :  { %1148 = vmatmul.msk.bf16.vlgmr.msra.gmra.mxu2 %vm467_vm0, %v895_v8  ;;  %518 = vmatpush.bf16.msra.mxu0 %v1217_v9  ;;  %v1030_v26 = vld [vmem:[%s1837_s0 + $0x120] sm:$0xf]  ;;  %v1201_v27 = vld [vmem:[%s1837_s0 + $0x128] sm:$0xf0]  ;;  %v887_v30 = vor.u32 %v1165_v25, %v886_v24  ;;  %v891_v32 = vor.u32 %v1164_v28, %v888_v29  ;;  %v1172_v34 = vld [vmem:[%s1837_s0 + $0x40] sm:$0xf0] }
   0xb   :  { %1232 = vmatpush.bf16.msra.mxu3 %v1217_v9  ;;  %607 = vmatpush.bf16.msra.mxu1 %v1225_v10  ;;  %v1031_v31 = vor.u32 %v1201_v27, %v1030_v26  ;;  %v919_v35 = vor.u32 %v1172_v34, %v918_v33  ;;  %v898_v36 = vld [vmem:[%s1837_s0 + $0x18] sm:$0xf]  ;;  %v1168_v37 = vld [vmem:[%s1837_s0 + $0x20] sm:$0xf0]  ;;  %v1167_v40 = vld [vmem:[%s1837_s0 + $0x1c] sm:$0xf] }
   0xc   :  { %v1042_v38 = vld [vmem:[%s1837_s0 + $0x138] sm:$0xf]  ;;  %v1204_v39 = vld [vmem:[%s1837_s0 + $0x140] sm:$0xf0]  ;;  %v900_v41 = vld [vmem:[%s1837_s0 + $0x24] sm:$0xf0]  ;;  %v899_v42 = vor.u32 %v1168_v37, %v898_v36 }
   0xd   :  { %v1043_v43 = vor.u32 %v1204_v39, %v1042_v38  ;;  %v903_v44 = vor.u32 %v1167_v40, %v900_v41  ;;  %v930_v45 = vld [vmem:[%s1837_s0 + $0x50] sm:$0xf]  ;;  %v1175_v46 = vld [vmem:[%s1837_s0 + $0x58] sm:$0xf0]  ;;  %v1170_v52 = vld [vmem:[%s1837_s0 + $0x34] sm:$0xf] }
   0xe   :  { %519 = vmatpush.bf16.msra.mxu0 %v1216_v11  ;;  %v931_v47 = vor.u32 %v1175_v46, %v930_v45  ;;  %v910_v48 = vld [vmem:[%s1837_s0 + $0x30] sm:$0xf]  ;;  %v1171_v49 = vld [vmem:[%s1837_s0 + $0x38] sm:$0xf0]  ;;  %v912_v53 = vld [vmem:[%s1837_s0 + $0x3c] sm:$0xf0] }
   0xf   :  { %1233 = vmatpush.bf16.msra.mxu3 %v1216_v11  ;;  %608 = vmatpush.bf16.msra.mxu1 %v1224_v12  ;;  %v1054_v50 = vld [vmem:[%s1837_s0 + $0x150] sm:$0xf]  ;;  %v1207_v51 = vld [vmem:[%s1837_s0 + $0x158] sm:$0xf0]  ;;  %v911_v54 = vor.u32 %v1171_v49, %v910_v48  ;;  %v915_v56 = vor.u32 %v1170_v52, %v912_v53  ;;  %v942_v57 = vld [vmem:[%s1837_s0 + $0x68] sm:$0xf] }
  0x10   :  { %v1055_v55 = vor.u32 %v1207_v51, %v1054_v50  ;;  %v1178_v58 = vld [vmem:[%s1837_s0 + $0x70] sm:$0xf0]  ;;  %v922_v60 = vld [vmem:[%s1837_s0 + $0x48] sm:$0xf]  ;;  %v1173_v0 = vld [vmem:[%s1837_s0 + $0x4c] sm:$0xf] }
  0x11   :  { %v943_v59 = vor.u32 %v1178_v58, %v942_v57  ;;  %v1174_v61 = vld [vmem:[%s1837_s0 + $0x50] sm:$0xf0]  ;;  %v1066_v62 = vld [vmem:[%s1837_s0 + $0x168] sm:$0xf]  ;;  %v1181_v6 = vld [vmem:[%s1837_s0 + $0x88] sm:$0xf0] }
  0x12   :  { %520 = vmatpush.bf16.msra.mxu0 %v1215_v13  ;;  %v1210_v63 = vld [vmem:[%s1837_s0 + $0x170] sm:$0xf0]  ;;  %v934_v8 = vld [vmem:[%s1837_s0 + $0x60] sm:$0xf]  ;;  %v1177_v9 = vld [vmem:[%s1837_s0 + $0x68] sm:$0xf0] }
  0x13   :  { %1234 = vmatpush.bf16.msra.mxu3 %v1215_v13  ;;  %609 = vmatpush.bf16.msra.mxu1 %v1223_v14  ;;  %v1067_v3 = vor.u32 %v1210_v63, %v1066_v62  ;;  %v1032_v11 = vld [vmem:[%s1837_s0 + $0x12c] sm:$0xf0]  ;;  %v966_v17 = vld [vmem:[%s1837_s0 + $0x98] sm:$0xf]  ;;  %v1184_v18 = vld [vmem:[%s1837_s0 + $0xa0] sm:$0xf0] }
  0x14   :  { %v936_v13 = vld [vmem:[%s1837_s0 + $0x6c] sm:$0xf0]  ;;  %v1179_v24 = vld [vmem:[%s1837_s0 + $0x7c] sm:$0xf]  ;;  %v948_v25 = vld [vmem:[%s1837_s0 + $0x84] sm:$0xf0] }
  0x15   :  { %v951_v28 = vor.u32 %v1179_v24, %v948_v25  ;;  %v978_v29 = vld [vmem:[%s1837_s0 + $0xb0] sm:$0xf]  ;;  %v1183_v33 = vld [vmem:[%s1837_s0 + $0x98] sm:$0xf0]  ;;  %v1206_v34 = vld [vmem:[%s1837_s0 + $0x154] sm:$0xf] }
  0x16   :  { %521 = vmatpush.bf16.msra.mxu0 %v1214_v15  ;;  %v1182_v36 = vld [vmem:[%s1837_s0 + $0x94] sm:$0xf]  ;;  %v960_v37 = vld [vmem:[%s1837_s0 + $0x9c] sm:$0xf0]  ;;  %v990_v41 = vld [vmem:[%s1837_s0 + $0xc8] sm:$0xf] }
  0x17   :  { %1235 = vmatpush.bf16.msra.mxu3 %v1214_v15  ;;  %610 = vmatpush.bf16.msra.mxu1 %v1222_v16  ;;  %v963_v40 = vor.u32 %v1182_v36, %v960_v37  ;;  %v1186_v45 = vld [vmem:[%s1837_s0 + $0xb0] sm:$0xf0]  ;;  %v1209_v46 = vld [vmem:[%s1837_s0 + $0x16c] sm:$0xf]  ;;  %v972_v49 = vld [vmem:[%s1837_s0 + $0xb4] sm:$0xf0] }
  0x18   :  { %v1185_v48 = vld [vmem:[%s1837_s0 + $0xac] sm:$0xf]  ;;  %v1547_v58 = vld [vmem:[%s1838_s2] ss:$0 sm:$0xff]  ;;  %v1208_v62 = vld [vmem:[%s1837_s0 + $0x160] sm:$0xf0] }
  0x19   :  { %v975_v53 = vor.u32 %v1185_v48, %v972_v49  ;;  %v1188_v63 = vld [vmem:[%s1837_s0 + $0xc4] sm:$0xf]  ;;  %v1211_v25 = vld [vmem:[%s1837_s0 + $0x178] sm:$0xf0] }
  0x1a   :  { %1149 = vmatmul.msk.bf16.gmra.mxu2 %vm467_vm0, %v907_v19  ;;  %522 = vmatpush.bf16.msra.mxu0 %v1213_v20  ;;  %v967_v19 = vor.u32 %v1184_v18, %v966_v17 }
  0x1b   :  { %1236 = vmatpush.bf16.msra.mxu3 %v1213_v20  ;;  %611 = vmatpush.bf16.msra.mxu1 %v1221_v21  ;;  %v946_v20 = vld [vmem:[%s1837_s0 + $0x78] sm:$0xf] }
  0x1e   :  { %523 = vmatpush.bf16.msra.mxu0 %v1212_v22 }
  0x1f   :  { %1237 = vmatpush.bf16.msra.mxu3 %v1212_v22  ;;  %612 = vmatpush.bf16.msra.mxu1 %v1220_v23  ;;  %v1203_v22 = vld [vmem:[%s1837_s0 + $0x13c] sm:$0xf] }
  0x21   :  { %524 = vmatmul.bf16.vlgmr.msra.gmra.mxu0 %v887_v30  ;;  %v1187_v30 = vld [vmem:[%s1837_s0 + $0xb8] sm:$0xf0] }
  0x22   :  { %584 = vmatmul.bf16.vlgmr.msra.gmra.mxu3 %v1031_v31  ;;  %613 = vmatmul.bf16.vlgmr.msra.gmra.mxu1 %v891_v32  ;;  %v979_v31 = vor.u32 %v1187_v30, %v978_v29  ;;  %v958_v32 = vld [vmem:[%s1837_s0 + $0x90] sm:$0xf] }
  0x23   :  { %1238 = vmatpush.bf16.msrb.mxu3 %v1227_v2  ;;  %v923_v2 = vor.u32 %v1174_v61, %v922_v60  ;;  %v959_v38 = vor.u32 %v1183_v33, %v958_v32  ;;  %v1189_v60 = vld [vmem:[%s1837_s0 + $0xc8] sm:$0xf0]  ;;  %v1062_v61 = vld [vmem:[%s1837_s0 + $0x158] sm:$0xf] }
  0x27   :  { %1239 = vmatpush.bf16.msrb.mxu3 %v1226_v5  ;;  %v954_v5 = vld [vmem:[%s1837_s0 + $0x80] sm:$0xf] }
  0x28   :  { %v955_v7 = vor.u32 %v1181_v6, %v954_v5 }
  0x2a   :  { %1150 = vmatmul.msk.bf16.gmra.mxu2 %vm467_vm0, %v919_v35  ;;  %v1056_v35 = vld [vmem:[%s1837_s0 + $0x15c] sm:$0xf0] }
  0x2b   :  { %1240 = vmatpush.bf16.msrb.mxu3 %v1225_v10  ;;  %v1200_v10 = vld [vmem:[%s1837_s0 + $0x124] sm:$0xf]  ;;  %v1059_v39 = vor.u32 %v1206_v34, %v1056_v35 }
  0x2c   :  { %v1035_v15 = vor.u32 %v1200_v10, %v1032_v11  ;;  %v1014_v10 = vld [vmem:[%s1837_s0 + $0xf8] sm:$0xf]  ;;  %v1196_v11 = vld [vmem:[%s1837_s0 + $0x100] sm:$0xf0] }
  0x2f   :  { %1241 = vmatpush.bf16.msrb.mxu3 %v1224_v12  ;;  %v1176_v12 = vld [vmem:[%s1837_s0 + $0x64] sm:$0xf] }
  0x31   :  { %529 = vmatmul.bf16.gmra.mxu0 %v899_v42  ;;  %v1190_v42 = vld [vmem:[%s1837_s0 + $0xd0] sm:$0xf0] }
  0x32   :  { %589 = vmatmul.bf16.gmra.mxu3 %v1043_v43  ;;  %618 = vmatmul.bf16.gmra.mxu1 %v903_v44  ;;  %v991_v43 = vor.u32 %v1190_v42, %v990_v41  ;;  %v970_v44 = vld [vmem:[%s1837_s0 + $0xa8] sm:$0xf]  ;;  %v1199_v41 = vld [vmem:[%s1837_s0 + $0x118] sm:$0xf0] }
  0x33   :  { %1242 = vmatpush.bf16.msrb.mxu3 %v1223_v14  ;;  %v935_v14 = vor.u32 %v1177_v9, %v934_v8  ;;  %v971_v51 = vor.u32 %v1186_v45, %v970_v44 }
  0x37   :  { %1243 = vmatpush.bf16.msrb.mxu3 %v1222_v16  ;;  %v939_v16 = vor.u32 %v1176_v12, %v936_v13 }
  0x3a   :  { %1151 = vmatmul.msk.bf16.gmra.mxu2 %vm467_vm0, %v931_v47  ;;  %v1068_v47 = vld [vmem:[%s1837_s0 + $0x174] sm:$0xf0] }
  0x3b   :  { %1244 = vmatpush.bf16.msrb.mxu3 %v1221_v21  ;;  %v1180_v21 = vld [vmem:[%s1837_s0 + $0x80] sm:$0xf0]  ;;  %v1071_v52 = vor.u32 %v1209_v46, %v1068_v47 }
  0x3c   :  { %v947_v26 = vor.u32 %v1180_v21, %v946_v20  ;;  %v994_v21 = vld [vmem:[%s1837_s0 + $0xd8] sm:$0xf] }
  0x3f   :  { %1245 = vmatpush.bf16.msrb.mxu3 %v1220_v23  ;;  %v1044_v23 = vld [vmem:[%s1837_s0 + $0x144] sm:$0xf0] }
  0x40   :  { %v1047_v27 = vor.u32 %v1203_v22, %v1044_v23  ;;  %v1192_v22 = vld [vmem:[%s1837_s0 + $0xe0] sm:$0xf0]  ;;  %v1074_v23 = vld [vmem:[%s1837_s0 + $0x170] sm:$0xf] }
  0x41   :  { %534 = vmatmul.bf16.gmra.mxu0 %v911_v54  ;;  %v1002_v54 = vld [vmem:[%s1837_s0 + $0xe0] sm:$0xf]  ;;  %v1075_v33 = vor.u32 %v1211_v25, %v1074_v23 }
  0x42   :  { %594 = vmatmul.bf16.gmra.mxu3 %v1055_v55  ;;  %623 = vmatmul.bf16.gmra.mxu1 %v915_v56  ;;  %v1193_v55 = vld [vmem:[%s1837_s0 + $0xe8] sm:$0xf0] }
  0x43   :  { %1246 = vmatpush.bf16.msra.mxu3 %v1275_v1  ;;  %v924_v1 = vld [vmem:[%s1837_s0 + $0x54] sm:$0xf0]  ;;  %v1003_v57 = vor.u32 %v1193_v55, %v1002_v54  ;;  %v1194_v54 = vld [vmem:[%s1837_s0 + $0xf4] sm:$0xf]  ;;  %v1008_v55 = vld [vmem:[%s1837_s0 + $0xfc] sm:$0xf0] }
  0x47   :  { %1247 = vmatpush.bf16.msra.mxu3 %v1286_v4  ;;  %v927_v4 = vor.u32 %v1173_v0, %v924_v1  ;;  %v984_v0 = vld [vmem:[%s1837_s0 + $0xcc] sm:$0xf0] }
  0x48   :  { %v987_v5 = vor.u32 %v1188_v63, %v984_v0 }
  0x4a   :  { %1152 = vmatmul.msk.bf16.gmra.mxu2 %vm467_vm0, %v943_v59  ;;  %v982_v59 = vld [vmem:[%s1837_s0 + $0xc0] sm:$0xf] }
  0x51   :  { %539 = vmatmul.bf16.gmra.mxu0 %v923_v2  ;;  %v983_v2 = vor.u32 %v1189_v60, %v982_v59 }
  0x52   :  { %599 = vmatmul.bf16.gmra.mxu3 %v1067_v3  ;;  %628 = vmatmul.bf16.gmra.mxu1 %v927_v4  ;;  %v1063_v4 = vor.u32 %v1208_v62, %v1062_v61  ;;  %v1011_v62 = vor.u32 %v1194_v54, %v1008_v55 }
  0x5a   :  { %1153 = vmatmul.msk.bf16.gmra.mxu2 %vm467_vm0, %v955_v7 }
  0x61   :  { %544 = vmatmul.bf16.gmra.mxu0 %v935_v14 }
  0x62   :  { %673 = vmatmul.bf16.vlgmr.msrb.gmra.mxu3 %v1035_v15  ;;  %633 = vmatmul.bf16.gmra.mxu1 %v939_v16  ;;  %v1015_v16 = vor.u32 %v1196_v11, %v1014_v10 }
  0x6a   :  { %1154 = vmatmul.msk.bf16.gmra.mxu2 %vm467_vm0, %v967_v19 }
  0x71   :  { %549 = vmatmul.bf16.gmra.mxu0 %v947_v26  ;;  %v1191_v26 = vld [vmem:[%s1837_s0 + $0xdc] sm:$0xf] }
  0x72   :  { %678 = vmatmul.bf16.gmra.mxu3 %v1047_v27  ;;  %638 = vmatmul.bf16.gmra.mxu1 %v951_v28  ;;  %v996_v27 = vld [vmem:[%s1837_s0 + $0xe4] sm:$0xf0] }
  0x73   :  { %v999_v34 = vor.u32 %v1191_v26, %v996_v27 }
  0x7a   :  { %1155 = vmatmul.msk.bf16.gmra.mxu2 %vm467_vm0, %v979_v31  ;;  %v995_v31 = vor.u32 %v1192_v22, %v994_v21 }
  0x81   :  { %554 = vmatmul.bf16.gmra.mxu0 %v959_v38 }
  0x82   :  { %683 = vmatmul.bf16.gmra.mxu3 %v1059_v39  ;;  %643 = vmatmul.bf16.gmra.mxu1 %v963_v40  ;;  %v1026_v40 = vld [vmem:[%s1837_s0 + $0x110] sm:$0xf] }
  0x83   :  { %v1027_v46 = vor.u32 %v1199_v41, %v1026_v40 }
  0x8a   :  { %1156 = vmatmul.msk.bf16.gmra.mxu2 %vm467_vm0, %v991_v43 }
  0x8d   :  { %v703_v50 = vpop.f32.mrf.mxu2 }
  0x91   :  { %559 = vmatmul.bf16.gmra.mxu0 %v971_v51  ;;  %v1006_v51 = vld [vmem:[%s1837_s0 + $0xf0] sm:$0xf] }
  0x92   :  { %688 = vmatmul.bf16.gmra.mxu3 %v1071_v52  ;;  %648 = vmatmul.bf16.gmra.mxu1 %v975_v53  ;;  %v1195_v52 = vld [vmem:[%s1837_s0 + $0xf8] sm:$0xf0] }
  0x93   :  { %v1007_v60 = vor.u32 %v1195_v52, %v1006_v51 }
  0x95   :  { %v705_v56 = vpop.f32.mrf.mxu2 }
  0x9a   :  { %1157 = vmatmul.msk.bf16.gmra.mxu2 %vm467_vm0, %v1003_v57 }
  0x9d   :  { %v708_v1 = vpop.f32.mrf.mxu2 }
  0x9e   :  { %v525_v3 = vpop.f32.mrf.mxu0 }
  0x9f   :  { %v526_v6 = vadd.f32 %v1547_v58, %v525_v3  ;;  %v614_v7 = vpop.f32.mrf.mxu1 }
  0xa1   :  { %v615_v8 = vadd.f32 %v614_v7, %v526_v6  ;;  %564 = vmatmul.bf16.gmra.mxu0 %v983_v2 }
  0xa2   :  { %1162 = vmatmul.msk.bf16.vlgmr.msra.gmra.mxu3 %vm467_vm0, %v1063_v4  ;;  %653 = vmatmul.bf16.gmra.mxu1 %v987_v5  ;;  %v1038_v4 = vld [vmem:[%s1837_s0 + $0x128] sm:$0xf]  ;;  %v1202_v5 = vld [vmem:[%s1837_s0 + $0x130] sm:$0xf0] }
  0xa3   :  { %v704_v9 = vadd.f32 %v703_v50, %v615_v8  ;;  %v1039_v10 = vor.u32 %v1202_v5, %v1038_v4 }
  0xa5   :  { %v783_v12 = vmax.f32 %v704_v9, 0.0  ;;  %v1576_v13 = vpop.f32.mrf.mxu3  ;;  %v710_v14 = vpop.f32.mrf.mxu2 }
  0xa6   :  { %v527_v15 = vpop.f32.mrf.mxu0  ;;  %v586_v55 = vadd.f32 %v1547_v58, %v1576_v13 }
  0xa7   :  { %v815_v17 = vpack.c.bf16 %v783_v12, %v783_v12  ;;  %v528_v18 = vadd.f32 %v1547_v58, %v527_v15  ;;  %v616_v19 = vpop.f32.mrf.mxu1 }
  0xa9   :  { %848 = vst.msk [vmem:[%s1839_s3] sm:$0xf] %vm847_vm1, %v815_v17  ;;  %v617_v20 = vadd.f32 %v616_v19, %v528_v18  ;;  %v1198_v17 = vld [vmem:[%s1837_s0 + $0x110] sm:$0xf0]  ;;  %v1197_v19 = vld [vmem:[%s1837_s0 + $0x10c] sm:$0xf] }
  0xaa   :  { %1158 = vmatmul.msk.bf16.gmra.mxu2 %vm467_vm0, %v1015_v16  ;;  %v1018_v16 = vld [vmem:[%s1837_s0 + $0x108] sm:$0xf] }
  0xab   :  { %v706_v24 = vadd.f32 %v705_v56, %v617_v20  ;;  %v1020_v20 = vld [vmem:[%s1837_s0 + $0x114] sm:$0xf0] }
  0xac   :  { %v1023_v26 = vor.u32 %v1197_v19, %v1020_v20 }
  0xad   :  { %v784_v28 = vmax.f32 %v706_v24, 0.0  ;;  %v1602_v29 = vpop.f32.mrf.mxu3  ;;  %v713_v30 = vpop.f32.mrf.mxu2  ;;  %v1019_v24 = vor.u32 %v1198_v17, %v1018_v16 }
  0xae   :  { %v530_v32 = vpop.f32.mrf.mxu0  ;;  %v588_v13 = vadd.f32 %v1547_v58, %v1602_v29 }
  0xaf   :  { %v816_v35 = vpack.c.bf16 %v784_v28, %v784_v28  ;;  %v531_v36 = vadd.f32 %v1547_v58, %v530_v32  ;;  %v619_v37 = vpop.f32.mrf.mxu1 }
  0xb1   :  { %849 = vst.msk [vmem:[%s1839_s3 + $0x4] sm:$0xf] %vm847_vm1, %v816_v35  ;;  %v620_v38 = vadd.f32 %v619_v37, %v531_v36  ;;  %569 = vmatmul.bf16.gmra.mxu0 %v995_v31 }
  0xb2   :  { %1163 = vmatmul.msk.bf16.gmra.mxu3 %vm467_vm0, %v1075_v33  ;;  %658 = vmatmul.bf16.gmra.mxu1 %v999_v34  ;;  %v1050_v33 = vld [vmem:[%s1837_s0 + $0x140] sm:$0xf]  ;;  %v1205_v34 = vld [vmem:[%s1837_s0 + $0x148] sm:$0xf0] }
  0xb3   :  { %v709_v39 = vadd.f32 %v708_v1, %v620_v38 }
  0xb5   :  { %v785_v42 = vmax.f32 %v709_v39, 0.0  ;;  %v1616_v43 = vpop.f32.mrf.mxu3  ;;  %v715_v44 = vpop.f32.mrf.mxu2  ;;  %v1051_v39 = vor.u32 %v1205_v34, %v1050_v33 }
  0xb6   :  { %v532_v45 = vpop.f32.mrf.mxu0  ;;  %v591_v29 = vadd.f32 %v1547_v58, %v1616_v43 }
  0xb7   :  { %v817_v47 = vpack.c.bf16 %v785_v42, %v785_v42  ;;  %v533_v48 = vadd.f32 %v1547_v58, %v532_v45  ;;  %v621_v49 = vpop.f32.mrf.mxu1 }
  0xb9   :  { %850 = vst.msk [vmem:[%s1839_s3 + $0x8] sm:$0xf] %vm847_vm1, %v817_v47  ;;  %v622_v50 = vadd.f32 %v621_v49, %v533_v48 }
  0xba   :  { %1159 = vmatmul.msk.bf16.gmra.mxu2 %vm467_vm0, %v1027_v46 }
  0xbb   :  { %v711_v53 = vadd.f32 %v710_v14, %v622_v50 }
  0xbd   :  { %v786_v56 = vmax.f32 %v711_v53, 0.0  ;;  %v1636_v57 = vpop.f32.mrf.mxu3  ;;  %v718_v59 = vpop.f32.mrf.mxu2 }
  0xbe   :  { %v535_v61 = vpop.f32.mrf.mxu0  ;;  %v593_v43 = vadd.f32 %v1547_v58, %v1636_v57 }
  0xbf   :  { %v818_v63 = vpack.c.bf16 %v786_v56, %v786_v56  ;;  %v536_v0 = vadd.f32 %v1547_v58, %v535_v61  ;;  %v624_v1 = vpop.f32.mrf.mxu1 }
  0xc1   :  { %851 = vst.msk [vmem:[%s1839_s3 + $0xc] sm:$0xf] %vm847_vm1, %v818_v63  ;;  %v625_v2 = vadd.f32 %v624_v1, %v536_v0  ;;  %574 = vmatmul.bf16.gmra.mxu0 %v1007_v60 }
  0xc2   :  { %663 = vmatmul.bf16.gmra.mxu1 %v1011_v62 }
  0xc3   :  { %v714_v3 = vadd.f32 %v713_v30, %v625_v2 }
  0xc5   :  { %v787_v6 = vmax.f32 %v714_v3, 0.0  ;;  %v1649_v7 = vpop.f32.mrf.mxu3  ;;  %v720_v8 = vpop.f32.mrf.mxu2 }
  0xc6   :  { %v537_v9 = vpop.f32.mrf.mxu0 }
  0xc7   :  { %v819_v11 = vpack.c.bf16 %v787_v6, %v787_v6  ;;  %v538_v12 = vadd.f32 %v1547_v58, %v537_v9  ;;  %v626_v14 = vpop.f32.mrf.mxu1 }
  0xc9   :  { %852 = vst.msk [vmem:[%s1839_s3 + $0x10] sm:$0xf] %vm847_vm1, %v819_v11  ;;  %v627_v15 = vadd.f32 %v626_v14, %v538_v12 }
  0xca   :  { %1160 = vmatmul.msk.bf16.gmra.mxu2 %vm467_vm0, %v1039_v10 }
  0xcb   :  { %v716_v18 = vadd.f32 %v715_v44, %v627_v15 }
  0xcd   :  { %v788_v21 = vmax.f32 %v716_v18, 0.0  ;;  %v1669_v22 = vpop.f32.mrf.mxu3  ;;  %v723_v23 = vpop.f32.mrf.mxu2 }
  0xce   :  { %v540_v25 = vpop.f32.mrf.mxu0 }
  0xcf   :  { %v820_v27 = vpack.c.bf16 %v788_v21, %v788_v21  ;;  %v541_v28 = vadd.f32 %v1547_v58, %v540_v25  ;;  %v629_v30 = vpop.f32.mrf.mxu1 }
  0xd1   :  { %853 = vst.msk [vmem:[%s1839_s3 + $0x14] sm:$0xf] %vm847_vm1, %v820_v27  ;;  %v630_v31 = vadd.f32 %v629_v30, %v541_v28  ;;  %579 = vmatmul.bf16.gmra.mxu0 %v1019_v24 }
  0xd2   :  { %668 = vmatmul.bf16.gmra.mxu1 %v1023_v26 }
  0xd3   :  { %v719_v32 = vadd.f32 %v718_v59, %v630_v31 }
  0xd5   :  { %v789_v35 = vmax.f32 %v719_v32, 0.0  ;;  %v1682_v36 = vpop.f32.mrf.mxu3  ;;  %v725_v37 = vpop.f32.mrf.mxu2 }
  0xd6   :  { %v542_v38 = vpop.f32.mrf.mxu0 }
  0xd7   :  { %v821_v40 = vpack.c.bf16 %v789_v35, %v789_v35  ;;  %v543_v41 = vadd.f32 %v1547_v58, %v542_v38  ;;  %v631_v42 = vpop.f32.mrf.mxu1 }
  0xd9   :  { %854 = vst.msk [vmem:[%s1839_s3 + $0x18] sm:$0xf] %vm847_vm1, %v821_v40  ;;  %v632_v44 = vadd.f32 %v631_v42, %v543_v41 }
  0xda   :  { %1161 = vmatmul.msk.bf16.gmra.mxu2 %vm467_vm0, %v1051_v39 }
  0xdb   :  { %v721_v45 = vadd.f32 %v720_v8, %v632_v44 }
  0xdd   :  { %v790_v46 = vmax.f32 %v721_v45, 0.0  ;;  %v1690_v47 = vpop.f32.mrf.mxu3  ;;  %v728_v48 = vpop.f32.mrf.mxu2 }
  0xde   :  { %v545_v49 = vpop.f32.mrf.mxu0 }
  0xdf   :  { %v822_v50 = vpack.c.bf16 %v790_v46, %v790_v46  ;;  %v546_v51 = vadd.f32 %v1547_v58, %v545_v49  ;;  %v634_v52 = vpop.f32.mrf.mxu1 }
  0xe1   :  { %855 = vst.msk [vmem:[%s1839_s3 + $0x1c] sm:$0xf] %vm847_vm1, %v822_v50  ;;  %v635_v53 = vadd.f32 %v634_v52, %v546_v51 }
  0xe3   :  { %v724_v54 = vadd.f32 %v723_v23, %v635_v53 }
  0xe5   :  { %v791_v56 = vmax.f32 %v724_v54, 0.0  ;;  %v674_v59 = vpop.f32.mrf.mxu3  ;;  %v730_v60 = vpop.f32.mrf.mxu2 }
  0xe6   :  { %v1699_v61 = vadd.f32 %v674_v59, %v586_v55  ;;  %v547_v62 = vpop.f32.mrf.mxu0 }
  0xe7   :  { %v823_v63 = vpack.c.bf16 %v791_v56, %v791_v56  ;;  %v548_v0 = vadd.f32 %v1547_v58, %v547_v62  ;;  %v636_v1 = vpop.f32.mrf.mxu1 }
  0xe9   :  { %856 = vst.msk [vmem:[%s1839_s3 + $0x20] sm:$0xf] %vm847_vm1, %v823_v63  ;;  %v637_v2 = vadd.f32 %v636_v1, %v548_v0 }
  0xeb   :  { %v726_v3 = vadd.f32 %v725_v37, %v637_v2 }
  0xed   :  { %v792_v4 = vmax.f32 %v726_v3, 0.0  ;;  %v676_v5 = vpop.f32.mrf.mxu3  ;;  %v733_v6 = vpop.f32.mrf.mxu2 }
  0xee   :  { %v1708_v8 = vadd.f32 %v676_v5, %v588_v13  ;;  %v550_v9 = vpop.f32.mrf.mxu0 }
  0xef   :  { %v824_v10 = vpack.c.bf16 %v792_v4, %v792_v4  ;;  %v551_v11 = vadd.f32 %v1547_v58, %v550_v9  ;;  %v639_v12 = vpop.f32.mrf.mxu1 }
  0xf1   :  { %857 = vst.msk [vmem:[%s1839_s3 + $0x24] sm:$0xf] %vm847_vm1, %v824_v10  ;;  %v640_v14 = vadd.f32 %v639_v12, %v551_v11 }
  0xf3   :  { %v729_v15 = vadd.f32 %v728_v48, %v640_v14 }
  0xf5   :  { %v793_v16 = vmax.f32 %v729_v15, 0.0  ;;  %v679_v17 = vpop.f32.mrf.mxu3  ;;  %v735_v18 = vpop.f32.mrf.mxu2 }
  0xf6   :  { %v1717_v19 = vadd.f32 %v679_v17, %v591_v29  ;;  %v552_v20 = vpop.f32.mrf.mxu0  ;;  %v596_v29 = vadd.f32 %v1547_v58, %v1649_v7  ;;  %v598_v7 = vadd.f32 %v1547_v58, %v1669_v22 }
  0xf7   :  { %v825_v21 = vpack.c.bf16 %v793_v16, %v793_v16  ;;  %v553_v23 = vadd.f32 %v1547_v58, %v552_v20  ;;  %v641_v24 = vpop.f32.mrf.mxu1 }
  0xf9   :  { %858 = vst.msk [vmem:[%s1839_s3 + $0x28] sm:$0xf] %vm847_vm1, %v825_v21  ;;  %v642_v25 = vadd.f32 %v641_v24, %v553_v23 }
  0xfb   :  { %v731_v26 = vadd.f32 %v730_v60, %v642_v25 }
  0xfd   :  { %v794_v27 = vmax.f32 %v731_v26, 0.0  ;;  %v681_v28 = vpop.f32.mrf.mxu3  ;;  %v738_v30 = vpop.f32.mrf.mxu2 }
  0xfe   :  { %v1726_v31 = vadd.f32 %v681_v28, %v593_v43  ;;  %v555_v32 = vpop.f32.mrf.mxu0 }
  0xff   :  { %v826_v33 = vpack.c.bf16 %v794_v27, %v794_v27  ;;  %v556_v34 = vadd.f32 %v1547_v58, %v555_v32  ;;  %v644_v35 = vpop.f32.mrf.mxu1 }
 0x101   :  { %859 = vst.msk [vmem:[%s1839_s3 + $0x2c] sm:$0xf] %vm847_vm1, %v826_v33  ;;  %v645_v37 = vadd.f32 %v644_v35, %v556_v34 }
 0x103   :  { %v734_v38 = vadd.f32 %v733_v6, %v645_v37 }
 0x105   :  { %v795_v39 = vmax.f32 %v734_v38, 0.0  ;;  %v684_v40 = vpop.f32.mrf.mxu3  ;;  %v740_v57 = vpop.f32.mrf.mxu2 }
 0x106   :  { %v557_v41 = vpop.f32.mrf.mxu0  ;;  %v685_v17 = vadd.f32 %v684_v40, %v596_v29 }
 0x107   :  { %v827_v42 = vpack.c.bf16 %v795_v39, %v795_v39  ;;  %v558_v44 = vadd.f32 %v1547_v58, %v557_v41  ;;  %v646_v45 = vpop.f32.mrf.mxu1 }
 0x109   :  { %860 = vst.msk [vmem:[%s1839_s3 + $0x30] sm:$0xf] %vm847_vm1, %v827_v42  ;;  %v647_v46 = vadd.f32 %v646_v45, %v558_v44  ;;  %v601_v44 = vadd.f32 %v1547_v58, %v1682_v36 }
 0x10b   :  { %v736_v48 = vadd.f32 %v735_v18, %v647_v46 }
 0x10d   :  { %v796_v49 = vmax.f32 %v736_v48, 0.0  ;;  %v686_v50 = vpop.f32.mrf.mxu3  ;;  %v743_v51 = vpop.f32.mrf.mxu2 }
 0x10e   :  { %v560_v52 = vpop.f32.mrf.mxu0  ;;  %v687_v33 = vadd.f32 %v686_v50, %v598_v7 }
 0x10f   :  { %v828_v53 = vpack.c.bf16 %v796_v49, %v796_v49  ;;  %v561_v54 = vadd.f32 %v1547_v58, %v560_v52  ;;  %v649_v55 = vpop.f32.mrf.mxu1 }
 0x111   :  { %861 = vst.msk [vmem:[%s1839_s3 + $0x34] sm:$0xf] %vm847_vm1, %v828_v53  ;;  %v650_v56 = vadd.f32 %v649_v55, %v561_v54 }
 0x113   :  { %v739_v59 = vadd.f32 %v738_v30, %v650_v56 }
 0x115   :  { %v797_v60 = vmax.f32 %v739_v59, 0.0  ;;  %v689_v62 = vpop.f32.mrf.mxu3  ;;  %v745_v63 = vpop.f32.mrf.mxu2 }
 0x116   :  { %v562_v0 = vpop.f32.mrf.mxu0  ;;  %v690_v48 = vadd.f32 %v689_v62, %v601_v44 }
 0x117   :  { %v829_v1 = vpack.c.bf16 %v797_v60, %v797_v60  ;;  %v563_v2 = vadd.f32 %v1547_v58, %v562_v0  ;;  %v651_v3 = vpop.f32.mrf.mxu1  ;;  %v603_v60 = vadd.f32 %v1547_v58, %v1690_v47 }
 0x119   :  { %862 = vst.msk [vmem:[%s1839_s3 + $0x38] sm:$0xf] %vm847_vm1, %v829_v1  ;;  %v652_v13 = vadd.f32 %v651_v3, %v563_v2 }
 0x11b   :  { %v741_v4 = vadd.f32 %v740_v57, %v652_v13 }
 0x11d   :  { %v798_v5 = vmax.f32 %v741_v4, 0.0  ;;  %v691_v6 = vpop.f32.mrf.mxu3  ;;  %v748_v9 = vpop.f32.mrf.mxu2 }
 0x11e   :  { %v565_v10 = vpop.f32.mrf.mxu0  ;;  %v692_v0 = vadd.f32 %v691_v6, %v603_v60 }
 0x11f   :  { %v830_v11 = vpack.c.bf16 %v798_v5, %v798_v5  ;;  %v566_v12 = vadd.f32 %v1547_v58, %v565_v10  ;;  %v654_v14 = vpop.f32.mrf.mxu1 }
 0x121   :  { %863 = vst.msk [vmem:[%s1839_s3 + $0x3c] sm:$0xf] %vm847_vm1, %v830_v11  ;;  %v655_v15 = vadd.f32 %v654_v14, %v566_v12 }
 0x123   :  { %v744_v16 = vadd.f32 %v743_v51, %v655_v15 }
 0x125   :  { %v799_v18 = vmax.f32 %v744_v16, 0.0  ;;  %v750_v20 = vpop.f32.mrf.mxu2  ;;  %v773_v21 = vpop.f32.mrf.mxu3 }
 0x126   :  { %v774_v23 = vadd.f32 %v773_v21, %v685_v17  ;;  %v567_v24 = vpop.f32.mrf.mxu0 }
 0x127   :  { %v831_v25 = vpack.c.bf16 %v799_v18, %v799_v18  ;;  %v568_v26 = vadd.f32 %v1547_v58, %v567_v24  ;;  %v656_v43 = vpop.f32.mrf.mxu1 }
 0x128   :  { %v811_v27 = vmax.f32 %v774_v23, 0.0 }
 0x129   :  { %864 = vst.msk [vmem:[%s1839_s3 + $0x40] sm:$0xf] %vm847_vm1, %v831_v25  ;;  %v657_v28 = vadd.f32 %v656_v43, %v568_v26 }
 0x12a   :  { %v843_v30 = vpack.c.bf16 %v811_v27, %v811_v27 }
 0x12b   :  { %v746_v32 = vadd.f32 %v745_v63, %v657_v28 }
 0x12c   :  { %876 = vst.msk [vmem:[%s1839_s3 + $0x70] sm:$0xf] %vm847_vm1, %v843_v30 }
 0x12d   :  { %v800_v34 = vmax.f32 %v746_v32, 0.0  ;;  %v753_v35 = vpop.f32.mrf.mxu2  ;;  %v775_v37 = vpop.f32.mrf.mxu3 }
 0x12e   :  { %v776_v38 = vadd.f32 %v775_v37, %v687_v33  ;;  %v570_v39 = vpop.f32.mrf.mxu0 }
 0x12f   :  { %v832_v40 = vpack.c.bf16 %v800_v34, %v800_v34  ;;  %v571_v57 = vadd.f32 %v1547_v58, %v570_v39  ;;  %v659_v41 = vpop.f32.mrf.mxu1 }
 0x130   :  { %v812_v42 = vmax.f32 %v776_v38, 0.0 }
 0x131   :  { %865 = vst.msk [vmem:[%s1839_s3 + $0x44] sm:$0xf] %vm847_vm1, %v832_v40  ;;  %v660_v22 = vadd.f32 %v659_v41, %v571_v57 }
 0x132   :  { %v844_v45 = vpack.c.bf16 %v812_v42, %v812_v42 }
 0x133   :  { %v749_v46 = vadd.f32 %v748_v9, %v660_v22 }
 0x134   :  { %877 = vst.msk [vmem:[%s1839_s3 + $0x74] sm:$0xf] %vm847_vm1, %v844_v45 }
 0x135   :  { %v801_v49 = vmax.f32 %v749_v46, 0.0  ;;  %v755_v50 = vpop.f32.mrf.mxu2  ;;  %v778_v51 = vpop.f32.mrf.mxu3 }
 0x136   :  { %v779_v52 = vadd.f32 %v778_v51, %v690_v48  ;;  %v572_v53 = vpop.f32.mrf.mxu0 }
 0x137   :  { %v833_v54 = vpack.c.bf16 %v801_v49, %v801_v49  ;;  %v573_v55 = vadd.f32 %v1547_v58, %v572_v53  ;;  %v661_v56 = vpop.f32.mrf.mxu1 }
 0x138   :  { %v813_v59 = vmax.f32 %v779_v52, 0.0 }
 0x139   :  { %866 = vst.msk [vmem:[%s1839_s3 + $0x48] sm:$0xf] %vm847_vm1, %v833_v54  ;;  %v662_v36 = vadd.f32 %v661_v56, %v573_v55 }
 0x13a   :  { %v845_v62 = vpack.c.bf16 %v813_v59, %v813_v59 }
 0x13b   :  { %v751_v63 = vadd.f32 %v750_v20, %v662_v36 }
 0x13c   :  { %878 = vst.msk [vmem:[%s1839_s3 + $0x78] sm:$0xf] %vm847_vm1, %v845_v62 }
 0x13d   :  { %v802_v1 = vmax.f32 %v751_v63, 0.0  ;;  %v758_v2 = vpop.f32.mrf.mxu2  ;;  %v780_v3 = vpop.f32.mrf.mxu3 }
 0x13e   :  { %v781_v13 = vadd.f32 %v780_v3, %v692_v0  ;;  %v575_v4 = vpop.f32.mrf.mxu0 }
 0x13f   :  { %v834_v5 = vpack.c.bf16 %v802_v1, %v802_v1  ;;  %v576_v9 = vadd.f32 %v1547_v58, %v575_v4  ;;  %v664_v10 = vpop.f32.mrf.mxu1 }
 0x140   :  { %v814_v11 = vmax.f32 %v781_v13, 0.0 }
 0x141   :  { %867 = vst.msk [vmem:[%s1839_s3 + $0x4c] sm:$0xf] %vm847_vm1, %v834_v5  ;;  %v665_v47 = vadd.f32 %v664_v10, %v576_v9 }
 0x142   :  { %v846_v6 = vpack.c.bf16 %v814_v11, %v814_v11 }
 0x143   :  { %v754_v12 = vadd.f32 %v753_v35, %v665_v47 }
 0x144   :  { %879 = vst.msk [vmem:[%s1839_s3 + $0x7c] sm:$0xf] %vm847_vm1, %v846_v6 }
 0x145   :  { %v803_v14 = vmax.f32 %v754_v12, 0.0  ;;  %v760_v15 = vpop.f32.mrf.mxu2 }
 0x146   :  { %v577_v29 = vpop.f32.mrf.mxu0 }
 0x147   :  { %v835_v16 = vpack.c.bf16 %v803_v14, %v803_v14  ;;  %v578_v17 = vadd.f32 %v1547_v58, %v577_v29  ;;  %v666_v18 = vpop.f32.mrf.mxu1 }
 0x149   :  { %868 = vst.msk [vmem:[%s1839_s3 + $0x50] sm:$0xf] %vm847_vm1, %v835_v16  ;;  %v667_v20 = vadd.f32 %v666_v18, %v578_v17 }
 0x14b   :  { %v756_v21 = vadd.f32 %v755_v50, %v667_v20 }
 0x14d   :  { %v804_v23 = vmax.f32 %v756_v21, 0.0  ;;  %v763_v24 = vpop.f32.mrf.mxu2 }
 0x14e   :  { %v764_v25 = vadd.f32 %v763_v24, %v1699_v61  ;;  %v580_v26 = vpop.f32.mrf.mxu0 }
 0x14f   :  { %v836_v43 = vpack.c.bf16 %v804_v23, %v804_v23  ;;  %v581_v27 = vadd.f32 %v1547_v58, %v580_v26  ;;  %v669_v28 = vpop.f32.mrf.mxu1 }
 0x150   :  { %v807_v7 = vmax.f32 %v764_v25, 0.0 }
 0x151   :  { %869 = vst.msk [vmem:[%s1839_s3 + $0x54] sm:$0xf] %vm847_vm1, %v836_v43  ;;  %v670_v30 = vadd.f32 %v669_v28, %v581_v27 }
 0x152   :  { %v839_v32 = vpack.c.bf16 %v807_v7, %v807_v7 }
 0x153   :  { %v759_v33 = vadd.f32 %v758_v2, %v670_v30 }
 0x154   :  { %872 = vst.msk [vmem:[%s1839_s3 + $0x60] sm:$0xf] %vm847_vm1, %v839_v32 }
 0x155   :  { %v805_v61 = vmax.f32 %v759_v33, 0.0  ;;  %v765_v34 = vpop.f32.mrf.mxu2 }
 0x156   :  { %v766_v35 = vadd.f32 %v765_v34, %v1708_v8  ;;  %v582_v37 = vpop.f32.mrf.mxu0 }
 0x157   :  { %v837_v38 = vpack.c.bf16 %v805_v61, %v805_v61  ;;  %v583_v39 = vadd.f32 %v1547_v58, %v582_v37  ;;  %v671_v40 = vpop.f32.mrf.mxu1 }
 0x158   :  { %v808_v57 = vmax.f32 %v766_v35, 0.0 }
 0x159   :  { %870 = vst.msk [vmem:[%s1839_s3 + $0x58] sm:$0xf] %vm847_vm1, %v837_v38  ;;  %v672_v41 = vadd.f32 %v671_v40, %v583_v39 }
 0x15a   :  { %v840_v42 = vpack.c.bf16 %v808_v57, %v808_v57 }
 0x15b   :  { %v761_v22 = vadd.f32 %v760_v15, %v672_v41 }
 0x15c   :  { %873 = vst.msk [vmem:[%s1839_s3 + $0x64] sm:$0xf] %vm847_vm1, %v840_v42 }
 0x15d   :  { %v806_v8 = vmax.f32 %v761_v22, 0.0  ;;  %v768_v44 = vpop.f32.mrf.mxu2 }
 0x15e   :  { %v769_v45 = vadd.f32 %v768_v44, %v1717_v19 }
 0x15f   :  { %v838_v58 = vpack.c.bf16 %v806_v8, %v806_v8 }
 0x160   :  { %v809_v46 = vmax.f32 %v769_v45, 0.0 }
 0x161   :  { %871 = vst.msk [vmem:[%s1839_s3 + $0x5c] sm:$0xf] %vm847_vm1, %v838_v58 }
 0x162   :  { %v841_v48 = vpack.c.bf16 %v809_v46, %v809_v46 }
 0x164   :  { %874 = vst.msk [vmem:[%s1839_s3 + $0x68] sm:$0xf] %vm847_vm1, %v841_v48 }
 0x165   :  { %v770_v49 = vpop.f32.mrf.mxu2 }
 0x166   :  { %v771_v50 = vadd.f32 %v770_v49, %v1726_v31 }
 0x168   :  { %v810_v51 = vmax.f32 %v771_v50, 0.0 }
 0x16a   :  { %v842_v52 = vpack.c.bf16 %v810_v51, %v810_v51 }
 0x16c   :  { %875 = vst.msk [vmem:[%s1839_s3 + $0x6c] sm:$0xf] %vm847_vm1, %v842_v52 }

// kernel: tiny_roma_forward.44
= control target key start
LH: loop header
LB: loop body
LE: loop exit
PB: predicated region body
PF: predicated region fallthrough
CT: control target
= control target key end

     0   :  { %vm239_vm0 = vcmask 261120   ;;  %vm355_vm1 = vcmask 519168   ;;  %s724_s1 = inlined_call_operand.vmem [shape: bf16[288,64], index: 1, kind: input, shape index: {}]   ;;  %s725_s0 = inlined_call_operand.vmem [shape: bf16[64,288], index: 0, kind: input, shape index: {}]   ;;  %s726_s2 = inlined_call_operand.vmem [shape: f32[1,64], index: 2, kind: input, shape index: {}]   ;;  %s727_s3 = inlined_call_operand.vmem [shape: bf16[64,64], index: 3, kind: output, shape index: {}]  }
   0x1   :  { %v511_v0 = vld [vmem:[%s724_s1 + $0x38] sm:$0xff]  ;;  %v521_v2 = vld [vmem:[%s724_s1 + $0x88] sm:$0xff]  ;;  %v510_v3 = vld [vmem:[%s724_s1 + $0x30] sm:$0xff] }
   0x2   :  { %v519_v1 = vld [vmem:[%s724_s1 + $0x78] sm:$0xff]  ;;  %252 = vmatpush.bf16.msra.mxu0 %v511_v0  ;;  %522 = vmatpush.bf16.msra.mxu3 %v511_v0  ;;  %v518_v4 = vld [vmem:[%s724_s1 + $0x70] sm:$0xff]  ;;  %v520_v5 = vld [vmem:[%s724_s1 + $0x80] sm:$0xff] }
   0x3   :  { %530 = vmatpush.bf16.msra.mxu1 %v519_v1  ;;  %316 = vmatpush.bf16.msra.mxu2 %v521_v2  ;;  %v378_v6 = vld [vmem:[%s725_s0 + $0x8] sm:$0xf]  ;;  %v494_v7 = vld [vmem:[%s725_s0 + $0x10] sm:$0xf0]  ;;  %v508_v11 = vld [vmem:[%s724_s1 + $0x20] sm:$0xff] }
   0x4   :  { %v509_v8 = vld [vmem:[%s724_s1 + $0x28] sm:$0xff]  ;;  %v379_v10 = vor.u32 %v494_v7, %v378_v6  ;;  %v516_v12 = vld [vmem:[%s724_s1 + $0x60] sm:$0xff]  ;;  %v507_v13 = vld [vmem:[%s724_s1 + $0x18] sm:$0xff] }
   0x5   :  { %v517_v9 = vld [vmem:[%s724_s1 + $0x68] sm:$0xff]  ;;  %v515_v14 = vld [vmem:[%s724_s1 + $0x58] sm:$0xff]  ;;  %v506_v15 = vld [vmem:[%s724_s1 + $0x10] sm:$0xff] }
   0x6   :  { %253 = vmatpush.bf16.msra.mxu0 %v510_v3  ;;  %523 = vmatpush.bf16.msra.mxu3 %v510_v3  ;;  %v514_v16 = vld [vmem:[%s724_s1 + $0x50] sm:$0xff]  ;;  %v390_v17 = vld [vmem:[%s725_s0 + $0x20] sm:$0xf]  ;;  %v497_v18 = vld [vmem:[%s725_s0 + $0x28] sm:$0xf0] }
   0x7   :  { %531 = vmatpush.bf16.msra.mxu1 %v518_v4  ;;  %317 = vmatpush.bf16.msra.mxu2 %v520_v5  ;;  %v505_v19 = vld [vmem:[%s724_s1 + $0x8] sm:$0xff]  ;;  %v391_v21 = vor.u32 %v497_v18, %v390_v17  ;;  %v504_v22 = vld [vmem:[%s724_s1] sm:$0xff]  ;;  %v382_v23 = vld [vmem:[%s725_s0 + $0x18] sm:$0xf] }
   0x8   :  { %v513_v20 = vld [vmem:[%s724_s1 + $0x48] sm:$0xff]  ;;  %v496_v24 = vld [vmem:[%s725_s0 + $0x20] sm:$0xf0]  ;;  %v370_v25 = vld [vmem:[%s725_s0] sm:$0xf] }
   0x9   :  { %v493_v26 = vld [vmem:[%s725_s0 + $0x8] sm:$0xf0]  ;;  %v512_v27 = vld [vmem:[%s724_s1 + $0x40] sm:$0xff]  ;;  %v495_v28 = vld [vmem:[%s725_s0 + $0x1c] sm:$0xf]  ;;  %v383_v30 = vor.u32 %v496_v24, %v382_v23 }
   0xa   :  { %254 = vmatpush.bf16.msra.mxu0 %v509_v8  ;;  %524 = vmatpush.bf16.msra.mxu3 %v509_v8  ;;  %v384_v29 = vld [vmem:[%s725_s0 + $0x24] sm:$0xf0]  ;;  %v371_v31 = vor.u32 %v493_v26, %v370_v25  ;;  %v402_v33 = vld [vmem:[%s725_s0 + $0x38] sm:$0xf]  ;;  %v500_v34 = vld [vmem:[%s725_s0 + $0x40] sm:$0xf0] }
   0xb   :  { %532 = vmatpush.bf16.msra.mxu1 %v517_v9  ;;  %488 = vmatmul.msk.bf16.vlgmr.msra.gmra.mxu2 %vm239_vm0, %v379_v10  ;;  %v387_v32 = vor.u32 %v495_v28, %v384_v29  ;;  %v403_v35 = vor.u32 %v500_v34, %v402_v33  ;;  %v394_v36 = vld [vmem:[%s725_s0 + $0x30] sm:$0xf]  ;;  %v499_v37 = vld [vmem:[%s725_s0 + $0x38] sm:$0xf0]  ;;  %v498_v38 = vld [vmem:[%s725_s0 + $0x34] sm:$0xf] }
   0xc   :  { %v396_v39 = vld [vmem:[%s725_s0 + $0x3c] sm:$0xf0]  ;;  %v395_v40 = vor.u32 %v499_v37, %v394_v36  ;;  %v414_v42 = vld [vmem:[%s725_s0 + $0x50] sm:$0xf]  ;;  %v503_v43 = vld [vmem:[%s725_s0 + $0x58] sm:$0xf0] }
   0xd   :  { %v399_v41 = vor.u32 %v498_v38, %v396_v39  ;;  %v415_v44 = vor.u32 %v503_v43, %v414_v42  ;;  %v492_v45 = vld [vmem:[%s725_s0 + $0x4] sm:$0xf]  ;;  %v372_v46 = vld [vmem:[%s725_s0 + $0xc] sm:$0xf0]  ;;  %v406_v48 = vld [vmem:[%s725_s0 + $0x48] sm:$0xf] }
   0xe   :  { %255 = vmatpush.bf16.msra.mxu0 %v508_v11  ;;  %525 = vmatpush.bf16.msra.mxu3 %v508_v11  ;;  %v375_v47 = vor.u32 %v492_v45, %v372_v46  ;;  %v502_v49 = vld [vmem:[%s725_s0 + $0x50] sm:$0xf0]  ;;  %v501_v50 = vld [vmem:[%s725_s0 + $0x4c] sm:$0xf]  ;;  %v408_v51 = vld [vmem:[%s725_s0 + $0x54] sm:$0xf0] }
   0xf   :  { %533 = vmatpush.bf16.msra.mxu1 %v516_v12  ;;  %v407_v52 = vor.u32 %v502_v49, %v406_v48  ;;  %v411_v53 = vor.u32 %v501_v50, %v408_v51  ;;  %v538_v58 = vld [vmem:[%s726_s2] ss:$0 sm:$0xff] }
  0x12   :  { %256 = vmatpush.bf16.msra.mxu0 %v507_v13  ;;  %526 = vmatpush.bf16.msra.mxu3 %v507_v13 }
  0x13   :  { %534 = vmatpush.bf16.msra.mxu1 %v515_v14 }
  0x16   :  { %257 = vmatpush.bf16.msra.mxu0 %v506_v15  ;;  %527 = vmatpush.bf16.msra.mxu3 %v506_v15 }
  0x17   :  { %535 = vmatpush.bf16.msra.mxu1 %v514_v16 }
  0x1a   :  { %258 = vmatpush.bf16.msra.mxu0 %v505_v19  ;;  %528 = vmatpush.bf16.msra.mxu3 %v505_v19 }
  0x1b   :  { %536 = vmatpush.bf16.msra.mxu1 %v513_v20  ;;  %489 = vmatmul.msk.bf16.gmra.mxu2 %vm239_vm0, %v391_v21 }
  0x1e   :  { %259 = vmatpush.bf16.msra.mxu0 %v504_v22  ;;  %529 = vmatpush.bf16.msra.mxu3 %v504_v22 }
  0x1f   :  { %537 = vmatpush.bf16.msra.mxu1 %v512_v27 }
  0x21   :  { %265 = vmatmul.bf16.vlgmr.msra.gmra.mxu3 %v383_v30  ;;  %260 = vmatmul.bf16.vlgmr.msra.gmra.mxu0 %v371_v31 }
  0x22   :  { %281 = vmatpush.bf16.msrb.mxu0 %v519_v1  ;;  %294 = vmatmul.bf16.vlgmr.msra.gmra.mxu1 %v387_v32 }
  0x26   :  { %282 = vmatpush.bf16.msrb.mxu0 %v518_v4 }
  0x2a   :  { %283 = vmatpush.bf16.msrb.mxu0 %v517_v9 }
  0x2b   :  { %490 = vmatmul.msk.bf16.gmra.mxu2 %vm239_vm0, %v403_v35 }
  0x2e   :  { %284 = vmatpush.bf16.msrb.mxu0 %v516_v12 }
  0x31   :  { %270 = vmatmul.bf16.gmra.mxu3 %v395_v40 }
  0x32   :  { %285 = vmatpush.bf16.msrb.mxu0 %v515_v14  ;;  %299 = vmatmul.bf16.gmra.mxu1 %v399_v41 }
  0x36   :  { %286 = vmatpush.bf16.msrb.mxu0 %v514_v16 }
  0x3a   :  { %287 = vmatpush.bf16.msrb.mxu0 %v513_v20 }
  0x3b   :  { %491 = vmatmul.msk.bf16.gmra.mxu2 %vm239_vm0, %v415_v44 }
  0x3e   :  { %288 = vmatpush.bf16.msrb.mxu0 %v512_v27 }
  0x41   :  { %289 = vmatmul.bf16.vlgmr.msrb.gmra.mxu0 %v375_v47  ;;  %275 = vmatmul.bf16.gmra.mxu3 %v407_v52 }
  0x42   :  { %304 = vmatmul.bf16.gmra.mxu1 %v411_v53 }
  0x8e   :  { %v319_v54 = vpop.f32.mrf.mxu2 }
  0x96   :  { %v321_v55 = vpop.f32.mrf.mxu2 }
  0x9e   :  { %v324_v56 = vpop.f32.mrf.mxu2  ;;  %v261_v63 = vpop.f32.mrf.mxu0 }
  0x9f   :  { %v295_v57 = vpop.f32.mrf.mxu1  ;;  %v262_v17 = vadd.f32 %v538_v58, %v261_v63 }
  0xa4   :  { %v266_v59 = vpop.f32.mrf.mxu3 }
  0xa5   :  { %v267_v60 = vadd.f32 %v538_v58, %v266_v59 }
  0xa6   :  { %v326_v0 = vpop.f32.mrf.mxu2  ;;  %v263_v9 = vpop.f32.mrf.mxu0 }
  0xa7   :  { %v296_v61 = vadd.f32 %v295_v57, %v267_v60  ;;  %v297_v62 = vpop.f32.mrf.mxu1  ;;  %v264_v30 = vadd.f32 %v538_v58, %v263_v9 }
  0xa9   :  { %v325_v1 = vadd.f32 %v324_v56, %v296_v61 }
  0xab   :  { %v341_v2 = vmax.f32 %v325_v1, 0.0 }
  0xac   :  { %v268_v3 = vpop.f32.mrf.mxu3 }
  0xad   :  { %v349_v4 = vpack.c.bf16 %v341_v2, %v341_v2  ;;  %v269_v5 = vadd.f32 %v538_v58, %v268_v3 }
  0xae   :  { %v329_v10 = vpop.f32.mrf.mxu2 }
  0xaf   :  { %358 = vst.msk [vmem:[%s727_s3 + $0x8] sm:$0xf] %vm355_vm1, %v349_v4  ;;  %v298_v6 = vadd.f32 %v297_v62, %v269_v5  ;;  %v300_v7 = vpop.f32.mrf.mxu1 }
  0xb1   :  { %v327_v8 = vadd.f32 %v326_v0, %v298_v6 }
  0xb3   :  { %v342_v11 = vmax.f32 %v327_v8, 0.0 }
  0xb4   :  { %v271_v12 = vpop.f32.mrf.mxu3 }
  0xb5   :  { %v350_v13 = vpack.c.bf16 %v342_v11, %v342_v11  ;;  %v272_v14 = vadd.f32 %v538_v58, %v271_v12 }
  0xb6   :  { %v331_v21 = vpop.f32.mrf.mxu2 }
  0xb7   :  { %359 = vst.msk [vmem:[%s727_s3 + $0xc] sm:$0xf] %vm355_vm1, %v350_v13  ;;  %v301_v15 = vadd.f32 %v300_v7, %v272_v14  ;;  %v302_v18 = vpop.f32.mrf.mxu1 }
  0xb9   :  { %v330_v16 = vadd.f32 %v329_v10, %v301_v15 }
  0xbb   :  { %v343_v19 = vmax.f32 %v330_v16, 0.0 }
  0xbc   :  { %v273_v23 = vpop.f32.mrf.mxu3 }
  0xbd   :  { %v351_v24 = vpack.c.bf16 %v343_v19, %v343_v19  ;;  %v274_v25 = vadd.f32 %v538_v58, %v273_v23 }
  0xbe   :  { %v290_v20 = vpop.f32.mrf.mxu0  ;;  %v334_v39 = vpop.f32.mrf.mxu2 }
  0xbf   :  { %v291_v22 = vadd.f32 %v290_v20, %v262_v17  ;;  %360 = vst.msk [vmem:[%s727_s3 + $0x10] sm:$0xf] %vm355_vm1, %v351_v24  ;;  %v303_v27 = vadd.f32 %v302_v18, %v274_v25  ;;  %v305_v34 = vpop.f32.mrf.mxu1 }
  0xc1   :  { %v320_v26 = vadd.f32 %v319_v54, %v291_v22  ;;  %v332_v29 = vadd.f32 %v331_v21, %v303_v27 }
  0xc3   :  { %v339_v28 = vmax.f32 %v320_v26, 0.0  ;;  %v344_v32 = vmax.f32 %v332_v29, 0.0 }
  0xc4   :  { %v276_v36 = vpop.f32.mrf.mxu3 }
  0xc5   :  { %v347_v31 = vpack.c.bf16 %v339_v28, %v339_v28  ;;  %v352_v37 = vpack.c.bf16 %v344_v32, %v344_v32  ;;  %v277_v38 = vadd.f32 %v538_v58, %v276_v36 }
  0xc6   :  { %v292_v33 = vpop.f32.mrf.mxu0  ;;  %v336_v51 = vpop.f32.mrf.mxu2 }
  0xc7   :  { %356 = vst.msk [vmem:[%s727_s3] sm:$0xf] %vm355_vm1, %v347_v31  ;;  %v293_v35 = vadd.f32 %v292_v33, %v264_v30  ;;  %v306_v41 = vadd.f32 %v305_v34, %v277_v38  ;;  %v307_v49 = vpop.f32.mrf.mxu1 }
  0xc8   :  { %361 = vst.msk [vmem:[%s727_s3 + $0x14] sm:$0xf] %vm355_vm1, %v352_v37 }
  0xc9   :  { %v322_v40 = vadd.f32 %v321_v55, %v293_v35  ;;  %v335_v43 = vadd.f32 %v334_v39, %v306_v41 }
  0xcb   :  { %v340_v42 = vmax.f32 %v322_v40, 0.0  ;;  %v345_v45 = vmax.f32 %v335_v43, 0.0 }
  0xcc   :  { %v278_v46 = vpop.f32.mrf.mxu3 }
  0xcd   :  { %v348_v44 = vpack.c.bf16 %v340_v42, %v340_v42  ;;  %v353_v47 = vpack.c.bf16 %v345_v45, %v345_v45  ;;  %v279_v48 = vadd.f32 %v538_v58, %v278_v46 }
  0xcf   :  { %357 = vst.msk [vmem:[%s727_s3 + $0x4] sm:$0xf] %vm355_vm1, %v348_v44  ;;  %v308_v50 = vadd.f32 %v307_v49, %v279_v48 }
  0xd0   :  { %362 = vst.msk [vmem:[%s727_s3 + $0x18] sm:$0xf] %vm355_vm1, %v353_v47 }
  0xd1   :  { %v337_v52 = vadd.f32 %v336_v51, %v308_v50 }
  0xd3   :  { %v346_v53 = vmax.f32 %v337_v52, 0.0 }
  0xd5   :  { %v354_v54 = vpack.c.bf16 %v346_v53, %v346_v53 }
  0xd7   :  { %363 = vst.msk [vmem:[%s727_s3 + $0x1c] sm:$0xf] %vm355_vm1, %v354_v54 }

// kernel: tiny_roma_forward.46
= control target key start
LH: loop header
LB: loop body
LE: loop exit
PB: predicated region body
PF: predicated region fallthrough
CT: control target
= control target key end

     0   :  { %vm79_vm0 = vcmask 523264   ;;  %vm137_vm1 = vcmask 519168   ;;  %s286_s1 = inlined_call_operand.vmem [shape: bf16[64,64], index: 1, kind: input, shape index: {}]   ;;  %s287_s2 = inlined_call_operand.vmem [shape: f32[1,64], index: 2, kind: input, shape index: {}]   ;;  %s288_s0 = inlined_call_operand.vmem [shape: bf16[64,64], index: 0, kind: input, shape index: {}]   ;;  %s289_s3 = inlined_call_operand.vmem [shape: bf16[64,64], index: 3, kind: output, shape index: {}]  }
   0x1   :  { %v193_v0 = vld [vmem:[%s286_s1 + $0x18] sm:$0xff]  ;;  %v192_v1 = vld [vmem:[%s286_s1 + $0x10] sm:$0xff]  ;;  %v191_v2 = vld [vmem:[%s286_s1 + $0x8] sm:$0xff] }
   0x2   :  { %96 = vmatpush.bf16.msra.mxu0 %v193_v0  ;;  %194 = vmatpush.bf16.msra.mxu1 %v193_v0  ;;  %v190_v3 = vld [vmem:[%s286_s1] sm:$0xff]  ;;  %v187_v5 = vld [vmem:[%s288_s0 + $0x8] sm:$0xff]  ;;  %v188_v6 = vld [vmem:[%s288_s0 + $0x10] sm:$0xff] }
   0x3   :  { %195 = vmatpush.bf16.msra.mxu2 %v193_v0  ;;  %196 = vmatpush.bf16.msra.mxu3 %v193_v0  ;;  %v186_v4 = vld [vmem:[%s288_s0] sm:$0xff]  ;;  %v189_v7 = vld [vmem:[%s288_s0 + $0x18] sm:$0xff] }
   0x4   :  { %v206_v8 = vld [vmem:[%s287_s2] ss:$0 sm:$0xff] }
   0x6   :  { %97 = vmatpush.bf16.msra.mxu0 %v192_v1  ;;  %197 = vmatpush.bf16.msra.mxu1 %v192_v1 }
   0x7   :  { %198 = vmatpush.bf16.msra.mxu2 %v192_v1  ;;  %199 = vmatpush.bf16.msra.mxu3 %v192_v1 }
   0xa   :  { %98 = vmatpush.bf16.msra.mxu0 %v191_v2  ;;  %200 = vmatpush.bf16.msra.mxu1 %v191_v2 }
   0xb   :  { %201 = vmatpush.bf16.msra.mxu2 %v191_v2  ;;  %202 = vmatpush.bf16.msra.mxu3 %v191_v2 }
   0xe   :  { %99 = vmatpush.bf16.msra.mxu0 %v190_v3  ;;  %203 = vmatpush.bf16.msra.mxu1 %v190_v3 }
   0xf   :  { %204 = vmatpush.bf16.msra.mxu2 %v190_v3  ;;  %205 = vmatpush.bf16.msra.mxu3 %v190_v3 }
  0x11   :  { %182 = vmatmul.msk.bf16.vlgmr.msra.gmra.mxu0 %vm79_vm0, %v186_v4  ;;  %183 = vmatmul.msk.bf16.vlgmr.msra.gmra.mxu1 %vm79_vm0, %v187_v5 }
  0x12   :  { %184 = vmatmul.msk.bf16.vlgmr.msra.gmra.mxu2 %vm79_vm0, %v188_v6  ;;  %185 = vmatmul.msk.bf16.vlgmr.msra.gmra.mxu3 %vm79_vm0, %v189_v7 }
  0x8e   :  { %v101_v9 = vpop.f32.mrf.mxu0  ;;  %v106_v10 = vpop.f32.mrf.mxu1 }
  0x8f   :  { %v102_v11 = vadd.f32 %v206_v8, %v101_v9  ;;  %v107_v12 = vadd.f32 %v206_v8, %v106_v10 }
  0x91   :  { %v121_v13 = vmax.f32 %v102_v11, 0.0  ;;  %v123_v14 = vmax.f32 %v107_v12, 0.0 }
  0x93   :  { %v129_v15 = vpack.c.bf16 %v121_v13, %v121_v13  ;;  %v131_v16 = vpack.c.bf16 %v123_v14, %v123_v14 }
  0x95   :  { %138 = vst.msk [vmem:[%s289_s3] sm:$0xf] %vm137_vm1, %v129_v15  ;;  %v111_v17 = vpop.f32.mrf.mxu2  ;;  %v116_v18 = vpop.f32.mrf.mxu3 }
  0x96   :  { %140 = vst.msk [vmem:[%s289_s3 + $0x8] sm:$0xf] %vm137_vm1, %v131_v16  ;;  %v112_v19 = vadd.f32 %v206_v8, %v111_v17  ;;  %v117_v20 = vadd.f32 %v206_v8, %v116_v18  ;;  %v103_v21 = vpop.f32.mrf.mxu0  ;;  %v108_v22 = vpop.f32.mrf.mxu1 }
  0x97   :  { %v104_v23 = vadd.f32 %v206_v8, %v103_v21  ;;  %v109_v24 = vadd.f32 %v206_v8, %v108_v22 }
  0x98   :  { %v125_v25 = vmax.f32 %v112_v19, 0.0  ;;  %v127_v26 = vmax.f32 %v117_v20, 0.0 }
  0x99   :  { %v122_v27 = vmax.f32 %v104_v23, 0.0  ;;  %v124_v28 = vmax.f32 %v109_v24, 0.0 }
  0x9a   :  { %v133_v29 = vpack.c.bf16 %v125_v25, %v125_v25  ;;  %v135_v30 = vpack.c.bf16 %v127_v26, %v127_v26 }
  0x9b   :  { %v130_v31 = vpack.c.bf16 %v122_v27, %v122_v27  ;;  %v132_v32 = vpack.c.bf16 %v124_v28, %v124_v28 }
  0x9c   :  { %142 = vst.msk [vmem:[%s289_s3 + $0x10] sm:$0xf] %vm137_vm1, %v133_v29 }
  0x9d   :  { %144 = vst.msk [vmem:[%s289_s3 + $0x18] sm:$0xf] %vm137_vm1, %v135_v30  ;;  %v113_v33 = vpop.f32.mrf.mxu2  ;;  %v118_v34 = vpop.f32.mrf.mxu3 }
  0x9e   :  { %139 = vst.msk [vmem:[%s289_s3 + $0x4] sm:$0xf] %vm137_vm1, %v130_v31  ;;  %v114_v35 = vadd.f32 %v206_v8, %v113_v33  ;;  %v119_v36 = vadd.f32 %v206_v8, %v118_v34 }
  0x9f   :  { %141 = vst.msk [vmem:[%s289_s3 + $0xc] sm:$0xf] %vm137_vm1, %v132_v32 }
  0xa0   :  { %v126_v37 = vmax.f32 %v114_v35, 0.0  ;;  %v128_v38 = vmax.f32 %v119_v36, 0.0 }
  0xa2   :  { %v134_v39 = vpack.c.bf16 %v126_v37, %v126_v37  ;;  %v136_v40 = vpack.c.bf16 %v128_v38, %v128_v38 }
  0xa4   :  { %143 = vst.msk [vmem:[%s289_s3 + $0x14] sm:$0xf] %vm137_vm1, %v134_v39 }
  0xa5   :  { %145 = vst.msk [vmem:[%s289_s3 + $0x1c] sm:$0xf] %vm137_vm1, %v136_v40 }

// kernel: tiny_roma_forward.45
= control target key start
LH: loop header
LB: loop body
LE: loop exit
PB: predicated region body
PF: predicated region fallthrough
CT: control target
= control target key end

     0   :  { %vm431_vm0 = vcmask 523264   ;;  %vm605_vm1 = vcmask 519168   ;;  %s1222_s1 = inlined_call_operand.vmem [shape: bf16[576,64], index: 1, kind: input, shape index: {}]   ;;  %s1223_s2 = inlined_call_operand.vmem [shape: f32[1,64], index: 2, kind: input, shape index: {}]   ;;  %s1224_s0 = inlined_call_operand.vmem [shape: bf16[64,576], index: 0, kind: input, shape index: {}]   ;;  %s1225_s3 = inlined_call_operand.vmem [shape: bf16[64,64], index: 3, kind: output, shape index: {}]  }
   0x1   :  { %v873_v0 = vld [vmem:[%s1222_s1 + $0x38] sm:$0xff]  ;;  %v872_v1 = vld [vmem:[%s1222_s1 + $0x30] sm:$0xff]  ;;  %v871_v4 = vld [vmem:[%s1222_s1 + $0x28] sm:$0xff] }
   0x2   :  { %902 = vmatpush.bf16.msra.mxu1 %v873_v0  ;;  %903 = vmatpush.bf16.msra.mxu2 %v873_v0  ;;  %v897_v2 = vld [vmem:[%s1222_s1 + $0xf8] sm:$0xff]  ;;  %v896_v3 = vld [vmem:[%s1222_s1 + $0xf0] sm:$0xff]  ;;  %v895_v5 = vld [vmem:[%s1222_s1 + $0xe8] sm:$0xff] }
   0x3   :  { %444 = vmatpush.bf16.msra.mxu0 %v873_v0  ;;  %531 = vmatpush.bf16.msra.mxu3 %v897_v2  ;;  %v870_v6 = vld [vmem:[%s1222_s1 + $0x20] sm:$0xff]  ;;  %v869_v8 = vld [vmem:[%s1222_s1 + $0x18] sm:$0xff]  ;;  %v868_v10 = vld [vmem:[%s1222_s1 + $0x10] sm:$0xff] }
   0x4   :  { %v894_v7 = vld [vmem:[%s1222_s1 + $0xe0] sm:$0xff]  ;;  %v893_v9 = vld [vmem:[%s1222_s1 + $0xd8] sm:$0xff]  ;;  %v892_v11 = vld [vmem:[%s1222_s1 + $0xd0] sm:$0xff] }
   0x5   :  { %v867_v12 = vld [vmem:[%s1222_s1 + $0x8] sm:$0xff]  ;;  %v866_v14 = vld [vmem:[%s1222_s1] sm:$0xff]  ;;  %v853_v16 = vld [vmem:[%s1224_s0 + $0x38] sm:$0xf0] }
   0x6   :  { %904 = vmatpush.bf16.msra.mxu1 %v872_v1  ;;  %905 = vmatpush.bf16.msra.mxu2 %v872_v1  ;;  %v891_v13 = vld [vmem:[%s1222_s1 + $0xc8] sm:$0xff]  ;;  %v680_v17 = vld [vmem:[%s1224_s0 + $0x78] sm:$0xf]  ;;  %v620_v21 = vld [vmem:[%s1224_s0] sm:$0xf] }
   0x7   :  { %445 = vmatpush.bf16.msra.mxu0 %v872_v1  ;;  %532 = vmatpush.bf16.msra.mxu3 %v896_v3  ;;  %v640_v15 = vld [vmem:[%s1224_s0 + $0x28] sm:$0xf]  ;;  %v863_v18 = vld [vmem:[%s1224_s0 + $0x88] sm:$0xf0]  ;;  %v889_v19 = vld [vmem:[%s1222_s1 + $0xb8] sm:$0xff] }
   0x8   :  { %v881_v20 = vld [vmem:[%s1222_s1 + $0x78] sm:$0xff]  ;;  %v890_v22 = vld [vmem:[%s1222_s1 + $0xc0] sm:$0xff]  ;;  %v641_v23 = vor.u32 %v853_v16, %v640_v15  ;;  %v681_v24 = vor.u32 %v863_v18, %v680_v17  ;;  %v848_v25 = vld [vmem:[%s1224_s0 + $0x10] sm:$0xf0] }
   0x9   :  { %v847_v26 = vld [vmem:[%s1224_s0 + $0xc] sm:$0xf]  ;;  %v630_v27 = vld [vmem:[%s1224_s0 + $0x1c] sm:$0xf0]  ;;  %v901_v28 = vld [vmem:[%s1222_s1 + $0x118] sm:$0xff]  ;;  %v621_v31 = vor.u32 %v848_v25, %v620_v21 }
   0xa   :  { %906 = vmatpush.bf16.msra.mxu1 %v871_v4  ;;  %907 = vmatpush.bf16.msra.mxu2 %v871_v4  ;;  %v888_v29 = vld [vmem:[%s1222_s1 + $0xb0] sm:$0xff]  ;;  %v633_v32 = vor.u32 %v847_v26, %v630_v27  ;;  %v887_v34 = vld [vmem:[%s1222_s1 + $0xa8] sm:$0xff]  ;;  %v886_v37 = vld [vmem:[%s1222_s1 + $0xa0] sm:$0xff] }
   0xb   :  { %446 = vmatpush.bf16.msra.mxu0 %v871_v4  ;;  %533 = vmatpush.bf16.msra.mxu3 %v895_v5  ;;  %v880_v30 = vld [vmem:[%s1222_s1 + $0x70] sm:$0xff]  ;;  %v879_v35 = vld [vmem:[%s1222_s1 + $0x68] sm:$0xff]  ;;  %v878_v38 = vld [vmem:[%s1222_s1 + $0x60] sm:$0xff] }
   0xc   :  { %v900_v33 = vld [vmem:[%s1222_s1 + $0x110] sm:$0xff]  ;;  %v899_v36 = vld [vmem:[%s1222_s1 + $0x108] sm:$0xff]  ;;  %v858_v40 = vld [vmem:[%s1224_s0 + $0x60] sm:$0xf0] }
   0xd   :  { %v660_v39 = vld [vmem:[%s1224_s0 + $0x50] sm:$0xf]  ;;  %v898_v41 = vld [vmem:[%s1222_s1 + $0x100] sm:$0xff]  ;;  %v885_v42 = vld [vmem:[%s1222_s1 + $0x98] sm:$0xff] }
   0xe   :  { %908 = vmatpush.bf16.msra.mxu1 %v870_v6  ;;  %909 = vmatpush.bf16.msra.mxu2 %v870_v6  ;;  %v877_v43 = vld [vmem:[%s1222_s1 + $0x58] sm:$0xff]  ;;  %v636_v44 = vld [vmem:[%s1224_s0 + $0x10] sm:$0xf]  ;;  %v661_v45 = vor.u32 %v858_v40, %v660_v39  ;;  %v850_v46 = vld [vmem:[%s1224_s0 + $0x20] sm:$0xf0] }
   0xf   :  { %447 = vmatpush.bf16.msra.mxu0 %v870_v6  ;;  %534 = vmatpush.bf16.msra.mxu3 %v894_v7  ;;  %v852_v47 = vld [vmem:[%s1224_s0 + $0x34] sm:$0xf]  ;;  %v650_v48 = vld [vmem:[%s1224_s0 + $0x44] sm:$0xf0]  ;;  %v637_v51 = vor.u32 %v850_v46, %v636_v44  ;;  %v882_v55 = vld [vmem:[%s1222_s1 + $0x80] sm:$0xff] }
  0x10   :  { %v884_v49 = vld [vmem:[%s1222_s1 + $0x90] sm:$0xff]  ;;  %v653_v52 = vor.u32 %v852_v47, %v650_v48  ;;  %v883_v53 = vld [vmem:[%s1222_s1 + $0x88] sm:$0xff]  ;;  %v874_v56 = vld [vmem:[%s1222_s1 + $0x40] sm:$0xff] }
  0x11   :  { %v876_v50 = vld [vmem:[%s1222_s1 + $0x50] sm:$0xff]  ;;  %v875_v54 = vld [vmem:[%s1222_s1 + $0x48] sm:$0xff]  ;;  %v849_v58 = vld [vmem:[%s1224_s0 + $0x18] sm:$0xf0] }
  0x12   :  { %910 = vmatpush.bf16.msra.mxu1 %v869_v8  ;;  %911 = vmatpush.bf16.msra.mxu2 %v869_v8  ;;  %v628_v57 = vld [vmem:[%s1224_s0 + $0x8] sm:$0xf]  ;;  %v846_v60 = vld [vmem:[%s1224_s0 + $0x4] sm:$0xf]  ;;  %v622_v61 = vld [vmem:[%s1224_s0 + $0x14] sm:$0xf0] }
  0x13   :  { %448 = vmatpush.bf16.msra.mxu0 %v869_v8  ;;  %535 = vmatpush.bf16.msra.mxu3 %v893_v9  ;;  %v629_v59 = vor.u32 %v849_v58, %v628_v57  ;;  %v656_v62 = vld [vmem:[%s1224_s0 + $0x38] sm:$0xf]  ;;  %v625_v63 = vor.u32 %v846_v60, %v622_v61  ;;  %v855_v0 = vld [vmem:[%s1224_s0 + $0x48] sm:$0xf0]  ;;  %v857_v1 = vld [vmem:[%s1224_s0 + $0x5c] sm:$0xf] }
  0x14   :  { %v670_v2 = vld [vmem:[%s1224_s0 + $0x6c] sm:$0xf0]  ;;  %v657_v3 = vor.u32 %v855_v0, %v656_v62  ;;  %v854_v6 = vld [vmem:[%s1224_s0 + $0x40] sm:$0xf0]  ;;  %v851_v8 = vld [vmem:[%s1224_s0 + $0x2c] sm:$0xf] }
  0x15   :  { %v673_v4 = vor.u32 %v857_v1, %v670_v2  ;;  %v648_v5 = vld [vmem:[%s1224_s0 + $0x30] sm:$0xf]  ;;  %v642_v9 = vld [vmem:[%s1224_s0 + $0x3c] sm:$0xf0]  ;;  %v668_v17 = vld [vmem:[%s1224_s0 + $0x58] sm:$0xf] }
  0x16   :  { %912 = vmatpush.bf16.msra.mxu1 %v868_v10  ;;  %913 = vmatpush.bf16.msra.mxu2 %v868_v10  ;;  %v649_v7 = vor.u32 %v854_v6, %v648_v5  ;;  %v859_v18 = vld [vmem:[%s1224_s0 + $0x68] sm:$0xf0]  ;;  %v662_v21 = vld [vmem:[%s1224_s0 + $0x64] sm:$0xf0]  ;;  %v688_v26 = vld [vmem:[%s1224_s0 + $0x80] sm:$0xf] }
  0x17   :  { %449 = vmatpush.bf16.msra.mxu0 %v868_v10  ;;  %536 = vmatpush.bf16.msra.mxu3 %v892_v11  ;;  %v676_v10 = vld [vmem:[%s1224_s0 + $0x60] sm:$0xf]  ;;  %v645_v11 = vor.u32 %v851_v8, %v642_v9  ;;  %v864_v27 = vld [vmem:[%s1224_s0 + $0x90] sm:$0xf0] }
  0x1a   :  { %914 = vmatpush.bf16.msra.mxu1 %v867_v12  ;;  %915 = vmatpush.bf16.msra.mxu2 %v867_v12 }
  0x1b   :  { %450 = vmatpush.bf16.msra.mxu0 %v867_v12  ;;  %537 = vmatpush.bf16.msra.mxu3 %v891_v13  ;;  %v860_v12 = vld [vmem:[%s1224_s0 + $0x70] sm:$0xf0]  ;;  %v862_v13 = vld [vmem:[%s1224_s0 + $0x84] sm:$0xf] }
  0x1c   :  { %v677_v15 = vor.u32 %v860_v12, %v676_v10 }
  0x1e   :  { %916 = vmatpush.bf16.msra.mxu1 %v866_v14  ;;  %917 = vmatpush.bf16.msra.mxu2 %v866_v14 }
  0x1f   :  { %451 = vmatpush.bf16.msra.mxu0 %v866_v14  ;;  %538 = vmatpush.bf16.msra.mxu3 %v890_v22  ;;  %v690_v14 = vld [vmem:[%s1224_s0 + $0x94] sm:$0xf0] }
  0x20   :  { %v693_v16 = vor.u32 %v862_v13, %v690_v14 }
  0x21   :  { %457 = vmatmul.bf16.vlgmr.msra.gmra.mxu1 %v641_v23  ;;  %467 = vmatmul.bf16.vlgmr.msra.gmra.mxu2 %v681_v24  ;;  %v696_v23 = vld [vmem:[%s1224_s0 + $0x88] sm:$0xf]  ;;  %v865_v24 = vld [vmem:[%s1224_s0 + $0x98] sm:$0xf0] }
  0x22   :  { %502 = vmatpush.bf16.msrb.mxu2 %v889_v19  ;;  %473 = vmatpush.bf16.msrb.mxu1 %v881_v20  ;;  %v669_v19 = vor.u32 %v859_v18, %v668_v17  ;;  %v856_v20 = vld [vmem:[%s1224_s0 + $0x54] sm:$0xf]  ;;  %v697_v25 = vor.u32 %v865_v24, %v696_v23 }
  0x23   :  { %564 = vmatpush.bf16.msrb.mxu0 %v901_v28  ;;  %539 = vmatmul.bf16.vlgmr.msra.gmra.mxu3 %v633_v32  ;;  %v665_v22 = vor.u32 %v856_v20, %v662_v21  ;;  %v689_v28 = vor.u32 %v864_v27, %v688_v26 }
  0x24   :  { %452 = vmatmul.bf16.vlgmr.msra.gmra.mxu0 %v621_v31 }
  0x26   :  { %503 = vmatpush.bf16.msrb.mxu2 %v888_v29  ;;  %474 = vmatpush.bf16.msrb.mxu1 %v880_v30  ;;  %v861_v29 = vld [vmem:[%s1224_s0 + $0x7c] sm:$0xf]  ;;  %v682_v30 = vld [vmem:[%s1224_s0 + $0x8c] sm:$0xf0] }
  0x27   :  { %565 = vmatpush.bf16.msrb.mxu0 %v900_v33  ;;  %v685_v31 = vor.u32 %v861_v29, %v682_v30 }
  0x2a   :  { %504 = vmatpush.bf16.msrb.mxu2 %v887_v34  ;;  %475 = vmatpush.bf16.msrb.mxu1 %v879_v35 }
  0x2b   :  { %566 = vmatpush.bf16.msrb.mxu0 %v899_v36 }
  0x2e   :  { %505 = vmatpush.bf16.msrb.mxu2 %v886_v37  ;;  %476 = vmatpush.bf16.msrb.mxu1 %v878_v38 }
  0x2f   :  { %567 = vmatpush.bf16.msrb.mxu0 %v898_v41 }
  0x31   :  { %462 = vmatmul.bf16.gmra.mxu1 %v661_v45 }
  0x32   :  { %506 = vmatpush.bf16.msrb.mxu2 %v885_v42  ;;  %477 = vmatpush.bf16.msrb.mxu1 %v877_v43  ;;  %v1178_v42 = vld [vmem:[%s1223_s2] ss:$0 sm:$0xff] }
  0x33   :  { %544 = vmatmul.bf16.gmra.mxu3 %v653_v52 }
  0x34   :  { %842 = vmatmul.msk.bf16.vlgmr.msrb.gmra.mxu0 %vm431_vm0, %v637_v51 }
  0x36   :  { %507 = vmatpush.bf16.msrb.mxu2 %v884_v49  ;;  %478 = vmatpush.bf16.msrb.mxu1 %v876_v50 }
  0x3a   :  { %508 = vmatpush.bf16.msrb.mxu2 %v883_v53  ;;  %479 = vmatpush.bf16.msrb.mxu1 %v875_v54 }
  0x3e   :  { %509 = vmatpush.bf16.msrb.mxu2 %v882_v55  ;;  %480 = vmatpush.bf16.msrb.mxu1 %v874_v56 }
  0x41   :  { %510 = vmatmul.bf16.vlgmr.msrb.gmra.mxu2 %v629_v59  ;;  %481 = vmatmul.bf16.vlgmr.msrb.gmra.mxu1 %v625_v63 }
  0x43   :  { %549 = vmatmul.bf16.gmra.mxu3 %v673_v4 }
  0x44   :  { %843 = vmatmul.msk.bf16.gmra.mxu0 %vm431_vm0, %v657_v3 }
  0x51   :  { %515 = vmatmul.bf16.gmra.mxu2 %v649_v7  ;;  %486 = vmatmul.bf16.gmra.mxu1 %v645_v11 }
  0x53   :  { %554 = vmatmul.bf16.gmra.mxu3 %v693_v16 }
  0x54   :  { %844 = vmatmul.msk.bf16.gmra.mxu0 %vm431_vm0, %v677_v15 }
  0x61   :  { %520 = vmatmul.bf16.gmra.mxu2 %v669_v19  ;;  %491 = vmatmul.bf16.gmra.mxu1 %v665_v22 }
  0x64   :  { %845 = vmatmul.msk.bf16.gmra.mxu0 %vm431_vm0, %v697_v25 }
  0x71   :  { %525 = vmatmul.bf16.gmra.mxu2 %v689_v28  ;;  %496 = vmatmul.bf16.gmra.mxu1 %v685_v31 }
  0x9e   :  { %v458_v32 = vpop.f32.mrf.mxu1 }
  0x9f   :  { %v459_v62 = vadd.f32 %v1178_v42, %v458_v32 }
  0xa1   :  { %v453_v33 = vpop.f32.mrf.mxu0 }
  0xa2   :  { %v454_v43 = vadd.f32 %v1178_v42, %v453_v33 }
  0xa4   :  { %v1171_v37 = vpop.f32.mrf.mxu2 }
  0xa6   :  { %v460_v34 = vpop.f32.mrf.mxu1  ;;  %v540_v38 = vpop.f32.mrf.mxu3 }
  0xa7   :  { %v461_v8 = vadd.f32 %v1178_v42, %v460_v34 }
  0xa9   :  { %v455_v35 = vpop.f32.mrf.mxu0 }
  0xaa   :  { %v456_v51 = vadd.f32 %v1178_v42, %v455_v35 }
  0xac   :  { %v1173_v41 = vpop.f32.mrf.mxu2 }
  0xae   :  { %v463_v36 = vpop.f32.mrf.mxu1  ;;  %v542_v46 = vpop.f32.mrf.mxu3 }
  0xaf   :  { %v464_v18 = vadd.f32 %v1178_v42, %v463_v36 }
  0xb1   :  { %v569_v40 = vpop.f32.mrf.mxu0 }
  0xb6   :  { %v465_v39 = vpop.f32.mrf.mxu1  ;;  %v545_v57 = vpop.f32.mrf.mxu3 }
  0xb7   :  { %v466_v29 = vadd.f32 %v1178_v42, %v465_v39 }
  0xb9   :  { %v571_v48 = vpop.f32.mrf.mxu0 }
  0xbe   :  { %v482_v44 = vpop.f32.mrf.mxu1  ;;  %v547_v6 = vpop.f32.mrf.mxu3 }
  0xbf   :  { %v483_v45 = vadd.f32 %v482_v44, %v454_v43  ;;  %v469_v44 = vadd.f32 %v1178_v42, %v1171_v37 }
  0xc1   :  { %v574_v60 = vpop.f32.mrf.mxu0 }
  0xc4   :  { %v511_v47 = vpop.f32.mrf.mxu2 }
  0xc5   :  { %v512_v49 = vadd.f32 %v511_v47, %v483_v45 }
  0xc6   :  { %v484_v53 = vpop.f32.mrf.mxu1  ;;  %v550_v19 = vpop.f32.mrf.mxu3 }
  0xc7   :  { %v541_v50 = vadd.f32 %v540_v38, %v512_v49  ;;  %v485_v54 = vadd.f32 %v484_v53, %v456_v51 }
  0xc9   :  { %v570_v52 = vadd.f32 %v569_v40, %v541_v50  ;;  %v576_v9 = vpop.f32.mrf.mxu0 }
  0xcb   :  { %v589_v55 = vmax.f32 %v570_v52, 0.0 }
  0xcc   :  { %v513_v56 = vpop.f32.mrf.mxu2 }
  0xcd   :  { %v597_v58 = vpack.c.bf16 %v589_v55, %v589_v55  ;;  %v514_v59 = vadd.f32 %v513_v56, %v485_v54  ;;  %v471_v54 = vadd.f32 %v1178_v42, %v1173_v41 }
  0xce   :  { %v487_v0 = vpop.f32.mrf.mxu1  ;;  %v552_v32 = vpop.f32.mrf.mxu3 }
  0xcf   :  { %606 = vst.msk [vmem:[%s1225_s3] sm:$0xf] %vm605_vm1, %v597_v58  ;;  %v543_v61 = vadd.f32 %v542_v46, %v514_v59  ;;  %v488_v1 = vadd.f32 %v487_v0, %v459_v62 }
  0xd1   :  { %v572_v63 = vadd.f32 %v571_v48, %v543_v61  ;;  %v579_v22 = vpop.f32.mrf.mxu0 }
  0xd3   :  { %v590_v2 = vmax.f32 %v572_v63, 0.0 }
  0xd4   :  { %v516_v3 = vpop.f32.mrf.mxu2 }
  0xd5   :  { %v598_v4 = vpack.c.bf16 %v590_v2, %v590_v2  ;;  %v517_v5 = vadd.f32 %v516_v3, %v488_v1 }
  0xd6   :  { %v489_v11 = vpop.f32.mrf.mxu1  ;;  %v555_v48 = vpop.f32.mrf.mxu3 }
  0xd7   :  { %607 = vst.msk [vmem:[%s1225_s3 + $0x4] sm:$0xf] %vm605_vm1, %v598_v4  ;;  %v546_v7 = vadd.f32 %v545_v57, %v517_v5  ;;  %v490_v12 = vadd.f32 %v489_v11, %v461_v8 }
  0xd9   :  { %v575_v10 = vadd.f32 %v574_v60, %v546_v7  ;;  %v581_v35 = vpop.f32.mrf.mxu0 }
  0xdb   :  { %v591_v13 = vmax.f32 %v575_v10, 0.0 }
  0xdc   :  { %v518_v14 = vpop.f32.mrf.mxu2 }
  0xdd   :  { %v599_v15 = vpack.c.bf16 %v591_v13, %v591_v13  ;;  %v519_v16 = vadd.f32 %v518_v14, %v490_v12 }
  0xde   :  { %v492_v21 = vpop.f32.mrf.mxu1  ;;  %v557_v61 = vpop.f32.mrf.mxu3 }
  0xdf   :  { %608 = vst.msk [vmem:[%s1225_s3 + $0x8] sm:$0xf] %vm605_vm1, %v599_v15  ;;  %v548_v17 = vadd.f32 %v547_v6, %v519_v16  ;;  %v493_v23 = vadd.f32 %v492_v21, %v464_v18 }
  0xe1   :  { %v577_v20 = vadd.f32 %v576_v9, %v548_v17  ;;  %v584_v52 = vpop.f32.mrf.mxu0 }
  0xe3   :  { %v592_v24 = vmax.f32 %v577_v20, 0.0 }
  0xe4   :  { %v521_v25 = vpop.f32.mrf.mxu2 }
  0xe5   :  { %v600_v26 = vpack.c.bf16 %v592_v24, %v592_v24  ;;  %v522_v27 = vadd.f32 %v521_v25, %v493_v23 }
  0xe6   :  { %v494_v31 = vpop.f32.mrf.mxu1 }
  0xe7   :  { %609 = vst.msk [vmem:[%s1225_s3 + $0xc] sm:$0xf] %vm605_vm1, %v600_v26  ;;  %v551_v28 = vadd.f32 %v550_v19, %v522_v27  ;;  %v495_v33 = vadd.f32 %v494_v31, %v466_v29 }
  0xe9   :  { %v580_v30 = vadd.f32 %v579_v22, %v551_v28  ;;  %v586_v63 = vpop.f32.mrf.mxu0 }
  0xeb   :  { %v593_v34 = vmax.f32 %v580_v30, 0.0 }
  0xec   :  { %v523_v36 = vpop.f32.mrf.mxu2 }
  0xed   :  { %v601_v38 = vpack.c.bf16 %v593_v34, %v593_v34  ;;  %v524_v40 = vadd.f32 %v523_v36, %v495_v33 }
  0xee   :  { %v497_v39 = vpop.f32.mrf.mxu1 }
  0xef   :  { %610 = vst.msk [vmem:[%s1225_s3 + $0x10] sm:$0xf] %vm605_vm1, %v601_v38  ;;  %v553_v43 = vadd.f32 %v552_v32, %v524_v40  ;;  %v498_v46 = vadd.f32 %v497_v39, %v469_v44 }
  0xf1   :  { %v582_v45 = vadd.f32 %v581_v35, %v553_v43 }
  0xf3   :  { %v594_v47 = vmax.f32 %v582_v45, 0.0 }
  0xf4   :  { %v526_v49 = vpop.f32.mrf.mxu2 }
  0xf5   :  { %v602_v50 = vpack.c.bf16 %v594_v47, %v594_v47  ;;  %v527_v51 = vadd.f32 %v526_v49, %v498_v46 }
  0xf6   :  { %v499_v37 = vpop.f32.mrf.mxu1 }
  0xf7   :  { %611 = vst.msk [vmem:[%s1225_s3 + $0x14] sm:$0xf] %vm605_vm1, %v602_v50  ;;  %v556_v53 = vadd.f32 %v555_v48, %v527_v51  ;;  %v500_v56 = vadd.f32 %v499_v37, %v471_v54 }
  0xf9   :  { %v585_v55 = vadd.f32 %v584_v52, %v556_v53 }
  0xfb   :  { %v595_v57 = vmax.f32 %v585_v55, 0.0 }
  0xfc   :  { %v528_v58 = vpop.f32.mrf.mxu2 }
  0xfd   :  { %v603_v59 = vpack.c.bf16 %v595_v57, %v595_v57  ;;  %v529_v60 = vadd.f32 %v528_v58, %v500_v56 }
  0xff   :  { %612 = vst.msk [vmem:[%s1225_s3 + $0x18] sm:$0xf] %vm605_vm1, %v603_v59  ;;  %v558_v62 = vadd.f32 %v557_v61, %v529_v60 }
 0x101   :  { %v587_v0 = vadd.f32 %v586_v63, %v558_v62 }
 0x103   :  { %v596_v1 = vmax.f32 %v587_v0, 0.0 }
 0x105   :  { %v604_v2 = vpack.c.bf16 %v596_v1, %v596_v1 }
 0x107   :  { %613 = vst.msk [vmem:[%s1225_s3 + $0x1c] sm:$0xf] %vm605_vm1, %v604_v2 }

// kernel: tiny_roma_forward.47
= control target key start
LH: loop header
LB: loop body
LE: loop exit
PB: predicated region body
PF: predicated region fallthrough
CT: control target
= control target key end

     0   :  { %vm338_vm0 = vcmask 523264   ;;  %vm416_vm1 = vcmask 519168   ;;  %s797_s1 = inlined_call_operand.vmem [shape: bf16[576,64], index: 1, kind: input, shape index: {}]   ;;  %s798_s2 = inlined_call_operand.vmem [shape: f32[1,64], index: 2, kind: input, shape index: {}]   ;;  %s799_s0 = inlined_call_operand.vmem [shape: bf16[16,576], index: 0, kind: input, shape index: {}]   ;;  %s800_s3 = inlined_call_operand.vmem [shape: bf16[16,64], index: 3, kind: output, shape index: {}]  }
   0x1   :  { %v600_v0 = vld [vmem:[%s797_s1 + $0x38] sm:$0xff]  ;;  %v599_v4 = vld [vmem:[%s797_s1 + $0x30] sm:$0xff]  ;;  %v598_v8 = vld [vmem:[%s797_s1 + $0x28] sm:$0xff] }
   0x2   :  { %v616_v1 = vld [vmem:[%s797_s1 + $0xb8] sm:$0xff]  ;;  %342 = vmatpush.bf16.msra.mxu0 %v600_v0  ;;  %v615_v5 = vld [vmem:[%s797_s1 + $0xb0] sm:$0xff]  ;;  %v614_v9 = vld [vmem:[%s797_s1 + $0xa8] sm:$0xff] }
   0x3   :  { %v624_v2 = vld [vmem:[%s797_s1 + $0xf8] sm:$0xff]  ;;  %370 = vmatpush.bf16.msra.mxu2 %v616_v1  ;;  %v623_v6 = vld [vmem:[%s797_s1 + $0xf0] sm:$0xff]  ;;  %v622_v10 = vld [vmem:[%s797_s1 + $0xe8] sm:$0xff] }
   0x4   :  { %v608_v3 = vld [vmem:[%s797_s1 + $0x78] sm:$0xff]  ;;  %384 = vmatpush.bf16.msra.mxu3 %v624_v2  ;;  %v607_v7 = vld [vmem:[%s797_s1 + $0x70] sm:$0xff]  ;;  %v606_v11 = vld [vmem:[%s797_s1 + $0x68] sm:$0xff] }
   0x5   :  { %356 = vmatpush.bf16.msra.mxu1 %v608_v3  ;;  %v597_v12 = vld [vmem:[%s797_s1 + $0x20] sm:$0xff]  ;;  %v596_v16 = vld [vmem:[%s797_s1 + $0x18] sm:$0xff]  ;;  %v595_v20 = vld [vmem:[%s797_s1 + $0x10] sm:$0xff] }
   0x6   :  { %343 = vmatpush.bf16.msra.mxu0 %v599_v4  ;;  %v613_v13 = vld [vmem:[%s797_s1 + $0xa0] sm:$0xff]  ;;  %v612_v17 = vld [vmem:[%s797_s1 + $0x98] sm:$0xff]  ;;  %v611_v21 = vld [vmem:[%s797_s1 + $0x90] sm:$0xff] }
   0x7   :  { %371 = vmatpush.bf16.msra.mxu2 %v615_v5  ;;  %v621_v14 = vld [vmem:[%s797_s1 + $0xe0] sm:$0xff]  ;;  %v620_v18 = vld [vmem:[%s797_s1 + $0xd8] sm:$0xff]  ;;  %v619_v22 = vld [vmem:[%s797_s1 + $0xd0] sm:$0xff] }
   0x8   :  { %385 = vmatpush.bf16.msra.mxu3 %v623_v6  ;;  %v605_v15 = vld [vmem:[%s797_s1 + $0x60] sm:$0xff]  ;;  %v604_v19 = vld [vmem:[%s797_s1 + $0x58] sm:$0xff]  ;;  %v603_v23 = vld [vmem:[%s797_s1 + $0x50] sm:$0xff] }
   0x9   :  { %357 = vmatpush.bf16.msra.mxu1 %v607_v7  ;;  %v594_v24 = vld [vmem:[%s797_s1 + $0x8] sm:$0xff]  ;;  %v593_v28 = vld [vmem:[%s797_s1] sm:$0xff]  ;;  %v590_v33 = vld [vmem:[%s799_s0 + $0x10] sm:$0xf0] }
   0xa   :  { %344 = vmatpush.bf16.msra.mxu0 %v598_v8  ;;  %v610_v25 = vld [vmem:[%s797_s1 + $0x88] sm:$0xff]  ;;  %v609_v29 = vld [vmem:[%s797_s1 + $0x80] sm:$0xff]  ;;  %v591_v35 = vld [vmem:[%s799_s0 + $0x18] sm:$0xf0] }
   0xb   :  { %372 = vmatpush.bf16.msra.mxu2 %v614_v9  ;;  %v618_v26 = vld [vmem:[%s797_s1 + $0xc8] sm:$0xff]  ;;  %v617_v30 = vld [vmem:[%s797_s1 + $0xc0] sm:$0xff]  ;;  %v427_v39 = vld [vmem:[%s799_s0 + $0x14] sm:$0xf0] }
   0xc   :  { %386 = vmatpush.bf16.msra.mxu3 %v622_v10  ;;  %v602_v27 = vld [vmem:[%s797_s1 + $0x48] sm:$0xff]  ;;  %v601_v31 = vld [vmem:[%s797_s1 + $0x40] sm:$0xff]  ;;  %v628_v40 = vld [vmem:[%s797_s1 + $0x118] sm:$0xff] }
   0xd   :  { %358 = vmatpush.bf16.msra.mxu1 %v606_v11  ;;  %v425_v32 = vld [vmem:[%s799_s0] sm:$0xf]  ;;  %v433_v34 = vld [vmem:[%s799_s0 + $0x8] sm:$0xf]  ;;  %v589_v36 = vld [vmem:[%s799_s0 + $0xc] sm:$0xf] }
   0xe   :  { %345 = vmatpush.bf16.msra.mxu0 %v597_v12  ;;  %v435_v37 = vld [vmem:[%s799_s0 + $0x1c] sm:$0xf0]  ;;  %v588_v38 = vld [vmem:[%s799_s0 + $0x4] sm:$0xf]  ;;  %v426_v41 = vor.u32 %v590_v33, %v425_v32  ;;  %v434_v42 = vor.u32 %v591_v35, %v433_v34  ;;  %v627_v45 = vld [vmem:[%s797_s1 + $0x110] sm:$0xff] }
   0xf   :  { %373 = vmatpush.bf16.msra.mxu2 %v613_v13  ;;  %v438_v43 = vor.u32 %v589_v36, %v435_v37  ;;  %v430_v44 = vor.u32 %v588_v38, %v427_v39  ;;  %v626_v46 = vld [vmem:[%s797_s1 + $0x108] sm:$0xff]  ;;  %v625_v47 = vld [vmem:[%s797_s1 + $0x100] sm:$0xff]  ;;  %v441_v48 = vld [vmem:[%s799_s0 + $0x10] sm:$0xf] }
  0x10   :  { %387 = vmatpush.bf16.msra.mxu3 %v621_v14  ;;  %v592_v49 = vld [vmem:[%s799_s0 + $0x20] sm:$0xf0]  ;;  %v629_v52 = vld [vmem:[%s798_s2] ss:$0 sm:$0xff] }
  0x11   :  { %359 = vmatpush.bf16.msra.mxu1 %v605_v15  ;;  %v442_v50 = vor.u32 %v592_v49, %v441_v48 }
  0x12   :  { %346 = vmatpush.bf16.msra.mxu0 %v596_v16 }
  0x13   :  { %374 = vmatpush.bf16.msra.mxu2 %v612_v17 }
  0x14   :  { %388 = vmatpush.bf16.msra.mxu3 %v620_v18 }
  0x15   :  { %360 = vmatpush.bf16.msra.mxu1 %v604_v19 }
  0x16   :  { %347 = vmatpush.bf16.msra.mxu0 %v595_v20 }
  0x17   :  { %375 = vmatpush.bf16.msra.mxu2 %v611_v21 }
  0x18   :  { %389 = vmatpush.bf16.msra.mxu3 %v619_v22 }
  0x19   :  { %361 = vmatpush.bf16.msra.mxu1 %v603_v23 }
  0x1a   :  { %348 = vmatpush.bf16.msra.mxu0 %v594_v24 }
  0x1b   :  { %376 = vmatpush.bf16.msra.mxu2 %v610_v25 }
  0x1c   :  { %390 = vmatpush.bf16.msra.mxu3 %v618_v26 }
  0x1d   :  { %362 = vmatpush.bf16.msra.mxu1 %v602_v27 }
  0x1e   :  { %349 = vmatpush.bf16.msra.mxu0 %v593_v28 }
  0x1f   :  { %377 = vmatpush.bf16.msra.mxu2 %v609_v29 }
  0x20   :  { %391 = vmatpush.bf16.msra.mxu3 %v617_v30 }
  0x21   :  { %363 = vmatpush.bf16.msra.mxu1 %v601_v31  ;;  %350 = vmatmul.bf16.vlgmr.msra.gmra.mxu0 %v426_v41 }
  0x22   :  { %402 = vmatpush.bf16.msrb.mxu0 %v628_v40  ;;  %378 = vmatmul.bf16.vlgmr.msra.gmra.mxu2 %v434_v42 }
  0x23   :  { %392 = vmatmul.bf16.vlgmr.msra.gmra.mxu3 %v438_v43 }
  0x24   :  { %364 = vmatmul.bf16.vlgmr.msra.gmra.mxu1 %v430_v44 }
  0x26   :  { %403 = vmatpush.bf16.msrb.mxu0 %v627_v45 }
  0x2a   :  { %404 = vmatpush.bf16.msrb.mxu0 %v626_v46 }
  0x2e   :  { %405 = vmatpush.bf16.msrb.mxu0 %v625_v47 }
  0x31   :  { %587 = vmatmul.msk.bf16.vlgmr.msrb.gmra.mxu0 %vm338_vm0, %v442_v50 }
  0x9e   :  { %v351_v51 = vpop.f32.mrf.mxu0 }
  0x9f   :  { %v352_v54 = vadd.f32 %v629_v52, %v351_v51 }
  0xa1   :  { %v365_v53 = vpop.f32.mrf.mxu1 }
  0xa2   :  { %v366_v57 = vadd.f32 %v365_v53, %v352_v54 }
  0xa5   :  { %v379_v55 = vpop.f32.mrf.mxu2 }
  0xa6   :  { %v353_v56 = vpop.f32.mrf.mxu0  ;;  %v380_v58 = vadd.f32 %v379_v55, %v366_v57  ;;  %v393_v59 = vpop.f32.mrf.mxu3 }
  0xa7   :  { %v354_v60 = vadd.f32 %v629_v52, %v353_v56 }
  0xa8   :  { %v394_v62 = vadd.f32 %v393_v59, %v380_v58 }
  0xa9   :  { %v367_v61 = vpop.f32.mrf.mxu1 }
  0xaa   :  { %v368_v1 = vadd.f32 %v367_v61, %v354_v60 }
  0xad   :  { %v381_v63 = vpop.f32.mrf.mxu2 }
  0xae   :  { %v407_v0 = vpop.f32.mrf.mxu0  ;;  %v382_v3 = vadd.f32 %v381_v63, %v368_v1  ;;  %v395_v6 = vpop.f32.mrf.mxu3 }
  0xaf   :  { %v408_v2 = vadd.f32 %v407_v0, %v394_v62 }
  0xb0   :  { %v396_v7 = vadd.f32 %v395_v6, %v382_v3 }
  0xb1   :  { %v412_v4 = vmax.f32 %v408_v2, 0.0 }
  0xb3   :  { %v414_v5 = vpack.c.bf16 %v412_v4, %v412_v4 }
  0xb5   :  { %417 = vst.msk [vmem:[%s800_s3] sm:$0xf] %vm416_vm1, %v414_v5 }
  0xb6   :  { %v409_v8 = vpop.f32.mrf.mxu0 }
  0xb7   :  { %v410_v9 = vadd.f32 %v409_v8, %v396_v7 }
  0xb9   :  { %v413_v10 = vmax.f32 %v410_v9, 0.0 }
  0xbb   :  { %v415_v11 = vpack.c.bf16 %v413_v10, %v413_v10 }
  0xbd   :  { %418 = vst.msk [vmem:[%s800_s3 + $0x4] sm:$0xf] %vm416_vm1, %v415_v11 }

// kernel: tiny_roma_forward.54
= control target key start
LH: loop header
LB: loop body
LE: loop exit
PB: predicated region body
PF: predicated region fallthrough
CT: control target
= control target key end

     0   :  { %s649_s12 = smov 0   ;;  %s651_s13 = smov 0   ;;  %s729_s0 = inlined_call_operand.vmem [shape: bf16[16,64], index: 0, kind: input, shape index: {}]   ;;  %s730_s1 = inlined_call_operand.vmem [shape: bf16[64,256], index: 1, kind: input, shape index: {}]   ;;  %s731_s2 = inlined_call_operand.vmem [shape: f32[1,256], index: 2, kind: input, shape index: {}]   ;;  %s732_s3 = inlined_call_operand.vmem [shape: bf16[16,256], index: 3, kind: output, shape index: {}]  }
   0x1   :  { %s653_s14 = smov 0   ;;  %s655_s15 = smov 0  }
   0x2   :  { %s657_s16 = smov 0  }
   0x3 LB: > { %s22_s17 = sadd.s32 1, %s623_s15  ;;  %s503_s18 = sadd.s32 4294967295, %s627_s16   ;;  %s627_s16 = sphi %s657_s16, %s13_s16   ;;  %s623_s15 = sphi %s655_s15, %s737_s15   ;;  %s619_s14 = sphi %s653_s14, %s736_s14   ;;  %s615_s13 = sphi %s651_s13, %s735_s13   ;;  %s611_s12 = sphi %s649_s12, %s734_s12  }
   0x4   : > { %p23_p0 = scmp.ge.s32.totalorder %s22_s17, 2  ;;  %p65_p1 = scmp.ne.s32.totalorder %s615_s13, %s611_s12 }
   0x5   : > { %p66_p2 = scmp.eq.s32.totalorder %s627_s16, 0  ;;  %p123_p4 = scmp.eq.s32.totalorder %s503_s18, 1 }
   0x6   : > { %s739_s17 = smov (%p23_p0, %s22_s17), 0  ;;  %s58_s20 = sadd.s32 1, %s615_s13 }
   0x7   : > { %p67_p3 = por %p66_p2, %p65_p1  ;;  %s55_s19 = ssub.s32 %s623_s15, %s739_s17 }
   0x8   : > { %p56_p5 = scmp.eq.s32.totalorder %s55_s19, 0  ;;  %p684_p6 = por %p123_p4, %p65_p1 }
   0x9   : > { %p507_p7 = scmp.ge.s32.totalorder %s627_s16, 2 }
   0xa   : > { %s689_s22 = scalar_select %p56_p5, %s615_s13, %s58_s20  }
   0xb   : > { %154 = sbr.rel (%p507_p7) target bundleno = 28 (0x1c), region = 20 }
  0x10   : > { %157 = sbr.rel (!%p67_p3) target bundleno = 28 (0x1c), region = 24  ;;  %s159_s23 = sand.u32 (%p67_p3), 1, %s615_s13  }
  0x11   : > { %s509_s24 = sshll.u32 (%p67_p3), %s623_s15, 2  ;;  %s508_s25 = sshll.u32 (%p67_p3), %s159_s23, 5 }
  0x12   : > { %s163_s28 = scalar_lea.vmem (%p67_p3), %s730_s1, %s509_s24  ;;  %s161_s29 = scalar_lea.vmem (%p67_p3), [#allocation2], %s508_s25 }
  0x13   : > { %v180_v0 = vld [vmem:[%s163_s28] sm:$0xf] (%p67_p3)  ;;  %v182_v1 = vld [vmem:[%s163_s28 + $0x8] sm:$0xf] (%p67_p3)  ;;  %v184_v2 = vld [vmem:[%s163_s28 + $0x10] sm:$0xf] (%p67_p3) }
  0x14   : > { %181 = vst [vmem:[%s161_s29] sm:$0xf] (%p67_p3), %v180_v0  ;;  %v186_v3 = vld [vmem:[%s163_s28 + $0x18] sm:$0xf] (%p67_p3)  ;;  %v188_v4 = vld [vmem:[%s163_s28 + $0x20] sm:$0xf] (%p67_p3) }
  0x15   : > { %183 = vst [vmem:[%s161_s29 + $0x4] sm:$0xf] %v182_v1  ;;  %v190_v5 = vld [vmem:[%s163_s28 + $0x28] sm:$0xf]  ;;  %v192_v6 = vld [vmem:[%s163_s28 + $0x30] sm:$0xf] }
  0x16   : > { %185 = vst [vmem:[%s161_s29 + $0x8] sm:$0xf] %v184_v2  ;;  %v194_v7 = vld [vmem:[%s163_s28 + $0x38] sm:$0xf] }
  0x17   : > { %187 = vst [vmem:[%s161_s29 + $0xc] sm:$0xf] %v186_v3 }
  0x18   : > { %189 = vst [vmem:[%s161_s29 + $0x10] sm:$0xf] %v188_v4 }
  0x19   : > { %191 = vst [vmem:[%s161_s29 + $0x14] sm:$0xf] %v190_v5 }
  0x1a   : > { %193 = vst [vmem:[%s161_s29 + $0x18] sm:$0xf] %v192_v6 }
  0x1b   : > { %195 = vst [vmem:[%s161_s29 + $0x1c] sm:$0xf] %v194_v7 }
  0x1c PF: > { %p510_p8 = scmp.ge.s32.totalorder %s627_s16, 1  ;;  %p240_p9 = scmp.lt.s32.totalorder %s627_s16, 3 }
  0x1e   : > { %p241_p10 = pnand %p510_p8, %p240_p9 }
  0x1f   : > { %s247_s30 = sand.u32 (!%p241_p10), 1, %s611_s12   ;;  %p283_p11 = scmp.lt.s32.totalorder (!%p241_p10), %s619_s14, 1 }
  0x20   : > { %244 = sbr.rel (%p241_p10) target bundleno = 203 (0xcb), region = 69  ;;  %s511_s4 = sshll.u32 (!%p241_p10), %s247_s30, 5 }
  0x21   : > { %s249_s5 = scalar_lea.vmem (!%p241_p10), [#allocation2], %s511_s4  ;;  %s512_s12 = sshll.u32 (!%p241_p10), %s247_s30, 3 }
  0x22   : > { %s276_s18 = scalar_lea.vmem (!%p241_p10), [#allocation3], %s512_s12 }
  0x25   : > { %v542_v8 = vld [vmem:[%s249_s5 + $0x18] sm:$0xff]  ;;  %s284_s6 = scalar_select %p283_p11, %s619_s14, 1  ;;  %v541_v9 = vld [vmem:[%s249_s5 + $0x10] sm:$0xff]  ;;  %v540_v10 = vld [vmem:[%s249_s5 + $0x8] sm:$0xff]  ;;  %vm331_vm0 = vcmask 523264  }
  0x26   : > { %339 = vmatpush.bf16.msra.mxu0 %v542_v8  ;;  %v539_v11 = vld [vmem:[%s249_s5] sm:$0xff]  ;;  %s535_s19 = sshll.u32 (%p684_p6), %s619_s14, 2 }
  0x27   : > { %s285_s9 = scalar_lea.vmem %s731_s2, %s284_s6  ;;  %v538_v12 = vld [vmem:[%s729_s0] sm:$0xff]  ;;  %s366_s24 = scalar_lea.vmem (%p684_p6), %s732_s3, %s535_s19 }
  0x28   : > { %v588_v14 = vld [vmem:[%s285_s9] ss:$0 sm:$0xff] }
  0x2a   : > { %340 = vmatpush.bf16.msra.mxu0 %v541_v9 }
  0x2e   : > { %341 = vmatpush.bf16.msra.mxu0 %v540_v10 }
  0x32   : > { %342 = vmatpush.bf16.msra.mxu0 %v539_v11 }
  0x35   : > { %533 = vmatmul.msk.bf16.vlgmr.msra.gmra.mxu0 %vm331_vm0, %v538_v12 }
  0xb2   : > { %v344_v13 = vpop.f32.mrf.mxu0 }
  0xb3   : > { %v345_v15 = vadd.f32 %v588_v14, %v344_v13 }
  0xb5   : > { %v349_v18 = vmax.f32 %v345_v15, 0.0 }
  0xba   : > { %v346_v16 = vpop.f32.mrf.mxu0 }
  0xbb   : > { %v347_v17 = vadd.f32 %v588_v14, %v346_v16 }
  0xbd   : > { %v350_v19 = vmax.f32 %v347_v17, 0.0  ;;  %361 = sbr.rel (!%p684_p6) target bundleno = 203 (0xcb), region = 77 }
  0xbf   : > { %v546_v20 = vpack.c.bf16 %v350_v19, %v349_v18 }
  0xc1   : > { %547 = vst [vmem:[%s276_s18] sm:$0xff] %v546_v20  }
  0xc8   : > { %v383_v21 = vld [vmem:[%s276_s18] sm:$0xf]  ;;  %v385_v22 = vld [vmem:[%s276_s18 + $0x4] sm:$0xf] }
  0xc9   : > { %384 = vst [vmem:[%s366_s24] sm:$0xf] %v383_v21 }
  0xca   : > { %386 = vst [vmem:[%s366_s24 + $0x8] sm:$0xf] %v385_v22 }
  0xcb PF: > { %s13_s16 = sadd.s32 1, %s627_s16   ;;  %s734_s12 = smov %s615_s13 }
  0xcc   : > { %p10_p12 = scmp.ge.s32.totalorder %s13_s16, 4   ;;  %s735_s13 = smov %s689_s22 }
  0xcd   : > { %s736_s14 = smov %s623_s15  ;;  %s737_s15 = smov %s739_s17 }
  0xce   :  { %12 = sbr.rel (!%p10_p12) target bundleno = 3 (0x3), region = 155 }

// kernel: tiny_roma_forward.50
= control target key start
LH: loop header
LB: loop body
LE: loop exit
PB: predicated region body
PF: predicated region fallthrough
CT: control target
= control target key end

     0   :  { %vm323_vm0 = vcmask 523264   ;;  %s720_s1 = inlined_call_operand.vmem [shape: bf16[576,128], index: 1, kind: input, shape index: {}]   ;;  %s721_s0 = inlined_call_operand.vmem [shape: bf16[4,576], index: 0, kind: input, shape index: {}]   ;;  %s722_s2 = inlined_call_operand.vmem [shape: f32[1,128], index: 2, kind: input, shape index: {}]   ;;  %s723_s3 = inlined_call_operand.vmem [shape: bf16[4,128], index: 3, kind: output, shape index: {}]  }
   0x1   :  { %v550_v0 = vld [vmem:[%s720_s1 + $0x38] sm:$0xff]  ;;  %v549_v4 = vld [vmem:[%s720_s1 + $0x30] sm:$0xff]  ;;  %v548_v8 = vld [vmem:[%s720_s1 + $0x28] sm:$0xff] }
   0x2   :  { %v566_v1 = vld [vmem:[%s720_s1 + $0xb8] sm:$0xff]  ;;  %326 = vmatpush.bf16.msra.mxu0 %v550_v0  ;;  %v565_v5 = vld [vmem:[%s720_s1 + $0xb0] sm:$0xff]  ;;  %v564_v9 = vld [vmem:[%s720_s1 + $0xa8] sm:$0xff] }
   0x3   :  { %v574_v2 = vld [vmem:[%s720_s1 + $0xf8] sm:$0xff]  ;;  %352 = vmatpush.bf16.msra.mxu2 %v566_v1  ;;  %v573_v6 = vld [vmem:[%s720_s1 + $0xf0] sm:$0xff]  ;;  %v572_v10 = vld [vmem:[%s720_s1 + $0xe8] sm:$0xff] }
   0x4   :  { %v558_v3 = vld [vmem:[%s720_s1 + $0x78] sm:$0xff]  ;;  %365 = vmatpush.bf16.msra.mxu3 %v574_v2  ;;  %v557_v7 = vld [vmem:[%s720_s1 + $0x70] sm:$0xff]  ;;  %v556_v11 = vld [vmem:[%s720_s1 + $0x68] sm:$0xff] }
   0x5   :  { %339 = vmatpush.bf16.msra.mxu1 %v558_v3  ;;  %v547_v12 = vld [vmem:[%s720_s1 + $0x20] sm:$0xff]  ;;  %v16_v17 = vld [vmem:[%s721_s0 + $0x8] sm:$0x3]  ;;  %v546_v18 = vld [vmem:[%s720_s1 + $0x18] sm:$0xff] }
   0x6   :  { %327 = vmatpush.bf16.msra.mxu0 %v549_v4  ;;  %v563_v13 = vld [vmem:[%s720_s1 + $0xa0] sm:$0xff]  ;;  %97 = vst [vmem:[#allocation1 + $0x20] ss:$4 sm:$0xff] %v16_v17  ;;  %v562_v19 = vld [vmem:[%s720_s1 + $0x98] sm:$0xff]  ;;  %v545_v22 = vld [vmem:[%s720_s1 + $0x10] sm:$0xff] }
   0x7   :  { %353 = vmatpush.bf16.msra.mxu2 %v565_v5  ;;  %v15_v14 = vld [vmem:[%s721_s0] sm:$0xff]  ;;  %v570_v20 = vld [vmem:[%s720_s1 + $0xd8] sm:$0xff]  ;;  %v561_v23 = vld [vmem:[%s720_s1 + $0x90] sm:$0xff] }
   0x8   :  { %366 = vmatpush.bf16.msra.mxu3 %v573_v6  ;;  %v571_v15 = vld [vmem:[%s720_s1 + $0xe0] sm:$0xff]  ;;  %94 = vst [vmem:[#allocation1] ss:$4 sm:$0xff] %v15_v14  ;;  %v554_v21 = vld [vmem:[%s720_s1 + $0x58] sm:$0xff]  ;;  %v569_v24 = vld [vmem:[%s720_s1 + $0xd0] sm:$0xff] }
   0x9   :  { %340 = vmatpush.bf16.msra.mxu1 %v557_v7  ;;  %v555_v16 = vld [vmem:[%s720_s1 + $0x60] sm:$0xff]  ;;  %v553_v25 = vld [vmem:[%s720_s1 + $0x50] sm:$0xff]  ;;  %v544_v26 = vld [vmem:[%s720_s1 + $0x8] sm:$0xff] }
   0xa   :  { %328 = vmatpush.bf16.msra.mxu0 %v548_v8  ;;  %v560_v27 = vld [vmem:[%s720_s1 + $0x88] sm:$0xff]  ;;  %v543_v30 = vld [vmem:[%s720_s1] sm:$0xff]  ;;  %v578_v34 = vld [vmem:[%s720_s1 + $0x118] sm:$0xff] }
   0xb   :  { %354 = vmatpush.bf16.msra.mxu2 %v564_v9  ;;  %v568_v28 = vld [vmem:[%s720_s1 + $0xc8] sm:$0xff]  ;;  %v559_v31 = vld [vmem:[%s720_s1 + $0x80] sm:$0xff]  ;;  %v577_v39 = vld [vmem:[%s720_s1 + $0x110] sm:$0xff] }
   0xc   :  { %367 = vmatpush.bf16.msra.mxu3 %v572_v10  ;;  %v552_v29 = vld [vmem:[%s720_s1 + $0x48] sm:$0xff]  ;;  %v567_v32 = vld [vmem:[%s720_s1 + $0xc0] sm:$0xff] }
   0xd   :  { %341 = vmatpush.bf16.msra.mxu1 %v556_v11  ;;  %v551_v33 = vld [vmem:[%s720_s1 + $0x40] sm:$0xff]  ;;  %v576_v40 = vld [vmem:[%s720_s1 + $0x108] sm:$0xff] }
   0xe   :  { %329 = vmatpush.bf16.msra.mxu0 %v547_v12  ;;  %v575_v41 = vld [vmem:[%s720_s1 + $0x100] sm:$0xff] }
   0xf   :  { %355 = vmatpush.bf16.msra.mxu2 %v563_v13  ;;  %v98_v35 = vld.sshfl [vmem:[#allocation1] sm:$0xff pattern:$0x73625140]  ;;  %v100_v36 = vld.sshfl [vmem:[#allocation1 + $0x10] sm:$0xff pattern:$0x73625140] }
  0x10   :  { %368 = vmatpush.bf16.msra.mxu3 %v571_v15  ;;  %v101_v37 = vld.sshfl [vmem:[#allocation1 + $0x18] sm:$0xff pattern:$0x73625140]  ;;  %v99_v38 = vld.sshfl [vmem:[#allocation1 + $0x8] sm:$0xff pattern:$0x73625140] }
  0x11   :  { %342 = vmatpush.bf16.msra.mxu1 %v555_v16  ;;  %v102_v42 = vld.sshfl [vmem:[#allocation1 + $0x20] sm:$0xff pattern:$0x73625140] }
  0x12   :  { %330 = vmatpush.bf16.msra.mxu0 %v546_v18  ;;  %v579_v44 = vld [vmem:[%s722_s2] ss:$0 sm:$0xff] }
  0x13   :  { %356 = vmatpush.bf16.msra.mxu2 %v562_v19 }
  0x14   :  { %369 = vmatpush.bf16.msra.mxu3 %v570_v20 }
  0x15   :  { %343 = vmatpush.bf16.msra.mxu1 %v554_v21 }
  0x16   :  { %331 = vmatpush.bf16.msra.mxu0 %v545_v22 }
  0x17   :  { %357 = vmatpush.bf16.msra.mxu2 %v561_v23 }
  0x18   :  { %370 = vmatpush.bf16.msra.mxu3 %v569_v24 }
  0x19   :  { %344 = vmatpush.bf16.msra.mxu1 %v553_v25 }
  0x1a   :  { %332 = vmatpush.bf16.msra.mxu0 %v544_v26 }
  0x1b   :  { %358 = vmatpush.bf16.msra.mxu2 %v560_v27 }
  0x1c   :  { %371 = vmatpush.bf16.msra.mxu3 %v568_v28 }
  0x1d   :  { %345 = vmatpush.bf16.msra.mxu1 %v552_v29 }
  0x1e   :  { %333 = vmatpush.bf16.msra.mxu0 %v543_v30 }
  0x1f   :  { %359 = vmatpush.bf16.msra.mxu2 %v559_v31 }
  0x20   :  { %372 = vmatpush.bf16.msra.mxu3 %v567_v32 }
  0x21   :  { %346 = vmatpush.bf16.msra.mxu1 %v551_v33  ;;  %334 = vmatmul.bf16.vlgmr.msra.gmra.mxu0 %v98_v35 }
  0x22   :  { %382 = vmatpush.bf16.msrb.mxu0 %v578_v34  ;;  %360 = vmatmul.bf16.vlgmr.msra.gmra.mxu2 %v100_v36 }
  0x23   :  { %373 = vmatmul.bf16.vlgmr.msra.gmra.mxu3 %v101_v37 }
  0x24   :  { %347 = vmatmul.bf16.vlgmr.msra.gmra.mxu1 %v99_v38 }
  0x26   :  { %383 = vmatpush.bf16.msrb.mxu0 %v577_v39 }
  0x2a   :  { %384 = vmatpush.bf16.msrb.mxu0 %v576_v40 }
  0x2e   :  { %385 = vmatpush.bf16.msrb.mxu0 %v575_v41 }
  0x31   :  { %542 = vmatmul.msk.bf16.vlgmr.msrb.gmra.mxu0 %vm323_vm0, %v102_v42 }
  0x9e   :  { %v335_v43 = vpop.f32.mrf.mxu0 }
  0x9f   :  { %v336_v46 = vadd.f32 %v579_v44, %v335_v43 }
  0xa1   :  { %v348_v45 = vpop.f32.mrf.mxu1 }
  0xa2   :  { %v349_v50 = vadd.f32 %v348_v45, %v336_v46 }
  0xa5   :  { %v361_v47 = vpop.f32.mrf.mxu2 }
  0xa6   :  { %v374_v48 = vpop.f32.mrf.mxu3  ;;  %v337_v49 = vpop.f32.mrf.mxu0  ;;  %v362_v52 = vadd.f32 %v361_v47, %v349_v50 }
  0xa8   :  { %v375_v54 = vadd.f32 %v374_v48, %v362_v52 }
  0xa9   :  { %v350_v51 = vpop.f32.mrf.mxu1 }
  0xad   :  { %v363_v53 = vpop.f32.mrf.mxu2 }
  0xae   :  { %v376_v55 = vpop.f32.mrf.mxu3  ;;  %v387_v56 = vpop.f32.mrf.mxu0 }
  0xaf   :  { %v388_v57 = vadd.f32 %v387_v56, %v375_v54 }
  0xb1   :  { %v391_v58 = vmax.f32 %v388_v57, 0.0 }
  0xb3   :  { %v392_v59 = vpack.c.bf16 %v391_v58, %v391_v58 }
  0xb5   :  { %393 = vst [vmem:[%s723_s3] sm:$0x3] %v392_v59 }
  0xb6   :  { %v389_v60 = vpop.f32.mrf.mxu0 }

// kernel: tiny_roma_forward.56
= control target key start
LH: loop header
LB: loop body
LE: loop exit
PB: predicated region body
PF: predicated region fallthrough
CT: control target
= control target key end

     0   :  { %s593_s12 = smov 0   ;;  %s595_s13 = smov 0   ;;  %s665_s0 = inlined_call_operand.vmem [shape: bf16[4,64], index: 0, kind: input, shape index: {}]   ;;  %s666_s1 = inlined_call_operand.vmem [shape: bf16[64,256], index: 1, kind: input, shape index: {}]   ;;  %s667_s2 = inlined_call_operand.vmem [shape: f32[1,256], index: 2, kind: input, shape index: {}]   ;;  %s668_s3 = inlined_call_operand.vmem [shape: bf16[4,256], index: 3, kind: output, shape index: {}]  }
   0x1   :  { %s597_s14 = smov 0   ;;  %s599_s15 = smov 0  }
   0x2   :  { %s601_s16 = smov 0  }
   0x3 LB: > { %s22_s17 = sadd.s32 1, %s567_s15  ;;  %p65_p1 = scmp.ne.s32.totalorder %s559_s13, %s555_s12  ;;  %s571_s16 = sphi %s601_s16, %s13_s16   ;;  %s567_s15 = sphi %s599_s15, %s672_s15   ;;  %s563_s14 = sphi %s597_s14, %s671_s14   ;;  %s559_s13 = sphi %s595_s13, %s670_s13   ;;  %s555_s12 = sphi %s593_s12, %s669_s12  }
   0x4   : > { %p23_p0 = scmp.ge.s32.totalorder %s22_s17, 2  ;;  %p66_p2 = scmp.eq.s32.totalorder %s571_s16, 0 }
   0x5   : > { %s58_s19 = sadd.s32 1, %s559_s13  ;;  %p463_p5 = scmp.ge.s32.totalorder %s571_s16, 2 }
   0x6   : > { %s674_s17 = smov (%p23_p0, %s22_s17), 0  ;;  %p67_p3 = por %p66_p2, %p65_p1 }
   0x7   : > { %s55_s18 = ssub.s32 %s567_s15, %s674_s17  ;;  %152 = sbr.rel (%p463_p5) target bundleno = 24 (0x18), region = 20 }
   0x8   : > { %p56_p4 = scmp.eq.s32.totalorder %s55_s18, 0 }
   0xa   : > { %s628_s20 = scalar_select %p56_p4, %s559_s13, %s58_s19  }
   0xc   : > { %155 = sbr.rel (!%p67_p3) target bundleno = 24 (0x18), region = 24  ;;  %s157_s21 = sand.u32 (%p67_p3), 1, %s559_s13  }
   0xd   : > { %s465_s22 = sshll.u32 (%p67_p3), %s567_s15, 2  ;;  %s464_s23 = sshll.u32 (%p67_p3), %s157_s21, 5 }
   0xe   : > { %s161_s26 = scalar_lea.vmem (%p67_p3), %s666_s1, %s465_s22  ;;  %s159_s27 = scalar_lea.vmem (%p67_p3), [#allocation2], %s464_s23 }
   0xf   : > { %v178_v0 = vld [vmem:[%s161_s26] sm:$0xf] (%p67_p3)  ;;  %v180_v1 = vld [vmem:[%s161_s26 + $0x8] sm:$0xf] (%p67_p3)  ;;  %v182_v2 = vld [vmem:[%s161_s26 + $0x10] sm:$0xf] (%p67_p3) }
  0x10   : > { %179 = vst [vmem:[%s159_s27] sm:$0xf] (%p67_p3), %v178_v0  ;;  %v184_v3 = vld [vmem:[%s161_s26 + $0x18] sm:$0xf] (%p67_p3)  ;;  %v186_v4 = vld [vmem:[%s161_s26 + $0x20] sm:$0xf] (%p67_p3) }
  0x11   : > { %181 = vst [vmem:[%s159_s27 + $0x4] sm:$0xf] %v180_v1  ;;  %v188_v5 = vld [vmem:[%s161_s26 + $0x28] sm:$0xf]  ;;  %v190_v6 = vld [vmem:[%s161_s26 + $0x30] sm:$0xf] }
  0x12   : > { %183 = vst [vmem:[%s159_s27 + $0x8] sm:$0xf] %v182_v2  ;;  %v192_v7 = vld [vmem:[%s161_s26 + $0x38] sm:$0xf] }
  0x13   : > { %185 = vst [vmem:[%s159_s27 + $0xc] sm:$0xf] %v184_v3 }
  0x14   : > { %187 = vst [vmem:[%s159_s27 + $0x10] sm:$0xf] %v186_v4 }
  0x15   : > { %189 = vst [vmem:[%s159_s27 + $0x14] sm:$0xf] %v188_v5 }
  0x16   : > { %191 = vst [vmem:[%s159_s27 + $0x18] sm:$0xf] %v190_v6 }
  0x17   : > { %193 = vst [vmem:[%s159_s27 + $0x1c] sm:$0xf] %v192_v7 }
  0x18 PF: > { %p466_p6 = scmp.ge.s32.totalorder %s571_s16, 1  ;;  %p238_p7 = scmp.lt.s32.totalorder %s571_s16, 3 }
  0x1a   : > { %p239_p8 = pnand %p466_p6, %p238_p7 }
  0x1b   : > { %s245_s28 = sand.u32 (!%p239_p8), 1, %s555_s12   ;;  %p282_p9 = scmp.lt.s32.totalorder (!%p239_p8), %s563_s14, 1 }
  0x1c   : > { %242 = sbr.rel (%p239_p8) target bundleno = 183 (0xb7), region = 69  ;;  %s467_s29 = sshll.u32 (!%p239_p8), %s245_s28, 5 }
  0x1d   : > { %s247_s30 = scalar_lea.vmem (!%p239_p8), [#allocation2], %s467_s29 }
  0x21   : > { %v491_v8 = vld [vmem:[%s247_s30 + $0x18] sm:$0xff]  ;;  %s676_s14 = smov (!%p282_p9, %s563_s14), 1  ;;  %v490_v9 = vld [vmem:[%s247_s30 + $0x10] sm:$0xff]  ;;  %v489_v10 = vld [vmem:[%s247_s30 + $0x8] sm:$0xff]  ;;  %vm331_vm0 = vcmask 523264  }
  0x22   : > { %339 = vmatpush.bf16.msra.mxu0 %v491_v8  ;;  %s284_s6 = scalar_lea.vmem %s667_s2, %s676_s14  ;;  %v488_v11 = vld [vmem:[%s247_s30] sm:$0xff]  ;;  %s468_s9 = sshll.u32 %s676_s14, 1 }
  0x23   : > { %v294_v12 = vld [vmem:[%s665_s0] sm:$0x3]  ;;  %s292_s12 = scalar_lea.vmem %s668_s3, %s468_s9 }
  0x24   : > { %v532_v13 = vld [vmem:[%s284_s6] ss:$0 sm:$0xff] }
  0x26   : > { %340 = vmatpush.bf16.msra.mxu0 %v490_v9 }
  0x2a   : > { %341 = vmatpush.bf16.msra.mxu0 %v489_v10 }
  0x2e   : > { %342 = vmatpush.bf16.msra.mxu0 %v488_v11 }
  0x31   : > { %485 = vmatmul.msk.bf16.vlgmr.msra.gmra.mxu0 %vm331_vm0, %v294_v12 }
  0xae   : > { %v344_v14 = vpop.f32.mrf.mxu0 }
  0xaf   : > { %v345_v15 = vadd.f32 %v532_v13, %v344_v14 }
  0xb1   : > { %v348_v16 = vmax.f32 %v345_v15, 0.0 }
  0xb3   : > { %v349_v17 = vpack.c.bf16 %v348_v16, %v348_v16 }
  0xb5   : > { %350 = vst [vmem:[%s292_s12] sm:$0x3] %v349_v17 }
  0xb6   : > { %v346_v18 = vpop.f32.mrf.mxu0 }
  0xb7 PF: > { %s13_s16 = sadd.s32 1, %s571_s16   ;;  %s669_s12 = smov %s559_s13 }
  0xb8   : > { %p10_p10 = scmp.ge.s32.totalorder %s13_s16, 4   ;;  %s670_s13 = smov %s628_s20 }
  0xb9   : > { %s671_s14 = smov %s567_s15  ;;  %s672_s15 = smov %s674_s17 }
  0xba   :  { %12 = sbr.rel (!%p10_p10) target bundleno = 3 (0x3), region = 114 }

// kernel: tiny_roma_forward.53
= control target key start
LH: loop header
LB: loop body
LE: loop exit
PB: predicated region body
PF: predicated region fallthrough
CT: control target
= control target key end

     0   :  { %vm98_vm0 = vcmask 517120   ;;  %s198_s1 = inlined_call_operand.vmem [shape: bf16[128,64], index: 1, kind: input, shape index: {}]   ;;  %s199_s2 = inlined_call_operand.vmem [shape: f32[1,64], index: 2, kind: input, shape index: {}]   ;;  %s200_s0 = inlined_call_operand.vmem [shape: bf16[4,128], index: 0, kind: input, shape index: {}]   ;;  %s201_s3 = inlined_call_operand.vmem [shape: bf16[4,64], index: 3, kind: output, shape index: {}]  }
   0x1   :  { %v143_v0 = vld [vmem:[%s198_s1 + $0x38] sm:$0xff]  ;;  %v142_v1 = vld [vmem:[%s198_s1 + $0x30] sm:$0xff]  ;;  %v141_v2 = vld [vmem:[%s198_s1 + $0x28] sm:$0xff] }
   0x2   :  { %83 = vmatpush.bf16.msra.mxu0 %v143_v0  ;;  %v140_v3 = vld [vmem:[%s198_s1 + $0x20] sm:$0xff]  ;;  %v139_v4 = vld [vmem:[%s198_s1 + $0x18] sm:$0xff]  ;;  %v138_v5 = vld [vmem:[%s198_s1 + $0x10] sm:$0xff] }
   0x3   :  { %v137_v6 = vld [vmem:[%s198_s1 + $0x8] sm:$0xff]  ;;  %v136_v7 = vld [vmem:[%s198_s1] sm:$0xff] }
   0x4   :  { %v14_v8 = vld [vmem:[%s200_s0] sm:$0x3] }
   0x5   :  { %v144_v9 = vld [vmem:[%s199_s2] ss:$0 sm:$0xff] }
   0x6   :  { %84 = vmatpush.bf16.msra.mxu0 %v142_v1 }
   0xa   :  { %85 = vmatpush.bf16.msra.mxu0 %v141_v2 }
   0xe   :  { %86 = vmatpush.bf16.msra.mxu0 %v140_v3 }
  0x12   :  { %87 = vmatpush.bf16.msra.mxu0 %v139_v4 }
  0x16   :  { %88 = vmatpush.bf16.msra.mxu0 %v138_v5 }
  0x1a   :  { %89 = vmatpush.bf16.msra.mxu0 %v137_v6 }
  0x1e   :  { %90 = vmatpush.bf16.msra.mxu0 %v136_v7 }
  0x21   :  { %91 = vmatmul.bf16.vlgmr.msra.gmra.mxu0 %v14_v8 }
  0x9e   :  { %v92_v10 = vpop.f32.mrf.mxu0 }
  0x9f   :  { %v93_v11 = vadd.f32 %v144_v9, %v92_v10 }
  0xa1   :  { %v96_v12 = vmax.f32 %v93_v11, 0.0 }
  0xa3   :  { %v97_v13 = vpack.c.bf16 %v96_v12, %v96_v12 }
  0xa5   :  { %99 = vst.msk [vmem:[%s201_s3] sm:$0x3] %vm98_vm0, %v97_v13 }
  0xa6   :  { %v94_v14 = vpop.f32.mrf.mxu0 }

// kernel: tiny_roma_forward.62
= control target key start
LH: loop header
LB: loop body
LE: loop exit
PB: predicated region body
PF: predicated region fallthrough
CT: control target
= control target key end

     0   :  { %vm79_vm0 = vcmask 523264   ;;  %vm129_vm1 = vcmask 519168   ;;  %s278_s1 = inlined_call_operand.vmem [shape: bf16[64,64], index: 1, kind: input, shape index: {}]   ;;  %s279_s2 = inlined_call_operand.vmem [shape: f32[1,64], index: 2, kind: input, shape index: {}]   ;;  %s280_s0 = inlined_call_operand.vmem [shape: bf16[64,64], index: 0, kind: input, shape index: {}]   ;;  %s281_s3 = inlined_call_operand.vmem [shape: bf16[64,64], index: 3, kind: output, shape index: {}]  }
   0x1   :  { %v185_v0 = vld [vmem:[%s278_s1 + $0x18] sm:$0xff]  ;;  %v184_v1 = vld [vmem:[%s278_s1 + $0x10] sm:$0xff]  ;;  %v183_v2 = vld [vmem:[%s278_s1 + $0x8] sm:$0xff] }
   0x2   :  { %96 = vmatpush.bf16.msra.mxu0 %v185_v0  ;;  %186 = vmatpush.bf16.msra.mxu1 %v185_v0  ;;  %v182_v3 = vld [vmem:[%s278_s1] sm:$0xff]  ;;  %v179_v5 = vld [vmem:[%s280_s0 + $0x8] sm:$0xff]  ;;  %v180_v6 = vld [vmem:[%s280_s0 + $0x10] sm:$0xff] }
   0x3   :  { %187 = vmatpush.bf16.msra.mxu2 %v185_v0  ;;  %188 = vmatpush.bf16.msra.mxu3 %v185_v0  ;;  %v178_v4 = vld [vmem:[%s280_s0] sm:$0xff]  ;;  %v181_v7 = vld [vmem:[%s280_s0 + $0x18] sm:$0xff] }
   0x4   :  { %v198_v8 = vld [vmem:[%s279_s2] ss:$0 sm:$0xff] }
   0x6   :  { %97 = vmatpush.bf16.msra.mxu0 %v184_v1  ;;  %189 = vmatpush.bf16.msra.mxu1 %v184_v1 }
   0x7   :  { %190 = vmatpush.bf16.msra.mxu2 %v184_v1  ;;  %191 = vmatpush.bf16.msra.mxu3 %v184_v1 }
   0xa   :  { %98 = vmatpush.bf16.msra.mxu0 %v183_v2  ;;  %192 = vmatpush.bf16.msra.mxu1 %v183_v2 }
   0xb   :  { %193 = vmatpush.bf16.msra.mxu2 %v183_v2  ;;  %194 = vmatpush.bf16.msra.mxu3 %v183_v2 }
   0xe   :  { %99 = vmatpush.bf16.msra.mxu0 %v182_v3  ;;  %195 = vmatpush.bf16.msra.mxu1 %v182_v3 }
   0xf   :  { %196 = vmatpush.bf16.msra.mxu2 %v182_v3  ;;  %197 = vmatpush.bf16.msra.mxu3 %v182_v3 }
  0x11   :  { %174 = vmatmul.msk.bf16.vlgmr.msra.gmra.mxu0 %vm79_vm0, %v178_v4  ;;  %175 = vmatmul.msk.bf16.vlgmr.msra.gmra.mxu1 %vm79_vm0, %v179_v5 }
  0x12   :  { %176 = vmatmul.msk.bf16.vlgmr.msra.gmra.mxu2 %vm79_vm0, %v180_v6  ;;  %177 = vmatmul.msk.bf16.vlgmr.msra.gmra.mxu3 %vm79_vm0, %v181_v7 }
  0x8e   :  { %v101_v9 = vpop.f32.mrf.mxu0  ;;  %v106_v10 = vpop.f32.mrf.mxu1 }
  0x8f   :  { %v102_v11 = vadd.f32 %v198_v8, %v101_v9  ;;  %v107_v12 = vadd.f32 %v198_v8, %v106_v10 }
  0x91   :  { %v121_v13 = vpack.c.bf16 %v102_v11, %v102_v11  ;;  %v123_v14 = vpack.c.bf16 %v107_v12, %v107_v12 }
  0x93   :  { %130 = vst.msk [vmem:[%s281_s3] sm:$0xf] %vm129_vm1, %v121_v13 }
  0x94   :  { %132 = vst.msk [vmem:[%s281_s3 + $0x8] sm:$0xf] %vm129_vm1, %v123_v14 }
  0x95   :  { %v111_v15 = vpop.f32.mrf.mxu2  ;;  %v116_v16 = vpop.f32.mrf.mxu3 }
  0x96   :  { %v112_v17 = vadd.f32 %v198_v8, %v111_v15  ;;  %v117_v18 = vadd.f32 %v198_v8, %v116_v16  ;;  %v103_v19 = vpop.f32.mrf.mxu0  ;;  %v108_v20 = vpop.f32.mrf.mxu1 }
  0x97   :  { %v104_v21 = vadd.f32 %v198_v8, %v103_v19  ;;  %v109_v22 = vadd.f32 %v198_v8, %v108_v20 }
  0x98   :  { %v125_v23 = vpack.c.bf16 %v112_v17, %v112_v17  ;;  %v127_v24 = vpack.c.bf16 %v117_v18, %v117_v18 }
  0x99   :  { %v122_v25 = vpack.c.bf16 %v104_v21, %v104_v21  ;;  %v124_v26 = vpack.c.bf16 %v109_v22, %v109_v22 }
  0x9a   :  { %134 = vst.msk [vmem:[%s281_s3 + $0x10] sm:$0xf] %vm129_vm1, %v125_v23 }
  0x9b   :  { %136 = vst.msk [vmem:[%s281_s3 + $0x18] sm:$0xf] %vm129_vm1, %v127_v24 }
  0x9c   :  { %131 = vst.msk [vmem:[%s281_s3 + $0x4] sm:$0xf] %vm129_vm1, %v122_v25 }
  0x9d   :  { %133 = vst.msk [vmem:[%s281_s3 + $0xc] sm:$0xf] %vm129_vm1, %v124_v26  ;;  %v113_v27 = vpop.f32.mrf.mxu2  ;;  %v118_v28 = vpop.f32.mrf.mxu3 }
  0x9e   :  { %v114_v29 = vadd.f32 %v198_v8, %v113_v27  ;;  %v119_v30 = vadd.f32 %v198_v8, %v118_v28 }
  0xa0   :  { %v126_v31 = vpack.c.bf16 %v114_v29, %v114_v29  ;;  %v128_v32 = vpack.c.bf16 %v119_v30, %v119_v30 }
  0xa2   :  { %135 = vst.msk [vmem:[%s281_s3 + $0x14] sm:$0xf] %vm129_vm1, %v126_v31 }
  0xa3   :  { %137 = vst.msk [vmem:[%s281_s3 + $0x1c] sm:$0xf] %vm129_vm1, %v128_v32 }

// kernel: tiny_roma_forward.51
= control target key start
LH: loop header
LB: loop body
LE: loop exit
PB: predicated region body
PF: predicated region fallthrough
CT: control target
= control target key end

     0   :  { %s1358_s1 = inlined_call_operand.vmem [shape: bf16[1152,128], index: 1, kind: input, shape index: {}]   ;;  %s1359_s0 = inlined_call_operand.vmem [shape: bf16[4,1152], index: 0, kind: input, shape index: {}]   ;;  %s1360_s2 = inlined_call_operand.vmem [shape: f32[1,128], index: 2, kind: input, shape index: {}]   ;;  %s1361_s3 = inlined_call_operand.vmem [shape: bf16[4,128], index: 3, kind: output, shape index: {}]  }
   0x1   :  { %v1041_v0 = vld [vmem:[%s1358_s1 + $0x38] sm:$0xff]  ;;  %v1040_v4 = vld [vmem:[%s1358_s1 + $0x30] sm:$0xff]  ;;  %v1039_v8 = vld [vmem:[%s1358_s1 + $0x28] sm:$0xff] }
   0x2   :  { %v1057_v1 = vld [vmem:[%s1358_s1 + $0xb8] sm:$0xff]  ;;  %622 = vmatpush.bf16.msra.mxu0 %v1041_v0  ;;  %v1056_v5 = vld [vmem:[%s1358_s1 + $0xb0] sm:$0xff]  ;;  %v1055_v9 = vld [vmem:[%s1358_s1 + $0xa8] sm:$0xff] }
   0x3   :  { %v1065_v2 = vld [vmem:[%s1358_s1 + $0xf8] sm:$0xff]  ;;  %648 = vmatpush.bf16.msra.mxu2 %v1057_v1  ;;  %v1064_v6 = vld [vmem:[%s1358_s1 + $0xf0] sm:$0xff]  ;;  %v1063_v10 = vld [vmem:[%s1358_s1 + $0xe8] sm:$0xff] }
   0x4   :  { %v1049_v3 = vld [vmem:[%s1358_s1 + $0x78] sm:$0xff]  ;;  %661 = vmatpush.bf16.msra.mxu3 %v1065_v2  ;;  %v1048_v7 = vld [vmem:[%s1358_s1 + $0x70] sm:$0xff]  ;;  %v1047_v11 = vld [vmem:[%s1358_s1 + $0x68] sm:$0xff] }
   0x5   :  { %635 = vmatpush.bf16.msra.mxu1 %v1049_v3  ;;  %v1038_v12 = vld [vmem:[%s1358_s1 + $0x20] sm:$0xff]  ;;  %v1037_v16 = vld [vmem:[%s1358_s1 + $0x18] sm:$0xff]  ;;  %v1036_v21 = vld [vmem:[%s1358_s1 + $0x10] sm:$0xff] }
   0x6   :  { %623 = vmatpush.bf16.msra.mxu0 %v1040_v4  ;;  %v1054_v13 = vld [vmem:[%s1358_s1 + $0xa0] sm:$0xff]  ;;  %v1053_v17 = vld [vmem:[%s1358_s1 + $0x98] sm:$0xff]  ;;  %v1052_v22 = vld [vmem:[%s1358_s1 + $0x90] sm:$0xff] }
   0x7   :  { %649 = vmatpush.bf16.msra.mxu2 %v1056_v5  ;;  %v1062_v14 = vld [vmem:[%s1358_s1 + $0xe0] sm:$0xff]  ;;  %v1061_v18 = vld [vmem:[%s1358_s1 + $0xd8] sm:$0xff]  ;;  %v1060_v23 = vld [vmem:[%s1358_s1 + $0xd0] sm:$0xff] }
   0x8   :  { %662 = vmatpush.bf16.msra.mxu3 %v1064_v6  ;;  %v1046_v15 = vld [vmem:[%s1358_s1 + $0x60] sm:$0xff]  ;;  %v1045_v19 = vld [vmem:[%s1358_s1 + $0x58] sm:$0xff]  ;;  %v1044_v24 = vld [vmem:[%s1358_s1 + $0x50] sm:$0xff] }
   0x9   :  { %636 = vmatpush.bf16.msra.mxu1 %v1048_v7  ;;  %v14_v20 = vld [vmem:[%s1359_s0] sm:$0xff]  ;;  %v1035_v25 = vld [vmem:[%s1358_s1 + $0x8] sm:$0xff]  ;;  %v16_v29 = vld [vmem:[%s1359_s0 + $0x10] sm:$0x3] }
   0xa   :  { %624 = vmatpush.bf16.msra.mxu0 %v1039_v8  ;;  %166 = vst [vmem:[#allocation1] ss:$4 sm:$0xff] %v14_v20  ;;  %v1051_v26 = vld [vmem:[%s1358_s1 + $0x88] sm:$0xff]  ;;  %v1034_v34 = vld [vmem:[%s1358_s1] sm:$0xff]  ;;  %v1073_v37 = vld [vmem:[%s1358_s1 + $0x138] sm:$0xff] }
   0xb   :  { %650 = vmatpush.bf16.msra.mxu2 %v1055_v9  ;;  %v1059_v27 = vld [vmem:[%s1358_s1 + $0xc8] sm:$0xff]  ;;  %v1050_v35 = vld [vmem:[%s1358_s1 + $0x80] sm:$0xff]  ;;  %v1089_v38 = vld [vmem:[%s1358_s1 + $0x1b8] sm:$0xff] }
   0xc   :  { %663 = vmatpush.bf16.msra.mxu3 %v1063_v10  ;;  %v1043_v28 = vld [vmem:[%s1358_s1 + $0x48] sm:$0xff]  ;;  %v1058_v39 = vld [vmem:[%s1358_s1 + $0xc0] sm:$0xff]  ;;  %v1097_v41 = vld [vmem:[%s1358_s1 + $0x1f8] sm:$0xff] }
   0xd   :  { %637 = vmatpush.bf16.msra.mxu1 %v1047_v11  ;;  %v15_v36 = vld [vmem:[%s1359_s0 + $0x8] sm:$0xff]  ;;  %v1042_v40 = vld [vmem:[%s1358_s1 + $0x40] sm:$0xff]  ;;  %v1081_v42 = vld [vmem:[%s1358_s1 + $0x178] sm:$0xff] }
   0xe   :  { %625 = vmatpush.bf16.msra.mxu0 %v1038_v12  ;;  %169 = vst [vmem:[#allocation1 + $0x20] ss:$4 sm:$0xff] %v15_v36  ;;  %v1072_v43 = vld [vmem:[%s1358_s1 + $0x130] sm:$0xff]  ;;  %v1071_v47 = vld [vmem:[%s1358_s1 + $0x128] sm:$0xff]  ;;  %v1070_v51 = vld [vmem:[%s1358_s1 + $0x120] sm:$0xff] }
   0xf   :  { %651 = vmatpush.bf16.msra.mxu2 %v1054_v13  ;;  %v1088_v44 = vld [vmem:[%s1358_s1 + $0x1b0] sm:$0xff]  ;;  %v1087_v48 = vld [vmem:[%s1358_s1 + $0x1a8] sm:$0xff]  ;;  %v1086_v52 = vld [vmem:[%s1358_s1 + $0x1a0] sm:$0xff] }
  0x10   :  { %664 = vmatpush.bf16.msra.mxu3 %v1062_v14  ;;  %v1096_v45 = vld [vmem:[%s1358_s1 + $0x1f0] sm:$0xff]  ;;  %v1095_v49 = vld [vmem:[%s1358_s1 + $0x1e8] sm:$0xff]  ;;  %v1094_v53 = vld [vmem:[%s1358_s1 + $0x1e0] sm:$0xff] }
  0x11   :  { %638 = vmatpush.bf16.msra.mxu1 %v1046_v15  ;;  %v172_v30 = vld.sshfl [vmem:[#allocation1 + $0x10] sm:$0xff pattern:$0x73625140]  ;;  %v170_v31 = vld.sshfl [vmem:[#allocation1] sm:$0xff pattern:$0x73625140] }
  0x12   :  { %626 = vmatpush.bf16.msra.mxu0 %v1037_v16  ;;  %v173_v32 = vld.sshfl [vmem:[#allocation1 + $0x18] sm:$0xff pattern:$0x73625140]  ;;  %v171_v33 = vld.sshfl [vmem:[#allocation1 + $0x8] sm:$0xff pattern:$0x73625140] }
  0x13   :  { %652 = vmatpush.bf16.msra.mxu2 %v1053_v17  ;;  %179 = vst [vmem:[#allocation1] ss:$4 sm:$0xff] %v16_v29  ;;  %v1080_v46 = vld [vmem:[%s1358_s1 + $0x170] sm:$0xff]  ;;  %v1079_v50 = vld [vmem:[%s1358_s1 + $0x168] sm:$0xff]  ;;  %v1078_v54 = vld [vmem:[%s1358_s1 + $0x160] sm:$0xff] }
  0x14   :  { %665 = vmatpush.bf16.msra.mxu3 %v1061_v18  ;;  %v1069_v55 = vld [vmem:[%s1358_s1 + $0x118] sm:$0xff]  ;;  %v1068_v59 = vld [vmem:[%s1358_s1 + $0x110] sm:$0xff]  ;;  %v1067_v63 = vld [vmem:[%s1358_s1 + $0x108] sm:$0xff] }
  0x15   :  { %639 = vmatpush.bf16.msra.mxu1 %v1045_v19  ;;  %v1085_v56 = vld [vmem:[%s1358_s1 + $0x198] sm:$0xff]  ;;  %v1084_v60 = vld [vmem:[%s1358_s1 + $0x190] sm:$0xff]  ;;  %v1083_v0 = vld [vmem:[%s1358_s1 + $0x188] sm:$0xff] }
  0x16   :  { %627 = vmatpush.bf16.msra.mxu0 %v1036_v21  ;;  %v1093_v57 = vld [vmem:[%s1358_s1 + $0x1d8] sm:$0xff]  ;;  %v1092_v61 = vld [vmem:[%s1358_s1 + $0x1d0] sm:$0xff]  ;;  %v1091_v1 = vld [vmem:[%s1358_s1 + $0x1c8] sm:$0xff] }
  0x17   :  { %653 = vmatpush.bf16.msra.mxu2 %v1052_v22  ;;  %v1077_v58 = vld [vmem:[%s1358_s1 + $0x158] sm:$0xff]  ;;  %v1076_v62 = vld [vmem:[%s1358_s1 + $0x150] sm:$0xff]  ;;  %v1075_v2 = vld [vmem:[%s1358_s1 + $0x148] sm:$0xff] }
  0x18   :  { %666 = vmatpush.bf16.msra.mxu3 %v1060_v23  ;;  %v1066_v3 = vld [vmem:[%s1358_s1 + $0x100] sm:$0xff]  ;;  %v1105_v5 = vld [vmem:[%s1358_s1 + $0x238] sm:$0xff]  ;;  %v176_v8 = vld.sshfl [vmem:[#allocation1 + $0x30] sm:$0xff pattern:$0x73625140] }
  0x19   :  { %640 = vmatpush.bf16.msra.mxu1 %v1044_v24  ;;  %v1082_v4 = vld [vmem:[%s1358_s1 + $0x180] sm:$0xff]  ;;  %v1104_v10 = vld [vmem:[%s1358_s1 + $0x230] sm:$0xff]  ;;  %v177_v11 = vld.sshfl [vmem:[#allocation1 + $0x38] sm:$0xff pattern:$0x73625140] }
  0x1a   :  { %628 = vmatpush.bf16.msra.mxu0 %v1035_v25  ;;  %v1090_v6 = vld [vmem:[%s1358_s1 + $0x1c0] sm:$0xff]  ;;  %v175_v12 = vld.sshfl [vmem:[#allocation1 + $0x28] sm:$0xff pattern:$0x73625140]  ;;  %v1101_v15 = vld [vmem:[%s1358_s1 + $0x218] sm:$0xff] }
  0x1b   :  { %654 = vmatpush.bf16.msra.mxu2 %v1051_v26  ;;  %v1074_v7 = vld [vmem:[%s1358_s1 + $0x140] sm:$0xff]  ;;  %v1103_v13 = vld [vmem:[%s1358_s1 + $0x228] sm:$0xff]  ;;  %v1100_v16 = vld [vmem:[%s1358_s1 + $0x210] sm:$0xff] }
  0x1c   :  { %667 = vmatpush.bf16.msra.mxu3 %v1059_v27  ;;  %v174_v9 = vld.sshfl [vmem:[#allocation1 + $0x20] sm:$0xff pattern:$0x73625140]  ;;  %v1099_v17 = vld [vmem:[%s1358_s1 + $0x208] sm:$0xff] }
  0x1d   :  { %641 = vmatpush.bf16.msra.mxu1 %v1043_v28  ;;  %v1102_v14 = vld [vmem:[%s1358_s1 + $0x220] sm:$0xff] }
  0x1e   :  { %629 = vmatpush.bf16.msra.mxu0 %v1034_v34  ;;  %v1098_v18 = vld [vmem:[%s1358_s1 + $0x200] sm:$0xff] }
  0x1f   :  { %655 = vmatpush.bf16.msra.mxu2 %v1050_v35  ;;  %v180_v19 = vld.sshfl [vmem:[#allocation1] sm:$0xff pattern:$0x73625140] }
  0x20   :  { %668 = vmatpush.bf16.msra.mxu3 %v1058_v39  ;;  %v1106_v28 = vld [vmem:[%s1360_s2] ss:$0 sm:$0xff] }
  0x21   :  { %642 = vmatpush.bf16.msra.mxu1 %v1042_v40  ;;  %630 = vmatmul.bf16.vlgmr.msra.gmra.mxu0 %v170_v31 }
  0x22   :  { %674 = vmatpush.bf16.msrb.mxu0 %v1073_v37  ;;  %656 = vmatmul.bf16.vlgmr.msra.gmra.mxu2 %v172_v30 }
  0x23   :  { %700 = vmatpush.bf16.msrb.mxu2 %v1089_v38  ;;  %669 = vmatmul.bf16.vlgmr.msra.gmra.mxu3 %v173_v32 }
  0x24   :  { %713 = vmatpush.bf16.msrb.mxu3 %v1097_v41  ;;  %643 = vmatmul.bf16.vlgmr.msra.gmra.mxu1 %v171_v33 }
  0x25   :  { %687 = vmatpush.bf16.msrb.mxu1 %v1081_v42 }
  0x26   :  { %675 = vmatpush.bf16.msrb.mxu0 %v1072_v43 }
  0x27   :  { %701 = vmatpush.bf16.msrb.mxu2 %v1088_v44 }
  0x28   :  { %714 = vmatpush.bf16.msrb.mxu3 %v1096_v45 }
  0x29   :  { %688 = vmatpush.bf16.msrb.mxu1 %v1080_v46 }
  0x2a   :  { %676 = vmatpush.bf16.msrb.mxu0 %v1071_v47 }
  0x2b   :  { %702 = vmatpush.bf16.msrb.mxu2 %v1087_v48 }
  0x2c   :  { %715 = vmatpush.bf16.msrb.mxu3 %v1095_v49 }
  0x2d   :  { %689 = vmatpush.bf16.msrb.mxu1 %v1079_v50 }
  0x2e   :  { %677 = vmatpush.bf16.msrb.mxu0 %v1070_v51 }
  0x2f   :  { %703 = vmatpush.bf16.msrb.mxu2 %v1086_v52 }
  0x30   :  { %716 = vmatpush.bf16.msrb.mxu3 %v1094_v53 }
  0x31   :  { %690 = vmatpush.bf16.msrb.mxu1 %v1078_v54 }
  0x32   :  { %678 = vmatpush.bf16.msrb.mxu0 %v1069_v55 }
  0x33   :  { %704 = vmatpush.bf16.msrb.mxu2 %v1085_v56 }
  0x34   :  { %717 = vmatpush.bf16.msrb.mxu3 %v1093_v57 }
  0x35   :  { %691 = vmatpush.bf16.msrb.mxu1 %v1077_v58 }
  0x36   :  { %679 = vmatpush.bf16.msrb.mxu0 %v1068_v59 }
  0x37   :  { %705 = vmatpush.bf16.msrb.mxu2 %v1084_v60 }
  0x38   :  { %718 = vmatpush.bf16.msrb.mxu3 %v1092_v61 }
  0x39   :  { %692 = vmatpush.bf16.msrb.mxu1 %v1076_v62 }
  0x3a   :  { %680 = vmatpush.bf16.msrb.mxu0 %v1067_v63 }
  0x3b   :  { %706 = vmatpush.bf16.msrb.mxu2 %v1083_v0 }
  0x3c   :  { %719 = vmatpush.bf16.msrb.mxu3 %v1091_v1 }
  0x3d   :  { %693 = vmatpush.bf16.msrb.mxu1 %v1075_v2 }
  0x3e   :  { %681 = vmatpush.bf16.msrb.mxu0 %v1066_v3 }
  0x3f   :  { %707 = vmatpush.bf16.msrb.mxu2 %v1082_v4 }
  0x40   :  { %720 = vmatpush.bf16.msrb.mxu3 %v1090_v6 }
  0x41   :  { %694 = vmatpush.bf16.msrb.mxu1 %v1074_v7  ;;  %682 = vmatmul.bf16.vlgmr.msrb.gmra.mxu0 %v174_v9 }
  0x42   :  { %726 = vmatpush.bf16.msra.mxu0 %v1105_v5  ;;  %708 = vmatmul.bf16.vlgmr.msrb.gmra.mxu2 %v176_v8 }
  0x43   :  { %721 = vmatmul.bf16.vlgmr.msrb.gmra.mxu3 %v177_v11 }
  0x44   :  { %695 = vmatmul.bf16.vlgmr.msrb.gmra.mxu1 %v175_v12 }
  0x46   :  { %727 = vmatpush.bf16.msra.mxu0 %v1104_v10 }
  0x4a   :  { %728 = vmatpush.bf16.msra.mxu0 %v1103_v13 }
  0x4e   :  { %729 = vmatpush.bf16.msra.mxu0 %v1102_v14 }
  0x52   :  { %730 = vmatpush.bf16.msra.mxu0 %v1101_v15 }
  0x56   :  { %731 = vmatpush.bf16.msra.mxu0 %v1100_v16 }
  0x5a   :  { %732 = vmatpush.bf16.msra.mxu0 %v1099_v17 }
  0x5e   :  { %733 = vmatpush.bf16.msra.mxu0 %v1098_v18 }
  0x61   :  { %734 = vmatmul.bf16.vlgmr.msra.gmra.mxu0 %v180_v19 }
  0x9e   :  { %v631_v20 = vpop.f32.mrf.mxu0 }
  0x9f   :  { %v632_v29 = vadd.f32 %v1106_v28, %v631_v20 }
  0xa1   :  { %v644_v21 = vpop.f32.mrf.mxu1 }
  0xa2   :  { %v645_v32 = vadd.f32 %v644_v21, %v632_v29 }
  0xa5   :  { %v657_v22 = vpop.f32.mrf.mxu2 }
  0xa6   :  { %v670_v23 = vpop.f32.mrf.mxu3  ;;  %v633_v24 = vpop.f32.mrf.mxu0  ;;  %v658_v34 = vadd.f32 %v657_v22, %v645_v32 }
  0xa8   :  { %v671_v38 = vadd.f32 %v670_v23, %v658_v34 }
  0xa9   :  { %v646_v25 = vpop.f32.mrf.mxu1 }
  0xad   :  { %v659_v26 = vpop.f32.mrf.mxu2 }
  0xae   :  { %v672_v27 = vpop.f32.mrf.mxu3 }
  0xbe   :  { %v683_v30 = vpop.f32.mrf.mxu0 }
  0xbf   :  { %v684_v40 = vadd.f32 %v683_v30, %v671_v38 }
  0xc1   :  { %v696_v31 = vpop.f32.mrf.mxu1 }
  0xc2   :  { %v697_v42 = vadd.f32 %v696_v31, %v684_v40 }
  0xc5   :  { %v709_v33 = vpop.f32.mrf.mxu2 }
  0xc6   :  { %v722_v35 = vpop.f32.mrf.mxu3  ;;  %v685_v36 = vpop.f32.mrf.mxu0  ;;  %v710_v43 = vadd.f32 %v709_v33, %v697_v42 }
  0xc8   :  { %v723_v44 = vadd.f32 %v722_v35, %v710_v43 }
  0xc9   :  { %v698_v37 = vpop.f32.mrf.mxu1 }
  0xcd   :  { %v711_v39 = vpop.f32.mrf.mxu2 }
  0xce   :  { %v724_v41 = vpop.f32.mrf.mxu3 }
  0xde   :  { %v735_v45 = vpop.f32.mrf.mxu0 }
  0xdf   :  { %v736_v46 = vadd.f32 %v735_v45, %v723_v44 }
  0xe1   :  { %v739_v47 = vmax.f32 %v736_v46, 0.0 }
  0xe3   :  { %v740_v48 = vpack.c.bf16 %v739_v47, %v739_v47 }
  0xe5   :  { %741 = vst [vmem:[%s1361_s3] sm:$0x3] %v740_v48 }
  0xe6   :  { %v737_v49 = vpop.f32.mrf.mxu0 }

// kernel: tiny_roma_forward.63
= control target key start
LH: loop header
LB: loop body
LE: loop exit
PB: predicated region body
PF: predicated region fallthrough
CT: control target
= control target key end

     0   :  { %vm36_vm0 = vcmask 523264   ;;  %v260_v2 = vmov 0   ;;  %vm91_vm1 = vcmask 130048   ;;  %vm214_vm2 = vcmask 122880   ;;  %s342_s1 = inlined_call_operand.vmem [shape: bf16[2,16,64], index: 1, kind: input, shape index: {}]   ;;  %s343_s3 = inlined_call_operand.vmem [shape: f32[16,1], index: 3, kind: input, shape index: {}]   ;;  %s344_s2 = inlined_call_operand.vmem [shape: f32[16,1], index: 2, kind: input, shape index: {}]   ;;  %s345_s0 = inlined_call_operand.vmem [shape: bf16[2,16,64], index: 0, kind: input, shape index: {}]   ;;  %s346_s4 = inlined_call_operand.vmem [shape: f32[2,2,16], index: 4, kind: output, shape index: {}]  }
   0x1   :  { %v243_v0 = vld [vmem:[%s342_s1] sm:$0xff]  ;;  %v244_v1 = vld [vmem:[%s342_s1 + $0x8] sm:$0xff]  ;;  %247 = vset.pattern.permute.xlu1 %v260_v2  ;;  %246 = vset.pattern.permute.xlu0 %v260_v2 }
   0x2   :  { %v178_v3 = vld [vmem:[%s343_s3] sm:$0xff]  ;;  %v41_v5 = vsel %vm36_vm0, %v243_v0, 0  ;;  %v71_v6 = vsel %vm36_vm0, %v244_v1, 0  ;;  %v242_v8 = vld [vmem:[%s345_s0 + $0x8] sm:$0xff] }
   0x3   :  { %v142_v4 = vld [vmem:[%s344_s2] sm:$0xff]  ;;  %182 = vperm.xlu1 %247, %v178_v3   ;;  %50 = vmatpush.bf16.xpose.msra.mxu0 %v41_v5  ;;  %v179_v9 = vld [vmem:[%s343_s3 + $0x8] sm:$0xff] }
   0x4   :  { %146 = vperm.xlu0 %246, %v142_v4   ;;  %80 = vmatpush.bf16.xpose.msra.mxu1 %v71_v6  ;;  %v241_v7 = vld [vmem:[%s345_s0] sm:$0xff]  ;;  %v143_v10 = vld [vmem:[%s344_s2 + $0x8] sm:$0xff] }
   0xa   :  { %231 = vmatmul.msk.bf16.vlgmr.msra.gmra.mxu0 %vm36_vm0, %v241_v7 }
   0xb   :  { %240 = vmatmul.msk.bf16.vlgmr.msra.gmra.mxu1 %vm36_vm0, %v242_v8  ;;  %187 = vperm.xlu1 %247, %v179_v9  }
   0xc   :  { %151 = vperm.xlu0 %246, %v143_v10  }
  0x75   :  { %v183_v41 = vpop.permute.xlu1 %182 }
  0x76   :  { %v147_v42 = vpop.permute.xlu0 %146 }
  0x7d   :  { %v188_v52 = vpop.permute.xlu1 %187 }
  0x7e   :  { %v152_v53 = vpop.permute.xlu0 %151 }
  0x87   :  { %v52_v11 = vpop.f32.mrf.mxu0 }
  0x88   :  { %v82_v12 = vpop.f32.mrf.mxu1  ;;  %v87_v13 = vmul.f32 0.125, %v52_v11 }
  0x89   :  { %v89_v14 = vmul.f32 0.125, %v82_v12 }
  0x8a   :  { %v92_v19 = vsel %vm91_vm1, %v87_v13, -inf }
  0x8b   :  { %v101_v20 = vsel %vm91_vm1, %v89_v14, -inf }
  0x8f   :  { %v54_v15 = vpop.f32.mrf.mxu0 }
  0x90   :  { %v84_v16 = vpop.f32.mrf.mxu1  ;;  %v88_v17 = vmul.f32 0.125, %v54_v15 }
  0x91   :  { %v90_v18 = vmul.f32 0.125, %v84_v16 }
  0x92   :  { %v93_v21 = vsel %vm91_vm1, %v88_v17, -inf }
  0x93   :  { %v102_v22 = vsel %vm91_vm1, %v90_v18, -inf  ;;  %v94_v23 = vmax.f32 %v92_v19, %v93_v21 }
  0x94   :  { %v103_v24 = vmax.f32 %v101_v20, %v102_v22 }
  0x95   :  { %v95_v25 = vrot.slane %v94_v23, 4 }
  0x96   :  { %v104_v26 = vrot.slane %v103_v24, 4 }
  0x97   :  { %v96_v27 = vmax.f32 %v94_v23, %v95_v25 }
  0x98   :  { %v105_v28 = vmax.f32 %v103_v24, %v104_v26 }
  0x99   :  { %v97_v29 = vrot.slane %v96_v27, 2 }
  0x9a   :  { %v106_v30 = vrot.slane %v105_v28, 2 }
  0x9b   :  { %v98_v31 = vmax.f32 %v96_v27, %v97_v29 }
  0x9c   :  { %v107_v32 = vmax.f32 %v105_v28, %v106_v30 }
  0x9d   :  { %v99_v33 = vrot.slane %v98_v31, 1 }
  0x9e   :  { %v108_v34 = vrot.slane %v107_v32, 1 }
  0x9f   :  { %v100_v35 = vmax.f32 %v98_v31, %v99_v33 }
  0xa0   :  { %v109_v36 = vmax.f32 %v107_v32, %v108_v34 }
  0xa1   :  { %v110_v37 = vsub.f32 %v87_v13, %v100_v35  ;;  %v111_v38 = vsub.f32 %v88_v17, %v100_v35 }
  0xa2   :  { %v112_v39 = vsub.f32 %v89_v14, %v109_v36  ;;  %v113_v40 = vsub.f32 %v90_v18, %v109_v36 }
  0xa3   :  { %v114_v43 = vmul.f32 1.442695, %v110_v37  ;;  %v116_v44 = vmul.f32 1.442695, %v111_v38 }
  0xa4   :  { %v118_v45 = vmul.f32 1.442695, %v112_v39  ;;  %v120_v46 = vmul.f32 1.442695, %v113_v40 }
  0xa5   :  { %248 = vpow2.f32 %v114_v43 }
  0xa6   :  { %250 = vpow2.f32 %v116_v44 }
  0xa7   :  { %252 = vpow2.f32 %v118_v45 }
  0xa8   :  { %254 = vpow2.f32 %v120_v46 }
  0xab   :  { %v249_v47 = vpop.eup %248 }
  0xac   :  { %v251_v48 = vpop.eup %250  ;;  %v122_v49 = vsel %vm91_vm1, %v249_v47, 0.0  ;;  %v190_v50 = vmul.f32 %v249_v47, %v183_v41  ;;  %v154_v51 = vmul.f32 %v249_v47, %v147_v42 }
  0xad   :  { %v253_v54 = vpop.eup %252  ;;  %v123_v55 = vsel %vm91_vm1, %v251_v48, 0.0  ;;  %v191_v56 = vmul.f32 %v251_v48, %v188_v52  ;;  %v155_v57 = vmul.f32 %v251_v48, %v152_v53 }
  0xae   :  { %v255_v58 = vpop.eup %254  ;;  %v124_v59 = vadd.f32 %v123_v55, %v122_v49  ;;  %v131_v60 = vsel %vm91_vm1, %v253_v54, 0.0  ;;  %v192_v61 = vmul.f32 %v253_v54, %v183_v41  ;;  %v194_v62 = vsel %vm91_vm1, %v190_v50, 0.0 }
  0xaf   :  { %v132_v63 = vsel %vm91_vm1, %v255_v58, 0.0  ;;  %v156_v0 = vmul.f32 %v253_v54, %v147_v42  ;;  %v158_v1 = vsel %vm91_vm1, %v154_v51, 0.0  ;;  %v193_v2 = vmul.f32 %v255_v58, %v188_v52 }
  0xb0   :  { %v125_v3 = vrot.slane %v124_v59, 4  ;;  %v133_v4 = vadd.f32 %v132_v63, %v131_v60  ;;  %v203_v5 = vsel %vm91_vm1, %v192_v61, 0.0  ;;  %v195_v6 = vsel %vm91_vm1, %v191_v56, 0.0 }
  0xb1   :  { %v167_v7 = vsel %vm91_vm1, %v156_v0, 0.0  ;;  %v196_v8 = vadd.f32 %v195_v6, %v194_v62  ;;  %v204_v9 = vsel %vm91_vm1, %v193_v2, 0.0  ;;  %v157_v10 = vmul.f32 %v255_v58, %v152_v53 }
  0xb2   :  { %v126_v11 = vadd.f32 %v125_v3, %v124_v59  ;;  %v134_v12 = vrot.slane %v133_v4, 4  ;;  %v205_v13 = vadd.f32 %v204_v9, %v203_v5  ;;  %v159_v14 = vsel %vm91_vm1, %v155_v57, 0.0 }
  0xb3   :  { %v197_v15 = vrot.slane %v196_v8, 4  ;;  %v160_v16 = vadd.f32 %v159_v14, %v158_v1  ;;  %v168_v17 = vsel %vm91_vm1, %v157_v10, 0.0 }
  0xb4   :  { %v135_v18 = vadd.f32 %v134_v12, %v133_v4  ;;  %v127_v19 = vrot.slane %v126_v11, 2  ;;  %v206_v20 = vrot.slane %v205_v13, 4  ;;  %v169_v21 = vadd.f32 %v168_v17, %v167_v7 }
  0xb5   :  { %v198_v22 = vadd.f32 %v197_v15, %v196_v8  ;;  %v161_v23 = vrot.slane %v160_v16, 4 }
  0xb6   :  { %v128_v24 = vadd.f32 %v127_v19, %v126_v11  ;;  %v136_v25 = vrot.slane %v135_v18, 2  ;;  %v207_v26 = vadd.f32 %v206_v20, %v205_v13  ;;  %v170_v27 = vrot.slane %v169_v21, 4 }
  0xb7   :  { %v199_v28 = vrot.slane %v198_v22, 2  ;;  %v162_v29 = vadd.f32 %v161_v23, %v160_v16 }
  0xb8   :  { %v129_v30 = vrot.slane %v128_v24, 1  ;;  %v137_v31 = vadd.f32 %v136_v25, %v135_v18  ;;  %v208_v32 = vrot.slane %v207_v26, 2  ;;  %v171_v33 = vadd.f32 %v170_v27, %v169_v21 }
  0xb9   :  { %v200_v34 = vadd.f32 %v199_v28, %v198_v22  ;;  %v163_v35 = vrot.slane %v162_v29, 2 }
  0xba   :  { %v130_v36 = vadd.f32 %v129_v30, %v128_v24  ;;  %v138_v37 = vrot.slane %v137_v31, 1  ;;  %v172_v38 = vrot.slane %v171_v33, 2  ;;  %v209_v39 = vadd.f32 %v208_v32, %v207_v26 }
  0xbb   :  { %v164_v40 = vadd.f32 %v163_v35, %v162_v29  ;;  %v201_v43 = vrot.slane %v200_v34, 1 }
  0xbc   :  { %v139_v41 = vadd.f32 %v138_v37, %v137_v31  ;;  %256 = vrcp.f32 %v130_v36  ;;  %v173_v42 = vadd.f32 %v172_v38, %v171_v33  ;;  %v210_v45 = vrot.slane %v209_v39, 1 }
  0xbd   :  { %v165_v44 = vrot.slane %v164_v40, 1  ;;  %v202_v47 = vadd.f32 %v201_v43, %v200_v34 }
  0xbe   :  { %258 = vrcp.f32 %v139_v41  ;;  %v174_v46 = vrot.slane %v173_v42, 1  ;;  %v211_v50 = vadd.f32 %v210_v45, %v209_v39 }
  0xbf   :  { %v166_v48 = vadd.f32 %v165_v44, %v164_v40 }
  0xc0   :  { %v175_v52 = vadd.f32 %v174_v46, %v173_v42 }
  0xc2   :  { %v257_v49 = vpop.eup %256 }
  0xc3   :  { %v212_v51 = vmul.f32 %v257_v49, %v202_v47  ;;  %v176_v53 = vmul.f32 %v257_v49, %v166_v48 }
  0xc4   :  { %v259_v54 = vpop.eup %258 }
  0xc5   :  { %v213_v55 = vmul.f32 %v259_v54, %v211_v50  ;;  %217 = vst.msk [vmem:[%s346_s4 + $0x1] sm:$0x1] %vm214_vm2, %v212_v51  ;;  %v177_v56 = vmul.f32 %v259_v54, %v175_v52 }
  0xc6   :  { %215 = vst.msk [vmem:[%s346_s4] sm:$0x1] %vm214_vm2, %v176_v53 }
  0xc7   :  { %218 = vst.msk [vmem:[%s346_s4 + $0x3] sm:$0x1] %vm214_vm2, %v213_v55 }
  0xc8   :  { %216 = vst.msk [vmem:[%s346_s4 + $0x2] sm:$0x1] %vm214_vm2, %v177_v56 }

// kernel: tiny_roma_forward.64
= control target key start
LH: loop header
LB: loop body
LE: loop exit
PB: predicated region body
PF: predicated region fallthrough
CT: control target
= control target key end

     0   :  { %s2538_s12 = smov 0   ;;  %s2540_s13 = smov 0   ;;  %s3123_s0 = inlined_call_operand.vmem [shape: bf16[32,1184], index: 0, kind: input, shape index: {}]   ;;  %s3124_s1 = inlined_call_operand.vmem [shape: bf16[1184,256], index: 1, kind: input, shape index: {}]   ;;  %s3125_s2 = inlined_call_operand.vmem [shape: f32[1,256], index: 2, kind: input, shape index: {}]   ;;  %s3126_s3 = inlined_call_operand.vmem [shape: bf16[32,256], index: 3, kind: output, shape index: {}]  }
   0x1   :  { %s2542_s14 = smov 0   ;;  %s2544_s15 = smov 0  }
   0x2   :  { %s2546_s16 = smov 0  }
   0x3 LB: > { %s22_s17 = sadd.s32 1, %s2512_s15  ;;  %s1930_s18 = sadd.s32 4294967295, %s2516_s16   ;;  %s2516_s16 = sphi %s2546_s16, %s13_s16   ;;  %s2512_s15 = sphi %s2544_s15, %s3131_s15   ;;  %s2508_s14 = sphi %s2542_s14, %s3130_s14   ;;  %s2504_s13 = sphi %s2540_s13, %s3129_s13   ;;  %s2500_s12 = sphi %s2538_s12, %s3128_s12  }
   0x4   : > { %p23_p0 = scmp.ge.s32.totalorder %s22_s17, 2  ;;  %p65_p1 = scmp.ne.s32.totalorder %s2504_s13, %s2500_s12 }
   0x5   : > { %p66_p2 = scmp.eq.s32.totalorder %s2516_s16, 0  ;;  %p123_p4 = scmp.eq.s32.totalorder %s1930_s18, 1 }
   0x6   : > { %s3133_s17 = smov (%p23_p0, %s22_s17), 0  ;;  %s58_s20 = sadd.s32 1, %s2504_s13 }
   0x7   : > { %p67_p3 = por %p66_p2, %p65_p1  ;;  %s55_s19 = ssub.s32 %s2512_s15, %s3133_s17 }
   0x8   : > { %p56_p5 = scmp.eq.s32.totalorder %s55_s19, 0  ;;  %p2573_p6 = por %p123_p4, %p65_p1 }
   0x9   : > { %p1934_p7 = scmp.ge.s32.totalorder %s2516_s16, 2 }
   0xa   : > { %s2578_s22 = scalar_select %p56_p5, %s2504_s13, %s58_s20  }
   0xb   : > { %155 = sbr.rel (%p1934_p7) target bundleno = 169 (0xa9), region = 20 }
  0x10   : > { %158 = sbr.rel (!%p67_p3) target bundleno = 169 (0xa9), region = 24  ;;  %s160_s23 = sand.u32 (%p67_p3), 1, %s2504_s13  }
  0x11   : > { %s1935_s24 = sshll.u32 (%p67_p3), %s2512_s15, 2  ;;  %s2435_s25 = smul.u32 (%p67_p3), 592, %s160_s23 }
  0x12   : > { %s2586_s28 = scalar_lea.vmem (%p67_p3), %s3124_s1, %s1935_s24 }
  0x13   : > { %v181_v0 = vld [vmem:[%s2586_s28] sm:$0xf] (%p67_p3)  ;;  %v183_v1 = vld [vmem:[%s2586_s28 + $0x8] sm:$0xf] (%p67_p3)  ;;  %v185_v2 = vld [vmem:[%s2586_s28 + $0x10] sm:$0xf] (%p67_p3) }
  0x14   : > { %s2591_s29 = scalar_lea.vmem (%p67_p3), [#allocation2], %s2435_s25  ;;  %v187_v3 = vld [vmem:[%s2586_s28 + $0x18] sm:$0xf] (%p67_p3)  ;;  %v189_v4 = vld [vmem:[%s2586_s28 + $0x20] sm:$0xf] (%p67_p3) }
  0x15   : > { %182 = vst [vmem:[%s2591_s29] sm:$0xf] %v181_v0  ;;  %v191_v5 = vld [vmem:[%s2586_s28 + $0x28] sm:$0xf]  ;;  %v193_v6 = vld [vmem:[%s2586_s28 + $0x30] sm:$0xf] }
  0x16   : > { %184 = vst [vmem:[%s2591_s29 + $0x4] sm:$0xf] %v183_v1  ;;  %v195_v7 = vld [vmem:[%s2586_s28 + $0x38] sm:$0xf]  ;;  %v197_v8 = vld [vmem:[%s2586_s28 + $0x40] sm:$0xf] }
  0x17   : > { %186 = vst [vmem:[%s2591_s29 + $0x8] sm:$0xf] %v185_v2  ;;  %v199_v9 = vld [vmem:[%s2586_s28 + $0x48] sm:$0xf]  ;;  %v201_v10 = vld [vmem:[%s2586_s28 + $0x50] sm:$0xf] }
  0x18   : > { %188 = vst [vmem:[%s2591_s29 + $0xc] sm:$0xf] %v187_v3  ;;  %v203_v11 = vld [vmem:[%s2586_s28 + $0x58] sm:$0xf]  ;;  %v205_v12 = vld [vmem:[%s2586_s28 + $0x60] sm:$0xf] }
  0x19   : > { %190 = vst [vmem:[%s2591_s29 + $0x10] sm:$0xf] %v189_v4  ;;  %v207_v13 = vld [vmem:[%s2586_s28 + $0x68] sm:$0xf]  ;;  %v209_v14 = vld [vmem:[%s2586_s28 + $0x70] sm:$0xf] }
  0x1a   : > { %192 = vst [vmem:[%s2591_s29 + $0x14] sm:$0xf] %v191_v5  ;;  %v211_v15 = vld [vmem:[%s2586_s28 + $0x78] sm:$0xf]  ;;  %v213_v16 = vld [vmem:[%s2586_s28 + $0x80] sm:$0xf] }
  0x1b   : > { %194 = vst [vmem:[%s2591_s29 + $0x18] sm:$0xf] %v193_v6  ;;  %v215_v17 = vld [vmem:[%s2586_s28 + $0x88] sm:$0xf]  ;;  %v217_v18 = vld [vmem:[%s2586_s28 + $0x90] sm:$0xf] }
  0x1c   : > { %196 = vst [vmem:[%s2591_s29 + $0x1c] sm:$0xf] %v195_v7  ;;  %v219_v19 = vld [vmem:[%s2586_s28 + $0x98] sm:$0xf]  ;;  %v221_v20 = vld [vmem:[%s2586_s28 + $0xa0] sm:$0xf] }
  0x1d   : > { %198 = vst [vmem:[%s2591_s29 + $0x20] sm:$0xf] %v197_v8  ;;  %v223_v21 = vld [vmem:[%s2586_s28 + $0xa8] sm:$0xf]  ;;  %v225_v22 = vld [vmem:[%s2586_s28 + $0xb0] sm:$0xf] }
  0x1e   : > { %200 = vst [vmem:[%s2591_s29 + $0x24] sm:$0xf] %v199_v9  ;;  %v227_v23 = vld [vmem:[%s2586_s28 + $0xb8] sm:$0xf]  ;;  %v229_v24 = vld [vmem:[%s2586_s28 + $0xc0] sm:$0xf] }
  0x1f   : > { %202 = vst [vmem:[%s2591_s29 + $0x28] sm:$0xf] %v201_v10  ;;  %v231_v25 = vld [vmem:[%s2586_s28 + $0xc8] sm:$0xf]  ;;  %v233_v26 = vld [vmem:[%s2586_s28 + $0xd0] sm:$0xf] }
  0x20   : > { %204 = vst [vmem:[%s2591_s29 + $0x2c] sm:$0xf] %v203_v11  ;;  %v235_v27 = vld [vmem:[%s2586_s28 + $0xd8] sm:$0xf]  ;;  %v237_v28 = vld [vmem:[%s2586_s28 + $0xe0] sm:$0xf] }
  0x21   : > { %206 = vst [vmem:[%s2591_s29 + $0x30] sm:$0xf] %v205_v12  ;;  %v239_v29 = vld [vmem:[%s2586_s28 + $0xe8] sm:$0xf]  ;;  %v241_v30 = vld [vmem:[%s2586_s28 + $0xf0] sm:$0xf] }
  0x22   : > { %208 = vst [vmem:[%s2591_s29 + $0x34] sm:$0xf] %v207_v13  ;;  %v243_v31 = vld [vmem:[%s2586_s28 + $0xf8] sm:$0xf]  ;;  %v245_v32 = vld [vmem:[%s2586_s28 + $0x100] sm:$0xf] }
  0x23   : > { %210 = vst [vmem:[%s2591_s29 + $0x38] sm:$0xf] %v209_v14  ;;  %v247_v33 = vld [vmem:[%s2586_s28 + $0x108] sm:$0xf]  ;;  %v249_v34 = vld [vmem:[%s2586_s28 + $0x110] sm:$0xf] }
  0x24   : > { %212 = vst [vmem:[%s2591_s29 + $0x3c] sm:$0xf] %v211_v15  ;;  %v251_v35 = vld [vmem:[%s2586_s28 + $0x118] sm:$0xf]  ;;  %v253_v36 = vld [vmem:[%s2586_s28 + $0x120] sm:$0xf] }
  0x25   : > { %214 = vst [vmem:[%s2591_s29 + $0x40] sm:$0xf] %v213_v16  ;;  %v255_v37 = vld [vmem:[%s2586_s28 + $0x128] sm:$0xf]  ;;  %v257_v38 = vld [vmem:[%s2586_s28 + $0x130] sm:$0xf] }
  0x26   : > { %216 = vst [vmem:[%s2591_s29 + $0x44] sm:$0xf] %v215_v17  ;;  %v259_v39 = vld [vmem:[%s2586_s28 + $0x138] sm:$0xf]  ;;  %v261_v40 = vld [vmem:[%s2586_s28 + $0x140] sm:$0xf] }
  0x27   : > { %218 = vst [vmem:[%s2591_s29 + $0x48] sm:$0xf] %v217_v18  ;;  %v263_v41 = vld [vmem:[%s2586_s28 + $0x148] sm:$0xf]  ;;  %v265_v42 = vld [vmem:[%s2586_s28 + $0x150] sm:$0xf] }
  0x28   : > { %220 = vst [vmem:[%s2591_s29 + $0x4c] sm:$0xf] %v219_v19  ;;  %v267_v43 = vld [vmem:[%s2586_s28 + $0x158] sm:$0xf]  ;;  %v269_v44 = vld [vmem:[%s2586_s28 + $0x160] sm:$0xf] }
  0x29   : > { %222 = vst [vmem:[%s2591_s29 + $0x50] sm:$0xf] %v221_v20  ;;  %v271_v45 = vld [vmem:[%s2586_s28 + $0x168] sm:$0xf]  ;;  %v273_v46 = vld [vmem:[%s2586_s28 + $0x170] sm:$0xf] }
  0x2a   : > { %224 = vst [vmem:[%s2591_s29 + $0x54] sm:$0xf] %v223_v21  ;;  %v275_v47 = vld [vmem:[%s2586_s28 + $0x178] sm:$0xf]  ;;  %v277_v48 = vld [vmem:[%s2586_s28 + $0x180] sm:$0xf] }
  0x2b   : > { %226 = vst [vmem:[%s2591_s29 + $0x58] sm:$0xf] %v225_v22  ;;  %v279_v49 = vld [vmem:[%s2586_s28 + $0x188] sm:$0xf]  ;;  %v281_v50 = vld [vmem:[%s2586_s28 + $0x190] sm:$0xf] }
  0x2c   : > { %228 = vst [vmem:[%s2591_s29 + $0x5c] sm:$0xf] %v227_v23  ;;  %v283_v51 = vld [vmem:[%s2586_s28 + $0x198] sm:$0xf]  ;;  %v285_v52 = vld [vmem:[%s2586_s28 + $0x1a0] sm:$0xf] }
  0x2d   : > { %230 = vst [vmem:[%s2591_s29 + $0x60] sm:$0xf] %v229_v24  ;;  %v287_v53 = vld [vmem:[%s2586_s28 + $0x1a8] sm:$0xf]  ;;  %v289_v54 = vld [vmem:[%s2586_s28 + $0x1b0] sm:$0xf] }
  0x2e   : > { %232 = vst [vmem:[%s2591_s29 + $0x64] sm:$0xf] %v231_v25  ;;  %v291_v55 = vld [vmem:[%s2586_s28 + $0x1b8] sm:$0xf]  ;;  %v293_v56 = vld [vmem:[%s2586_s28 + $0x1c0] sm:$0xf] }
  0x2f   : > { %234 = vst [vmem:[%s2591_s29 + $0x68] sm:$0xf] %v233_v26  ;;  %v295_v57 = vld [vmem:[%s2586_s28 + $0x1c8] sm:$0xf]  ;;  %v297_v58 = vld [vmem:[%s2586_s28 + $0x1d0] sm:$0xf] }
  0x30   : > { %236 = vst [vmem:[%s2591_s29 + $0x6c] sm:$0xf] %v235_v27  ;;  %v299_v59 = vld [vmem:[%s2586_s28 + $0x1d8] sm:$0xf]  ;;  %v301_v60 = vld [vmem:[%s2586_s28 + $0x1e0] sm:$0xf] }
  0x31   : > { %238 = vst [vmem:[%s2591_s29 + $0x70] sm:$0xf] %v237_v28  ;;  %v303_v61 = vld [vmem:[%s2586_s28 + $0x1e8] sm:$0xf]  ;;  %v305_v62 = vld [vmem:[%s2586_s28 + $0x1f0] sm:$0xf] }
  0x32   : > { %240 = vst [vmem:[%s2591_s29 + $0x74] sm:$0xf] %v239_v29  ;;  %v307_v63 = vld [vmem:[%s2586_s28 + $0x1f8] sm:$0xf]  ;;  %v309_v0 = vld [vmem:[%s2586_s28 + $0x200] sm:$0xf] }
  0x33   : > { %242 = vst [vmem:[%s2591_s29 + $0x78] sm:$0xf] %v241_v30  ;;  %v311_v1 = vld [vmem:[%s2586_s28 + $0x208] sm:$0xf]  ;;  %v313_v2 = vld [vmem:[%s2586_s28 + $0x210] sm:$0xf] }
  0x34   : > { %244 = vst [vmem:[%s2591_s29 + $0x7c] sm:$0xf] %v243_v31  ;;  %v315_v3 = vld [vmem:[%s2586_s28 + $0x218] sm:$0xf]  ;;  %v317_v4 = vld [vmem:[%s2586_s28 + $0x220] sm:$0xf] }
  0x35   : > { %246 = vst [vmem:[%s2591_s29 + $0x80] sm:$0xf] %v245_v32  ;;  %v319_v5 = vld [vmem:[%s2586_s28 + $0x228] sm:$0xf]  ;;  %v321_v6 = vld [vmem:[%s2586_s28 + $0x230] sm:$0xf] }
  0x36   : > { %248 = vst [vmem:[%s2591_s29 + $0x84] sm:$0xf] %v247_v33  ;;  %v323_v7 = vld [vmem:[%s2586_s28 + $0x238] sm:$0xf]  ;;  %v325_v8 = vld [vmem:[%s2586_s28 + $0x240] sm:$0xf] }
  0x37   : > { %250 = vst [vmem:[%s2591_s29 + $0x88] sm:$0xf] %v249_v34  ;;  %v327_v9 = vld [vmem:[%s2586_s28 + $0x248] sm:$0xf]  ;;  %v329_v10 = vld [vmem:[%s2586_s28 + $0x250] sm:$0xf] }
  0x38   : > { %252 = vst [vmem:[%s2591_s29 + $0x8c] sm:$0xf] %v251_v35  ;;  %v331_v11 = vld [vmem:[%s2586_s28 + $0x258] sm:$0xf]  ;;  %v333_v12 = vld [vmem:[%s2586_s28 + $0x260] sm:$0xf] }
  0x39   : > { %254 = vst [vmem:[%s2591_s29 + $0x90] sm:$0xf] %v253_v36  ;;  %v335_v13 = vld [vmem:[%s2586_s28 + $0x268] sm:$0xf]  ;;  %v337_v14 = vld [vmem:[%s2586_s28 + $0x270] sm:$0xf] }
  0x3a   : > { %256 = vst [vmem:[%s2591_s29 + $0x94] sm:$0xf] %v255_v37  ;;  %v339_v15 = vld [vmem:[%s2586_s28 + $0x278] sm:$0xf]  ;;  %v341_v16 = vld [vmem:[%s2586_s28 + $0x280] sm:$0xf] }
  0x3b   : > { %258 = vst [vmem:[%s2591_s29 + $0x98] sm:$0xf] %v257_v38  ;;  %v343_v17 = vld [vmem:[%s2586_s28 + $0x288] sm:$0xf]  ;;  %v345_v18 = vld [vmem:[%s2586_s28 + $0x290] sm:$0xf] }
  0x3c   : > { %260 = vst [vmem:[%s2591_s29 + $0x9c] sm:$0xf] %v259_v39  ;;  %v347_v19 = vld [vmem:[%s2586_s28 + $0x298] sm:$0xf]  ;;  %v349_v20 = vld [vmem:[%s2586_s28 + $0x2a0] sm:$0xf] }
  0x3d   : > { %262 = vst [vmem:[%s2591_s29 + $0xa0] sm:$0xf] %v261_v40  ;;  %v351_v21 = vld [vmem:[%s2586_s28 + $0x2a8] sm:$0xf]  ;;  %v353_v22 = vld [vmem:[%s2586_s28 + $0x2b0] sm:$0xf] }
  0x3e   : > { %264 = vst [vmem:[%s2591_s29 + $0xa4] sm:$0xf] %v263_v41  ;;  %v355_v23 = vld [vmem:[%s2586_s28 + $0x2b8] sm:$0xf]  ;;  %v357_v24 = vld [vmem:[%s2586_s28 + $0x2c0] sm:$0xf] }
  0x3f   : > { %266 = vst [vmem:[%s2591_s29 + $0xa8] sm:$0xf] %v265_v42  ;;  %v359_v25 = vld [vmem:[%s2586_s28 + $0x2c8] sm:$0xf]  ;;  %v361_v26 = vld [vmem:[%s2586_s28 + $0x2d0] sm:$0xf] }
  0x40   : > { %268 = vst [vmem:[%s2591_s29 + $0xac] sm:$0xf] %v267_v43  ;;  %v363_v27 = vld [vmem:[%s2586_s28 + $0x2d8] sm:$0xf]  ;;  %v365_v28 = vld [vmem:[%s2586_s28 + $0x2e0] sm:$0xf] }
  0x41   : > { %270 = vst [vmem:[%s2591_s29 + $0xb0] sm:$0xf] %v269_v44  ;;  %v367_v29 = vld [vmem:[%s2586_s28 + $0x2e8] sm:$0xf]  ;;  %v369_v30 = vld [vmem:[%s2586_s28 + $0x2f0] sm:$0xf] }
  0x42   : > { %272 = vst [vmem:[%s2591_s29 + $0xb4] sm:$0xf] %v271_v45  ;;  %v371_v31 = vld [vmem:[%s2586_s28 + $0x2f8] sm:$0xf]  ;;  %v373_v32 = vld [vmem:[%s2586_s28 + $0x300] sm:$0xf] }
  0x43   : > { %274 = vst [vmem:[%s2591_s29 + $0xb8] sm:$0xf] %v273_v46  ;;  %v375_v33 = vld [vmem:[%s2586_s28 + $0x308] sm:$0xf]  ;;  %v377_v34 = vld [vmem:[%s2586_s28 + $0x310] sm:$0xf] }
  0x44   : > { %276 = vst [vmem:[%s2591_s29 + $0xbc] sm:$0xf] %v275_v47  ;;  %v379_v35 = vld [vmem:[%s2586_s28 + $0x318] sm:$0xf]  ;;  %v381_v36 = vld [vmem:[%s2586_s28 + $0x320] sm:$0xf] }
  0x45   : > { %278 = vst [vmem:[%s2591_s29 + $0xc0] sm:$0xf] %v277_v48  ;;  %v383_v37 = vld [vmem:[%s2586_s28 + $0x328] sm:$0xf]  ;;  %v385_v38 = vld [vmem:[%s2586_s28 + $0x330] sm:$0xf] }
  0x46   : > { %280 = vst [vmem:[%s2591_s29 + $0xc4] sm:$0xf] %v279_v49  ;;  %v387_v39 = vld [vmem:[%s2586_s28 + $0x338] sm:$0xf]  ;;  %v389_v40 = vld [vmem:[%s2586_s28 + $0x340] sm:$0xf] }
  0x47   : > { %282 = vst [vmem:[%s2591_s29 + $0xc8] sm:$0xf] %v281_v50  ;;  %v391_v41 = vld [vmem:[%s2586_s28 + $0x348] sm:$0xf]  ;;  %v393_v42 = vld [vmem:[%s2586_s28 + $0x350] sm:$0xf] }
  0x48   : > { %284 = vst [vmem:[%s2591_s29 + $0xcc] sm:$0xf] %v283_v51  ;;  %v395_v43 = vld [vmem:[%s2586_s28 + $0x358] sm:$0xf]  ;;  %v397_v44 = vld [vmem:[%s2586_s28 + $0x360] sm:$0xf] }
  0x49   : > { %286 = vst [vmem:[%s2591_s29 + $0xd0] sm:$0xf] %v285_v52  ;;  %v399_v45 = vld [vmem:[%s2586_s28 + $0x368] sm:$0xf]  ;;  %v401_v46 = vld [vmem:[%s2586_s28 + $0x370] sm:$0xf] }
  0x4a   : > { %288 = vst [vmem:[%s2591_s29 + $0xd4] sm:$0xf] %v287_v53  ;;  %v403_v47 = vld [vmem:[%s2586_s28 + $0x378] sm:$0xf]  ;;  %v405_v48 = vld [vmem:[%s2586_s28 + $0x380] sm:$0xf] }
  0x4b   : > { %290 = vst [vmem:[%s2591_s29 + $0xd8] sm:$0xf] %v289_v54  ;;  %v407_v49 = vld [vmem:[%s2586_s28 + $0x388] sm:$0xf]  ;;  %v409_v50 = vld [vmem:[%s2586_s28 + $0x390] sm:$0xf] }
  0x4c   : > { %292 = vst [vmem:[%s2591_s29 + $0xdc] sm:$0xf] %v291_v55  ;;  %v411_v51 = vld [vmem:[%s2586_s28 + $0x398] sm:$0xf]  ;;  %v413_v52 = vld [vmem:[%s2586_s28 + $0x3a0] sm:$0xf] }
  0x4d   : > { %294 = vst [vmem:[%s2591_s29 + $0xe0] sm:$0xf] %v293_v56  ;;  %v415_v53 = vld [vmem:[%s2586_s28 + $0x3a8] sm:$0xf]  ;;  %v417_v54 = vld [vmem:[%s2586_s28 + $0x3b0] sm:$0xf] }
  0x4e   : > { %296 = vst [vmem:[%s2591_s29 + $0xe4] sm:$0xf] %v295_v57  ;;  %v419_v55 = vld [vmem:[%s2586_s28 + $0x3b8] sm:$0xf]  ;;  %v421_v56 = vld [vmem:[%s2586_s28 + $0x3c0] sm:$0xf] }
  0x4f   : > { %298 = vst [vmem:[%s2591_s29 + $0xe8] sm:$0xf] %v297_v58  ;;  %v423_v57 = vld [vmem:[%s2586_s28 + $0x3c8] sm:$0xf]  ;;  %v425_v58 = vld [vmem:[%s2586_s28 + $0x3d0] sm:$0xf] }
  0x50   : > { %300 = vst [vmem:[%s2591_s29 + $0xec] sm:$0xf] %v299_v59  ;;  %v427_v59 = vld [vmem:[%s2586_s28 + $0x3d8] sm:$0xf] }
  0x51   : > { %302 = vst [vmem:[%s2591_s29 + $0xf0] sm:$0xf] %v301_v60  ;;  %v429_v60 = vld [vmem:[%s2586_s28 + $0x3e0] sm:$0xf] }
  0x52   : > { %304 = vst [vmem:[%s2591_s29 + $0xf4] sm:$0xf] %v303_v61  ;;  %v431_v61 = vld [vmem:[%s2586_s28 + $0x3e8] sm:$0xf] }
  0x53   : > { %306 = vst [vmem:[%s2591_s29 + $0xf8] sm:$0xf] %v305_v62  ;;  %v433_v62 = vld [vmem:[%s2586_s28 + $0x3f0] sm:$0xf] }
  0x54   : > { %308 = vst [vmem:[%s2591_s29 + $0xfc] sm:$0xf] %v307_v63  ;;  %v435_v63 = vld [vmem:[%s2586_s28 + $0x3f8] sm:$0xf] }
  0x55   : > { %310 = vst [vmem:[%s2591_s29 + $0x100] sm:$0xf] %v309_v0  ;;  %v437_v0 = vld [vmem:[%s2586_s28 + $0x400] sm:$0xf] }
  0x56   : > { %312 = vst [vmem:[%s2591_s29 + $0x104] sm:$0xf] %v311_v1  ;;  %v439_v1 = vld [vmem:[%s2586_s28 + $0x408] sm:$0xf] }
  0x57   : > { %314 = vst [vmem:[%s2591_s29 + $0x108] sm:$0xf] %v313_v2  ;;  %v441_v2 = vld [vmem:[%s2586_s28 + $0x410] sm:$0xf] }
  0x58   : > { %316 = vst [vmem:[%s2591_s29 + $0x10c] sm:$0xf] %v315_v3  ;;  %v443_v3 = vld [vmem:[%s2586_s28 + $0x418] sm:$0xf] }
  0x59   : > { %318 = vst [vmem:[%s2591_s29 + $0x110] sm:$0xf] %v317_v4  ;;  %v445_v4 = vld [vmem:[%s2586_s28 + $0x420] sm:$0xf] }
  0x5a   : > { %320 = vst [vmem:[%s2591_s29 + $0x114] sm:$0xf] %v319_v5  ;;  %v447_v5 = vld [vmem:[%s2586_s28 + $0x428] sm:$0xf] }
  0x5b   : > { %322 = vst [vmem:[%s2591_s29 + $0x118] sm:$0xf] %v321_v6  ;;  %v449_v6 = vld [vmem:[%s2586_s28 + $0x430] sm:$0xf] }
  0x5c   : > { %324 = vst [vmem:[%s2591_s29 + $0x11c] sm:$0xf] %v323_v7  ;;  %v451_v7 = vld [vmem:[%s2586_s28 + $0x438] sm:$0xf] }
  0x5d   : > { %326 = vst [vmem:[%s2591_s29 + $0x120] sm:$0xf] %v325_v8  ;;  %v453_v8 = vld [vmem:[%s2586_s28 + $0x440] sm:$0xf] }
  0x5e   : > { %328 = vst [vmem:[%s2591_s29 + $0x124] sm:$0xf] %v327_v9  ;;  %v455_v9 = vld [vmem:[%s2586_s28 + $0x448] sm:$0xf] }
  0x5f   : > { %330 = vst [vmem:[%s2591_s29 + $0x128] sm:$0xf] %v329_v10  ;;  %v457_v10 = vld [vmem:[%s2586_s28 + $0x450] sm:$0xf] }
  0x60   : > { %332 = vst [vmem:[%s2591_s29 + $0x12c] sm:$0xf] %v331_v11  ;;  %v459_v11 = vld [vmem:[%s2586_s28 + $0x458] sm:$0xf] }
  0x61   : > { %334 = vst [vmem:[%s2591_s29 + $0x130] sm:$0xf] %v333_v12  ;;  %v461_v12 = vld [vmem:[%s2586_s28 + $0x460] sm:$0xf] }
  0x62   : > { %336 = vst [vmem:[%s2591_s29 + $0x134] sm:$0xf] %v335_v13  ;;  %v463_v13 = vld [vmem:[%s2586_s28 + $0x468] sm:$0xf] }
  0x63   : > { %338 = vst [vmem:[%s2591_s29 + $0x138] sm:$0xf] %v337_v14  ;;  %v465_v14 = vld [vmem:[%s2586_s28 + $0x470] sm:$0xf] }
  0x64   : > { %340 = vst [vmem:[%s2591_s29 + $0x13c] sm:$0xf] %v339_v15  ;;  %v467_v15 = vld [vmem:[%s2586_s28 + $0x478] sm:$0xf] }
  0x65   : > { %342 = vst [vmem:[%s2591_s29 + $0x140] sm:$0xf] %v341_v16  ;;  %v469_v16 = vld [vmem:[%s2586_s28 + $0x480] sm:$0xf] }
  0x66   : > { %344 = vst [vmem:[%s2591_s29 + $0x144] sm:$0xf] %v343_v17  ;;  %v471_v17 = vld [vmem:[%s2586_s28 + $0x488] sm:$0xf] }
  0x67   : > { %346 = vst [vmem:[%s2591_s29 + $0x148] sm:$0xf] %v345_v18  ;;  %v473_v18 = vld [vmem:[%s2586_s28 + $0x490] sm:$0xf] }
  0x68   : > { %348 = vst [vmem:[%s2591_s29 + $0x14c] sm:$0xf] %v347_v19  ;;  %v475_v19 = vld [vmem:[%s2586_s28 + $0x498] sm:$0xf] }
  0x69   : > { %350 = vst [vmem:[%s2591_s29 + $0x150] sm:$0xf] %v349_v20 }
  0x6a   : > { %352 = vst [vmem:[%s2591_s29 + $0x154] sm:$0xf] %v351_v21 }
  0x6b   : > { %354 = vst [vmem:[%s2591_s29 + $0x158] sm:$0xf] %v353_v22 }
  0x6c   : > { %356 = vst [vmem:[%s2591_s29 + $0x15c] sm:$0xf] %v355_v23 }
  0x6d   : > { %358 = vst [vmem:[%s2591_s29 + $0x160] sm:$0xf] %v357_v24 }
  0x6e   : > { %360 = vst [vmem:[%s2591_s29 + $0x164] sm:$0xf] %v359_v25 }
  0x6f   : > { %362 = vst [vmem:[%s2591_s29 + $0x168] sm:$0xf] %v361_v26 }
  0x70   : > { %364 = vst [vmem:[%s2591_s29 + $0x16c] sm:$0xf] %v363_v27 }
  0x71   : > { %366 = vst [vmem:[%s2591_s29 + $0x170] sm:$0xf] %v365_v28 }
  0x72   : > { %368 = vst [vmem:[%s2591_s29 + $0x174] sm:$0xf] %v367_v29 }
  0x73   : > { %370 = vst [vmem:[%s2591_s29 + $0x178] sm:$0xf] %v369_v30 }
  0x74   : > { %372 = vst [vmem:[%s2591_s29 + $0x17c] sm:$0xf] %v371_v31 }
  0x75   : > { %374 = vst [vmem:[%s2591_s29 + $0x180] sm:$0xf] %v373_v32 }
  0x76   : > { %376 = vst [vmem:[%s2591_s29 + $0x184] sm:$0xf] %v375_v33 }
  0x77   : > { %378 = vst [vmem:[%s2591_s29 + $0x188] sm:$0xf] %v377_v34 }
  0x78   : > { %380 = vst [vmem:[%s2591_s29 + $0x18c] sm:$0xf] %v379_v35 }
  0x79   : > { %382 = vst [vmem:[%s2591_s29 + $0x190] sm:$0xf] %v381_v36 }
  0x7a   : > { %384 = vst [vmem:[%s2591_s29 + $0x194] sm:$0xf] %v383_v37 }
  0x7b   : > { %386 = vst [vmem:[%s2591_s29 + $0x198] sm:$0xf] %v385_v38 }
  0x7c   : > { %388 = vst [vmem:[%s2591_s29 + $0x19c] sm:$0xf] %v387_v39 }
  0x7d   : > { %390 = vst [vmem:[%s2591_s29 + $0x1a0] sm:$0xf] %v389_v40 }
  0x7e   : > { %392 = vst [vmem:[%s2591_s29 + $0x1a4] sm:$0xf] %v391_v41 }
  0x7f   : > { %394 = vst [vmem:[%s2591_s29 + $0x1a8] sm:$0xf] %v393_v42 }
  0x80   : > { %396 = vst [vmem:[%s2591_s29 + $0x1ac] sm:$0xf] %v395_v43 }
  0x81   : > { %398 = vst [vmem:[%s2591_s29 + $0x1b0] sm:$0xf] %v397_v44 }
  0x82   : > { %400 = vst [vmem:[%s2591_s29 + $0x1b4] sm:$0xf] %v399_v45 }
  0x83   : > { %402 = vst [vmem:[%s2591_s29 + $0x1b8] sm:$0xf] %v401_v46 }
  0x84   : > { %404 = vst [vmem:[%s2591_s29 + $0x1bc] sm:$0xf] %v403_v47 }
  0x85   : > { %406 = vst [vmem:[%s2591_s29 + $0x1c0] sm:$0xf] %v405_v48 }
  0x86   : > { %408 = vst [vmem:[%s2591_s29 + $0x1c4] sm:$0xf] %v407_v49 }
  0x87   : > { %410 = vst [vmem:[%s2591_s29 + $0x1c8] sm:$0xf] %v409_v50 }
  0x88   : > { %412 = vst [vmem:[%s2591_s29 + $0x1cc] sm:$0xf] %v411_v51 }
  0x89   : > { %414 = vst [vmem:[%s2591_s29 + $0x1d0] sm:$0xf] %v413_v52 }
  0x8a   : > { %416 = vst [vmem:[%s2591_s29 + $0x1d4] sm:$0xf] %v415_v53 }
  0x8b   : > { %418 = vst [vmem:[%s2591_s29 + $0x1d8] sm:$0xf] %v417_v54 }
  0x8c   : > { %420 = vst [vmem:[%s2591_s29 + $0x1dc] sm:$0xf] %v419_v55 }
  0x8d   : > { %422 = vst [vmem:[%s2591_s29 + $0x1e0] sm:$0xf] %v421_v56 }
  0x8e   : > { %424 = vst [vmem:[%s2591_s29 + $0x1e4] sm:$0xf] %v423_v57 }
  0x8f   : > { %426 = vst [vmem:[%s2591_s29 + $0x1e8] sm:$0xf] %v425_v58 }
  0x90   : > { %428 = vst [vmem:[%s2591_s29 + $0x1ec] sm:$0xf] %v427_v59 }
  0x91   : > { %430 = vst [vmem:[%s2591_s29 + $0x1f0] sm:$0xf] %v429_v60 }
  0x92   : > { %432 = vst [vmem:[%s2591_s29 + $0x1f4] sm:$0xf] %v431_v61 }
  0x93   : > { %434 = vst [vmem:[%s2591_s29 + $0x1f8] sm:$0xf] %v433_v62 }
  0x94   : > { %436 = vst [vmem:[%s2591_s29 + $0x1fc] sm:$0xf] %v435_v63 }
  0x95   : > { %438 = vst [vmem:[%s2591_s29 + $0x200] sm:$0xf] %v437_v0 }
  0x96   : > { %440 = vst [vmem:[%s2591_s29 + $0x204] sm:$0xf] %v439_v1 }
  0x97   : > { %442 = vst [vmem:[%s2591_s29 + $0x208] sm:$0xf] %v441_v2 }
  0x98   : > { %444 = vst [vmem:[%s2591_s29 + $0x20c] sm:$0xf] %v443_v3 }
  0x99   : > { %446 = vst [vmem:[%s2591_s29 + $0x210] sm:$0xf] %v445_v4 }
  0x9a   : > { %448 = vst [vmem:[%s2591_s29 + $0x214] sm:$0xf] %v447_v5 }
  0x9b   : > { %450 = vst [vmem:[%s2591_s29 + $0x218] sm:$0xf] %v449_v6 }
  0x9c   : > { %452 = vst [vmem:[%s2591_s29 + $0x21c] sm:$0xf] %v451_v7 }
  0x9d   : > { %454 = vst [vmem:[%s2591_s29 + $0x220] sm:$0xf] %v453_v8 }
  0x9e   : > { %456 = vst [vmem:[%s2591_s29 + $0x224] sm:$0xf] %v455_v9 }
  0x9f   : > { %458 = vst [vmem:[%s2591_s29 + $0x228] sm:$0xf] %v457_v10 }
  0xa0   : > { %460 = vst [vmem:[%s2591_s29 + $0x22c] sm:$0xf] %v459_v11 }
  0xa1   : > { %462 = vst [vmem:[%s2591_s29 + $0x230] sm:$0xf] %v461_v12 }
  0xa2   : > { %464 = vst [vmem:[%s2591_s29 + $0x234] sm:$0xf] %v463_v13 }
  0xa3   : > { %466 = vst [vmem:[%s2591_s29 + $0x238] sm:$0xf] %v465_v14 }
  0xa4   : > { %468 = vst [vmem:[%s2591_s29 + $0x23c] sm:$0xf] %v467_v15 }
  0xa5   : > { %470 = vst [vmem:[%s2591_s29 + $0x240] sm:$0xf] %v469_v16 }
  0xa6   : > { %472 = vst [vmem:[%s2591_s29 + $0x244] sm:$0xf] %v471_v17 }
  0xa7   : > { %474 = vst [vmem:[%s2591_s29 + $0x248] sm:$0xf] %v473_v18 }
  0xa8   : > { %476 = vst [vmem:[%s2591_s29 + $0x24c] sm:$0xf] %v475_v19 }
  0xa9 PF: > { %p1936_p8 = scmp.ge.s32.totalorder %s2516_s16, 1  ;;  %p801_p9 = scmp.lt.s32.totalorder %s2516_s16, 3 }
  0xab   : > { %p802_p10 = pnand %p1936_p8, %p801_p9 }
  0xac   : > { %s808_s30 = sand.u32 (!%p802_p10), 1, %s2500_s12   ;;  %p846_p11 = scmp.lt.s32.totalorder (!%p802_p10), %s2508_s14, 1 }
  0xad   : > { %805 = sbr.rel (%p802_p10) target bundleno = 434 (0x1b2), region = 69 }
  0xae   : > { %s2436_s4 = smul.u32 (!%p802_p10), 592, %s808_s30 }
  0xb0   : > { %s2891_s5 = scalar_lea.vmem (!%p802_p10), [#allocation2], %s2436_s4 }
  0xb2   : > { %v2347_v20 = vld [vmem:[%s2891_s5 + $0x38] sm:$0xff]  ;;  %v2346_v24 = vld [vmem:[%s2891_s5 + $0x30] sm:$0xff]  ;;  %v2345_v28 = vld [vmem:[%s2891_s5 + $0x28] sm:$0xff]  ;;  %s2917_s6 = scalar_select %p846_p11, %s2508_s14, 1  ;;  %vm1565_vm0 = vcmask 261120  }
  0xb3   : > { %v2355_v21 = vld [vmem:[%s2891_s5 + $0x78] sm:$0xff]  ;;  %1572 = vmatpush.bf16.msra.mxu0 %v2347_v20  ;;  %v2354_v25 = vld [vmem:[%s2891_s5 + $0x70] sm:$0xff]  ;;  %v2353_v29 = vld [vmem:[%s2891_s5 + $0x68] sm:$0xff]  ;;  %s2317_s12 = sshll.u32 (%p2573_p6), %s2508_s14, 2 }
  0xb4   : > { %v2363_v22 = vld [vmem:[%s2891_s5 + $0xb8] sm:$0xff]  ;;  %1591 = vmatpush.bf16.msra.mxu1 %v2355_v21  ;;  %v2362_v26 = vld [vmem:[%s2891_s5 + $0xb0] sm:$0xff]  ;;  %v2361_v30 = vld [vmem:[%s2891_s5 + $0xa8] sm:$0xff]  ;;  %s848_s9 = scalar_lea.vmem %s3125_s2, %s2917_s6  ;;  %s1937_s6 = sshll.u32 %s808_s30, 4 }
  0xb5   : > { %v2371_v23 = vld [vmem:[%s2891_s5 + $0xf8] sm:$0xff]  ;;  %1610 = vmatpush.bf16.msra.mxu2 %v2363_v22  ;;  %v2370_v27 = vld [vmem:[%s2891_s5 + $0xf0] sm:$0xff]  ;;  %v2369_v31 = vld [vmem:[%s2891_s5 + $0xe8] sm:$0xff]  ;;  %s1785_s25 = scalar_lea.vmem (%p2573_p6), %s3126_s3, %s2317_s12 }
  0xb6   : > { %1629 = vmatpush.bf16.msra.mxu3 %v2371_v23  ;;  %v2344_v32 = vld [vmem:[%s2891_s5 + $0x20] sm:$0xff]  ;;  %v2343_v36 = vld [vmem:[%s2891_s5 + $0x18] sm:$0xff]  ;;  %v2342_v40 = vld [vmem:[%s2891_s5 + $0x10] sm:$0xff] }
  0xb7   : > { %1573 = vmatpush.bf16.msra.mxu0 %v2346_v24  ;;  %v2352_v33 = vld [vmem:[%s2891_s5 + $0x60] sm:$0xff]  ;;  %v2351_v37 = vld [vmem:[%s2891_s5 + $0x58] sm:$0xff]  ;;  %v2350_v41 = vld [vmem:[%s2891_s5 + $0x50] sm:$0xff] }
  0xb8   : > { %1592 = vmatpush.bf16.msra.mxu1 %v2354_v25  ;;  %v2360_v34 = vld [vmem:[%s2891_s5 + $0xa0] sm:$0xff]  ;;  %v2359_v38 = vld [vmem:[%s2891_s5 + $0x98] sm:$0xff]  ;;  %v2358_v42 = vld [vmem:[%s2891_s5 + $0x90] sm:$0xff] }
  0xb9   : > { %1611 = vmatpush.bf16.msra.mxu2 %v2362_v26  ;;  %v2368_v35 = vld [vmem:[%s2891_s5 + $0xe0] sm:$0xff]  ;;  %v2367_v39 = vld [vmem:[%s2891_s5 + $0xd8] sm:$0xff]  ;;  %v2366_v43 = vld [vmem:[%s2891_s5 + $0xd0] sm:$0xff] }
  0xba   : > { %1630 = vmatpush.bf16.msra.mxu3 %v2370_v27  ;;  %v2341_v44 = vld [vmem:[%s2891_s5 + $0x8] sm:$0xff]  ;;  %v2340_v48 = vld [vmem:[%s2891_s5] sm:$0xff]  ;;  %v2395_v60 = vld [vmem:[%s2891_s5 + $0x1b8] sm:$0xff] }
  0xbb   : > { %1574 = vmatpush.bf16.msra.mxu0 %v2345_v28  ;;  %v2349_v45 = vld [vmem:[%s2891_s5 + $0x48] sm:$0xff]  ;;  %v1940_v49 = vld [vmem:[%s3123_s0] sm:$0xf]  ;;  %v2320_v54 = vld [vmem:[%s3123_s0 + $0x4] sm:$0xf] }
  0xbc   : > { %1593 = vmatpush.bf16.msra.mxu1 %v2353_v29  ;;  %v2357_v46 = vld [vmem:[%s2891_s5 + $0x88] sm:$0xff]  ;;  %v2348_v51 = vld [vmem:[%s2891_s5 + $0x40] sm:$0xff]  ;;  %v2379_v61 = vld [vmem:[%s2891_s5 + $0x138] sm:$0xff] }
  0xbd   : > { %1612 = vmatpush.bf16.msra.mxu2 %v2361_v30  ;;  %v2365_v47 = vld [vmem:[%s2891_s5 + $0xc8] sm:$0xff]  ;;  %v2356_v52 = vld [vmem:[%s2891_s5 + $0x80] sm:$0xff]  ;;  %v2387_v2 = vld [vmem:[%s2891_s5 + $0x178] sm:$0xff] }
  0xbe   : > { %1631 = vmatpush.bf16.msra.mxu3 %v2369_v31  ;;  %v2325_v50 = vld [vmem:[%s3123_s0 + $0x24] sm:$0xf0]  ;;  %v2364_v53 = vld [vmem:[%s2891_s5 + $0xc0] sm:$0xff]  ;;  %v1942_v55 = vld [vmem:[%s3123_s0 + $0x28] sm:$0xf0] }
  0xbf   : > { %1575 = vmatpush.bf16.msra.mxu0 %v2344_v32  ;;  %v1948_v56 = vld [vmem:[%s3123_s0 + $0x8] sm:$0xf]  ;;  %v2326_v57 = vld [vmem:[%s3123_s0 + $0x2c] sm:$0xf0]  ;;  %v2321_v58 = vld [vmem:[%s3123_s0 + $0xc] sm:$0xf]  ;;  %v1941_v62 = vor.u32 %v2325_v50, %v1940_v49  ;;  %v1945_v63 = vor.u32 %v2320_v54, %v1942_v55 }
  0xc0   : > { %1594 = vmatpush.bf16.msra.mxu1 %v2352_v33  ;;  %v1950_v59 = vld [vmem:[%s3123_s0 + $0x30] sm:$0xf0]  ;;  %v1949_v0 = vor.u32 %v2326_v57, %v1948_v56  ;;  %v2403_v3 = vld [vmem:[%s2891_s5 + $0x1f8] sm:$0xff]  ;;  %v2393_v8 = vld [vmem:[%s2891_s5 + $0x1a8] sm:$0xff] }
  0xc1   : > { %1613 = vmatpush.bf16.msra.mxu2 %v2360_v34  ;;  %v1953_v1 = vor.u32 %v2321_v58, %v1950_v59  ;;  %v2394_v4 = vld [vmem:[%s2891_s5 + $0x1b0] sm:$0xff]  ;;  %v2377_v9 = vld [vmem:[%s2891_s5 + $0x128] sm:$0xff]  ;;  %v2392_v12 = vld [vmem:[%s2891_s5 + $0x1a0] sm:$0xff] }
  0xc2   : > { %1632 = vmatpush.bf16.msra.mxu3 %v2368_v35  ;;  %v2378_v5 = vld [vmem:[%s2891_s5 + $0x130] sm:$0xff]  ;;  %v2385_v10 = vld [vmem:[%s2891_s5 + $0x168] sm:$0xff]  ;;  %v2376_v13 = vld [vmem:[%s2891_s5 + $0x120] sm:$0xff] }
  0xc3   : > { %1576 = vmatpush.bf16.msra.mxu0 %v2343_v36  ;;  %v2386_v6 = vld [vmem:[%s2891_s5 + $0x170] sm:$0xff]  ;;  %v2401_v11 = vld [vmem:[%s2891_s5 + $0x1e8] sm:$0xff]  ;;  %v2384_v14 = vld [vmem:[%s2891_s5 + $0x160] sm:$0xff] }
  0xc4   : > { %1595 = vmatpush.bf16.msra.mxu1 %v2351_v37  ;;  %v2402_v7 = vld [vmem:[%s2891_s5 + $0x1f0] sm:$0xff]  ;;  %v2400_v15 = vld [vmem:[%s2891_s5 + $0x1e0] sm:$0xff]  ;;  %v2335_v17 = vld [vmem:[%s3123_s0 + $0x74] sm:$0xf0] }
  0xc5   : > { %1614 = vmatpush.bf16.msra.mxu2 %v2359_v38  ;;  %v1980_v16 = vld [vmem:[%s3123_s0 + $0x50] sm:$0xf]  ;;  %v2330_v18 = vld [vmem:[%s3123_s0 + $0x54] sm:$0xf]  ;;  %v1982_v19 = vld [vmem:[%s3123_s0 + $0x78] sm:$0xf0] }
  0xc6   : > { %1633 = vmatpush.bf16.msra.mxu3 %v2367_v39  ;;  %v1988_v20 = vld [vmem:[%s3123_s0 + $0x58] sm:$0xf]  ;;  %v2336_v21 = vld [vmem:[%s3123_s0 + $0x7c] sm:$0xf0]  ;;  %v2331_v22 = vld [vmem:[%s3123_s0 + $0x5c] sm:$0xf]  ;;  %v1981_v26 = vor.u32 %v2335_v17, %v1980_v16  ;;  %v1985_v27 = vor.u32 %v2330_v18, %v1982_v19 }
  0xc7   : > { %1577 = vmatpush.bf16.msra.mxu0 %v2342_v40  ;;  %v1990_v23 = vld [vmem:[%s3123_s0 + $0x80] sm:$0xf0]  ;;  %v2391_v24 = vld [vmem:[%s2891_s5 + $0x198] sm:$0xff]  ;;  %v1989_v28 = vor.u32 %v2336_v21, %v1988_v20  ;;  %v2389_v36 = vld [vmem:[%s2891_s5 + $0x188] sm:$0xff] }
  0xc8   : > { %1596 = vmatpush.bf16.msra.mxu1 %v2350_v41  ;;  %v2375_v25 = vld [vmem:[%s2891_s5 + $0x118] sm:$0xff]  ;;  %v1993_v29 = vor.u32 %v2331_v22, %v1990_v23  ;;  %v2390_v32 = vld [vmem:[%s2891_s5 + $0x190] sm:$0xff]  ;;  %v2373_v37 = vld [vmem:[%s2891_s5 + $0x108] sm:$0xff] }
  0xc9   : > { %1615 = vmatpush.bf16.msra.mxu2 %v2358_v42  ;;  %v2383_v30 = vld [vmem:[%s2891_s5 + $0x158] sm:$0xff]  ;;  %v2374_v33 = vld [vmem:[%s2891_s5 + $0x110] sm:$0xff]  ;;  %v2381_v38 = vld [vmem:[%s2891_s5 + $0x148] sm:$0xff] }
  0xca   : > { %1634 = vmatpush.bf16.msra.mxu3 %v2366_v43  ;;  %v2399_v31 = vld [vmem:[%s2891_s5 + $0x1d8] sm:$0xff]  ;;  %v2382_v34 = vld [vmem:[%s2891_s5 + $0x150] sm:$0xff]  ;;  %v2397_v39 = vld [vmem:[%s2891_s5 + $0x1c8] sm:$0xff] }
  0xcb   : > { %1578 = vmatpush.bf16.msra.mxu0 %v2341_v44  ;;  %v2398_v35 = vld [vmem:[%s2891_s5 + $0x1d0] sm:$0xff]  ;;  %v2388_v40 = vld [vmem:[%s2891_s5 + $0x180] sm:$0xff]  ;;  %v2411_v44 = vld [vmem:[%s2891_s5 + $0x238] sm:$0xff] }
  0xcc   : > { %1597 = vmatpush.bf16.msra.mxu1 %v2349_v45  ;;  %v2372_v41 = vld [vmem:[%s2891_s5 + $0x100] sm:$0xff]  ;;  %v1964_v49 = vld [vmem:[%s3123_s0 + $0x18] sm:$0xf]  ;;  %v2410_v55 = vld [vmem:[%s2891_s5 + $0x230] sm:$0xff] }
  0xcd   : > { %1616 = vmatpush.bf16.msra.mxu2 %v2357_v46  ;;  %v2380_v42 = vld [vmem:[%s2891_s5 + $0x140] sm:$0xff]  ;;  %v2327_v46 = vld [vmem:[%s3123_s0 + $0x34] sm:$0xf0]  ;;  %v1974_v19 = vld [vmem:[%s3123_s0 + $0x48] sm:$0xf0] }
  0xce   : > { %1635 = vmatpush.bf16.msra.mxu3 %v2365_v47  ;;  %v2396_v43 = vld [vmem:[%s2891_s5 + $0x1c0] sm:$0xff]  ;;  %v2339_v17 = vld [vmem:[%s3123_s0 + $0x94] sm:$0xf0]  ;;  %v2014_v21 = vld [vmem:[%s3123_s0 + $0x98] sm:$0xf0] }
  0xcf   : > { %1579 = vmatpush.bf16.msra.mxu0 %v2340_v48  ;;  %v1956_v45 = vld [vmem:[%s3123_s0 + $0x10] sm:$0xf]  ;;  %v2322_v47 = vld [vmem:[%s3123_s0 + $0x14] sm:$0xf]  ;;  %v1958_v48 = vld [vmem:[%s3123_s0 + $0x38] sm:$0xf0] }
  0xd0   : > { %1598 = vmatpush.bf16.msra.mxu1 %v2348_v51  ;;  %v2328_v50 = vld [vmem:[%s3123_s0 + $0x3c] sm:$0xf0]  ;;  %v2323_v51 = vld [vmem:[%s3123_s0 + $0x1c] sm:$0xf]  ;;  %v1957_v54 = vor.u32 %v2327_v46, %v1956_v45  ;;  %v1961_v56 = vor.u32 %v2322_v47, %v1958_v48  ;;  %v2012_v16 = vld [vmem:[%s3123_s0 + $0x70] sm:$0xf] }
  0xd1   : > { %1617 = vmatpush.bf16.msra.mxu2 %v2356_v52  ;;  %v1966_v52 = vld [vmem:[%s3123_s0 + $0x40] sm:$0xf0]  ;;  %v1965_v57 = vor.u32 %v2328_v50, %v1964_v49  ;;  %v2334_v20 = vld [vmem:[%s3123_s0 + $0x74] sm:$0xf]  ;;  %v2013_v23 = vor.u32 %v2339_v17, %v2012_v16 }
  0xd2   : > { %1636 = vmatpush.bf16.msra.mxu3 %v2364_v53  ;;  %1580 = vmatmul.bf16.vlgmr.msra.gmra.mxu0 %v1941_v62  ;;  %v2413_v53 = vld [vmem:[%s2891_s5 + $0x248] sm:$0xff]  ;;  %v1969_v58 = vor.u32 %v2323_v51, %v1966_v52  ;;  %v2412_v59 = vld [vmem:[%s2891_s5 + $0x240] sm:$0xff]  ;;  %v2407_v62 = vld [vmem:[%s2891_s5 + $0x218] sm:$0xff] }
  0xd3   : > { %1648 = vmatpush.bf16.msrb.mxu0 %v2379_v61  ;;  %1599 = vmatmul.bf16.vlgmr.msra.gmra.mxu1 %v1945_v63  ;;  %v2408_v61 = vld [vmem:[%s2891_s5 + $0x220] sm:$0xff] }
  0xd4   : > { %1618 = vmatmul.bf16.vlgmr.msra.gmra.mxu2 %v1949_v0  ;;  %1667 = vmatpush.bf16.msrb.mxu1 %v2387_v2  ;;  %v1996_v63 = vld [vmem:[%s3123_s0 + $0x60] sm:$0xf]  ;;  %v2337_v0 = vld [vmem:[%s3123_s0 + $0x84] sm:$0xf0]  ;;  %v1998_v2 = vld [vmem:[%s3123_s0 + $0x88] sm:$0xf0] }
  0xd5   : > { %1686 = vmatpush.bf16.msrb.mxu2 %v2395_v60  ;;  %1637 = vmatmul.bf16.vlgmr.msra.gmra.mxu3 %v1953_v1  ;;  %v2409_v60 = vld [vmem:[%s2891_s5 + $0x228] sm:$0xff]  ;;  %v2332_v1 = vld [vmem:[%s3123_s0 + $0x64] sm:$0xf] }
  0xd6   : > { %1705 = vmatpush.bf16.msrb.mxu3 %v2403_v3  ;;  %v2004_v3 = vld [vmem:[%s3123_s0 + $0x68] sm:$0xf]  ;;  %v2324_v18 = vld [vmem:[%s3123_s0 + $0x24] sm:$0xf] }
  0xd7   : > { %1649 = vmatpush.bf16.msrb.mxu0 %v2378_v5  ;;  %v2333_v5 = vld [vmem:[%s3123_s0 + $0x6c] sm:$0xf] }
  0xd8   : > { %1668 = vmatpush.bf16.msrb.mxu1 %v2386_v6  ;;  %v2006_v6 = vld [vmem:[%s3123_s0 + $0x90] sm:$0xf0] }
  0xd9   : > { %1687 = vmatpush.bf16.msrb.mxu2 %v2394_v4  ;;  %v2338_v4 = vld [vmem:[%s3123_s0 + $0x8c] sm:$0xf0] }
  0xda   : > { %1706 = vmatpush.bf16.msrb.mxu3 %v2402_v7  ;;  %v1997_v7 = vor.u32 %v2337_v0, %v1996_v63 }
  0xdb   : > { %1650 = vmatpush.bf16.msrb.mxu0 %v2377_v9  ;;  %v2001_v9 = vor.u32 %v2332_v1, %v1998_v2 }
  0xdc   : > { %1669 = vmatpush.bf16.msrb.mxu1 %v2385_v10  ;;  %v2005_v10 = vor.u32 %v2338_v4, %v2004_v3 }
  0xdd   : > { %1688 = vmatpush.bf16.msrb.mxu2 %v2393_v8  ;;  %v2406_v8 = vld [vmem:[%s2891_s5 + $0x210] sm:$0xff] }
  0xde   : > { %1707 = vmatpush.bf16.msrb.mxu3 %v2401_v11  ;;  %v2009_v11 = vor.u32 %v2333_v5, %v2006_v6 }
  0xdf   : > { %1651 = vmatpush.bf16.msrb.mxu0 %v2376_v13  ;;  %v2404_v13 = vld [vmem:[%s2891_s5 + $0x200] sm:$0xff] }
  0xe0   : > { %1670 = vmatpush.bf16.msrb.mxu1 %v2384_v14  ;;  %v1972_v14 = vld [vmem:[%s3123_s0 + $0x20] sm:$0xf] }
  0xe1   : > { %1689 = vmatpush.bf16.msrb.mxu2 %v2392_v12  ;;  %v2405_v12 = vld [vmem:[%s2891_s5 + $0x208] sm:$0xff] }
  0xe2   : > { %1708 = vmatpush.bf16.msrb.mxu3 %v2400_v15  ;;  %1585 = vmatmul.bf16.gmra.mxu0 %v1981_v26  ;;  %v2329_v15 = vld [vmem:[%s3123_s0 + $0x44] sm:$0xf0] }
  0xe3   : > { %1652 = vmatpush.bf16.msrb.mxu0 %v2375_v25  ;;  %1604 = vmatmul.bf16.gmra.mxu1 %v1985_v27  ;;  %v1973_v22 = vor.u32 %v2329_v15, %v1972_v14  ;;  %v2017_v25 = vor.u32 %v2334_v20, %v2014_v21 }
  0xe4   : > { %1623 = vmatmul.bf16.gmra.mxu2 %v1989_v28  ;;  %1671 = vmatpush.bf16.msrb.mxu1 %v2383_v30 }
  0xe5   : > { %1690 = vmatpush.bf16.msrb.mxu2 %v2391_v24  ;;  %1642 = vmatmul.bf16.gmra.mxu3 %v1993_v29  ;;  %v1977_v24 = vor.u32 %v2324_v18, %v1974_v19 }
  0xe6   : > { %1709 = vmatpush.bf16.msrb.mxu3 %v2399_v31 }
  0xe7   : > { %1653 = vmatpush.bf16.msrb.mxu0 %v2374_v33 }
  0xe8   : > { %1672 = vmatpush.bf16.msrb.mxu1 %v2382_v34 }
  0xe9   : > { %1691 = vmatpush.bf16.msrb.mxu2 %v2390_v32 }
  0xea   : > { %1710 = vmatpush.bf16.msrb.mxu3 %v2398_v35 }
  0xeb   : > { %1654 = vmatpush.bf16.msrb.mxu0 %v2373_v37 }
  0xec   : > { %1673 = vmatpush.bf16.msrb.mxu1 %v2381_v38 }
  0xed   : > { %1692 = vmatpush.bf16.msrb.mxu2 %v2389_v36 }
  0xee   : > { %1711 = vmatpush.bf16.msrb.mxu3 %v2397_v39 }
  0xef   : > { %1655 = vmatpush.bf16.msrb.mxu0 %v2372_v41 }
  0xf0   : > { %1674 = vmatpush.bf16.msrb.mxu1 %v2380_v42 }
  0xf1   : > { %1693 = vmatpush.bf16.msrb.mxu2 %v2388_v40 }
  0xf2   : > { %1712 = vmatpush.bf16.msrb.mxu3 %v2396_v43  ;;  %1656 = vmatmul.bf16.vlgmr.msrb.gmra.mxu0 %v1957_v54 }
  0xf3   : > { %1724 = vmatpush.bf16.msra.mxu0 %v2411_v44  ;;  %1675 = vmatmul.bf16.vlgmr.msrb.gmra.mxu1 %v1961_v56 }
  0xf4   : > { %1749 = vmatpush.bf16.msra.mxu1 %v2413_v53  ;;  %1694 = vmatmul.bf16.vlgmr.msrb.gmra.mxu2 %v1965_v57 }
  0xf5   : > { %2425 = vmatpush.bf16.msra.mxu2 %v2411_v44  ;;  %1713 = vmatmul.bf16.vlgmr.msrb.gmra.mxu3 %v1969_v58  ;;  %v2477_v44 = vld [vmem:[%s848_s9] ss:$0 sm:$0xff]  ;;  %s838_s9 = scalar_lea.vmem [#allocation3], %s1937_s6 }
  0xf6   : > { %2433 = vmatpush.bf16.msra.mxu3 %v2413_v53 }
  0xf7   : > { %1725 = vmatpush.bf16.msra.mxu0 %v2410_v55 }
  0xf8   : > { %1750 = vmatpush.bf16.msra.mxu1 %v2412_v59 }
  0xf9   : > { %2426 = vmatpush.bf16.msra.mxu2 %v2410_v55 }
  0xfa   : > { %2434 = vmatpush.bf16.msra.mxu3 %v2412_v59 }
  0xfb   : > { %1726 = vmatpush.bf16.msra.mxu0 %v2409_v60 }
  0xfd   : > { %2427 = vmatpush.bf16.msra.mxu2 %v2409_v60 }
  0xff   : > { %1727 = vmatpush.bf16.msra.mxu0 %v2408_v61 }
 0x101   : > { %2428 = vmatpush.bf16.msra.mxu2 %v2408_v61 }
 0x102   : > { %1661 = vmatmul.bf16.gmra.mxu0 %v1997_v7 }
 0x103   : > { %1728 = vmatpush.bf16.msra.mxu0 %v2407_v62  ;;  %1680 = vmatmul.bf16.gmra.mxu1 %v2001_v9 }
 0x104   : > { %1699 = vmatmul.bf16.gmra.mxu2 %v2005_v10 }
 0x105   : > { %2429 = vmatpush.bf16.msra.mxu2 %v2407_v62  ;;  %1718 = vmatmul.bf16.gmra.mxu3 %v2009_v11 }
 0x107   : > { %1729 = vmatpush.bf16.msra.mxu0 %v2406_v8 }
 0x109   : > { %2430 = vmatpush.bf16.msra.mxu2 %v2406_v8 }
 0x10b   : > { %1730 = vmatpush.bf16.msra.mxu0 %v2405_v12 }
 0x10d   : > { %2431 = vmatpush.bf16.msra.mxu2 %v2405_v12 }
 0x10f   : > { %1731 = vmatpush.bf16.msra.mxu0 %v2404_v13 }
 0x111   : > { %2432 = vmatpush.bf16.msra.mxu2 %v2404_v13 }
 0x112   : > { %1732 = vmatmul.bf16.vlgmr.msra.gmra.mxu0 %v1973_v22 }
 0x113   : > { %2314 = vmatmul.msk.bf16.vlgmr.msra.gmra.mxu1 %vm1565_vm0, %v1977_v24 }
 0x114   : > { %1737 = vmatmul.bf16.vlgmr.msra.gmra.mxu2 %v2013_v23 }
 0x115   : > { %2315 = vmatmul.msk.bf16.vlgmr.msra.gmra.mxu3 %vm1565_vm0, %v2017_v25 }
 0x14f   : > { %v1581_v26 = vpop.f32.mrf.mxu0 }
 0x150   : > { %v1600_v27 = vpop.f32.mrf.mxu1  ;;  %v1582_v49 = vadd.f32 %v2477_v44, %v1581_v26 }
 0x152   : > { %v1601_v50 = vadd.f32 %v1600_v27, %v1582_v49 }
 0x157   : > { %v1619_v28 = vpop.f32.mrf.mxu2  ;;  %v1583_v30 = vpop.f32.mrf.mxu0 }
 0x158   : > { %v1638_v29 = vpop.f32.mrf.mxu3  ;;  %v1602_v31 = vpop.f32.mrf.mxu1  ;;  %v1584_v54 = vadd.f32 %v2477_v44, %v1583_v30  ;;  %v1620_v57 = vadd.f32 %v1619_v28, %v1601_v50 }
 0x15a   : > { %v1603_v58 = vadd.f32 %v1602_v31, %v1584_v54  ;;  %v1639_v60 = vadd.f32 %v1638_v29, %v1620_v57 }
 0x15f   : > { %v1621_v32 = vpop.f32.mrf.mxu2  ;;  %v1586_v34 = vpop.f32.mrf.mxu0 }
 0x160   : > { %v1640_v33 = vpop.f32.mrf.mxu3  ;;  %v1605_v35 = vpop.f32.mrf.mxu1  ;;  %v1587_v56 = vadd.f32 %v2477_v44, %v1586_v34  ;;  %v1622_v61 = vadd.f32 %v1621_v32, %v1603_v58 }
 0x162   : > { %v1606_v59 = vadd.f32 %v1605_v35, %v1587_v56  ;;  %v1641_v5 = vadd.f32 %v1640_v33, %v1622_v61 }
 0x167   : > { %v1624_v36 = vpop.f32.mrf.mxu2  ;;  %v1588_v38 = vpop.f32.mrf.mxu0 }
 0x168   : > { %v1643_v37 = vpop.f32.mrf.mxu3  ;;  %v1607_v39 = vpop.f32.mrf.mxu1  ;;  %v1589_v63 = vadd.f32 %v2477_v44, %v1588_v38  ;;  %v1625_v4 = vadd.f32 %v1624_v36, %v1606_v59 }
 0x16a   : > { %v1608_v6 = vadd.f32 %v1607_v39, %v1589_v63  ;;  %v1644_v9 = vadd.f32 %v1643_v37, %v1625_v4 }
 0x16f   : > { %v1626_v40 = vpop.f32.mrf.mxu2  ;;  %v1657_v42 = vpop.f32.mrf.mxu0 }
 0x170   : > { %v1645_v41 = vpop.f32.mrf.mxu3  ;;  %v1676_v43 = vpop.f32.mrf.mxu1  ;;  %v1658_v2 = vadd.f32 %v1657_v42, %v1639_v60  ;;  %v1627_v10 = vadd.f32 %v1626_v40, %v1608_v6 }
 0x172   : > { %v1677_v7 = vadd.f32 %v1676_v43, %v1658_v2  ;;  %v1646_v18 = vadd.f32 %v1645_v41, %v1627_v10 }
 0x177   : > { %v1695_v45 = vpop.f32.mrf.mxu2  ;;  %v1659_v47 = vpop.f32.mrf.mxu0 }
 0x178   : > { %v1714_v46 = vpop.f32.mrf.mxu3  ;;  %v1678_v48 = vpop.f32.mrf.mxu1  ;;  %v1660_v8 = vadd.f32 %v1659_v47, %v1641_v5  ;;  %v1696_v11 = vadd.f32 %v1695_v45, %v1677_v7 }
 0x17a   : > { %v1679_v16 = vadd.f32 %v1678_v48, %v1660_v8  ;;  %v1715_v19 = vadd.f32 %v1714_v46, %v1696_v11 }
 0x17f   : > { %v1697_v51 = vpop.f32.mrf.mxu2  ;;  %v1662_v53 = vpop.f32.mrf.mxu0 }
 0x180   : > { %v1716_v52 = vpop.f32.mrf.mxu3  ;;  %v1681_v55 = vpop.f32.mrf.mxu1  ;;  %v1663_v13 = vadd.f32 %v1662_v53, %v1644_v9  ;;  %v1698_v20 = vadd.f32 %v1697_v51, %v1679_v16 }
 0x182   : > { %v1682_v21 = vadd.f32 %v1681_v55, %v1663_v13  ;;  %v1717_v25 = vadd.f32 %v1716_v52, %v1698_v20 }
 0x187   : > { %v1700_v62 = vpop.f32.mrf.mxu2  ;;  %v1664_v1 = vpop.f32.mrf.mxu0 }
 0x188   : > { %v1719_v0 = vpop.f32.mrf.mxu3  ;;  %v1683_v3 = vpop.f32.mrf.mxu1  ;;  %v1665_v22 = vadd.f32 %v1664_v1, %v1646_v18  ;;  %v1701_v24 = vadd.f32 %v1700_v62, %v1682_v21 }
 0x18a   : > { %v1684_v27 = vadd.f32 %v1683_v3, %v1665_v22  ;;  %v1720_v32 = vadd.f32 %v1719_v0, %v1701_v24 }
 0x18f   : > { %v1702_v12 = vpop.f32.mrf.mxu2  ;;  %v1733_v15 = vpop.f32.mrf.mxu0 }
 0x190   : > { %v1721_v14 = vpop.f32.mrf.mxu3  ;;  %v1752_v17 = vpop.f32.mrf.mxu1  ;;  %v1734_v23 = vadd.f32 %v1733_v15, %v1715_v19  ;;  %v1703_v33 = vadd.f32 %v1702_v12, %v1684_v27 }
 0x192   : > { %v1753_v30 = vadd.f32 %v1752_v17, %v1734_v23  ;;  %v1722_v39 = vadd.f32 %v1721_v14, %v1703_v33 }
 0x194   : > { %v1762_v37 = vmax.f32 %v1753_v30, 0.0 }
 0x197   : > { %v1738_v26 = vpop.f32.mrf.mxu2  ;;  %v1735_v29 = vpop.f32.mrf.mxu0 }
 0x198   : > { %v1757_v28 = vpop.f32.mrf.mxu3  ;;  %v1736_v31 = vadd.f32 %v1735_v29, %v1717_v25  ;;  %v1754_v34 = vpop.f32.mrf.mxu1  ;;  %v1739_v36 = vadd.f32 %v1738_v26, %v1720_v32 }
 0x19a   : > { %v1755_v35 = vadd.f32 %v1754_v34, %v1736_v31  ;;  %v1758_v42 = vadd.f32 %v1757_v28, %v1739_v36 }
 0x19c   : > { %v1763_v38 = vmax.f32 %v1755_v35, 0.0  ;;  %v1764_v46 = vmax.f32 %v1758_v42, 0.0 }
 0x19e   : > { %v2417_v40 = vpack.c.bf16 %v1763_v38, %v1762_v37 }
 0x19f   : > { %v1740_v41 = vpop.f32.mrf.mxu2 }
 0x1a0   : > { %v1741_v43 = vadd.f32 %v1740_v41, %v1722_v39  ;;  %2418 = vst [vmem:[%s838_s9] sm:$0xff] %v2417_v40   ;;  %v1759_v44 = vpop.f32.mrf.mxu3 }
 0x1a2   : > { %v1760_v45 = vadd.f32 %v1759_v44, %v1741_v43 }
 0x1a4   : > { %v1765_v47 = vmax.f32 %v1760_v45, 0.0  ;;  %1780 = sbr.rel (!%p2573_p6) target bundleno = 434 (0x1b2), region = 77 }
 0x1a6   : > { %v2422_v48 = vpack.c.bf16 %v1765_v47, %v1764_v46 }
 0x1a7   : > { %v1802_v49 = vld [vmem:[%s838_s9] sm:$0xf] (%p2573_p6)  ;;  %v1804_v50 = vld [vmem:[%s838_s9 + $0x4] sm:$0xf] (%p2573_p6) }
 0x1a8   : > { %2424 = vst [vmem:[%s838_s9 + $0x8] sm:$0xff] %v2422_v48  }
 0x1a9   : > { %1803 = vst [vmem:[%s1785_s25] sm:$0xf] %v1802_v49 }
 0x1aa   : > { %1805 = vst [vmem:[%s1785_s25 + $0x8] sm:$0xf] %v1804_v50 }
 0x1af   : > { %v1806_v51 = vld [vmem:[%s838_s9 + $0x8] sm:$0xf]  ;;  %v1808_v52 = vld [vmem:[%s838_s9 + $0xc] sm:$0xf] }
 0x1b0   : > { %1807 = vst [vmem:[%s1785_s25 + $0x10] sm:$0xf] %v1806_v51 }
 0x1b1   : > { %1809 = vst [vmem:[%s1785_s25 + $0x18] sm:$0xf] %v1808_v52 }
 0x1b2 PF: > { %s13_s16 = sadd.s32 1, %s2516_s16   ;;  %s3128_s12 = smov %s2504_s13 }
 0x1b3   : > { %p10_p12 = scmp.ge.s32.totalorder %s13_s16, 4   ;;  %s3129_s13 = smov %s2578_s22 }
 0x1b4   : > { %s3130_s14 = smov %s2512_s15  ;;  %s3131_s15 = smov %s3133_s17 }
 0x1b5   :  { %12 = sbr.rel (!%p10_p12) target bundleno = 3 (0x3), region = 155 }

// kernel: tiny_roma_forward.68
= control target key start
LH: loop header
LB: loop body
LE: loop exit
PB: predicated region body
PF: predicated region fallthrough
CT: control target
= control target key end

     0   :  { %vm208_vm0 = vcmask 23552   ;;  %s445_s1 = inlined_call_operand.vmem [shape: bf16[256,3], index: 1, kind: input, shape index: {}]   ;;  %s446_s2 = inlined_call_operand.vmem [shape: f32[1,3], index: 2, kind: input, shape index: {}]   ;;  %s447_s0 = inlined_call_operand.vmem [shape: bf16[32,256], index: 0, kind: input, shape index: {}]   ;;  %s448_s3 = inlined_call_operand.vmem [shape: f32[32,3], index: 3, kind: output, shape index: {}]  }
   0x1   :  { %v308_v0 = vld [vmem:[%s445_s1 + $0x38] sm:$0xff]  ;;  %v307_v2 = vld [vmem:[%s445_s1 + $0x30] sm:$0xff]  ;;  %v306_v4 = vld [vmem:[%s445_s1 + $0x28] sm:$0xff] }
   0x2   :  { %v316_v1 = vld [vmem:[%s445_s1 + $0x78] sm:$0xff]  ;;  %170 = vmatpush.bf16.msra.mxu0 %v308_v0  ;;  %317 = vmatpush.bf16.msra.mxu2 %v308_v0  ;;  %v315_v3 = vld [vmem:[%s445_s1 + $0x70] sm:$0xff]  ;;  %v314_v5 = vld [vmem:[%s445_s1 + $0x68] sm:$0xff] }
   0x3   :  { %189 = vmatpush.bf16.msra.mxu1 %v316_v1  ;;  %325 = vmatpush.bf16.msra.mxu3 %v316_v1  ;;  %v305_v6 = vld [vmem:[%s445_s1 + $0x20] sm:$0xff]  ;;  %v304_v8 = vld [vmem:[%s445_s1 + $0x18] sm:$0xff]  ;;  %v303_v10 = vld [vmem:[%s445_s1 + $0x10] sm:$0xff] }
   0x4   :  { %v313_v7 = vld [vmem:[%s445_s1 + $0x60] sm:$0xff]  ;;  %v312_v9 = vld [vmem:[%s445_s1 + $0x58] sm:$0xff]  ;;  %v311_v11 = vld [vmem:[%s445_s1 + $0x50] sm:$0xff] }
   0x5   :  { %v302_v12 = vld [vmem:[%s445_s1 + $0x8] sm:$0xff]  ;;  %v301_v14 = vld [vmem:[%s445_s1] sm:$0xff]  ;;  %v227_v18 = vld [vmem:[%s447_s0 + $0x10] sm:$0xf] }
   0x6   :  { %171 = vmatpush.bf16.msra.mxu0 %v307_v2  ;;  %318 = vmatpush.bf16.msra.mxu2 %v307_v2  ;;  %v310_v13 = vld [vmem:[%s445_s1 + $0x48] sm:$0xff]  ;;  %v309_v15 = vld [vmem:[%s445_s1 + $0x40] sm:$0xff]  ;;  %v300_v19 = vld [vmem:[%s447_s0 + $0x14] sm:$0xf0] }
   0x7   :  { %190 = vmatpush.bf16.msra.mxu1 %v315_v3  ;;  %326 = vmatpush.bf16.msra.mxu3 %v315_v3  ;;  %v219_v16 = vld [vmem:[%s447_s0] sm:$0xf]  ;;  %v298_v17 = vld [vmem:[%s447_s0 + $0x4] sm:$0xf0]  ;;  %v297_v20 = vld [vmem:[%s447_s0 + $0x4] sm:$0xf]  ;;  %v228_v25 = vor.u32 %v300_v19, %v227_v18 }
   0x8   :  { %v221_v21 = vld [vmem:[%s447_s0 + $0x8] sm:$0xf0]  ;;  %v299_v22 = vld [vmem:[%s447_s0 + $0x14] sm:$0xf]  ;;  %v229_v23 = vld [vmem:[%s447_s0 + $0x18] sm:$0xf0]  ;;  %v220_v24 = vor.u32 %v298_v17, %v219_v16 }
   0x9   :  { %v224_v26 = vor.u32 %v297_v20, %v221_v21  ;;  %v232_v27 = vor.u32 %v299_v22, %v229_v23  ;;  %v333_v28 = vld [vmem:[%s446_s2] ss:$0 sm:$0xff] }
   0xa   :  { %172 = vmatpush.bf16.msra.mxu0 %v306_v4  ;;  %319 = vmatpush.bf16.msra.mxu2 %v306_v4 }
   0xb   :  { %191 = vmatpush.bf16.msra.mxu1 %v314_v5  ;;  %327 = vmatpush.bf16.msra.mxu3 %v314_v5 }
   0xe   :  { %173 = vmatpush.bf16.msra.mxu0 %v305_v6  ;;  %320 = vmatpush.bf16.msra.mxu2 %v305_v6 }
   0xf   :  { %192 = vmatpush.bf16.msra.mxu1 %v313_v7  ;;  %328 = vmatpush.bf16.msra.mxu3 %v313_v7 }
  0x12   :  { %174 = vmatpush.bf16.msra.mxu0 %v304_v8  ;;  %321 = vmatpush.bf16.msra.mxu2 %v304_v8 }
  0x13   :  { %193 = vmatpush.bf16.msra.mxu1 %v312_v9  ;;  %329 = vmatpush.bf16.msra.mxu3 %v312_v9 }
  0x16   :  { %175 = vmatpush.bf16.msra.mxu0 %v303_v10  ;;  %322 = vmatpush.bf16.msra.mxu2 %v303_v10 }
  0x17   :  { %194 = vmatpush.bf16.msra.mxu1 %v311_v11  ;;  %330 = vmatpush.bf16.msra.mxu3 %v311_v11 }
  0x1a   :  { %176 = vmatpush.bf16.msra.mxu0 %v302_v12  ;;  %323 = vmatpush.bf16.msra.mxu2 %v302_v12 }
  0x1b   :  { %195 = vmatpush.bf16.msra.mxu1 %v310_v13  ;;  %331 = vmatpush.bf16.msra.mxu3 %v310_v13 }
  0x1e   :  { %177 = vmatpush.bf16.msra.mxu0 %v301_v14  ;;  %324 = vmatpush.bf16.msra.mxu2 %v301_v14 }
  0x1f   :  { %196 = vmatpush.bf16.msra.mxu1 %v309_v15  ;;  %332 = vmatpush.bf16.msra.mxu3 %v309_v15 }
  0x21   :  { %178 = vmatmul.bf16.vlgmr.msra.gmra.mxu0 %v220_v24  ;;  %183 = vmatmul.bf16.vlgmr.msra.gmra.mxu2 %v228_v25 }
  0x22   :  { %197 = vmatmul.bf16.vlgmr.msra.gmra.mxu1 %v224_v26  ;;  %202 = vmatmul.bf16.vlgmr.msra.gmra.mxu3 %v232_v27 }
  0x9e   :  { %v179_v29 = vpop.f32.mrf.mxu0 }
  0x9f   :  { %v180_v30 = vadd.f32 %v333_v28, %v179_v29  ;;  %v198_v31 = vpop.f32.mrf.mxu1 }
  0xa1   :  { %v199_v32 = vadd.f32 %v198_v31, %v180_v30 }
  0xa3   :  { %209 = vst.msk [vmem:[%s448_s3] sm:$0xff] %vm208_vm0, %v199_v32 }
  0xa4   :  { %v184_v33 = vpop.f32.mrf.mxu2 }
  0xa5   :  { %v185_v34 = vadd.f32 %v333_v28, %v184_v33  ;;  %v203_v35 = vpop.f32.mrf.mxu3 }
  0xa6   :  { %v181_v36 = vpop.f32.mrf.mxu0 }
  0xa7   :  { %v204_v37 = vadd.f32 %v203_v35, %v185_v34  ;;  %v182_v38 = vadd.f32 %v333_v28, %v181_v36  ;;  %v200_v39 = vpop.f32.mrf.mxu1 }
  0xa9   :  { %211 = vst.msk [vmem:[%s448_s3 + $0x10] sm:$0xff] %vm208_vm0, %v204_v37  ;;  %v201_v40 = vadd.f32 %v200_v39, %v182_v38 }
  0xab   :  { %210 = vst.msk [vmem:[%s448_s3 + $0x8] sm:$0xff] %vm208_vm0, %v201_v40 }
  0xac   :  { %v186_v41 = vpop.f32.mrf.mxu2 }
  0xad   :  { %v187_v42 = vadd.f32 %v333_v28, %v186_v41  ;;  %v205_v43 = vpop.f32.mrf.mxu3 }
  0xaf   :  { %v206_v44 = vadd.f32 %v205_v43, %v187_v42 }
  0xb1   :  { %212 = vst.msk [vmem:[%s448_s3 + $0x18] sm:$0xff] %vm208_vm0, %v206_v44 }

// kernel: tiny_roma_forward.65
= control target key start
LH: loop header
LB: loop body
LE: loop exit
PB: predicated region body
PF: predicated region fallthrough
CT: control target
= control target key end

     0   :  { %s5520_s12 = smov 0   ;;  %s5522_s13 = smov 0   ;;  %s6551_s0 = inlined_call_operand.vmem [shape: bf16[32,2304], index: 0, kind: input, shape index: {}]   ;;  %s6552_s1 = inlined_call_operand.vmem [shape: bf16[2304,256], index: 1, kind: input, shape index: {}]   ;;  %s6553_s2 = inlined_call_operand.vmem [shape: f32[1,256], index: 2, kind: input, shape index: {}]   ;;  %s6554_s3 = inlined_call_operand.vmem [shape: bf16[32,256], index: 3, kind: output, shape index: {}]  }
   0x1   :  { %s5524_s14 = smov 0   ;;  %s5526_s15 = smov 0  }
   0x2   :  { %s5528_s16 = smov 0  }
   0x3 LB: > { %s22_s17 = sadd.s32 1, %s5494_s15  ;;  %s4478_s18 = sadd.s32 4294967295, %s5498_s16   ;;  %s5498_s16 = sphi %s5528_s16, %s13_s16   ;;  %s5494_s15 = sphi %s5526_s15, %s6559_s15   ;;  %s5490_s14 = sphi %s5524_s14, %s6558_s14   ;;  %s5486_s13 = sphi %s5522_s13, %s6557_s13   ;;  %s5482_s12 = sphi %s5520_s12, %s6556_s12  }
   0x4   : > { %p23_p0 = scmp.ge.s32.totalorder %s22_s17, 2  ;;  %p65_p1 = scmp.ne.s32.totalorder %s5486_s13, %s5482_s12 }
   0x5   : > { %p66_p2 = scmp.eq.s32.totalorder %s5498_s16, 0  ;;  %p123_p4 = scmp.eq.s32.totalorder %s4478_s18, 1 }
   0x6   : > { %s6561_s17 = smov (%p23_p0, %s22_s17), 0  ;;  %s58_s20 = sadd.s32 1, %s5486_s13 }
   0x7   : > { %p67_p3 = por %p66_p2, %p65_p1  ;;  %s55_s19 = ssub.s32 %s5494_s15, %s6561_s17 }
   0x8   : > { %p56_p5 = scmp.eq.s32.totalorder %s55_s19, 0  ;;  %p5555_p6 = por %p123_p4, %p65_p1 }
   0x9   : > { %p4482_p7 = scmp.ge.s32.totalorder %s5498_s16, 2 }
   0xa   : > { %s5560_s22 = scalar_select %p56_p5, %s5486_s13, %s58_s20  }
   0xb   : > { %155 = sbr.rel (%p4482_p7) target bundleno = 309 (0x135), region = 20 }
  0x10   : > { %158 = sbr.rel (!%p67_p3) target bundleno = 309 (0x135), region = 24  ;;  %s160_s23 = sand.u32 (%p67_p3), 1, %s5486_s13  }
  0x11   : > { %s4483_s24 = sshll.u32 (%p67_p3), %s5494_s15, 2  ;;  %s5417_s25 = smul.u32 (%p67_p3), 1152, %s160_s23 }
  0x12   : > { %s5568_s28 = scalar_lea.vmem (%p67_p3), %s6552_s1, %s4483_s24 }
  0x13   : > { %v181_v0 = vld [vmem:[%s5568_s28] sm:$0xf] (%p67_p3)  ;;  %v183_v1 = vld [vmem:[%s5568_s28 + $0x8] sm:$0xf] (%p67_p3)  ;;  %v185_v2 = vld [vmem:[%s5568_s28 + $0x10] sm:$0xf] (%p67_p3) }
  0x14   : > { %s5573_s29 = scalar_lea.vmem (%p67_p3), [#allocation2], %s5417_s25  ;;  %v187_v3 = vld [vmem:[%s5568_s28 + $0x18] sm:$0xf] (%p67_p3)  ;;  %v189_v4 = vld [vmem:[%s5568_s28 + $0x20] sm:$0xf] (%p67_p3) }
  0x15   : > { %182 = vst [vmem:[%s5573_s29] sm:$0xf] %v181_v0  ;;  %v191_v5 = vld [vmem:[%s5568_s28 + $0x28] sm:$0xf]  ;;  %v193_v6 = vld [vmem:[%s5568_s28 + $0x30] sm:$0xf] }
  0x16   : > { %184 = vst [vmem:[%s5573_s29 + $0x4] sm:$0xf] %v183_v1  ;;  %v195_v7 = vld [vmem:[%s5568_s28 + $0x38] sm:$0xf]  ;;  %v197_v8 = vld [vmem:[%s5568_s28 + $0x40] sm:$0xf] }
  0x17   : > { %186 = vst [vmem:[%s5573_s29 + $0x8] sm:$0xf] %v185_v2  ;;  %v199_v9 = vld [vmem:[%s5568_s28 + $0x48] sm:$0xf]  ;;  %v201_v10 = vld [vmem:[%s5568_s28 + $0x50] sm:$0xf] }
  0x18   : > { %188 = vst [vmem:[%s5573_s29 + $0xc] sm:$0xf] %v187_v3  ;;  %v203_v11 = vld [vmem:[%s5568_s28 + $0x58] sm:$0xf]  ;;  %v205_v12 = vld [vmem:[%s5568_s28 + $0x60] sm:$0xf] }
  0x19   : > { %190 = vst [vmem:[%s5573_s29 + $0x10] sm:$0xf] %v189_v4  ;;  %v207_v13 = vld [vmem:[%s5568_s28 + $0x68] sm:$0xf]  ;;  %v209_v14 = vld [vmem:[%s5568_s28 + $0x70] sm:$0xf] }
  0x1a   : > { %192 = vst [vmem:[%s5573_s29 + $0x14] sm:$0xf] %v191_v5  ;;  %v211_v15 = vld [vmem:[%s5568_s28 + $0x78] sm:$0xf]  ;;  %v213_v16 = vld [vmem:[%s5568_s28 + $0x80] sm:$0xf] }
  0x1b   : > { %194 = vst [vmem:[%s5573_s29 + $0x18] sm:$0xf] %v193_v6  ;;  %v215_v17 = vld [vmem:[%s5568_s28 + $0x88] sm:$0xf]  ;;  %v217_v18 = vld [vmem:[%s5568_s28 + $0x90] sm:$0xf] }
  0x1c   : > { %196 = vst [vmem:[%s5573_s29 + $0x1c] sm:$0xf] %v195_v7  ;;  %v219_v19 = vld [vmem:[%s5568_s28 + $0x98] sm:$0xf]  ;;  %v221_v20 = vld [vmem:[%s5568_s28 + $0xa0] sm:$0xf] }
  0x1d   : > { %198 = vst [vmem:[%s5573_s29 + $0x20] sm:$0xf] %v197_v8  ;;  %v223_v21 = vld [vmem:[%s5568_s28 + $0xa8] sm:$0xf]  ;;  %v225_v22 = vld [vmem:[%s5568_s28 + $0xb0] sm:$0xf] }
  0x1e   : > { %200 = vst [vmem:[%s5573_s29 + $0x24] sm:$0xf] %v199_v9  ;;  %v227_v23 = vld [vmem:[%s5568_s28 + $0xb8] sm:$0xf]  ;;  %v229_v24 = vld [vmem:[%s5568_s28 + $0xc0] sm:$0xf] }
  0x1f   : > { %202 = vst [vmem:[%s5573_s29 + $0x28] sm:$0xf] %v201_v10  ;;  %v231_v25 = vld [vmem:[%s5568_s28 + $0xc8] sm:$0xf]  ;;  %v233_v26 = vld [vmem:[%s5568_s28 + $0xd0] sm:$0xf] }
  0x20   : > { %204 = vst [vmem:[%s5573_s29 + $0x2c] sm:$0xf] %v203_v11  ;;  %v235_v27 = vld [vmem:[%s5568_s28 + $0xd8] sm:$0xf]  ;;  %v237_v28 = vld [vmem:[%s5568_s28 + $0xe0] sm:$0xf] }
  0x21   : > { %206 = vst [vmem:[%s5573_s29 + $0x30] sm:$0xf] %v205_v12  ;;  %v239_v29 = vld [vmem:[%s5568_s28 + $0xe8] sm:$0xf]  ;;  %v241_v30 = vld [vmem:[%s5568_s28 + $0xf0] sm:$0xf] }
  0x22   : > { %208 = vst [vmem:[%s5573_s29 + $0x34] sm:$0xf] %v207_v13  ;;  %v243_v31 = vld [vmem:[%s5568_s28 + $0xf8] sm:$0xf]  ;;  %v245_v32 = vld [vmem:[%s5568_s28 + $0x100] sm:$0xf] }
  0x23   : > { %210 = vst [vmem:[%s5573_s29 + $0x38] sm:$0xf] %v209_v14  ;;  %v247_v33 = vld [vmem:[%s5568_s28 + $0x108] sm:$0xf]  ;;  %v249_v34 = vld [vmem:[%s5568_s28 + $0x110] sm:$0xf] }
  0x24   : > { %212 = vst [vmem:[%s5573_s29 + $0x3c] sm:$0xf] %v211_v15  ;;  %v251_v35 = vld [vmem:[%s5568_s28 + $0x118] sm:$0xf]  ;;  %v253_v36 = vld [vmem:[%s5568_s28 + $0x120] sm:$0xf] }
  0x25   : > { %214 = vst [vmem:[%s5573_s29 + $0x40] sm:$0xf] %v213_v16  ;;  %v255_v37 = vld [vmem:[%s5568_s28 + $0x128] sm:$0xf]  ;;  %v257_v38 = vld [vmem:[%s5568_s28 + $0x130] sm:$0xf] }
  0x26   : > { %216 = vst [vmem:[%s5573_s29 + $0x44] sm:$0xf] %v215_v17  ;;  %v259_v39 = vld [vmem:[%s5568_s28 + $0x138] sm:$0xf]  ;;  %v261_v40 = vld [vmem:[%s5568_s28 + $0x140] sm:$0xf] }
  0x27   : > { %218 = vst [vmem:[%s5573_s29 + $0x48] sm:$0xf] %v217_v18  ;;  %v263_v41 = vld [vmem:[%s5568_s28 + $0x148] sm:$0xf]  ;;  %v265_v42 = vld [vmem:[%s5568_s28 + $0x150] sm:$0xf] }
  0x28   : > { %220 = vst [vmem:[%s5573_s29 + $0x4c] sm:$0xf] %v219_v19  ;;  %v267_v43 = vld [vmem:[%s5568_s28 + $0x158] sm:$0xf]  ;;  %v269_v44 = vld [vmem:[%s5568_s28 + $0x160] sm:$0xf] }
  0x29   : > { %222 = vst [vmem:[%s5573_s29 + $0x50] sm:$0xf] %v221_v20  ;;  %v271_v45 = vld [vmem:[%s5568_s28 + $0x168] sm:$0xf]  ;;  %v273_v46 = vld [vmem:[%s5568_s28 + $0x170] sm:$0xf] }
  0x2a   : > { %224 = vst [vmem:[%s5573_s29 + $0x54] sm:$0xf] %v223_v21  ;;  %v275_v47 = vld [vmem:[%s5568_s28 + $0x178] sm:$0xf]  ;;  %v277_v48 = vld [vmem:[%s5568_s28 + $0x180] sm:$0xf] }
  0x2b   : > { %226 = vst [vmem:[%s5573_s29 + $0x58] sm:$0xf] %v225_v22  ;;  %v279_v49 = vld [vmem:[%s5568_s28 + $0x188] sm:$0xf]  ;;  %v281_v50 = vld [vmem:[%s5568_s28 + $0x190] sm:$0xf] }
  0x2c   : > { %228 = vst [vmem:[%s5573_s29 + $0x5c] sm:$0xf] %v227_v23  ;;  %v283_v51 = vld [vmem:[%s5568_s28 + $0x198] sm:$0xf]  ;;  %v285_v52 = vld [vmem:[%s5568_s28 + $0x1a0] sm:$0xf] }
  0x2d   : > { %230 = vst [vmem:[%s5573_s29 + $0x60] sm:$0xf] %v229_v24  ;;  %v287_v53 = vld [vmem:[%s5568_s28 + $0x1a8] sm:$0xf]  ;;  %v289_v54 = vld [vmem:[%s5568_s28 + $0x1b0] sm:$0xf] }
  0x2e   : > { %232 = vst [vmem:[%s5573_s29 + $0x64] sm:$0xf] %v231_v25  ;;  %v291_v55 = vld [vmem:[%s5568_s28 + $0x1b8] sm:$0xf]  ;;  %v293_v56 = vld [vmem:[%s5568_s28 + $0x1c0] sm:$0xf] }
  0x2f   : > { %234 = vst [vmem:[%s5573_s29 + $0x68] sm:$0xf] %v233_v26  ;;  %v295_v57 = vld [vmem:[%s5568_s28 + $0x1c8] sm:$0xf]  ;;  %v297_v58 = vld [vmem:[%s5568_s28 + $0x1d0] sm:$0xf] }
  0x30   : > { %236 = vst [vmem:[%s5573_s29 + $0x6c] sm:$0xf] %v235_v27  ;;  %v299_v59 = vld [vmem:[%s5568_s28 + $0x1d8] sm:$0xf]  ;;  %v301_v60 = vld [vmem:[%s5568_s28 + $0x1e0] sm:$0xf] }
  0x31   : > { %238 = vst [vmem:[%s5573_s29 + $0x70] sm:$0xf] %v237_v28  ;;  %v303_v61 = vld [vmem:[%s5568_s28 + $0x1e8] sm:$0xf]  ;;  %v305_v62 = vld [vmem:[%s5568_s28 + $0x1f0] sm:$0xf] }
  0x32   : > { %240 = vst [vmem:[%s5573_s29 + $0x74] sm:$0xf] %v239_v29  ;;  %v307_v63 = vld [vmem:[%s5568_s28 + $0x1f8] sm:$0xf]  ;;  %v309_v0 = vld [vmem:[%s5568_s28 + $0x200] sm:$0xf] }
  0x33   : > { %242 = vst [vmem:[%s5573_s29 + $0x78] sm:$0xf] %v241_v30  ;;  %v311_v1 = vld [vmem:[%s5568_s28 + $0x208] sm:$0xf]  ;;  %v313_v2 = vld [vmem:[%s5568_s28 + $0x210] sm:$0xf] }
  0x34   : > { %244 = vst [vmem:[%s5573_s29 + $0x7c] sm:$0xf] %v243_v31  ;;  %v315_v3 = vld [vmem:[%s5568_s28 + $0x218] sm:$0xf]  ;;  %v317_v4 = vld [vmem:[%s5568_s28 + $0x220] sm:$0xf] }
  0x35   : > { %246 = vst [vmem:[%s5573_s29 + $0x80] sm:$0xf] %v245_v32  ;;  %v319_v5 = vld [vmem:[%s5568_s28 + $0x228] sm:$0xf]  ;;  %v321_v6 = vld [vmem:[%s5568_s28 + $0x230] sm:$0xf] }
  0x36   : > { %248 = vst [vmem:[%s5573_s29 + $0x84] sm:$0xf] %v247_v33  ;;  %v323_v7 = vld [vmem:[%s5568_s28 + $0x238] sm:$0xf]  ;;  %v325_v8 = vld [vmem:[%s5568_s28 + $0x240] sm:$0xf] }
  0x37   : > { %250 = vst [vmem:[%s5573_s29 + $0x88] sm:$0xf] %v249_v34  ;;  %v327_v9 = vld [vmem:[%s5568_s28 + $0x248] sm:$0xf]  ;;  %v329_v10 = vld [vmem:[%s5568_s28 + $0x250] sm:$0xf] }
  0x38   : > { %252 = vst [vmem:[%s5573_s29 + $0x8c] sm:$0xf] %v251_v35  ;;  %v331_v11 = vld [vmem:[%s5568_s28 + $0x258] sm:$0xf]  ;;  %v333_v12 = vld [vmem:[%s5568_s28 + $0x260] sm:$0xf] }
  0x39   : > { %254 = vst [vmem:[%s5573_s29 + $0x90] sm:$0xf] %v253_v36  ;;  %v335_v13 = vld [vmem:[%s5568_s28 + $0x268] sm:$0xf]  ;;  %v337_v14 = vld [vmem:[%s5568_s28 + $0x270] sm:$0xf] }
  0x3a   : > { %256 = vst [vmem:[%s5573_s29 + $0x94] sm:$0xf] %v255_v37  ;;  %v339_v15 = vld [vmem:[%s5568_s28 + $0x278] sm:$0xf]  ;;  %v341_v16 = vld [vmem:[%s5568_s28 + $0x280] sm:$0xf] }
  0x3b   : > { %258 = vst [vmem:[%s5573_s29 + $0x98] sm:$0xf] %v257_v38  ;;  %v343_v17 = vld [vmem:[%s5568_s28 + $0x288] sm:$0xf]  ;;  %v345_v18 = vld [vmem:[%s5568_s28 + $0x290] sm:$0xf] }
  0x3c   : > { %260 = vst [vmem:[%s5573_s29 + $0x9c] sm:$0xf] %v259_v39  ;;  %v347_v19 = vld [vmem:[%s5568_s28 + $0x298] sm:$0xf]  ;;  %v349_v20 = vld [vmem:[%s5568_s28 + $0x2a0] sm:$0xf] }
  0x3d   : > { %262 = vst [vmem:[%s5573_s29 + $0xa0] sm:$0xf] %v261_v40  ;;  %v351_v21 = vld [vmem:[%s5568_s28 + $0x2a8] sm:$0xf]  ;;  %v353_v22 = vld [vmem:[%s5568_s28 + $0x2b0] sm:$0xf] }
  0x3e   : > { %264 = vst [vmem:[%s5573_s29 + $0xa4] sm:$0xf] %v263_v41  ;;  %v355_v23 = vld [vmem:[%s5568_s28 + $0x2b8] sm:$0xf]  ;;  %v357_v24 = vld [vmem:[%s5568_s28 + $0x2c0] sm:$0xf] }
  0x3f   : > { %266 = vst [vmem:[%s5573_s29 + $0xa8] sm:$0xf] %v265_v42  ;;  %v359_v25 = vld [vmem:[%s5568_s28 + $0x2c8] sm:$0xf]  ;;  %v361_v26 = vld [vmem:[%s5568_s28 + $0x2d0] sm:$0xf] }
  0x40   : > { %268 = vst [vmem:[%s5573_s29 + $0xac] sm:$0xf] %v267_v43  ;;  %v363_v27 = vld [vmem:[%s5568_s28 + $0x2d8] sm:$0xf]  ;;  %v365_v28 = vld [vmem:[%s5568_s28 + $0x2e0] sm:$0xf] }
  0x41   : > { %270 = vst [vmem:[%s5573_s29 + $0xb0] sm:$0xf] %v269_v44  ;;  %v367_v29 = vld [vmem:[%s5568_s28 + $0x2e8] sm:$0xf]  ;;  %v369_v30 = vld [vmem:[%s5568_s28 + $0x2f0] sm:$0xf] }
  0x42   : > { %272 = vst [vmem:[%s5573_s29 + $0xb4] sm:$0xf] %v271_v45  ;;  %v371_v31 = vld [vmem:[%s5568_s28 + $0x2f8] sm:$0xf]  ;;  %v373_v32 = vld [vmem:[%s5568_s28 + $0x300] sm:$0xf] }
  0x43   : > { %274 = vst [vmem:[%s5573_s29 + $0xb8] sm:$0xf] %v273_v46  ;;  %v375_v33 = vld [vmem:[%s5568_s28 + $0x308] sm:$0xf]  ;;  %v377_v34 = vld [vmem:[%s5568_s28 + $0x310] sm:$0xf] }
  0x44   : > { %276 = vst [vmem:[%s5573_s29 + $0xbc] sm:$0xf] %v275_v47  ;;  %v379_v35 = vld [vmem:[%s5568_s28 + $0x318] sm:$0xf]  ;;  %v381_v36 = vld [vmem:[%s5568_s28 + $0x320] sm:$0xf] }
  0x45   : > { %278 = vst [vmem:[%s5573_s29 + $0xc0] sm:$0xf] %v277_v48  ;;  %v383_v37 = vld [vmem:[%s5568_s28 + $0x328] sm:$0xf]  ;;  %v385_v38 = vld [vmem:[%s5568_s28 + $0x330] sm:$0xf] }
  0x46   : > { %280 = vst [vmem:[%s5573_s29 + $0xc4] sm:$0xf] %v279_v49  ;;  %v387_v39 = vld [vmem:[%s5568_s28 + $0x338] sm:$0xf]  ;;  %v389_v40 = vld [vmem:[%s5568_s28 + $0x340] sm:$0xf] }
  0x47   : > { %282 = vst [vmem:[%s5573_s29 + $0xc8] sm:$0xf] %v281_v50  ;;  %v391_v41 = vld [vmem:[%s5568_s28 + $0x348] sm:$0xf]  ;;  %v393_v42 = vld [vmem:[%s5568_s28 + $0x350] sm:$0xf] }
  0x48   : > { %284 = vst [vmem:[%s5573_s29 + $0xcc] sm:$0xf] %v283_v51  ;;  %v395_v43 = vld [vmem:[%s5568_s28 + $0x358] sm:$0xf]  ;;  %v397_v44 = vld [vmem:[%s5568_s28 + $0x360] sm:$0xf] }
  0x49   : > { %286 = vst [vmem:[%s5573_s29 + $0xd0] sm:$0xf] %v285_v52  ;;  %v399_v45 = vld [vmem:[%s5568_s28 + $0x368] sm:$0xf]  ;;  %v401_v46 = vld [vmem:[%s5568_s28 + $0x370] sm:$0xf] }
  0x4a   : > { %288 = vst [vmem:[%s5573_s29 + $0xd4] sm:$0xf] %v287_v53  ;;  %v403_v47 = vld [vmem:[%s5568_s28 + $0x378] sm:$0xf]  ;;  %v405_v48 = vld [vmem:[%s5568_s28 + $0x380] sm:$0xf] }
  0x4b   : > { %290 = vst [vmem:[%s5573_s29 + $0xd8] sm:$0xf] %v289_v54  ;;  %v407_v49 = vld [vmem:[%s5568_s28 + $0x388] sm:$0xf]  ;;  %v409_v50 = vld [vmem:[%s5568_s28 + $0x390] sm:$0xf] }
  0x4c   : > { %292 = vst [vmem:[%s5573_s29 + $0xdc] sm:$0xf] %v291_v55  ;;  %v411_v51 = vld [vmem:[%s5568_s28 + $0x398] sm:$0xf]  ;;  %v413_v52 = vld [vmem:[%s5568_s28 + $0x3a0] sm:$0xf] }
  0x4d   : > { %294 = vst [vmem:[%s5573_s29 + $0xe0] sm:$0xf] %v293_v56  ;;  %v415_v53 = vld [vmem:[%s5568_s28 + $0x3a8] sm:$0xf]  ;;  %v417_v54 = vld [vmem:[%s5568_s28 + $0x3b0] sm:$0xf] }
  0x4e   : > { %296 = vst [vmem:[%s5573_s29 + $0xe4] sm:$0xf] %v295_v57  ;;  %v419_v55 = vld [vmem:[%s5568_s28 + $0x3b8] sm:$0xf]  ;;  %v421_v56 = vld [vmem:[%s5568_s28 + $0x3c0] sm:$0xf] }
  0x4f   : > { %298 = vst [vmem:[%s5573_s29 + $0xe8] sm:$0xf] %v297_v58  ;;  %v423_v57 = vld [vmem:[%s5568_s28 + $0x3c8] sm:$0xf]  ;;  %v425_v58 = vld [vmem:[%s5568_s28 + $0x3d0] sm:$0xf] }
  0x50   : > { %300 = vst [vmem:[%s5573_s29 + $0xec] sm:$0xf] %v299_v59  ;;  %v427_v59 = vld [vmem:[%s5568_s28 + $0x3d8] sm:$0xf] }
  0x51   : > { %302 = vst [vmem:[%s5573_s29 + $0xf0] sm:$0xf] %v301_v60  ;;  %v429_v60 = vld [vmem:[%s5568_s28 + $0x3e0] sm:$0xf] }
  0x52   : > { %304 = vst [vmem:[%s5573_s29 + $0xf4] sm:$0xf] %v303_v61  ;;  %v431_v61 = vld [vmem:[%s5568_s28 + $0x3e8] sm:$0xf] }
  0x53   : > { %306 = vst [vmem:[%s5573_s29 + $0xf8] sm:$0xf] %v305_v62  ;;  %v433_v62 = vld [vmem:[%s5568_s28 + $0x3f0] sm:$0xf] }
  0x54   : > { %308 = vst [vmem:[%s5573_s29 + $0xfc] sm:$0xf] %v307_v63  ;;  %v435_v63 = vld [vmem:[%s5568_s28 + $0x3f8] sm:$0xf] }
  0x55   : > { %310 = vst [vmem:[%s5573_s29 + $0x100] sm:$0xf] %v309_v0  ;;  %v437_v0 = vld [vmem:[%s5568_s28 + $0x400] sm:$0xf] }
  0x56   : > { %312 = vst [vmem:[%s5573_s29 + $0x104] sm:$0xf] %v311_v1  ;;  %v439_v1 = vld [vmem:[%s5568_s28 + $0x408] sm:$0xf] }
  0x57   : > { %314 = vst [vmem:[%s5573_s29 + $0x108] sm:$0xf] %v313_v2  ;;  %v441_v2 = vld [vmem:[%s5568_s28 + $0x410] sm:$0xf] }
  0x58   : > { %316 = vst [vmem:[%s5573_s29 + $0x10c] sm:$0xf] %v315_v3  ;;  %v443_v3 = vld [vmem:[%s5568_s28 + $0x418] sm:$0xf] }
  0x59   : > { %318 = vst [vmem:[%s5573_s29 + $0x110] sm:$0xf] %v317_v4  ;;  %v445_v4 = vld [vmem:[%s5568_s28 + $0x420] sm:$0xf] }
  0x5a   : > { %320 = vst [vmem:[%s5573_s29 + $0x114] sm:$0xf] %v319_v5  ;;  %v447_v5 = vld [vmem:[%s5568_s28 + $0x428] sm:$0xf] }
  0x5b   : > { %322 = vst [vmem:[%s5573_s29 + $0x118] sm:$0xf] %v321_v6  ;;  %v449_v6 = vld [vmem:[%s5568_s28 + $0x430] sm:$0xf] }
  0x5c   : > { %324 = vst [vmem:[%s5573_s29 + $0x11c] sm:$0xf] %v323_v7  ;;  %v451_v7 = vld [vmem:[%s5568_s28 + $0x438] sm:$0xf] }
  0x5d   : > { %326 = vst [vmem:[%s5573_s29 + $0x120] sm:$0xf] %v325_v8  ;;  %v453_v8 = vld [vmem:[%s5568_s28 + $0x440] sm:$0xf] }
  0x5e   : > { %328 = vst [vmem:[%s5573_s29 + $0x124] sm:$0xf] %v327_v9  ;;  %v455_v9 = vld [vmem:[%s5568_s28 + $0x448] sm:$0xf] }
  0x5f   : > { %330 = vst [vmem:[%s5573_s29 + $0x128] sm:$0xf] %v329_v10  ;;  %v457_v10 = vld [vmem:[%s5568_s28 + $0x450] sm:$0xf] }
  0x60   : > { %332 = vst [vmem:[%s5573_s29 + $0x12c] sm:$0xf] %v331_v11  ;;  %v459_v11 = vld [vmem:[%s5568_s28 + $0x458] sm:$0xf] }
  0x61   : > { %334 = vst [vmem:[%s5573_s29 + $0x130] sm:$0xf] %v333_v12  ;;  %v461_v12 = vld [vmem:[%s5568_s28 + $0x460] sm:$0xf] }
  0x62   : > { %336 = vst [vmem:[%s5573_s29 + $0x134] sm:$0xf] %v335_v13  ;;  %v463_v13 = vld [vmem:[%s5568_s28 + $0x468] sm:$0xf] }
  0x63   : > { %338 = vst [vmem:[%s5573_s29 + $0x138] sm:$0xf] %v337_v14  ;;  %v465_v14 = vld [vmem:[%s5568_s28 + $0x470] sm:$0xf] }
  0x64   : > { %340 = vst [vmem:[%s5573_s29 + $0x13c] sm:$0xf] %v339_v15  ;;  %v467_v15 = vld [vmem:[%s5568_s28 + $0x478] sm:$0xf] }
  0x65   : > { %342 = vst [vmem:[%s5573_s29 + $0x140] sm:$0xf] %v341_v16  ;;  %v469_v16 = vld [vmem:[%s5568_s28 + $0x480] sm:$0xf] }
  0x66   : > { %344 = vst [vmem:[%s5573_s29 + $0x144] sm:$0xf] %v343_v17  ;;  %v471_v17 = vld [vmem:[%s5568_s28 + $0x488] sm:$0xf] }
  0x67   : > { %346 = vst [vmem:[%s5573_s29 + $0x148] sm:$0xf] %v345_v18  ;;  %v473_v18 = vld [vmem:[%s5568_s28 + $0x490] sm:$0xf] }
  0x68   : > { %348 = vst [vmem:[%s5573_s29 + $0x14c] sm:$0xf] %v347_v19  ;;  %v475_v19 = vld [vmem:[%s5568_s28 + $0x498] sm:$0xf] }
  0x69   : > { %350 = vst [vmem:[%s5573_s29 + $0x150] sm:$0xf] %v349_v20  ;;  %v477_v20 = vld [vmem:[%s5568_s28 + $0x4a0] sm:$0xf] }
  0x6a   : > { %352 = vst [vmem:[%s5573_s29 + $0x154] sm:$0xf] %v351_v21  ;;  %v479_v21 = vld [vmem:[%s5568_s28 + $0x4a8] sm:$0xf] }
  0x6b   : > { %354 = vst [vmem:[%s5573_s29 + $0x158] sm:$0xf] %v353_v22  ;;  %v481_v22 = vld [vmem:[%s5568_s28 + $0x4b0] sm:$0xf] }
  0x6c   : > { %356 = vst [vmem:[%s5573_s29 + $0x15c] sm:$0xf] %v355_v23  ;;  %v483_v23 = vld [vmem:[%s5568_s28 + $0x4b8] sm:$0xf] }
  0x6d   : > { %358 = vst [vmem:[%s5573_s29 + $0x160] sm:$0xf] %v357_v24  ;;  %v485_v24 = vld [vmem:[%s5568_s28 + $0x4c0] sm:$0xf] }
  0x6e   : > { %360 = vst [vmem:[%s5573_s29 + $0x164] sm:$0xf] %v359_v25  ;;  %v487_v25 = vld [vmem:[%s5568_s28 + $0x4c8] sm:$0xf] }
  0x6f   : > { %362 = vst [vmem:[%s5573_s29 + $0x168] sm:$0xf] %v361_v26  ;;  %v489_v26 = vld [vmem:[%s5568_s28 + $0x4d0] sm:$0xf] }
  0x70   : > { %364 = vst [vmem:[%s5573_s29 + $0x16c] sm:$0xf] %v363_v27  ;;  %v491_v27 = vld [vmem:[%s5568_s28 + $0x4d8] sm:$0xf] }
  0x71   : > { %366 = vst [vmem:[%s5573_s29 + $0x170] sm:$0xf] %v365_v28  ;;  %v493_v28 = vld [vmem:[%s5568_s28 + $0x4e0] sm:$0xf] }
  0x72   : > { %368 = vst [vmem:[%s5573_s29 + $0x174] sm:$0xf] %v367_v29  ;;  %v495_v29 = vld [vmem:[%s5568_s28 + $0x4e8] sm:$0xf] }
  0x73   : > { %370 = vst [vmem:[%s5573_s29 + $0x178] sm:$0xf] %v369_v30  ;;  %v497_v30 = vld [vmem:[%s5568_s28 + $0x4f0] sm:$0xf] }
  0x74   : > { %372 = vst [vmem:[%s5573_s29 + $0x17c] sm:$0xf] %v371_v31  ;;  %v499_v31 = vld [vmem:[%s5568_s28 + $0x4f8] sm:$0xf] }
  0x75   : > { %374 = vst [vmem:[%s5573_s29 + $0x180] sm:$0xf] %v373_v32  ;;  %v501_v32 = vld [vmem:[%s5568_s28 + $0x500] sm:$0xf] }
  0x76   : > { %376 = vst [vmem:[%s5573_s29 + $0x184] sm:$0xf] %v375_v33  ;;  %v503_v33 = vld [vmem:[%s5568_s28 + $0x508] sm:$0xf] }
  0x77   : > { %378 = vst [vmem:[%s5573_s29 + $0x188] sm:$0xf] %v377_v34  ;;  %v505_v34 = vld [vmem:[%s5568_s28 + $0x510] sm:$0xf] }
  0x78   : > { %380 = vst [vmem:[%s5573_s29 + $0x18c] sm:$0xf] %v379_v35  ;;  %v507_v35 = vld [vmem:[%s5568_s28 + $0x518] sm:$0xf] }
  0x79   : > { %382 = vst [vmem:[%s5573_s29 + $0x190] sm:$0xf] %v381_v36  ;;  %v509_v36 = vld [vmem:[%s5568_s28 + $0x520] sm:$0xf] }
  0x7a   : > { %384 = vst [vmem:[%s5573_s29 + $0x194] sm:$0xf] %v383_v37  ;;  %v511_v37 = vld [vmem:[%s5568_s28 + $0x528] sm:$0xf] }
  0x7b   : > { %386 = vst [vmem:[%s5573_s29 + $0x198] sm:$0xf] %v385_v38  ;;  %v513_v38 = vld [vmem:[%s5568_s28 + $0x530] sm:$0xf] }
  0x7c   : > { %388 = vst [vmem:[%s5573_s29 + $0x19c] sm:$0xf] %v387_v39  ;;  %v515_v39 = vld [vmem:[%s5568_s28 + $0x538] sm:$0xf] }
  0x7d   : > { %390 = vst [vmem:[%s5573_s29 + $0x1a0] sm:$0xf] %v389_v40  ;;  %v517_v40 = vld [vmem:[%s5568_s28 + $0x540] sm:$0xf] }
  0x7e   : > { %392 = vst [vmem:[%s5573_s29 + $0x1a4] sm:$0xf] %v391_v41  ;;  %v519_v41 = vld [vmem:[%s5568_s28 + $0x548] sm:$0xf] }
  0x7f   : > { %394 = vst [vmem:[%s5573_s29 + $0x1a8] sm:$0xf] %v393_v42  ;;  %v521_v42 = vld [vmem:[%s5568_s28 + $0x550] sm:$0xf] }
  0x80   : > { %396 = vst [vmem:[%s5573_s29 + $0x1ac] sm:$0xf] %v395_v43  ;;  %v523_v43 = vld [vmem:[%s5568_s28 + $0x558] sm:$0xf] }
  0x81   : > { %398 = vst [vmem:[%s5573_s29 + $0x1b0] sm:$0xf] %v397_v44  ;;  %v525_v44 = vld [vmem:[%s5568_s28 + $0x560] sm:$0xf] }
  0x82   : > { %400 = vst [vmem:[%s5573_s29 + $0x1b4] sm:$0xf] %v399_v45  ;;  %v527_v45 = vld [vmem:[%s5568_s28 + $0x568] sm:$0xf] }
  0x83   : > { %402 = vst [vmem:[%s5573_s29 + $0x1b8] sm:$0xf] %v401_v46  ;;  %v529_v46 = vld [vmem:[%s5568_s28 + $0x570] sm:$0xf] }
  0x84   : > { %404 = vst [vmem:[%s5573_s29 + $0x1bc] sm:$0xf] %v403_v47  ;;  %v531_v47 = vld [vmem:[%s5568_s28 + $0x578] sm:$0xf] }
  0x85   : > { %406 = vst [vmem:[%s5573_s29 + $0x1c0] sm:$0xf] %v405_v48  ;;  %v533_v48 = vld [vmem:[%s5568_s28 + $0x580] sm:$0xf] }
  0x86   : > { %408 = vst [vmem:[%s5573_s29 + $0x1c4] sm:$0xf] %v407_v49  ;;  %v535_v49 = vld [vmem:[%s5568_s28 + $0x588] sm:$0xf] }
  0x87   : > { %410 = vst [vmem:[%s5573_s29 + $0x1c8] sm:$0xf] %v409_v50  ;;  %v537_v50 = vld [vmem:[%s5568_s28 + $0x590] sm:$0xf] }
  0x88   : > { %412 = vst [vmem:[%s5573_s29 + $0x1cc] sm:$0xf] %v411_v51  ;;  %v539_v51 = vld [vmem:[%s5568_s28 + $0x598] sm:$0xf] }
  0x89   : > { %414 = vst [vmem:[%s5573_s29 + $0x1d0] sm:$0xf] %v413_v52  ;;  %v541_v52 = vld [vmem:[%s5568_s28 + $0x5a0] sm:$0xf] }
  0x8a   : > { %416 = vst [vmem:[%s5573_s29 + $0x1d4] sm:$0xf] %v415_v53  ;;  %v543_v53 = vld [vmem:[%s5568_s28 + $0x5a8] sm:$0xf] }
  0x8b   : > { %418 = vst [vmem:[%s5573_s29 + $0x1d8] sm:$0xf] %v417_v54  ;;  %v545_v54 = vld [vmem:[%s5568_s28 + $0x5b0] sm:$0xf] }
  0x8c   : > { %420 = vst [vmem:[%s5573_s29 + $0x1dc] sm:$0xf] %v419_v55  ;;  %v547_v55 = vld [vmem:[%s5568_s28 + $0x5b8] sm:$0xf] }
  0x8d   : > { %422 = vst [vmem:[%s5573_s29 + $0x1e0] sm:$0xf] %v421_v56  ;;  %v549_v56 = vld [vmem:[%s5568_s28 + $0x5c0] sm:$0xf] }
  0x8e   : > { %424 = vst [vmem:[%s5573_s29 + $0x1e4] sm:$0xf] %v423_v57  ;;  %v551_v57 = vld [vmem:[%s5568_s28 + $0x5c8] sm:$0xf] }
  0x8f   : > { %426 = vst [vmem:[%s5573_s29 + $0x1e8] sm:$0xf] %v425_v58  ;;  %v553_v58 = vld [vmem:[%s5568_s28 + $0x5d0] sm:$0xf] }
  0x90   : > { %428 = vst [vmem:[%s5573_s29 + $0x1ec] sm:$0xf] %v427_v59  ;;  %v555_v59 = vld [vmem:[%s5568_s28 + $0x5d8] sm:$0xf] }
  0x91   : > { %430 = vst [vmem:[%s5573_s29 + $0x1f0] sm:$0xf] %v429_v60  ;;  %v557_v60 = vld [vmem:[%s5568_s28 + $0x5e0] sm:$0xf] }
  0x92   : > { %432 = vst [vmem:[%s5573_s29 + $0x1f4] sm:$0xf] %v431_v61  ;;  %v559_v61 = vld [vmem:[%s5568_s28 + $0x5e8] sm:$0xf] }
  0x93   : > { %434 = vst [vmem:[%s5573_s29 + $0x1f8] sm:$0xf] %v433_v62  ;;  %v561_v62 = vld [vmem:[%s5568_s28 + $0x5f0] sm:$0xf] }
  0x94   : > { %436 = vst [vmem:[%s5573_s29 + $0x1fc] sm:$0xf] %v435_v63  ;;  %v563_v63 = vld [vmem:[%s5568_s28 + $0x5f8] sm:$0xf] }
  0x95   : > { %438 = vst [vmem:[%s5573_s29 + $0x200] sm:$0xf] %v437_v0  ;;  %v565_v0 = vld [vmem:[%s5568_s28 + $0x600] sm:$0xf] }
  0x96   : > { %440 = vst [vmem:[%s5573_s29 + $0x204] sm:$0xf] %v439_v1  ;;  %v567_v1 = vld [vmem:[%s5568_s28 + $0x608] sm:$0xf] }
  0x97   : > { %442 = vst [vmem:[%s5573_s29 + $0x208] sm:$0xf] %v441_v2  ;;  %v569_v2 = vld [vmem:[%s5568_s28 + $0x610] sm:$0xf] }
  0x98   : > { %444 = vst [vmem:[%s5573_s29 + $0x20c] sm:$0xf] %v443_v3  ;;  %v571_v3 = vld [vmem:[%s5568_s28 + $0x618] sm:$0xf] }
  0x99   : > { %446 = vst [vmem:[%s5573_s29 + $0x210] sm:$0xf] %v445_v4  ;;  %v573_v4 = vld [vmem:[%s5568_s28 + $0x620] sm:$0xf] }
  0x9a   : > { %448 = vst [vmem:[%s5573_s29 + $0x214] sm:$0xf] %v447_v5  ;;  %v575_v5 = vld [vmem:[%s5568_s28 + $0x628] sm:$0xf] }
  0x9b   : > { %450 = vst [vmem:[%s5573_s29 + $0x218] sm:$0xf] %v449_v6  ;;  %v577_v6 = vld [vmem:[%s5568_s28 + $0x630] sm:$0xf] }
  0x9c   : > { %452 = vst [vmem:[%s5573_s29 + $0x21c] sm:$0xf] %v451_v7  ;;  %v579_v7 = vld [vmem:[%s5568_s28 + $0x638] sm:$0xf] }
  0x9d   : > { %454 = vst [vmem:[%s5573_s29 + $0x220] sm:$0xf] %v453_v8  ;;  %v581_v8 = vld [vmem:[%s5568_s28 + $0x640] sm:$0xf] }
  0x9e   : > { %456 = vst [vmem:[%s5573_s29 + $0x224] sm:$0xf] %v455_v9  ;;  %v583_v9 = vld [vmem:[%s5568_s28 + $0x648] sm:$0xf] }
  0x9f   : > { %458 = vst [vmem:[%s5573_s29 + $0x228] sm:$0xf] %v457_v10  ;;  %v585_v10 = vld [vmem:[%s5568_s28 + $0x650] sm:$0xf] }
  0xa0   : > { %460 = vst [vmem:[%s5573_s29 + $0x22c] sm:$0xf] %v459_v11  ;;  %v587_v11 = vld [vmem:[%s5568_s28 + $0x658] sm:$0xf] }
  0xa1   : > { %462 = vst [vmem:[%s5573_s29 + $0x230] sm:$0xf] %v461_v12  ;;  %v589_v12 = vld [vmem:[%s5568_s28 + $0x660] sm:$0xf] }
  0xa2   : > { %464 = vst [vmem:[%s5573_s29 + $0x234] sm:$0xf] %v463_v13  ;;  %v591_v13 = vld [vmem:[%s5568_s28 + $0x668] sm:$0xf] }
  0xa3   : > { %466 = vst [vmem:[%s5573_s29 + $0x238] sm:$0xf] %v465_v14  ;;  %v593_v14 = vld [vmem:[%s5568_s28 + $0x670] sm:$0xf] }
  0xa4   : > { %468 = vst [vmem:[%s5573_s29 + $0x23c] sm:$0xf] %v467_v15  ;;  %v595_v15 = vld [vmem:[%s5568_s28 + $0x678] sm:$0xf] }
  0xa5   : > { %470 = vst [vmem:[%s5573_s29 + $0x240] sm:$0xf] %v469_v16  ;;  %v597_v16 = vld [vmem:[%s5568_s28 + $0x680] sm:$0xf] }
  0xa6   : > { %472 = vst [vmem:[%s5573_s29 + $0x244] sm:$0xf] %v471_v17  ;;  %v599_v17 = vld [vmem:[%s5568_s28 + $0x688] sm:$0xf] }
  0xa7   : > { %474 = vst [vmem:[%s5573_s29 + $0x248] sm:$0xf] %v473_v18  ;;  %v601_v18 = vld [vmem:[%s5568_s28 + $0x690] sm:$0xf] }
  0xa8   : > { %476 = vst [vmem:[%s5573_s29 + $0x24c] sm:$0xf] %v475_v19  ;;  %v603_v19 = vld [vmem:[%s5568_s28 + $0x698] sm:$0xf] }
  0xa9   : > { %478 = vst [vmem:[%s5573_s29 + $0x250] sm:$0xf] %v477_v20  ;;  %v605_v20 = vld [vmem:[%s5568_s28 + $0x6a0] sm:$0xf] }
  0xaa   : > { %480 = vst [vmem:[%s5573_s29 + $0x254] sm:$0xf] %v479_v21  ;;  %v607_v21 = vld [vmem:[%s5568_s28 + $0x6a8] sm:$0xf] }
  0xab   : > { %482 = vst [vmem:[%s5573_s29 + $0x258] sm:$0xf] %v481_v22  ;;  %v609_v22 = vld [vmem:[%s5568_s28 + $0x6b0] sm:$0xf] }
  0xac   : > { %484 = vst [vmem:[%s5573_s29 + $0x25c] sm:$0xf] %v483_v23  ;;  %v611_v23 = vld [vmem:[%s5568_s28 + $0x6b8] sm:$0xf] }
  0xad   : > { %486 = vst [vmem:[%s5573_s29 + $0x260] sm:$0xf] %v485_v24  ;;  %v613_v24 = vld [vmem:[%s5568_s28 + $0x6c0] sm:$0xf] }
  0xae   : > { %488 = vst [vmem:[%s5573_s29 + $0x264] sm:$0xf] %v487_v25  ;;  %v615_v25 = vld [vmem:[%s5568_s28 + $0x6c8] sm:$0xf] }
  0xaf   : > { %490 = vst [vmem:[%s5573_s29 + $0x268] sm:$0xf] %v489_v26  ;;  %v617_v26 = vld [vmem:[%s5568_s28 + $0x6d0] sm:$0xf] }
  0xb0   : > { %492 = vst [vmem:[%s5573_s29 + $0x26c] sm:$0xf] %v491_v27  ;;  %v619_v27 = vld [vmem:[%s5568_s28 + $0x6d8] sm:$0xf] }
  0xb1   : > { %494 = vst [vmem:[%s5573_s29 + $0x270] sm:$0xf] %v493_v28  ;;  %v621_v28 = vld [vmem:[%s5568_s28 + $0x6e0] sm:$0xf] }
  0xb2   : > { %496 = vst [vmem:[%s5573_s29 + $0x274] sm:$0xf] %v495_v29  ;;  %v623_v29 = vld [vmem:[%s5568_s28 + $0x6e8] sm:$0xf] }
  0xb3   : > { %498 = vst [vmem:[%s5573_s29 + $0x278] sm:$0xf] %v497_v30  ;;  %v625_v30 = vld [vmem:[%s5568_s28 + $0x6f0] sm:$0xf] }
  0xb4   : > { %500 = vst [vmem:[%s5573_s29 + $0x27c] sm:$0xf] %v499_v31  ;;  %v627_v31 = vld [vmem:[%s5568_s28 + $0x6f8] sm:$0xf] }
  0xb5   : > { %502 = vst [vmem:[%s5573_s29 + $0x280] sm:$0xf] %v501_v32  ;;  %v629_v32 = vld [vmem:[%s5568_s28 + $0x700] sm:$0xf] }
  0xb6   : > { %504 = vst [vmem:[%s5573_s29 + $0x284] sm:$0xf] %v503_v33  ;;  %v631_v33 = vld [vmem:[%s5568_s28 + $0x708] sm:$0xf] }
  0xb7   : > { %506 = vst [vmem:[%s5573_s29 + $0x288] sm:$0xf] %v505_v34  ;;  %v633_v34 = vld [vmem:[%s5568_s28 + $0x710] sm:$0xf] }
  0xb8   : > { %508 = vst [vmem:[%s5573_s29 + $0x28c] sm:$0xf] %v507_v35  ;;  %v635_v35 = vld [vmem:[%s5568_s28 + $0x718] sm:$0xf] }
  0xb9   : > { %510 = vst [vmem:[%s5573_s29 + $0x290] sm:$0xf] %v509_v36  ;;  %v637_v36 = vld [vmem:[%s5568_s28 + $0x720] sm:$0xf] }
  0xba   : > { %512 = vst [vmem:[%s5573_s29 + $0x294] sm:$0xf] %v511_v37  ;;  %v639_v37 = vld [vmem:[%s5568_s28 + $0x728] sm:$0xf] }
  0xbb   : > { %514 = vst [vmem:[%s5573_s29 + $0x298] sm:$0xf] %v513_v38  ;;  %v641_v38 = vld [vmem:[%s5568_s28 + $0x730] sm:$0xf] }
  0xbc   : > { %516 = vst [vmem:[%s5573_s29 + $0x29c] sm:$0xf] %v515_v39  ;;  %v643_v39 = vld [vmem:[%s5568_s28 + $0x738] sm:$0xf] }
  0xbd   : > { %518 = vst [vmem:[%s5573_s29 + $0x2a0] sm:$0xf] %v517_v40  ;;  %v645_v40 = vld [vmem:[%s5568_s28 + $0x740] sm:$0xf] }
  0xbe   : > { %520 = vst [vmem:[%s5573_s29 + $0x2a4] sm:$0xf] %v519_v41  ;;  %v647_v41 = vld [vmem:[%s5568_s28 + $0x748] sm:$0xf] }
  0xbf   : > { %522 = vst [vmem:[%s5573_s29 + $0x2a8] sm:$0xf] %v521_v42  ;;  %v649_v42 = vld [vmem:[%s5568_s28 + $0x750] sm:$0xf] }
  0xc0   : > { %524 = vst [vmem:[%s5573_s29 + $0x2ac] sm:$0xf] %v523_v43  ;;  %v651_v43 = vld [vmem:[%s5568_s28 + $0x758] sm:$0xf] }
  0xc1   : > { %526 = vst [vmem:[%s5573_s29 + $0x2b0] sm:$0xf] %v525_v44  ;;  %v653_v44 = vld [vmem:[%s5568_s28 + $0x760] sm:$0xf] }
  0xc2   : > { %528 = vst [vmem:[%s5573_s29 + $0x2b4] sm:$0xf] %v527_v45  ;;  %v655_v45 = vld [vmem:[%s5568_s28 + $0x768] sm:$0xf] }
  0xc3   : > { %530 = vst [vmem:[%s5573_s29 + $0x2b8] sm:$0xf] %v529_v46  ;;  %v657_v46 = vld [vmem:[%s5568_s28 + $0x770] sm:$0xf] }
  0xc4   : > { %532 = vst [vmem:[%s5573_s29 + $0x2bc] sm:$0xf] %v531_v47  ;;  %v659_v47 = vld [vmem:[%s5568_s28 + $0x778] sm:$0xf] }
  0xc5   : > { %534 = vst [vmem:[%s5573_s29 + $0x2c0] sm:$0xf] %v533_v48  ;;  %v661_v48 = vld [vmem:[%s5568_s28 + $0x780] sm:$0xf] }
  0xc6   : > { %536 = vst [vmem:[%s5573_s29 + $0x2c4] sm:$0xf] %v535_v49  ;;  %v663_v49 = vld [vmem:[%s5568_s28 + $0x788] sm:$0xf] }
  0xc7   : > { %538 = vst [vmem:[%s5573_s29 + $0x2c8] sm:$0xf] %v537_v50  ;;  %v665_v50 = vld [vmem:[%s5568_s28 + $0x790] sm:$0xf] }
  0xc8   : > { %540 = vst [vmem:[%s5573_s29 + $0x2cc] sm:$0xf] %v539_v51  ;;  %v667_v51 = vld [vmem:[%s5568_s28 + $0x798] sm:$0xf] }
  0xc9   : > { %542 = vst [vmem:[%s5573_s29 + $0x2d0] sm:$0xf] %v541_v52  ;;  %v669_v52 = vld [vmem:[%s5568_s28 + $0x7a0] sm:$0xf] }
  0xca   : > { %544 = vst [vmem:[%s5573_s29 + $0x2d4] sm:$0xf] %v543_v53  ;;  %v671_v53 = vld [vmem:[%s5568_s28 + $0x7a8] sm:$0xf] }
  0xcb   : > { %546 = vst [vmem:[%s5573_s29 + $0x2d8] sm:$0xf] %v545_v54  ;;  %v673_v54 = vld [vmem:[%s5568_s28 + $0x7b0] sm:$0xf] }
  0xcc   : > { %548 = vst [vmem:[%s5573_s29 + $0x2dc] sm:$0xf] %v547_v55  ;;  %v675_v55 = vld [vmem:[%s5568_s28 + $0x7b8] sm:$0xf] }
  0xcd   : > { %550 = vst [vmem:[%s5573_s29 + $0x2e0] sm:$0xf] %v549_v56  ;;  %v677_v56 = vld [vmem:[%s5568_s28 + $0x7c0] sm:$0xf] }
  0xce   : > { %552 = vst [vmem:[%s5573_s29 + $0x2e4] sm:$0xf] %v551_v57  ;;  %v679_v57 = vld [vmem:[%s5568_s28 + $0x7c8] sm:$0xf] }
  0xcf   : > { %554 = vst [vmem:[%s5573_s29 + $0x2e8] sm:$0xf] %v553_v58  ;;  %v681_v58 = vld [vmem:[%s5568_s28 + $0x7d0] sm:$0xf] }
  0xd0   : > { %556 = vst [vmem:[%s5573_s29 + $0x2ec] sm:$0xf] %v555_v59  ;;  %v683_v59 = vld [vmem:[%s5568_s28 + $0x7d8] sm:$0xf] }
  0xd1   : > { %558 = vst [vmem:[%s5573_s29 + $0x2f0] sm:$0xf] %v557_v60  ;;  %v685_v60 = vld [vmem:[%s5568_s28 + $0x7e0] sm:$0xf] }
  0xd2   : > { %560 = vst [vmem:[%s5573_s29 + $0x2f4] sm:$0xf] %v559_v61  ;;  %v687_v61 = vld [vmem:[%s5568_s28 + $0x7e8] sm:$0xf] }
  0xd3   : > { %562 = vst [vmem:[%s5573_s29 + $0x2f8] sm:$0xf] %v561_v62  ;;  %v689_v62 = vld [vmem:[%s5568_s28 + $0x7f0] sm:$0xf] }
  0xd4   : > { %564 = vst [vmem:[%s5573_s29 + $0x2fc] sm:$0xf] %v563_v63  ;;  %v691_v63 = vld [vmem:[%s5568_s28 + $0x7f8] sm:$0xf] }
  0xd5   : > { %566 = vst [vmem:[%s5573_s29 + $0x300] sm:$0xf] %v565_v0  ;;  %v693_v0 = vld [vmem:[%s5568_s28 + $0x800] sm:$0xf] }
  0xd6   : > { %568 = vst [vmem:[%s5573_s29 + $0x304] sm:$0xf] %v567_v1  ;;  %v695_v1 = vld [vmem:[%s5568_s28 + $0x808] sm:$0xf] }
  0xd7   : > { %570 = vst [vmem:[%s5573_s29 + $0x308] sm:$0xf] %v569_v2  ;;  %v697_v2 = vld [vmem:[%s5568_s28 + $0x810] sm:$0xf] }
  0xd8   : > { %572 = vst [vmem:[%s5573_s29 + $0x30c] sm:$0xf] %v571_v3  ;;  %v699_v3 = vld [vmem:[%s5568_s28 + $0x818] sm:$0xf] }
  0xd9   : > { %574 = vst [vmem:[%s5573_s29 + $0x310] sm:$0xf] %v573_v4  ;;  %v701_v4 = vld [vmem:[%s5568_s28 + $0x820] sm:$0xf] }
  0xda   : > { %576 = vst [vmem:[%s5573_s29 + $0x314] sm:$0xf] %v575_v5  ;;  %v703_v5 = vld [vmem:[%s5568_s28 + $0x828] sm:$0xf] }
  0xdb   : > { %578 = vst [vmem:[%s5573_s29 + $0x318] sm:$0xf] %v577_v6  ;;  %v705_v6 = vld [vmem:[%s5568_s28 + $0x830] sm:$0xf] }
  0xdc   : > { %580 = vst [vmem:[%s5573_s29 + $0x31c] sm:$0xf] %v579_v7  ;;  %v707_v7 = vld [vmem:[%s5568_s28 + $0x838] sm:$0xf] }
  0xdd   : > { %582 = vst [vmem:[%s5573_s29 + $0x320] sm:$0xf] %v581_v8  ;;  %v709_v8 = vld [vmem:[%s5568_s28 + $0x840] sm:$0xf] }
  0xde   : > { %584 = vst [vmem:[%s5573_s29 + $0x324] sm:$0xf] %v583_v9  ;;  %v711_v9 = vld [vmem:[%s5568_s28 + $0x848] sm:$0xf] }
  0xdf   : > { %586 = vst [vmem:[%s5573_s29 + $0x328] sm:$0xf] %v585_v10  ;;  %v713_v10 = vld [vmem:[%s5568_s28 + $0x850] sm:$0xf] }
  0xe0   : > { %588 = vst [vmem:[%s5573_s29 + $0x32c] sm:$0xf] %v587_v11  ;;  %v715_v11 = vld [vmem:[%s5568_s28 + $0x858] sm:$0xf] }
  0xe1   : > { %590 = vst [vmem:[%s5573_s29 + $0x330] sm:$0xf] %v589_v12  ;;  %v717_v12 = vld [vmem:[%s5568_s28 + $0x860] sm:$0xf] }
  0xe2   : > { %592 = vst [vmem:[%s5573_s29 + $0x334] sm:$0xf] %v591_v13  ;;  %v719_v13 = vld [vmem:[%s5568_s28 + $0x868] sm:$0xf] }
  0xe3   : > { %594 = vst [vmem:[%s5573_s29 + $0x338] sm:$0xf] %v593_v14  ;;  %v721_v14 = vld [vmem:[%s5568_s28 + $0x870] sm:$0xf] }
  0xe4   : > { %596 = vst [vmem:[%s5573_s29 + $0x33c] sm:$0xf] %v595_v15  ;;  %v723_v15 = vld [vmem:[%s5568_s28 + $0x878] sm:$0xf] }
  0xe5   : > { %598 = vst [vmem:[%s5573_s29 + $0x340] sm:$0xf] %v597_v16  ;;  %v725_v16 = vld [vmem:[%s5568_s28 + $0x880] sm:$0xf] }
  0xe6   : > { %600 = vst [vmem:[%s5573_s29 + $0x344] sm:$0xf] %v599_v17  ;;  %v727_v17 = vld [vmem:[%s5568_s28 + $0x888] sm:$0xf] }
  0xe7   : > { %602 = vst [vmem:[%s5573_s29 + $0x348] sm:$0xf] %v601_v18  ;;  %v729_v18 = vld [vmem:[%s5568_s28 + $0x890] sm:$0xf] }
  0xe8   : > { %604 = vst [vmem:[%s5573_s29 + $0x34c] sm:$0xf] %v603_v19  ;;  %v731_v19 = vld [vmem:[%s5568_s28 + $0x898] sm:$0xf] }
  0xe9   : > { %606 = vst [vmem:[%s5573_s29 + $0x350] sm:$0xf] %v605_v20  ;;  %v733_v20 = vld [vmem:[%s5568_s28 + $0x8a0] sm:$0xf] }
  0xea   : > { %608 = vst [vmem:[%s5573_s29 + $0x354] sm:$0xf] %v607_v21  ;;  %v735_v21 = vld [vmem:[%s5568_s28 + $0x8a8] sm:$0xf] }
  0xeb   : > { %610 = vst [vmem:[%s5573_s29 + $0x358] sm:$0xf] %v609_v22  ;;  %v737_v22 = vld [vmem:[%s5568_s28 + $0x8b0] sm:$0xf] }
  0xec   : > { %612 = vst [vmem:[%s5573_s29 + $0x35c] sm:$0xf] %v611_v23  ;;  %v739_v23 = vld [vmem:[%s5568_s28 + $0x8b8] sm:$0xf] }
  0xed   : > { %614 = vst [vmem:[%s5573_s29 + $0x360] sm:$0xf] %v613_v24  ;;  %v741_v24 = vld [vmem:[%s5568_s28 + $0x8c0] sm:$0xf] }
  0xee   : > { %616 = vst [vmem:[%s5573_s29 + $0x364] sm:$0xf] %v615_v25  ;;  %v743_v25 = vld [vmem:[%s5568_s28 + $0x8c8] sm:$0xf] }
  0xef   : > { %618 = vst [vmem:[%s5573_s29 + $0x368] sm:$0xf] %v617_v26  ;;  %v745_v26 = vld [vmem:[%s5568_s28 + $0x8d0] sm:$0xf] }
  0xf0   : > { %620 = vst [vmem:[%s5573_s29 + $0x36c] sm:$0xf] %v619_v27  ;;  %v747_v27 = vld [vmem:[%s5568_s28 + $0x8d8] sm:$0xf] }
  0xf1   : > { %622 = vst [vmem:[%s5573_s29 + $0x370] sm:$0xf] %v621_v28  ;;  %v749_v28 = vld [vmem:[%s5568_s28 + $0x8e0] sm:$0xf] }
  0xf2   : > { %624 = vst [vmem:[%s5573_s29 + $0x374] sm:$0xf] %v623_v29  ;;  %v751_v29 = vld [vmem:[%s5568_s28 + $0x8e8] sm:$0xf] }
  0xf3   : > { %626 = vst [vmem:[%s5573_s29 + $0x378] sm:$0xf] %v625_v30  ;;  %v753_v30 = vld [vmem:[%s5568_s28 + $0x8f0] sm:$0xf] }
  0xf4   : > { %628 = vst [vmem:[%s5573_s29 + $0x37c] sm:$0xf] %v627_v31  ;;  %v755_v31 = vld [vmem:[%s5568_s28 + $0x8f8] sm:$0xf] }
  0xf5   : > { %630 = vst [vmem:[%s5573_s29 + $0x380] sm:$0xf] %v629_v32 }
  0xf6   : > { %632 = vst [vmem:[%s5573_s29 + $0x384] sm:$0xf] %v631_v33 }
  0xf7   : > { %634 = vst [vmem:[%s5573_s29 + $0x388] sm:$0xf] %v633_v34 }
  0xf8   : > { %636 = vst [vmem:[%s5573_s29 + $0x38c] sm:$0xf] %v635_v35 }
  0xf9   : > { %638 = vst [vmem:[%s5573_s29 + $0x390] sm:$0xf] %v637_v36 }
  0xfa   : > { %640 = vst [vmem:[%s5573_s29 + $0x394] sm:$0xf] %v639_v37 }
  0xfb   : > { %642 = vst [vmem:[%s5573_s29 + $0x398] sm:$0xf] %v641_v38 }
  0xfc   : > { %644 = vst [vmem:[%s5573_s29 + $0x39c] sm:$0xf] %v643_v39 }
  0xfd   : > { %646 = vst [vmem:[%s5573_s29 + $0x3a0] sm:$0xf] %v645_v40 }
  0xfe   : > { %648 = vst [vmem:[%s5573_s29 + $0x3a4] sm:$0xf] %v647_v41 }
  0xff   : > { %650 = vst [vmem:[%s5573_s29 + $0x3a8] sm:$0xf] %v649_v42 }
 0x100   : > { %652 = vst [vmem:[%s5573_s29 + $0x3ac] sm:$0xf] %v651_v43 }
 0x101   : > { %654 = vst [vmem:[%s5573_s29 + $0x3b0] sm:$0xf] %v653_v44 }
 0x102   : > { %656 = vst [vmem:[%s5573_s29 + $0x3b4] sm:$0xf] %v655_v45 }
 0x103   : > { %658 = vst [vmem:[%s5573_s29 + $0x3b8] sm:$0xf] %v657_v46 }
 0x104   : > { %660 = vst [vmem:[%s5573_s29 + $0x3bc] sm:$0xf] %v659_v47 }
 0x105   : > { %662 = vst [vmem:[%s5573_s29 + $0x3c0] sm:$0xf] %v661_v48 }
 0x106   : > { %664 = vst [vmem:[%s5573_s29 + $0x3c4] sm:$0xf] %v663_v49 }
 0x107   : > { %666 = vst [vmem:[%s5573_s29 + $0x3c8] sm:$0xf] %v665_v50 }
 0x108   : > { %668 = vst [vmem:[%s5573_s29 + $0x3cc] sm:$0xf] %v667_v51 }
 0x109   : > { %670 = vst [vmem:[%s5573_s29 + $0x3d0] sm:$0xf] %v669_v52 }
 0x10a   : > { %672 = vst [vmem:[%s5573_s29 + $0x3d4] sm:$0xf] %v671_v53 }
 0x10b   : > { %674 = vst [vmem:[%s5573_s29 + $0x3d8] sm:$0xf] %v673_v54 }
 0x10c   : > { %676 = vst [vmem:[%s5573_s29 + $0x3dc] sm:$0xf] %v675_v55 }
 0x10d   : > { %678 = vst [vmem:[%s5573_s29 + $0x3e0] sm:$0xf] %v677_v56 }
 0x10e   : > { %680 = vst [vmem:[%s5573_s29 + $0x3e4] sm:$0xf] %v679_v57 }
 0x10f   : > { %682 = vst [vmem:[%s5573_s29 + $0x3e8] sm:$0xf] %v681_v58 }
 0x110   : > { %684 = vst [vmem:[%s5573_s29 + $0x3ec] sm:$0xf] %v683_v59 }
 0x111   : > { %686 = vst [vmem:[%s5573_s29 + $0x3f0] sm:$0xf] %v685_v60 }
 0x112   : > { %688 = vst [vmem:[%s5573_s29 + $0x3f4] sm:$0xf] %v687_v61 }
 0x113   : > { %690 = vst [vmem:[%s5573_s29 + $0x3f8] sm:$0xf] %v689_v62 }
 0x114   : > { %692 = vst [vmem:[%s5573_s29 + $0x3fc] sm:$0xf] %v691_v63 }
 0x115   : > { %694 = vst [vmem:[%s5573_s29 + $0x400] sm:$0xf] %v693_v0 }
 0x116   : > { %696 = vst [vmem:[%s5573_s29 + $0x404] sm:$0xf] %v695_v1 }
 0x117   : > { %698 = vst [vmem:[%s5573_s29 + $0x408] sm:$0xf] %v697_v2 }
 0x118   : > { %700 = vst [vmem:[%s5573_s29 + $0x40c] sm:$0xf] %v699_v3 }
 0x119   : > { %702 = vst [vmem:[%s5573_s29 + $0x410] sm:$0xf] %v701_v4 }
 0x11a   : > { %704 = vst [vmem:[%s5573_s29 + $0x414] sm:$0xf] %v703_v5 }
 0x11b   : > { %706 = vst [vmem:[%s5573_s29 + $0x418] sm:$0xf] %v705_v6 }
 0x11c   : > { %708 = vst [vmem:[%s5573_s29 + $0x41c] sm:$0xf] %v707_v7 }
 0x11d   : > { %710 = vst [vmem:[%s5573_s29 + $0x420] sm:$0xf] %v709_v8 }
 0x11e   : > { %712 = vst [vmem:[%s5573_s29 + $0x424] sm:$0xf] %v711_v9 }
 0x11f   : > { %714 = vst [vmem:[%s5573_s29 + $0x428] sm:$0xf] %v713_v10 }
 0x120   : > { %716 = vst [vmem:[%s5573_s29 + $0x42c] sm:$0xf] %v715_v11 }
 0x121   : > { %718 = vst [vmem:[%s5573_s29 + $0x430] sm:$0xf] %v717_v12 }
 0x122   : > { %720 = vst [vmem:[%s5573_s29 + $0x434] sm:$0xf] %v719_v13 }
 0x123   : > { %722 = vst [vmem:[%s5573_s29 + $0x438] sm:$0xf] %v721_v14 }
 0x124   : > { %724 = vst [vmem:[%s5573_s29 + $0x43c] sm:$0xf] %v723_v15 }
 0x125   : > { %726 = vst [vmem:[%s5573_s29 + $0x440] sm:$0xf] %v725_v16 }
 0x126   : > { %728 = vst [vmem:[%s5573_s29 + $0x444] sm:$0xf] %v727_v17 }
 0x127   : > { %730 = vst [vmem:[%s5573_s29 + $0x448] sm:$0xf] %v729_v18 }
 0x128   : > { %732 = vst [vmem:[%s5573_s29 + $0x44c] sm:$0xf] %v731_v19 }
 0x129   : > { %734 = vst [vmem:[%s5573_s29 + $0x450] sm:$0xf] %v733_v20 }
 0x12a   : > { %736 = vst [vmem:[%s5573_s29 + $0x454] sm:$0xf] %v735_v21 }
 0x12b   : > { %738 = vst [vmem:[%s5573_s29 + $0x458] sm:$0xf] %v737_v22 }
 0x12c   : > { %740 = vst [vmem:[%s5573_s29 + $0x45c] sm:$0xf] %v739_v23 }
 0x12d   : > { %742 = vst [vmem:[%s5573_s29 + $0x460] sm:$0xf] %v741_v24 }
 0x12e   : > { %744 = vst [vmem:[%s5573_s29 + $0x464] sm:$0xf] %v743_v25 }
 0x12f   : > { %746 = vst [vmem:[%s5573_s29 + $0x468] sm:$0xf] %v745_v26 }
 0x130   : > { %748 = vst [vmem:[%s5573_s29 + $0x46c] sm:$0xf] %v747_v27 }
 0x131   : > { %750 = vst [vmem:[%s5573_s29 + $0x470] sm:$0xf] %v749_v28 }
 0x132   : > { %752 = vst [vmem:[%s5573_s29 + $0x474] sm:$0xf] %v751_v29 }
 0x133   : > { %754 = vst [vmem:[%s5573_s29 + $0x478] sm:$0xf] %v753_v30 }
 0x134   : > { %756 = vst [vmem:[%s5573_s29 + $0x47c] sm:$0xf] %v755_v31 }
 0x135 PF: > { %p4484_p8 = scmp.ge.s32.totalorder %s5498_s16, 1  ;;  %p2539_p9 = scmp.lt.s32.totalorder %s5498_s16, 3 }
 0x137   : > { %p2540_p10 = pnand %p4484_p8, %p2539_p9 }
 0x138   : > { %s2546_s30 = sand.u32 (!%p2540_p10), 1, %s5482_s12   ;;  %p2584_p11 = scmp.lt.s32.totalorder (!%p2540_p10), %s5490_s14, 1 }
 0x139   : > { %2543 = sbr.rel (%p2540_p10) target bundleno = 638 (0x27e), region = 80  ;;  %s4485_s25 = sshll.u32 (!%p2540_p10), %s2546_s30, 4 }
 0x13a   : > { %s5418_s4 = smul.u32 (!%p2540_p10), 1152, %s2546_s30  ;;  %s2576_s26 = scalar_lea.vmem (!%p2540_p10), [#allocation3], %s4485_s25 }
 0x13c   : > { %s6153_s5 = scalar_lea.vmem (!%p2540_p10), [#allocation2], %s5418_s4 }
 0x13e   : > { %v5253_v32 = vld [vmem:[%s6153_s5 + $0x38] sm:$0xff]  ;;  %v5252_v36 = vld [vmem:[%s6153_s5 + $0x30] sm:$0xff]  ;;  %v5251_v40 = vld [vmem:[%s6153_s5 + $0x28] sm:$0xff]  ;;  %s6195_s10 = scalar_select %p2584_p11, %s5490_s14, 1 }
 0x13f   : > { %v5261_v33 = vld [vmem:[%s6153_s5 + $0x78] sm:$0xff]  ;;  %3960 = vmatpush.bf16.msra.mxu0 %v5253_v32  ;;  %v5260_v37 = vld [vmem:[%s6153_s5 + $0x70] sm:$0xff]  ;;  %v5259_v41 = vld [vmem:[%s6153_s5 + $0x68] sm:$0xff]  ;;  %s5207_s12 = sshll.u32 (%p5555_p6), %s5490_s14, 2 }
 0x140   : > { %v5269_v34 = vld [vmem:[%s6153_s5 + $0xb8] sm:$0xff]  ;;  %3979 = vmatpush.bf16.msra.mxu1 %v5261_v33  ;;  %v5268_v38 = vld [vmem:[%s6153_s5 + $0xb0] sm:$0xff]  ;;  %v5267_v42 = vld [vmem:[%s6153_s5 + $0xa8] sm:$0xff]  ;;  %s2586_s8 = scalar_lea.vmem %s6553_s2, %s6195_s10  ;;  %s4325_s28 = scalar_lea.vmem (%p5555_p6), %s6554_s3, %s5207_s12 }
 0x141   : > { %v5277_v35 = vld [vmem:[%s6153_s5 + $0xf8] sm:$0xff]  ;;  %3998 = vmatpush.bf16.msra.mxu2 %v5269_v34  ;;  %v5276_v39 = vld [vmem:[%s6153_s5 + $0xf0] sm:$0xff]  ;;  %v5275_v43 = vld [vmem:[%s6153_s5 + $0xe8] sm:$0xff] }
 0x142   : > { %4017 = vmatpush.bf16.msra.mxu3 %v5277_v35  ;;  %v5250_v44 = vld [vmem:[%s6153_s5 + $0x20] sm:$0xff]  ;;  %v5249_v48 = vld [vmem:[%s6153_s5 + $0x18] sm:$0xff]  ;;  %v5248_v52 = vld [vmem:[%s6153_s5 + $0x10] sm:$0xff] }
 0x143   : > { %3961 = vmatpush.bf16.msra.mxu0 %v5252_v36  ;;  %v5258_v45 = vld [vmem:[%s6153_s5 + $0x60] sm:$0xff]  ;;  %v5257_v49 = vld [vmem:[%s6153_s5 + $0x58] sm:$0xff]  ;;  %v5256_v53 = vld [vmem:[%s6153_s5 + $0x50] sm:$0xff] }
 0x144   : > { %3980 = vmatpush.bf16.msra.mxu1 %v5260_v37  ;;  %v5266_v46 = vld [vmem:[%s6153_s5 + $0xa0] sm:$0xff]  ;;  %v5265_v50 = vld [vmem:[%s6153_s5 + $0x98] sm:$0xff]  ;;  %v5264_v54 = vld [vmem:[%s6153_s5 + $0x90] sm:$0xff] }
 0x145   : > { %3999 = vmatpush.bf16.msra.mxu2 %v5268_v38  ;;  %v5274_v47 = vld [vmem:[%s6153_s5 + $0xe0] sm:$0xff]  ;;  %v5273_v51 = vld [vmem:[%s6153_s5 + $0xd8] sm:$0xff]  ;;  %v5272_v55 = vld [vmem:[%s6153_s5 + $0xd0] sm:$0xff] }
 0x146   : > { %4018 = vmatpush.bf16.msra.mxu3 %v5276_v39  ;;  %v5247_v56 = vld [vmem:[%s6153_s5 + $0x8] sm:$0xff]  ;;  %v5246_v60 = vld [vmem:[%s6153_s5] sm:$0xff]  ;;  %v5220_v5 = vld [vmem:[%s6551_s0 + $0x4c] sm:$0xf0] }
 0x147   : > { %3962 = vmatpush.bf16.msra.mxu0 %v5251_v40  ;;  %v5255_v57 = vld [vmem:[%s6153_s5 + $0x48] sm:$0xff]  ;;  %v4488_v61 = vld [vmem:[%s6551_s0] sm:$0xf]  ;;  %v5210_v2 = vld [vmem:[%s6551_s0 + $0x4] sm:$0xf] }
 0x148   : > { %3981 = vmatpush.bf16.msra.mxu1 %v5259_v41  ;;  %v5263_v58 = vld [vmem:[%s6153_s5 + $0x88] sm:$0xff]  ;;  %v5254_v63 = vld [vmem:[%s6153_s5 + $0x40] sm:$0xff]  ;;  %v4498_v7 = vld [vmem:[%s6551_s0 + $0x50] sm:$0xf0] }
 0x149   : > { %4000 = vmatpush.bf16.msra.mxu2 %v5267_v42  ;;  %v5271_v59 = vld [vmem:[%s6153_s5 + $0xc8] sm:$0xff]  ;;  %v5262_v0 = vld [vmem:[%s6153_s5 + $0x80] sm:$0xff]  ;;  %v5301_v8 = vld [vmem:[%s6153_s5 + $0x1b8] sm:$0xff] }
 0x14a   : > { %4019 = vmatpush.bf16.msra.mxu3 %v5275_v43  ;;  %v5219_v62 = vld [vmem:[%s6551_s0 + $0x44] sm:$0xf0]  ;;  %v5270_v1 = vld [vmem:[%s6153_s5 + $0xc0] sm:$0xff]  ;;  %v4490_v3 = vld [vmem:[%s6551_s0 + $0x48] sm:$0xf0] }
 0x14b   : > { %3963 = vmatpush.bf16.msra.mxu0 %v5250_v44  ;;  %v4496_v4 = vld [vmem:[%s6551_s0 + $0x8] sm:$0xf]  ;;  %v5211_v6 = vld [vmem:[%s6551_s0 + $0xc] sm:$0xf]  ;;  %v5285_v9 = vld [vmem:[%s6153_s5 + $0x138] sm:$0xff]  ;;  %v4489_v10 = vor.u32 %v5219_v62, %v4488_v61  ;;  %v4493_v11 = vor.u32 %v5210_v2, %v4490_v3 }
 0x14c   : > { %3982 = vmatpush.bf16.msra.mxu1 %v5258_v45  ;;  %v4497_v12 = vor.u32 %v5220_v5, %v4496_v4  ;;  %v4501_v13 = vor.u32 %v5211_v6, %v4498_v7  ;;  %v5293_v14 = vld [vmem:[%s6153_s5 + $0x178] sm:$0xff]  ;;  %v5300_v16 = vld [vmem:[%s6153_s5 + $0x1b0] sm:$0xff]  ;;  %v5299_v20 = vld [vmem:[%s6153_s5 + $0x1a8] sm:$0xff] }
 0x14d   : > { %4001 = vmatpush.bf16.msra.mxu2 %v5266_v46  ;;  %v5309_v15 = vld [vmem:[%s6153_s5 + $0x1f8] sm:$0xff]  ;;  %v5284_v17 = vld [vmem:[%s6153_s5 + $0x130] sm:$0xff]  ;;  %v5283_v21 = vld [vmem:[%s6153_s5 + $0x128] sm:$0xff] }
 0x14e   : > { %4020 = vmatpush.bf16.msra.mxu3 %v5274_v47  ;;  %v5292_v18 = vld [vmem:[%s6153_s5 + $0x170] sm:$0xff]  ;;  %v5291_v22 = vld [vmem:[%s6153_s5 + $0x168] sm:$0xff]  ;;  %v5298_v24 = vld [vmem:[%s6153_s5 + $0x1a0] sm:$0xff] }
 0x14f   : > { %3964 = vmatpush.bf16.msra.mxu0 %v5249_v48  ;;  %v5308_v19 = vld [vmem:[%s6153_s5 + $0x1f0] sm:$0xff]  ;;  %v5307_v23 = vld [vmem:[%s6153_s5 + $0x1e8] sm:$0xff]  ;;  %v5282_v25 = vld [vmem:[%s6153_s5 + $0x120] sm:$0xff] }
 0x150   : > { %3983 = vmatpush.bf16.msra.mxu1 %v5257_v49  ;;  %v5290_v26 = vld [vmem:[%s6153_s5 + $0x160] sm:$0xff]  ;;  %v4560_v28 = vld [vmem:[%s6551_s0 + $0x90] sm:$0xf]  ;;  %v5237_v29 = vld [vmem:[%s6551_s0 + $0xd4] sm:$0xf0] }
 0x151   : > { %4002 = vmatpush.bf16.msra.mxu2 %v5265_v50  ;;  %v5306_v27 = vld [vmem:[%s6153_s5 + $0x1e0] sm:$0xff]  ;;  %v5228_v30 = vld [vmem:[%s6551_s0 + $0x94] sm:$0xf]  ;;  %v4562_v31 = vld [vmem:[%s6551_s0 + $0xd8] sm:$0xf0]  ;;  %v4561_v38 = vor.u32 %v5237_v29, %v4560_v28 }
 0x152   : > { %4021 = vmatpush.bf16.msra.mxu3 %v5273_v51  ;;  %v4568_v32 = vld [vmem:[%s6551_s0 + $0x98] sm:$0xf]  ;;  %v5238_v33 = vld [vmem:[%s6551_s0 + $0xdc] sm:$0xf0]  ;;  %v5229_v34 = vld [vmem:[%s6551_s0 + $0x9c] sm:$0xf]  ;;  %v4565_v39 = vor.u32 %v5228_v30, %v4562_v31 }
 0x153   : > { %3965 = vmatpush.bf16.msra.mxu0 %v5248_v52  ;;  %v4570_v35 = vld [vmem:[%s6551_s0 + $0xe0] sm:$0xf0]  ;;  %v5297_v36 = vld [vmem:[%s6153_s5 + $0x198] sm:$0xff]  ;;  %v4569_v40 = vor.u32 %v5238_v33, %v4568_v32  ;;  %v5296_v44 = vld [vmem:[%s6153_s5 + $0x190] sm:$0xff] }
 0x154   : > { %3984 = vmatpush.bf16.msra.mxu1 %v5256_v53  ;;  %v5281_v37 = vld [vmem:[%s6153_s5 + $0x118] sm:$0xff]  ;;  %v4573_v41 = vor.u32 %v5229_v34, %v4570_v35  ;;  %v5280_v45 = vld [vmem:[%s6153_s5 + $0x110] sm:$0xff]  ;;  %v5295_v48 = vld [vmem:[%s6153_s5 + $0x188] sm:$0xff] }
 0x155   : > { %4003 = vmatpush.bf16.msra.mxu2 %v5264_v54  ;;  %v5289_v42 = vld [vmem:[%s6153_s5 + $0x158] sm:$0xff]  ;;  %v5288_v46 = vld [vmem:[%s6153_s5 + $0x150] sm:$0xff]  ;;  %v5279_v49 = vld [vmem:[%s6153_s5 + $0x108] sm:$0xff] }
 0x156   : > { %4022 = vmatpush.bf16.msra.mxu3 %v5272_v55  ;;  %v5305_v43 = vld [vmem:[%s6153_s5 + $0x1d8] sm:$0xff]  ;;  %v5304_v47 = vld [vmem:[%s6153_s5 + $0x1d0] sm:$0xff]  ;;  %v5287_v50 = vld [vmem:[%s6153_s5 + $0x148] sm:$0xff] }
 0x157   : > { %3966 = vmatpush.bf16.msra.mxu0 %v5247_v56  ;;  %v5303_v51 = vld [vmem:[%s6153_s5 + $0x1c8] sm:$0xff]  ;;  %v5294_v52 = vld [vmem:[%s6153_s5 + $0x180] sm:$0xff]  ;;  %v4504_v56 = vld [vmem:[%s6551_s0 + $0x10] sm:$0xf] }
 0x158   : > { %3985 = vmatpush.bf16.msra.mxu1 %v5255_v57  ;;  %v5278_v53 = vld [vmem:[%s6153_s5 + $0x100] sm:$0xff]  ;;  %v5333_v57 = vld [vmem:[%s6153_s5 + $0x2b8] sm:$0xff]  ;;  %v5332_v5 = vld [vmem:[%s6153_s5 + $0x2b0] sm:$0xff] }
 0x159   : > { %4004 = vmatpush.bf16.msra.mxu2 %v5263_v58  ;;  %v5286_v54 = vld [vmem:[%s6153_s5 + $0x140] sm:$0xff]  ;;  %v5317_v58 = vld [vmem:[%s6153_s5 + $0x238] sm:$0xff]  ;;  %v4586_v29 = vld [vmem:[%s6551_s0 + $0xf0] sm:$0xf0] }
 0x15a   : > { %4023 = vmatpush.bf16.msra.mxu3 %v5271_v59  ;;  %v5302_v55 = vld [vmem:[%s6153_s5 + $0x1c0] sm:$0xff]  ;;  %v5221_v59 = vld [vmem:[%s6551_s0 + $0x54] sm:$0xf0]  ;;  %v4506_v61 = vld [vmem:[%s6551_s0 + $0x58] sm:$0xf0] }
 0x15b   : > { %3967 = vmatpush.bf16.msra.mxu0 %v5246_v60  ;;  %v5212_v60 = vld [vmem:[%s6551_s0 + $0x14] sm:$0xf]  ;;  %v4512_v62 = vld [vmem:[%s6551_s0 + $0x18] sm:$0xf]  ;;  %v4505_v4 = vor.u32 %v5221_v59, %v4504_v56  ;;  %v4522_v56 = vld [vmem:[%s6551_s0 + $0x68] sm:$0xf0] }
 0x15c   : > { %3986 = vmatpush.bf16.msra.mxu1 %v5254_v63  ;;  %v5222_v63 = vld [vmem:[%s6551_s0 + $0x5c] sm:$0xf0]  ;;  %v5325_v2 = vld [vmem:[%s6153_s5 + $0x278] sm:$0xff]  ;;  %v4509_v6 = vor.u32 %v5212_v60, %v4506_v61  ;;  %v5328_v33 = vld [vmem:[%s6153_s5 + $0x290] sm:$0xff] }
 0x15d   : > { %4005 = vmatpush.bf16.msra.mxu2 %v5262_v0  ;;  %v5213_v0 = vld [vmem:[%s6551_s0 + $0x1c] sm:$0xf]  ;;  %v4513_v7 = vor.u32 %v5222_v63, %v4512_v62  ;;  %v5215_v59 = vld [vmem:[%s6551_s0 + $0x2c] sm:$0xf]  ;;  %v4530_v60 = vld [vmem:[%s6551_s0 + $0x70] sm:$0xf0] }
 0x15e   : > { %4024 = vmatpush.bf16.msra.mxu3 %v5270_v1  ;;  %3968 = vmatmul.bf16.vlgmr.msra.gmra.mxu0 %v4489_v10  ;;  %v4514_v1 = vld [vmem:[%s6551_s0 + $0x60] sm:$0xf0]  ;;  %v5341_v3 = vld [vmem:[%s6153_s5 + $0x2f8] sm:$0xff]  ;;  %v5324_v10 = vld [vmem:[%s6153_s5 + $0x270] sm:$0xff] }
 0x15f   : > { %4036 = vmatpush.bf16.msrb.mxu0 %v5285_v9  ;;  %3987 = vmatmul.bf16.vlgmr.msra.gmra.mxu1 %v4493_v11  ;;  %v5316_v9 = vld [vmem:[%s6153_s5 + $0x230] sm:$0xff]  ;;  %v5313_v28 = vld [vmem:[%s6153_s5 + $0x218] sm:$0xff] }
 0x160   : > { %4006 = vmatmul.bf16.vlgmr.msra.gmra.mxu2 %v4497_v12  ;;  %4055 = vmatpush.bf16.msrb.mxu1 %v5293_v14  ;;  %v5340_v11 = vld [vmem:[%s6153_s5 + $0x2f0] sm:$0xff]  ;;  %v5331_v12 = vld [vmem:[%s6153_s5 + $0x2a8] sm:$0xff]  ;;  %v5321_v30 = vld [vmem:[%s6153_s5 + $0x258] sm:$0xff] }
 0x161   : > { %4074 = vmatpush.bf16.msrb.mxu2 %v5301_v8  ;;  %4025 = vmatmul.bf16.vlgmr.msra.gmra.mxu3 %v4501_v13  ;;  %v4517_v8 = vor.u32 %v5213_v0, %v4514_v1  ;;  %v5315_v13 = vld [vmem:[%s6153_s5 + $0x228] sm:$0xff]  ;;  %v5337_v31 = vld [vmem:[%s6153_s5 + $0x2d8] sm:$0xff]  ;;  %v5356_v62 = vld [vmem:[%s6153_s5 + $0x370] sm:$0xff]  ;;  %v4533_v1 = vor.u32 %v5215_v59, %v4530_v60 }
 0x162   : > { %4093 = vmatpush.bf16.msrb.mxu3 %v5309_v15  ;;  %v5323_v14 = vld [vmem:[%s6153_s5 + $0x268] sm:$0xff]  ;;  %v5386_v59 = vld [vmem:[%s6153_s5 + $0x460] sm:$0xff]  ;;  %v5377_v60 = vld [vmem:[%s6153_s5 + $0x418] sm:$0xff] }
 0x163   : > { %4037 = vmatpush.bf16.msrb.mxu0 %v5284_v17  ;;  %v5339_v15 = vld [vmem:[%s6153_s5 + $0x2e8] sm:$0xff]  ;;  %v5314_v17 = vld [vmem:[%s6153_s5 + $0x220] sm:$0xff] }
 0x164   : > { %4056 = vmatpush.bf16.msrb.mxu1 %v5292_v18  ;;  %v5322_v18 = vld [vmem:[%s6153_s5 + $0x260] sm:$0xff] }
 0x165   : > { %4075 = vmatpush.bf16.msrb.mxu2 %v5300_v16  ;;  %v5330_v16 = vld [vmem:[%s6153_s5 + $0x2a0] sm:$0xff] }
 0x166   : > { %4094 = vmatpush.bf16.msrb.mxu3 %v5308_v19  ;;  %v5338_v19 = vld [vmem:[%s6153_s5 + $0x2e0] sm:$0xff] }
 0x167   : > { %4038 = vmatpush.bf16.msrb.mxu0 %v5283_v21  ;;  %v5239_v21 = vld [vmem:[%s6551_s0 + $0xe4] sm:$0xf0] }
 0x168   : > { %4057 = vmatpush.bf16.msrb.mxu1 %v5291_v22  ;;  %v5329_v22 = vld [vmem:[%s6153_s5 + $0x298] sm:$0xff] }
 0x169   : > { %4076 = vmatpush.bf16.msrb.mxu2 %v5299_v20  ;;  %v4576_v20 = vld [vmem:[%s6551_s0 + $0xa0] sm:$0xf] }
 0x16a   : > { %4095 = vmatpush.bf16.msrb.mxu3 %v5307_v23  ;;  %v5230_v23 = vld [vmem:[%s6551_s0 + $0xa4] sm:$0xf]  ;;  %v4577_v32 = vor.u32 %v5239_v21, %v4576_v20  ;;  %v5233_v20 = vld [vmem:[%s6551_s0 + $0xbc] sm:$0xf] }
 0x16b   : > { %4039 = vmatpush.bf16.msrb.mxu0 %v5282_v25  ;;  %v4584_v25 = vld [vmem:[%s6551_s0 + $0xa8] sm:$0xf]  ;;  %v5345_v21 = vld [vmem:[%s6153_s5 + $0x318] sm:$0xff] }
 0x16c   : > { %4058 = vmatpush.bf16.msrb.mxu1 %v5290_v26  ;;  %v5240_v26 = vld [vmem:[%s6551_s0 + $0xec] sm:$0xf0] }
 0x16d   : > { %4077 = vmatpush.bf16.msrb.mxu2 %v5298_v24  ;;  %v4578_v24 = vld [vmem:[%s6551_s0 + $0xe8] sm:$0xf0]  ;;  %v4585_v35 = vor.u32 %v5240_v26, %v4584_v25  ;;  %v5352_v26 = vld [vmem:[%s6153_s5 + $0x350] sm:$0xff] }
 0x16e   : > { %4096 = vmatpush.bf16.msrb.mxu3 %v5306_v27  ;;  %3973 = vmatmul.bf16.gmra.mxu0 %v4561_v38  ;;  %v5231_v27 = vld [vmem:[%s6551_s0 + $0xac] sm:$0xf]  ;;  %v4581_v34 = vor.u32 %v5230_v23, %v4578_v24  ;;  %v5320_v38 = vld [vmem:[%s6153_s5 + $0x250] sm:$0xff]  ;;  %v5369_v23 = vld [vmem:[%s6153_s5 + $0x3d8] sm:$0xff] }
 0x16f   : > { %4040 = vmatpush.bf16.msrb.mxu0 %v5281_v37  ;;  %3992 = vmatmul.bf16.gmra.mxu1 %v4565_v39  ;;  %v5312_v37 = vld [vmem:[%s6153_s5 + $0x210] sm:$0xff] }
 0x170   : > { %4011 = vmatmul.bf16.gmra.mxu2 %v4569_v40  ;;  %4059 = vmatpush.bf16.msrb.mxu1 %v5289_v42  ;;  %v5336_v39 = vld [vmem:[%s6153_s5 + $0x2d0] sm:$0xff]  ;;  %v5327_v40 = vld [vmem:[%s6153_s5 + $0x288] sm:$0xff] }
 0x171   : > { %4078 = vmatpush.bf16.msrb.mxu2 %v5297_v36  ;;  %4030 = vmatmul.bf16.gmra.mxu3 %v4573_v41  ;;  %v4589_v36 = vor.u32 %v5231_v27, %v4586_v29  ;;  %v5311_v41 = vld [vmem:[%s6153_s5 + $0x208] sm:$0xff]  ;;  %v5360_v24 = vld [vmem:[%s6153_s5 + $0x390] sm:$0xff] }
 0x172   : > { %4097 = vmatpush.bf16.msrb.mxu3 %v5305_v43  ;;  %v5319_v42 = vld [vmem:[%s6153_s5 + $0x248] sm:$0xff] }
 0x173   : > { %4041 = vmatpush.bf16.msrb.mxu0 %v5280_v45  ;;  %v5335_v43 = vld [vmem:[%s6153_s5 + $0x2c8] sm:$0xff]  ;;  %v5365_v45 = vld [vmem:[%s6153_s5 + $0x3b8] sm:$0xff] }
 0x174   : > { %4060 = vmatpush.bf16.msrb.mxu1 %v5288_v46  ;;  %v5310_v46 = vld [vmem:[%s6153_s5 + $0x200] sm:$0xff] }
 0x175   : > { %4079 = vmatpush.bf16.msrb.mxu2 %v5296_v44  ;;  %v5326_v44 = vld [vmem:[%s6153_s5 + $0x280] sm:$0xff] }
 0x176   : > { %4098 = vmatpush.bf16.msrb.mxu3 %v5304_v47  ;;  %v5318_v47 = vld [vmem:[%s6153_s5 + $0x240] sm:$0xff] }
 0x177   : > { %4042 = vmatpush.bf16.msrb.mxu0 %v5279_v49  ;;  %v4520_v49 = vld [vmem:[%s6551_s0 + $0x20] sm:$0xf] }
 0x178   : > { %4061 = vmatpush.bf16.msrb.mxu1 %v5287_v50  ;;  %v5223_v50 = vld [vmem:[%s6551_s0 + $0x64] sm:$0xf0] }
 0x179   : > { %4080 = vmatpush.bf16.msrb.mxu2 %v5295_v48  ;;  %v5334_v48 = vld [vmem:[%s6153_s5 + $0x2c0] sm:$0xff]  ;;  %v4521_v61 = vor.u32 %v5223_v50, %v4520_v49  ;;  %v5217_v50 = vld [vmem:[%s6551_s0 + $0x3c] sm:$0xf] }
 0x17a   : > { %4099 = vmatpush.bf16.msrb.mxu3 %v5303_v51  ;;  %v5349_v51 = vld [vmem:[%s6153_s5 + $0x338] sm:$0xff]  ;;  %v5226_v49 = vld [vmem:[%s6551_s0 + $0x7c] sm:$0xf0] }
 0x17b   : > { %4043 = vmatpush.bf16.msrb.mxu0 %v5278_v53  ;;  %v5214_v53 = vld [vmem:[%s6551_s0 + $0x24] sm:$0xf] }
 0x17c   : > { %4062 = vmatpush.bf16.msrb.mxu1 %v5286_v54  ;;  %v5373_v54 = vld [vmem:[%s6153_s5 + $0x3f8] sm:$0xff]  ;;  %v4525_v63 = vor.u32 %v5214_v53, %v4522_v56  ;;  %v5379_v56 = vld [vmem:[%s6153_s5 + $0x428] sm:$0xff] }
 0x17d   : > { %4081 = vmatpush.bf16.msrb.mxu2 %v5294_v52  ;;  %v5357_v52 = vld [vmem:[%s6153_s5 + $0x378] sm:$0xff] }
 0x17e   : > { %4100 = vmatpush.bf16.msrb.mxu3 %v5302_v55  ;;  %4044 = vmatmul.bf16.vlgmr.msrb.gmra.mxu0 %v4505_v4  ;;  %v5364_v55 = vld [vmem:[%s6153_s5 + $0x3b0] sm:$0xff]  ;;  %v5363_v4 = vld [vmem:[%s6153_s5 + $0x3a8] sm:$0xff] }
 0x17f   : > { %4112 = vmatpush.bf16.msra.mxu0 %v5317_v58  ;;  %4063 = vmatmul.bf16.vlgmr.msrb.gmra.mxu1 %v4509_v6  ;;  %v5224_v58 = vld [vmem:[%s6551_s0 + $0x6c] sm:$0xf0]  ;;  %v5347_v6 = vld [vmem:[%s6153_s5 + $0x328] sm:$0xff] }
 0x180   : > { %4131 = vmatpush.bf16.msra.mxu1 %v5325_v2  ;;  %4082 = vmatmul.bf16.vlgmr.msrb.gmra.mxu2 %v4513_v7  ;;  %v5348_v2 = vld [vmem:[%s6153_s5 + $0x330] sm:$0xff]  ;;  %v5371_v7 = vld [vmem:[%s6153_s5 + $0x3e8] sm:$0xff] }
 0x181   : > { %4150 = vmatpush.bf16.msra.mxu2 %v5333_v57  ;;  %4101 = vmatmul.bf16.vlgmr.msrb.gmra.mxu3 %v4517_v8  ;;  %v4528_v57 = vld [vmem:[%s6551_s0 + $0x28] sm:$0xf]  ;;  %v5362_v8 = vld [vmem:[%s6153_s5 + $0x3a0] sm:$0xff] }
 0x182   : > { %4169 = vmatpush.bf16.msra.mxu3 %v5341_v3  ;;  %v4529_v0 = vor.u32 %v5224_v58, %v4528_v57  ;;  %v5372_v3 = vld [vmem:[%s6153_s5 + $0x3f0] sm:$0xff]  ;;  %v5387_v57 = vld [vmem:[%s6153_s5 + $0x468] sm:$0xff]  ;;  %v5378_v58 = vld [vmem:[%s6153_s5 + $0x420] sm:$0xff] }
 0x183   : > { %4113 = vmatpush.bf16.msra.mxu0 %v5316_v9  ;;  %v5354_v9 = vld [vmem:[%s6153_s5 + $0x360] sm:$0xff] }
 0x184   : > { %4132 = vmatpush.bf16.msra.mxu1 %v5324_v10  ;;  %v5346_v10 = vld [vmem:[%s6153_s5 + $0x320] sm:$0xff] }
 0x185   : > { %4151 = vmatpush.bf16.msra.mxu2 %v5332_v5  ;;  %v5355_v5 = vld [vmem:[%s6153_s5 + $0x368] sm:$0xff] }
 0x186   : > { %4170 = vmatpush.bf16.msra.mxu3 %v5340_v11  ;;  %v5370_v11 = vld [vmem:[%s6153_s5 + $0x3e0] sm:$0xff] }
 0x187   : > { %4114 = vmatpush.bf16.msra.mxu0 %v5315_v13  ;;  %v4592_v13 = vld [vmem:[%s6551_s0 + $0xb0] sm:$0xf] }
 0x188   : > { %4133 = vmatpush.bf16.msra.mxu1 %v5323_v14  ;;  %v5241_v14 = vld [vmem:[%s6551_s0 + $0xf4] sm:$0xf0] }
 0x189   : > { %4152 = vmatpush.bf16.msra.mxu2 %v5331_v12  ;;  %v5361_v12 = vld [vmem:[%s6153_s5 + $0x398] sm:$0xff]  ;;  %v4593_v25 = vor.u32 %v5241_v14, %v4592_v13  ;;  %v5383_v13 = vld [vmem:[%s6153_s5 + $0x448] sm:$0xff]  ;;  %v5374_v14 = vld [vmem:[%s6153_s5 + $0x400] sm:$0xff] }
 0x18a   : > { %4171 = vmatpush.bf16.msra.mxu3 %v5339_v15  ;;  %v5353_v15 = vld [vmem:[%s6153_s5 + $0x358] sm:$0xff] }
 0x18b   : > { %4115 = vmatpush.bf16.msra.mxu0 %v5314_v17  ;;  %v4594_v17 = vld [vmem:[%s6551_s0 + $0xf8] sm:$0xf0] }
 0x18c   : > { %4134 = vmatpush.bf16.msra.mxu1 %v5322_v18  ;;  %v4600_v18 = vld [vmem:[%s6551_s0 + $0xb8] sm:$0xf] }
 0x18d   : > { %4153 = vmatpush.bf16.msra.mxu2 %v5330_v16  ;;  %v5232_v16 = vld [vmem:[%s6551_s0 + $0xb4] sm:$0xf] }
 0x18e   : > { %4172 = vmatpush.bf16.msra.mxu3 %v5338_v19  ;;  %4049 = vmatmul.bf16.gmra.mxu0 %v4577_v32  ;;  %v5242_v19 = vld [vmem:[%s6551_s0 + $0xfc] sm:$0xf0]  ;;  %v4597_v27 = vor.u32 %v5232_v16, %v4594_v17  ;;  %v5359_v32 = vld [vmem:[%s6153_s5 + $0x388] sm:$0xff] }
 0x18f   : > { %4116 = vmatpush.bf16.msra.mxu0 %v5313_v28  ;;  %4068 = vmatmul.bf16.gmra.mxu1 %v4581_v34  ;;  %v4601_v28 = vor.u32 %v5242_v19, %v4600_v18  ;;  %v5343_v34 = vld [vmem:[%s6153_s5 + $0x308] sm:$0xff]  ;;  %v5459_v16 = vld [vmem:[%s2586_s8] ss:$0 sm:$0xff]  ;;  %v4624_v19 = vld [vmem:[%s6551_s0 + $0xd0] sm:$0xf] }
 0x190   : > { %4135 = vmatpush.bf16.msra.mxu1 %v5321_v30  ;;  %4087 = vmatmul.bf16.gmra.mxu2 %v4585_v35  ;;  %v5344_v30 = vld [vmem:[%s6153_s5 + $0x310] sm:$0xff]  ;;  %v5367_v35 = vld [vmem:[%s6153_s5 + $0x3c8] sm:$0xff]  ;;  %v4552_v17 = vld [vmem:[%s6551_s0 + $0x40] sm:$0xf] }
 0x191   : > { %4154 = vmatpush.bf16.msra.mxu2 %v5329_v22  ;;  %4106 = vmatmul.bf16.gmra.mxu3 %v4589_v36  ;;  %v4602_v22 = vld [vmem:[%s6551_s0 + $0x100] sm:$0xf0]  ;;  %v5227_v18 = vld [vmem:[%s6551_s0 + $0x84] sm:$0xf0] }
 0x192   : > { %4173 = vmatpush.bf16.msra.mxu3 %v5337_v31  ;;  %v4605_v29 = vor.u32 %v5233_v20, %v4602_v22  ;;  %v5368_v31 = vld [vmem:[%s6153_s5 + $0x3d0] sm:$0xff]  ;;  %v5358_v36 = vld [vmem:[%s6153_s5 + $0x380] sm:$0xff]  ;;  %v5245_v20 = vld [vmem:[%s6551_s0 + $0x114] sm:$0xf0] }
 0x193   : > { %4117 = vmatpush.bf16.msra.mxu0 %v5312_v37  ;;  %v5350_v37 = vld [vmem:[%s6153_s5 + $0x340] sm:$0xff]  ;;  %v4554_v22 = vld [vmem:[%s6551_s0 + $0x88] sm:$0xf0] }
 0x194   : > { %4136 = vmatpush.bf16.msra.mxu1 %v5320_v38  ;;  %v5381_v38 = vld [vmem:[%s6153_s5 + $0x438] sm:$0xff] }
 0x195   : > { %4155 = vmatpush.bf16.msra.mxu2 %v5328_v33  ;;  %v5351_v33 = vld [vmem:[%s6153_s5 + $0x348] sm:$0xff] }
 0x196   : > { %4174 = vmatpush.bf16.msra.mxu3 %v5336_v39  ;;  %v5389_v39 = vld [vmem:[%s6153_s5 + $0x478] sm:$0xff] }
 0x197   : > { %4118 = vmatpush.bf16.msra.mxu0 %v5311_v41  ;;  %v5366_v41 = vld [vmem:[%s6153_s5 + $0x3c0] sm:$0xff] }
 0x198   : > { %4137 = vmatpush.bf16.msra.mxu1 %v5319_v42  ;;  %v4536_v42 = vld [vmem:[%s6551_s0 + $0x30] sm:$0xf] }
 0x199   : > { %4156 = vmatpush.bf16.msra.mxu2 %v5327_v40  ;;  %v5342_v40 = vld [vmem:[%s6153_s5 + $0x300] sm:$0xff] }
 0x19a   : > { %4175 = vmatpush.bf16.msra.mxu3 %v5335_v43  ;;  %v5380_v43 = vld [vmem:[%s6153_s5 + $0x430] sm:$0xff] }
 0x19b   : > { %4119 = vmatpush.bf16.msra.mxu0 %v5310_v46  ;;  %v5388_v46 = vld [vmem:[%s6153_s5 + $0x470] sm:$0xff] }
 0x19c   : > { %4138 = vmatpush.bf16.msra.mxu1 %v5318_v47  ;;  %v4538_v47 = vld [vmem:[%s6551_s0 + $0x78] sm:$0xf0] }
 0x19d   : > { %4157 = vmatpush.bf16.msra.mxu2 %v5326_v44  ;;  %v5225_v44 = vld [vmem:[%s6551_s0 + $0x74] sm:$0xf0] }
 0x19e   : > { %4176 = vmatpush.bf16.msra.mxu3 %v5334_v48  ;;  %4120 = vmatmul.bf16.vlgmr.msra.gmra.mxu0 %v4521_v61  ;;  %v4544_v48 = vld [vmem:[%s6551_s0 + $0x38] sm:$0xf] }
 0x19f   : > { %4188 = vmatpush.bf16.msrb.mxu0 %v5349_v51  ;;  %4139 = vmatmul.bf16.vlgmr.msra.gmra.mxu1 %v4525_v63  ;;  %v4546_v51 = vld [vmem:[%s6551_s0 + $0x80] sm:$0xf0]  ;;  %v5385_v61 = vld [vmem:[%s6153_s5 + $0x458] sm:$0xff]  ;;  %v5243_v63 = vld [vmem:[%s6551_s0 + $0x104] sm:$0xf0] }
 0x1a0   : > { %4207 = vmatpush.bf16.msrb.mxu1 %v5357_v52  ;;  %4158 = vmatmul.bf16.vlgmr.msra.gmra.mxu2 %v4529_v0  ;;  %v4537_v52 = vor.u32 %v5225_v44, %v4536_v42  ;;  %v5234_v0 = vld [vmem:[%s6551_s0 + $0xc4] sm:$0xf] }
 0x1a1   : > { %4226 = vmatpush.bf16.msrb.mxu2 %v5365_v45  ;;  %4177 = vmatmul.bf16.vlgmr.msra.gmra.mxu3 %v4533_v1  ;;  %v5216_v45 = vld [vmem:[%s6551_s0 + $0x34] sm:$0xf]  ;;  %v4610_v1 = vld [vmem:[%s6551_s0 + $0x108] sm:$0xf0] }
 0x1a2   : > { %4245 = vmatpush.bf16.msrb.mxu3 %v5373_v54  ;;  %v4541_v53 = vor.u32 %v5216_v45, %v4538_v47  ;;  %v4545_v54 = vor.u32 %v5226_v49, %v4544_v48 }
 0x1a3   : > { %4189 = vmatpush.bf16.msrb.mxu0 %v5348_v2  ;;  %v4616_v2 = vld [vmem:[%s6551_s0 + $0xc8] sm:$0xf] }
 0x1a4   : > { %4208 = vmatpush.bf16.msrb.mxu1 %v5356_v62  ;;  %v4608_v62 = vld [vmem:[%s6551_s0 + $0xc0] sm:$0xf] }
 0x1a5   : > { %4227 = vmatpush.bf16.msrb.mxu2 %v5364_v55  ;;  %v4549_v55 = vor.u32 %v5217_v50, %v4546_v51 }
 0x1a6   : > { %4246 = vmatpush.bf16.msrb.mxu3 %v5372_v3  ;;  %v5244_v3 = vld [vmem:[%s6551_s0 + $0x10c] sm:$0xf0] }
 0x1a7   : > { %4190 = vmatpush.bf16.msrb.mxu0 %v5347_v6  ;;  %v4618_v6 = vld [vmem:[%s6551_s0 + $0x110] sm:$0xf0] }
 0x1a8   : > { %4209 = vmatpush.bf16.msrb.mxu1 %v5355_v5  ;;  %v5235_v5 = vld [vmem:[%s6551_s0 + $0xcc] sm:$0xf] }
 0x1a9   : > { %4228 = vmatpush.bf16.msrb.mxu2 %v5363_v4  ;;  %v5376_v4 = vld [vmem:[%s6153_s5 + $0x410] sm:$0xff] }
 0x1aa   : > { %4247 = vmatpush.bf16.msrb.mxu3 %v5371_v7  ;;  %v5384_v7 = vld [vmem:[%s6153_s5 + $0x450] sm:$0xff] }
 0x1ab   : > { %4191 = vmatpush.bf16.msrb.mxu0 %v5346_v10  ;;  %v4617_v10 = vor.u32 %v5244_v3, %v4616_v2 }
 0x1ac   : > { %4210 = vmatpush.bf16.msrb.mxu1 %v5354_v9  ;;  %v4613_v9 = vor.u32 %v5234_v0, %v4610_v1 }
 0x1ad   : > { %4229 = vmatpush.bf16.msrb.mxu2 %v5362_v8  ;;  %v4609_v8 = vor.u32 %v5243_v63, %v4608_v62 }
 0x1ae   : > { %4248 = vmatpush.bf16.msrb.mxu3 %v5370_v11  ;;  %4125 = vmatmul.bf16.gmra.mxu0 %v4593_v25  ;;  %v4621_v11 = vor.u32 %v5235_v5, %v4618_v6  ;;  %v4553_v25 = vor.u32 %v5227_v18, %v4552_v17 }
 0x1af   : > { %4192 = vmatpush.bf16.msrb.mxu0 %v5345_v21  ;;  %4144 = vmatmul.bf16.gmra.mxu1 %v4597_v27  ;;  %v5218_v21 = vld [vmem:[%s6551_s0 + $0x44] sm:$0xf] }
 0x1b0   : > { %4211 = vmatpush.bf16.msrb.mxu1 %v5353_v15  ;;  %4163 = vmatmul.bf16.gmra.mxu2 %v4601_v28  ;;  %v5382_v15 = vld [vmem:[%s6153_s5 + $0x440] sm:$0xff]  ;;  %v4625_v28 = vor.u32 %v5245_v20, %v4624_v19 }
 0x1b1   : > { %4230 = vmatpush.bf16.msrb.mxu2 %v5361_v12  ;;  %4182 = vmatmul.bf16.gmra.mxu3 %v4605_v29  ;;  %v5375_v12 = vld [vmem:[%s6153_s5 + $0x408] sm:$0xff]  ;;  %v4557_v29 = vor.u32 %v5218_v21, %v4554_v22 }
 0x1b2   : > { %4249 = vmatpush.bf16.msrb.mxu3 %v5369_v23  ;;  %v5236_v23 = vld [vmem:[%s6551_s0 + $0xd4] sm:$0xf] }
 0x1b3   : > { %4193 = vmatpush.bf16.msrb.mxu0 %v5344_v30 }
 0x1b4   : > { %4212 = vmatpush.bf16.msrb.mxu1 %v5352_v26 }
 0x1b5   : > { %4231 = vmatpush.bf16.msrb.mxu2 %v5360_v24  ;;  %v4626_v24 = vld [vmem:[%s6551_s0 + $0x118] sm:$0xf0] }
 0x1b6   : > { %4250 = vmatpush.bf16.msrb.mxu3 %v5368_v31  ;;  %v4629_v31 = vor.u32 %v5236_v23, %v4626_v24 }
 0x1b7   : > { %4194 = vmatpush.bf16.msrb.mxu0 %v5343_v34 }
 0x1b8   : > { %4213 = vmatpush.bf16.msrb.mxu1 %v5351_v33 }
 0x1b9   : > { %4232 = vmatpush.bf16.msrb.mxu2 %v5359_v32 }
 0x1ba   : > { %4251 = vmatpush.bf16.msrb.mxu3 %v5367_v35 }
 0x1bb   : > { %4195 = vmatpush.bf16.msrb.mxu0 %v5342_v40 }
 0x1bc   : > { %4214 = vmatpush.bf16.msrb.mxu1 %v5350_v37 }
 0x1bd   : > { %4233 = vmatpush.bf16.msrb.mxu2 %v5358_v36 }
 0x1be   : > { %4252 = vmatpush.bf16.msrb.mxu3 %v5366_v41  ;;  %4196 = vmatmul.bf16.vlgmr.msrb.gmra.mxu0 %v4537_v52 }
 0x1bf   : > { %4264 = vmatpush.bf16.msra.mxu0 %v5381_v38  ;;  %4215 = vmatmul.bf16.vlgmr.msrb.gmra.mxu1 %v4541_v53 }
 0x1c0   : > { %4283 = vmatpush.bf16.msra.mxu1 %v5389_v39  ;;  %4234 = vmatmul.bf16.vlgmr.msrb.gmra.mxu2 %v4545_v54 }
 0x1c1   : > { %5401 = vmatpush.bf16.msra.mxu2 %v5381_v38  ;;  %4253 = vmatmul.bf16.vlgmr.msrb.gmra.mxu3 %v4549_v55 }
 0x1c2   : > { %5409 = vmatpush.bf16.msra.mxu3 %v5389_v39 }
 0x1c3   : > { %4265 = vmatpush.bf16.msra.mxu0 %v5380_v43 }
 0x1c4   : > { %4284 = vmatpush.bf16.msra.mxu1 %v5388_v46 }
 0x1c5   : > { %5402 = vmatpush.bf16.msra.mxu2 %v5380_v43 }
 0x1c6   : > { %5410 = vmatpush.bf16.msra.mxu3 %v5388_v46 }
 0x1c7   : > { %4266 = vmatpush.bf16.msra.mxu0 %v5379_v56 }
 0x1c8   : > { %4285 = vmatpush.bf16.msra.mxu1 %v5387_v57 }
 0x1c9   : > { %5403 = vmatpush.bf16.msra.mxu2 %v5379_v56 }
 0x1ca   : > { %5411 = vmatpush.bf16.msra.mxu3 %v5387_v57 }
 0x1cb   : > { %4267 = vmatpush.bf16.msra.mxu0 %v5378_v58 }
 0x1cc   : > { %4286 = vmatpush.bf16.msra.mxu1 %v5386_v59 }
 0x1cd   : > { %5404 = vmatpush.bf16.msra.mxu2 %v5378_v58 }
 0x1ce   : > { %5412 = vmatpush.bf16.msra.mxu3 %v5386_v59  ;;  %4201 = vmatmul.bf16.gmra.mxu0 %v4609_v8 }
 0x1cf   : > { %4268 = vmatpush.bf16.msra.mxu0 %v5377_v60  ;;  %4220 = vmatmul.bf16.gmra.mxu1 %v4613_v9 }
 0x1d0   : > { %4287 = vmatpush.bf16.msra.mxu1 %v5385_v61  ;;  %4239 = vmatmul.bf16.gmra.mxu2 %v4617_v10 }
 0x1d1   : > { %5405 = vmatpush.bf16.msra.mxu2 %v5377_v60  ;;  %4258 = vmatmul.bf16.gmra.mxu3 %v4621_v11 }
 0x1d2   : > { %5413 = vmatpush.bf16.msra.mxu3 %v5385_v61 }
 0x1d3   : > { %4269 = vmatpush.bf16.msra.mxu0 %v5376_v4 }
 0x1d4   : > { %4288 = vmatpush.bf16.msra.mxu1 %v5384_v7 }
 0x1d5   : > { %5406 = vmatpush.bf16.msra.mxu2 %v5376_v4 }
 0x1d6   : > { %5414 = vmatpush.bf16.msra.mxu3 %v5384_v7 }
 0x1d7   : > { %4270 = vmatpush.bf16.msra.mxu0 %v5375_v12 }
 0x1d8   : > { %4289 = vmatpush.bf16.msra.mxu1 %v5383_v13 }
 0x1d9   : > { %5407 = vmatpush.bf16.msra.mxu2 %v5375_v12 }
 0x1da   : > { %5415 = vmatpush.bf16.msra.mxu3 %v5383_v13 }
 0x1db   : > { %4271 = vmatpush.bf16.msra.mxu0 %v5374_v14  ;;  %v3969_v26 = vpop.f32.mrf.mxu0 }
 0x1dc   : > { %4290 = vmatpush.bf16.msra.mxu1 %v5382_v15  ;;  %v3988_v27 = vpop.f32.mrf.mxu1  ;;  %v3970_v30 = vadd.f32 %v5459_v16, %v3969_v26 }
 0x1dd   : > { %5408 = vmatpush.bf16.msra.mxu2 %v5374_v14 }
 0x1de   : > { %5416 = vmatpush.bf16.msra.mxu3 %v5382_v15  ;;  %v3989_v32 = vadd.f32 %v3988_v27, %v3970_v30  ;;  %4272 = vmatmul.bf16.vlgmr.msra.gmra.mxu0 %v4553_v25 }
 0x1df   : > { %4291 = vmatmul.bf16.vlgmr.msra.gmra.mxu1 %v4557_v29 }
 0x1e0   : > { %4277 = vmatmul.bf16.vlgmr.msra.gmra.mxu2 %v4625_v28 }
 0x1e1   : > { %4296 = vmatmul.bf16.vlgmr.msra.gmra.mxu3 %v4629_v31 }
 0x1e3   : > { %v4007_v33 = vpop.f32.mrf.mxu2  ;;  %v3971_v36 = vpop.f32.mrf.mxu0 }
 0x1e4   : > { %v4026_v34 = vpop.f32.mrf.mxu3  ;;  %v4008_v35 = vadd.f32 %v4007_v33, %v3989_v32  ;;  %v3990_v37 = vpop.f32.mrf.mxu1  ;;  %v3972_v38 = vadd.f32 %v5459_v16, %v3971_v36 }
 0x1e6   : > { %v4027_v39 = vadd.f32 %v4026_v34, %v4008_v35  ;;  %v3991_v40 = vadd.f32 %v3990_v37, %v3972_v38 }
 0x1eb   : > { %v4009_v41 = vpop.f32.mrf.mxu2  ;;  %v3974_v44 = vpop.f32.mrf.mxu0 }
 0x1ec   : > { %v4028_v42 = vpop.f32.mrf.mxu3  ;;  %v4010_v43 = vadd.f32 %v4009_v41, %v3991_v40  ;;  %v3993_v45 = vpop.f32.mrf.mxu1  ;;  %v3975_v46 = vadd.f32 %v5459_v16, %v3974_v44 }
 0x1ee   : > { %v4029_v47 = vadd.f32 %v4028_v42, %v4010_v43  ;;  %v3994_v48 = vadd.f32 %v3993_v45, %v3975_v46 }
 0x1f3   : > { %v4012_v49 = vpop.f32.mrf.mxu2  ;;  %v3976_v52 = vpop.f32.mrf.mxu0 }
 0x1f4   : > { %v4031_v50 = vpop.f32.mrf.mxu3  ;;  %v4013_v51 = vadd.f32 %v4012_v49, %v3994_v48  ;;  %v3995_v53 = vpop.f32.mrf.mxu1  ;;  %v3977_v54 = vadd.f32 %v5459_v16, %v3976_v52 }
 0x1f6   : > { %v4032_v55 = vadd.f32 %v4031_v50, %v4013_v51  ;;  %v3996_v56 = vadd.f32 %v3995_v53, %v3977_v54 }
 0x1fb   : > { %v4014_v57 = vpop.f32.mrf.mxu2  ;;  %v4045_v60 = vpop.f32.mrf.mxu0 }
 0x1fc   : > { %v4033_v58 = vpop.f32.mrf.mxu3  ;;  %v4015_v59 = vadd.f32 %v4014_v57, %v3996_v56  ;;  %v4046_v61 = vadd.f32 %v4045_v60, %v4027_v39  ;;  %v4064_v62 = vpop.f32.mrf.mxu1 }
 0x1fe   : > { %v4034_v63 = vadd.f32 %v4033_v58, %v4015_v59  ;;  %v4065_v0 = vadd.f32 %v4064_v62, %v4046_v61 }
 0x203   : > { %v4083_v1 = vpop.f32.mrf.mxu2  ;;  %v4047_v4 = vpop.f32.mrf.mxu0 }
 0x204   : > { %v4084_v2 = vadd.f32 %v4083_v1, %v4065_v0  ;;  %v4102_v3 = vpop.f32.mrf.mxu3  ;;  %v4048_v5 = vadd.f32 %v4047_v4, %v4029_v47  ;;  %v4066_v6 = vpop.f32.mrf.mxu1 }
 0x206   : > { %v4103_v7 = vadd.f32 %v4102_v3, %v4084_v2  ;;  %v4067_v8 = vadd.f32 %v4066_v6, %v4048_v5 }
 0x20b   : > { %v4085_v9 = vpop.f32.mrf.mxu2  ;;  %v4050_v12 = vpop.f32.mrf.mxu0 }
 0x20c   : > { %v4086_v10 = vadd.f32 %v4085_v9, %v4067_v8  ;;  %v4104_v11 = vpop.f32.mrf.mxu3  ;;  %v4051_v13 = vadd.f32 %v4050_v12, %v4032_v55  ;;  %v4069_v14 = vpop.f32.mrf.mxu1 }
 0x20e   : > { %v4105_v15 = vadd.f32 %v4104_v11, %v4086_v10  ;;  %v4070_v16 = vadd.f32 %v4069_v14, %v4051_v13 }
 0x213   : > { %v4088_v17 = vpop.f32.mrf.mxu2  ;;  %v4052_v20 = vpop.f32.mrf.mxu0 }
 0x214   : > { %v4089_v18 = vadd.f32 %v4088_v17, %v4070_v16  ;;  %v4107_v19 = vpop.f32.mrf.mxu3  ;;  %v4071_v21 = vpop.f32.mrf.mxu1  ;;  %v4053_v47 = vadd.f32 %v4052_v20, %v4034_v63 }
 0x216   : > { %v4108_v22 = vadd.f32 %v4107_v19, %v4089_v18  ;;  %v4072_v50 = vadd.f32 %v4071_v21, %v4053_v47 }
 0x21b   : > { %v4090_v23 = vpop.f32.mrf.mxu2  ;;  %v4121_v25 = vpop.f32.mrf.mxu0 }
 0x21c   : > { %v4109_v24 = vpop.f32.mrf.mxu3  ;;  %v4140_v26 = vpop.f32.mrf.mxu1  ;;  %v4122_v48 = vadd.f32 %v4121_v25, %v4103_v7  ;;  %v4091_v56 = vadd.f32 %v4090_v23, %v4072_v50 }
 0x21e   : > { %v4141_v53 = vadd.f32 %v4140_v26, %v4122_v48  ;;  %v4110_v60 = vadd.f32 %v4109_v24, %v4091_v56 }
 0x223   : > { %v4159_v27 = vpop.f32.mrf.mxu2  ;;  %v4123_v29 = vpop.f32.mrf.mxu0 }
 0x224   : > { %v4178_v28 = vpop.f32.mrf.mxu3  ;;  %v4142_v30 = vpop.f32.mrf.mxu1  ;;  %v4124_v54 = vadd.f32 %v4123_v29, %v4105_v15  ;;  %v4160_v57 = vadd.f32 %v4159_v27, %v4141_v53 }
 0x226   : > { %v4143_v59 = vadd.f32 %v4142_v30, %v4124_v54  ;;  %v4179_v61 = vadd.f32 %v4178_v28, %v4160_v57 }
 0x22b   : > { %v4161_v31 = vpop.f32.mrf.mxu2  ;;  %v4126_v33 = vpop.f32.mrf.mxu0 }
 0x22c   : > { %v4180_v32 = vpop.f32.mrf.mxu3  ;;  %v4145_v34 = vpop.f32.mrf.mxu1  ;;  %v4127_v58 = vadd.f32 %v4126_v33, %v4108_v22  ;;  %v4162_v62 = vadd.f32 %v4161_v31, %v4143_v59 }
 0x22e   : > { %v4146_v1 = vadd.f32 %v4145_v34, %v4127_v58  ;;  %v4181_v7 = vadd.f32 %v4180_v32, %v4162_v62 }
 0x233   : > { %v4164_v35 = vpop.f32.mrf.mxu2  ;;  %v4128_v37 = vpop.f32.mrf.mxu0 }
 0x234   : > { %v4183_v36 = vpop.f32.mrf.mxu3  ;;  %v4147_v38 = vpop.f32.mrf.mxu1  ;;  %v4129_v2 = vadd.f32 %v4128_v37, %v4110_v60  ;;  %v4165_v6 = vadd.f32 %v4164_v35, %v4146_v1 }
 0x236   : > { %v4148_v8 = vadd.f32 %v4147_v38, %v4129_v2  ;;  %v4184_v11 = vadd.f32 %v4183_v36, %v4165_v6 }
 0x23b   : > { %v4166_v39 = vpop.f32.mrf.mxu2  ;;  %v4197_v41 = vpop.f32.mrf.mxu0 }
 0x23c   : > { %v4185_v40 = vpop.f32.mrf.mxu3  ;;  %v4216_v42 = vpop.f32.mrf.mxu1  ;;  %v4198_v4 = vadd.f32 %v4197_v41, %v4179_v61  ;;  %v4167_v12 = vadd.f32 %v4166_v39, %v4148_v8 }
 0x23e   : > { %v4217_v9 = vadd.f32 %v4216_v42, %v4198_v4  ;;  %v4186_v20 = vadd.f32 %v4185_v40, %v4167_v12 }
 0x243   : > { %v4235_v43 = vpop.f32.mrf.mxu2  ;;  %v4199_v45 = vpop.f32.mrf.mxu0 }
 0x244   : > { %v4254_v44 = vpop.f32.mrf.mxu3  ;;  %v4218_v46 = vpop.f32.mrf.mxu1  ;;  %v4200_v10 = vadd.f32 %v4199_v45, %v4181_v7  ;;  %v4236_v13 = vadd.f32 %v4235_v43, %v4217_v9 }
 0x246   : > { %v4219_v18 = vadd.f32 %v4218_v46, %v4200_v10  ;;  %v4255_v21 = vadd.f32 %v4254_v44, %v4236_v13 }
 0x24b   : > { %v4237_v49 = vpop.f32.mrf.mxu2  ;;  %v4202_v52 = vpop.f32.mrf.mxu0 }
 0x24c   : > { %v4256_v51 = vpop.f32.mrf.mxu3  ;;  %v4221_v55 = vpop.f32.mrf.mxu1  ;;  %v4203_v15 = vadd.f32 %v4202_v52, %v4184_v11  ;;  %v4238_v22 = vadd.f32 %v4237_v49, %v4219_v18 }
 0x24e   : > { %v4222_v23 = vadd.f32 %v4221_v55, %v4203_v15  ;;  %v4257_v27 = vadd.f32 %v4256_v51, %v4238_v22 }
 0x253   : > { %v4240_v0 = vpop.f32.mrf.mxu2  ;;  %v4204_v63 = vpop.f32.mrf.mxu0 }
 0x254   : > { %v4259_v3 = vpop.f32.mrf.mxu3  ;;  %v4223_v5 = vpop.f32.mrf.mxu1  ;;  %v4205_v24 = vadd.f32 %v4204_v63, %v4186_v20  ;;  %v4241_v26 = vadd.f32 %v4240_v0, %v4222_v23 }
 0x256   : > { %v4224_v29 = vadd.f32 %v4223_v5, %v4205_v24  ;;  %v4260_v34 = vadd.f32 %v4259_v3, %v4241_v26 }
 0x25b   : > { %v4242_v14 = vpop.f32.mrf.mxu2  ;;  %v4273_v17 = vpop.f32.mrf.mxu0 }
 0x25c   : > { %v4261_v16 = vpop.f32.mrf.mxu3  ;;  %v4292_v19 = vpop.f32.mrf.mxu1  ;;  %v4274_v25 = vadd.f32 %v4273_v17, %v4255_v21  ;;  %v4243_v35 = vadd.f32 %v4242_v14, %v4224_v29 }
 0x25e   : > { %v4293_v32 = vadd.f32 %v4292_v19, %v4274_v25  ;;  %v4262_v41 = vadd.f32 %v4261_v16, %v4243_v35 }
 0x260   : > { %v4302_v39 = vmax.f32 %v4293_v32, 0.0 }
 0x263   : > { %v4278_v28 = vpop.f32.mrf.mxu2  ;;  %v4275_v31 = vpop.f32.mrf.mxu0 }
 0x264   : > { %v4297_v30 = vpop.f32.mrf.mxu3  ;;  %v4276_v33 = vadd.f32 %v4275_v31, %v4257_v27  ;;  %v4294_v36 = vpop.f32.mrf.mxu1  ;;  %v4279_v38 = vadd.f32 %v4278_v28, %v4260_v34 }
 0x266   : > { %v4295_v37 = vadd.f32 %v4294_v36, %v4276_v33  ;;  %v4298_v44 = vadd.f32 %v4297_v30, %v4279_v38 }
 0x268   : > { %v4303_v40 = vmax.f32 %v4295_v37, 0.0  ;;  %v4304_v48 = vmax.f32 %v4298_v44, 0.0 }
 0x26a   : > { %v5393_v42 = vpack.c.bf16 %v4303_v40, %v4302_v39 }
 0x26b   : > { %v4280_v43 = vpop.f32.mrf.mxu2 }
 0x26c   : > { %v4281_v45 = vadd.f32 %v4280_v43, %v4262_v41  ;;  %5394 = vst [vmem:[%s2576_s26] sm:$0xff] %v5393_v42   ;;  %v4299_v46 = vpop.f32.mrf.mxu3 }
 0x26e   : > { %v4300_v47 = vadd.f32 %v4299_v46, %v4281_v45 }
 0x270   : > { %v4305_v49 = vmax.f32 %v4300_v47, 0.0  ;;  %4320 = sbr.rel (!%p5555_p6) target bundleno = 638 (0x27e), region = 88 }
 0x272   : > { %v5398_v50 = vpack.c.bf16 %v4305_v49, %v4304_v48 }
 0x273   : > { %v4342_v51 = vld [vmem:[%s2576_s26] sm:$0xf] (%p5555_p6)  ;;  %v4344_v52 = vld [vmem:[%s2576_s26 + $0x4] sm:$0xf] (%p5555_p6) }
 0x274   : > { %5400 = vst [vmem:[%s2576_s26 + $0x8] sm:$0xff] %v5398_v50  }
 0x275   : > { %4343 = vst [vmem:[%s4325_s28] sm:$0xf] %v4342_v51 }
 0x276   : > { %4345 = vst [vmem:[%s4325_s28 + $0x8] sm:$0xf] %v4344_v52 }
 0x27b   : > { %v4346_v53 = vld [vmem:[%s2576_s26 + $0x8] sm:$0xf]  ;;  %v4348_v54 = vld [vmem:[%s2576_s26 + $0xc] sm:$0xf] }
 0x27c   : > { %4347 = vst [vmem:[%s4325_s28 + $0x10] sm:$0xf] %v4346_v53 }
 0x27d   : > { %4349 = vst [vmem:[%s4325_s28 + $0x18] sm:$0xf] %v4348_v54 }
 0x27e PF: > { %s13_s16 = sadd.s32 1, %s5498_s16   ;;  %s6556_s12 = smov %s5486_s13 }
 0x27f   : > { %p10_p12 = scmp.ge.s32.totalorder %s13_s16, 4   ;;  %s6557_s13 = smov %s5560_s22 }
 0x280   : > { %s6558_s14 = smov %s5494_s15  ;;  %s6559_s15 = smov %s6561_s17 }
 0x281   :  { %12 = sbr.rel (!%p10_p12) target bundleno = 3 (0x3), region = 170 }

</bundles_post_ra>
